<compile_context>
chip_gen: v7x
topology: tpu7x:2x2x1
jax: 0.10.0
libtpu: 0.0.40
codegen_flags: <defaults>
</compile_context>

<pallas_src>
import functools
import numpy as np

import jax
import jax.numpy as jnp
from jax import lax
from jax.experimental import pallas as pl
from jax.experimental.pallas import tpu as pltpu

# ----------------------------------------------------------------------------
# Small, shape-consistent config (HyperDream defaults scaled down)
# ----------------------------------------------------------------------------
BATCH        = 2
IMG_SIZE     = 32          # reference image spatial size
PATCH        = 16          # ViT-style patch size -> 4 patches
IN_CH        = 3
ENC_DIM      = 64          # stand-in encoder feature dim (folded away pre-kernel)
WEIGHT_DIM   = 128         # weight_dim
WEIGHT_NUM   = 8           # weight_num
DECODER_BLKS = 2           # decoder_blocks
SAMPLE_ITERS = 2           # sample_iters
FF_MULT      = 4
LN_EPS       = 1e-5

NUM_PATCHES  = (IMG_SIZE // PATCH) ** 2          # 4
PATCH_DIM    = IN_CH * PATCH * PATCH             # 768

# heads derivation copied verbatim from WeightDecoder.__init__
_heads = 1
while WEIGHT_DIM % _heads == 0 and WEIGHT_DIM // _heads > 64:
    _heads *= 2
_heads //= 2
HEADS    = _heads
DIM_HEAD = WEIGHT_DIM // HEADS
INNER    = HEADS * DIM_HEAD
# For WEIGHT_DIM=128 this yields HEADS=1 / DIM_HEAD=128; the fused attention
# below relies on the head split being a no-op.
assert HEADS == 1, "fused kernel assumes single-head attention (WEIGHT_DIM=128)"


# ----------------------------------------------------------------------------
# Sinusoid position table (matches _get_sinusoid_encoding_table)
# ----------------------------------------------------------------------------
def get_sinusoid_encoding_table(n_position, d_hid):
    def get_position_angle_vec(position):
        return [position / np.power(10000, 2 * (hid_j // 2) / d_hid)
                for hid_j in range(d_hid)]
    tbl = np.array([get_position_angle_vec(p) for p in range(n_position)])
    tbl[:, 0::2] = np.sin(tbl[:, 0::2])
    tbl[:, 1::2] = np.cos(tbl[:, 1::2])
    return jnp.asarray(tbl[None, ...], dtype=jnp.float32)   # (1, n_position, d_hid)


# ----------------------------------------------------------------------------
# Fused Pallas kernel: entire forward (all batch elements) in one invocation
# ----------------------------------------------------------------------------
def _hyperdream_kernel(
    patches_ref, w0_ref,
    enc_w_ref, enc_b_ref, pos_ref,
    ln_g_ref, ln_b_ref,
    a1_qkv_ref, a1_ow_ref, a1_ob_ref,
    a2_q_ref, a2_kv_ref, a2_ow_ref, a2_ob_ref,
    ff_w1_ref, ff_b1_ref, ff_w2_ref, ff_b2_ref,
    dln_g_ref, dln_b_ref, dw_ref,
    out_ref,
    *, batch, sample_iters, decoder_blocks):

    D = WEIGHT_DIM
    scale = DIM_HEAD ** -0.5

    def mm(a, w):
        # a @ w; activations cast to the (bf16) weight dtype, f32 accumulation.
        return lax.dot_general(a.astype(w.dtype), w, (((1,), (0,)), ((), ())),
                               preferred_element_type=jnp.float32)

    def mm_nt(a, b):
        # a @ b.T without a materialized transpose (f32 activations).
        return lax.dot_general(a, b, (((1,), (1,)), ((), ())),
                               preferred_element_type=jnp.float32)

    def layernorm(x, g, b):
        mu = jnp.mean(x, axis=-1, keepdims=True)
        var = jnp.mean((x - mu) * (x - mu), axis=-1, keepdims=True)
        return (x - mu) * lax.rsqrt(var + LN_EPS) * g + b

    def softmax(s):
        m = jnp.max(s, axis=-1, keepdims=True)
        p = jnp.exp(s - m)
        return p * pl.reciprocal(jnp.sum(p, axis=-1, keepdims=True), approx=True)

    def attn(q, k, v, q_rows, kv_rows):
        # Per-batch attention via static row slices (HEADS == 1).  Scores are
        # tiny ((8,8)/(8,4)) so this path is not performance-critical.
        outs = []
        for b in range(batch):
            qb = q[b * q_rows:(b + 1) * q_rows]
            kb = k[b * kv_rows:(b + 1) * kv_rows]
            vb = v[b * kv_rows:(b + 1) * kv_rows]
            p = softmax(mm_nt(qb, kb) * scale)
            outs.append(lax.dot_general(p, vb, (((1,), (0,)), ((), ())),
                                        preferred_element_type=jnp.float32))
        return jnp.concatenate(outs, axis=0)

    # Fused stand-in patch-embed + feature_proj for the whole batch:
    # (B*NP, 768) @ (768, 128) + b
    feats = mm(patches_ref[...], enc_w_ref[...]) + enc_b_ref[...]      # (B*NP, D)

    # Cross-attention K/V of the (iteration-invariant) image features for all
    # decoder blocks in one (B*NP, D) @ (D, 2*NBLK*D) matmul.
    ctx_kv = mm(feats, a2_kv_ref[...])                                 # (B*NP, 2*NBLK*D)

    # Position embedding fully precomputed host-side; tile across batch once.
    pos_full = jnp.concatenate([pos_ref[...]] * batch, axis=0)         # (B*WN, D)

    w = w0_ref[...]                                                    # (B*WN, D)
    # TODO(synk): switch to lax.fori_loop(..., unroll=True) over iterations if
    # sample_iters/decoder_blocks are scaled up to the real HyperDream config.
    for _ in range(sample_iters):
        h = w + pos_full
        for blk in range(decoder_blocks):
            # --- self-attention (fused QKV projection) ---
            hn = layernorm(h, ln_g_ref[3 * blk:3 * blk + 1],
                           ln_b_ref[3 * blk:3 * blk + 1])
            qkv = mm(hn, a1_qkv_ref[blk])                              # (B*WN, 3D)
            o = attn(qkv[:, 0:D], qkv[:, D:2 * D], qkv[:, 2 * D:3 * D],
                     WEIGHT_NUM, WEIGHT_NUM)
            h = mm(o, a1_ow_ref[blk]) + a1_ob_ref[blk:blk + 1] + h
            # --- cross-attention over image features ---
            hn = layernorm(h, ln_g_ref[3 * blk + 1:3 * blk + 2],
                           ln_b_ref[3 * blk + 1:3 * blk + 2])
            q = mm(hn, a2_q_ref[blk])                                  # (B*WN, D)
            ck = ctx_kv[:, (2 * blk) * D:(2 * blk + 1) * D]
            cv = ctx_kv[:, (2 * blk + 1) * D:(2 * blk + 2) * D]
            o = attn(q, ck, cv, WEIGHT_NUM, NUM_PATCHES)
            h = mm(o, a2_ow_ref[blk]) + a2_ob_ref[blk:blk + 1] + h
            # --- feed-forward (gated_ff=False): Linear -> GELU -> Linear ---
            hn = layernorm(h, ln_g_ref[3 * blk + 2:3 * blk + 3],
                           ln_b_ref[3 * blk + 2:3 * blk + 3])
            f = jax.nn.gelu(mm(hn, ff_w1_ref[blk]) + ff_b1_ref[blk:blk + 1],
                            approximate=True)
            f = mm(f, ff_w2_ref[blk]) + ff_b2_ref[blk:blk + 1]
            h = f + h
        # delta_proj = LayerNorm -> Linear(no bias); residual onto weight
        hn = layernorm(h, dln_g_ref[...], dln_b_ref[...])
        w = w + mm(hn, dw_ref[...])

    out_ref[...] = w


def hyperdream_pallas(packed, patches, weight0, iters):
    n_rows = weight0.shape[0]                 # B * WEIGHT_NUM
    batch = n_rows // WEIGHT_NUM
    kern = functools.partial(_hyperdream_kernel,
                             batch=batch,
                             sample_iters=iters,
                             decoder_blocks=DECODER_BLKS)

    names = ["enc_w", "enc_b", "pos_emb", "ln_g", "ln_b",
             "a1_qkv", "a1_ow", "a1_ob",
             "a2_q", "a2_kv", "a2_ow", "a2_ob",
             "ff_w1", "ff_b1", "ff_w2", "ff_b2",
             "dln_g", "dln_b", "dw"]
    shared = [packed[n] for n in names]

    vmem_spec = pl.BlockSpec(memory_space=pltpu.MemorySpace.VMEM)
    return pl.pallas_call(
        kern,
        out_shape=jax.ShapeDtypeStruct((n_rows, WEIGHT_DIM), jnp.float32),
        in_specs=[vmem_spec] * (2 + len(shared)),   # whole arrays in VMEM (~2 MiB total)
        out_specs=vmem_spec,
    )(patches, weight0, *shared)


# ----------------------------------------------------------------------------
# Parameter construction (deterministic, synthetic) + packing for the kernel
# ----------------------------------------------------------------------------
def xavier_uniform(key, shape):
    fan_in, fan_out = shape[0], shape[1]
    limit = float(np.sqrt(6.0 / (fan_in + fan_out)))
    return jax.random.uniform(key, shape, jnp.float32, -limit, limit)


def make_params(key):
    keys = iter(jax.random.split(key, 256))
    p = {}
    # TODO(synk): pretrained timm ViT encoder (checkpoint load) replaced by a
    # deterministic patch-embedding stand-in encoder.
    p["patch_w"] = xavier_uniform(next(keys), (PATCH_DIM, ENC_DIM))
    p["patch_b"] = jnp.zeros((ENC_DIM,), jnp.float32)
    # ImgWeightGenerator.feature_proj (no bias)
    p["feature_proj_w"] = xavier_uniform(next(keys), (ENC_DIM, WEIGHT_DIM))
    # WeightDecoder
    p["block_pos_emb"] = get_sinusoid_encoding_table(WEIGHT_NUM * 2, WEIGHT_DIM)
    p["pos_emb_proj_w"] = xavier_uniform(next(keys), (WEIGHT_DIM, WEIGHT_DIM))
    blocks = []
    for _ in range(DECODER_BLKS):
        blk = {
            "norm1_g": jnp.ones((WEIGHT_DIM,), jnp.float32),
            "norm1_b": jnp.zeros((WEIGHT_DIM,), jnp.float32),
            "norm2_g": jnp.ones((WEIGHT_DIM,), jnp.float32),
            "norm2_b": jnp.zeros((WEIGHT_DIM,), jnp.float32),
            "norm3_g": jnp.ones((WEIGHT_DIM,), jnp.float32),
            "norm3_b": jnp.zeros((WEIGHT_DIM,), jnp.float32),
            "attn1": {
                "to_q": xavier_uniform(next(keys), (WEIGHT_DIM, INNER)),
                "to_k": xavier_uniform(next(keys), (WEIGHT_DIM, INNER)),
                "to_v": xavier_uniform(next(keys), (WEIGHT_DIM, INNER)),
                "to_out_w": xavier_uniform(next(keys), (INNER, WEIGHT_DIM)),
                "to_out_b": jnp.zeros((WEIGHT_DIM,), jnp.float32),
            },
            "attn2": {
                "to_q": xavier_uniform(next(keys), (WEIGHT_DIM, INNER)),
                "to_k": xavier_uniform(next(keys), (WEIGHT_DIM, INNER)),
                "to_v": xavier_uniform(next(keys), (WEIGHT_DIM, INNER)),
                "to_out_w": xavier_uniform(next(keys), (INNER, WEIGHT_DIM)),
                "to_out_b": jnp.zeros((WEIGHT_DIM,), jnp.float32),
            },
            "ff_w1": xavier_uniform(next(keys), (WEIGHT_DIM, FF_MULT * WEIGHT_DIM)),
            "ff_b1": jnp.zeros((FF_MULT * WEIGHT_DIM,), jnp.float32),
            "ff_w2": xavier_uniform(next(keys), (FF_MULT * WEIGHT_DIM, WEIGHT_DIM)),
            "ff_b2": jnp.zeros((WEIGHT_DIM,), jnp.float32),
        }
        blocks.append(blk)
    p["blocks"] = blocks
    p["delta_ln_g"] = jnp.ones((WEIGHT_DIM,), jnp.float32)
    p["delta_ln_b"] = jnp.zeros((WEIGHT_DIM,), jnp.float32)
    p["delta_w"] = 0.001 * jax.random.normal(next(keys), (WEIGHT_DIM, WEIGHT_DIM),
                                             jnp.float32)
    return p


def pack_params(p):
    """Pre-fold / fuse weights for the kernel:
       * patch_w @ feature_proj_w folded into one (768, D) matmul,
       * pos_emb_proj applied host-side (input independent),
       * per-block self-attn QKV fused to (D, 3D),
       * all blocks' cross-attn K|V fused to one (D, 2*NBLK*D),
       * matmul weights stored in bfloat16, LN params / biases in f32 2-D rows."""
    blocks = p["blocks"]
    bf16 = jnp.bfloat16

    def stack(get, dtype=None):
        arr = jnp.stack([get(b) for b in blocks], axis=0)
        return arr.astype(dtype) if dtype is not None else arr

    packed = {
        # (x @ Wp + bp) @ Wf  ==  x @ (Wp @ Wf) + (bp @ Wf)
        "enc_w": jnp.dot(p["patch_w"], p["feature_proj_w"]).astype(bf16),   # (768, D)
        "enc_b": jnp.dot(p["patch_b"][None, :], p["feature_proj_w"]),       # (1, D)
        # pos_emb_proj(block_pos_emb[:, :WN]) precomputed host-side
        "pos_emb": jnp.dot(p["block_pos_emb"][0, :WEIGHT_NUM],
                           p["pos_emb_proj_w"]),                            # (WN, D)
        "ln_g": jnp.stack([g for b in blocks
                           for g in (b["norm1_g"], b["norm2_g"], b["norm3_g"])]),
        "ln_b": jnp.stack([g for b in blocks
                           for g in (b["norm1_b"], b["norm2_b"], b["norm3_b"])]),
        # fused self-attn Q|K|V: (NBLK, D, 3D)
        "a1_qkv": stack(lambda b: jnp.concatenate(
            [b["attn1"]["to_q"], b["attn1"]["to_k"], b["attn1"]["to_v"]],
            axis=1), bf16),
        "a1_ow": stack(lambda b: b["attn1"]["to_out_w"], bf16),             # (NBLK, D, D)
        "a1_ob": stack(lambda b: b["attn1"]["to_out_b"]),                   # (NBLK, D)
        "a2_q": stack(lambda b: b["attn2"]["to_q"], bf16),                  # (NBLK, D, D)
        # all blocks' cross-attn K|V fused along the lane axis: (D, 2*NBLK*D)
        "a2_kv": jnp.concatenate(
            [w for b in blocks
             for w in (b["attn2"]["to_k"], b["attn2"]["to_v"])],
            axis=1).astype(bf16),
        "a2_ow": stack(lambda b: b["attn2"]["to_out_w"], bf16),
        "a2_ob": stack(lambda b: b["attn2"]["to_out_b"]),
        "ff_w1": stack(lambda b: b["ff_w1"], bf16),                         # (NBLK, D, 4D)
        "ff_b1": stack(lambda b: b["ff_b1"]),                               # (NBLK, 4D)
        "ff_w2": stack(lambda b: b["ff_w2"], bf16),                         # (NBLK, 4D, D)
        "ff_b2": stack(lambda b: b["ff_b2"]),                               # (NBLK, D)
        "dln_g": p["delta_ln_g"][None, :],                                  # (1, D)
        "dln_b": p["delta_ln_b"][None, :],                                  # (1, D)
        "dw": p["delta_w"].astype(bf16),                                    # (D, D)
    }
    return packed


# ----------------------------------------------------------------------------
# Jitted forward: patchify glue + one fused Pallas kernel
# ----------------------------------------------------------------------------
@functools.partial(jax.jit, static_argnames=("iters",))
def hyperdream_forward(packed, ref_img, weight0, iters=SAMPLE_ITERS):
    """ref_img: (B, C, H, W) float32 NCHW.  Returns (weights, weight_list)."""
    B, C, H, W = ref_img.shape
    ph, pw = H // PATCH, W // PATCH
    # patchify NCHW -> (B*num_patches, C*p*p) (Conv2d patch-embed flattening),
    # batch folded into the matmul M dimension.
    patches = (ref_img.reshape(B, C, ph, PATCH, pw, PATCH)
               .transpose(0, 2, 4, 1, 3, 5)
               .reshape(B * ph * pw, C * PATCH * PATCH))
    w0 = weight0.reshape(B * WEIGHT_NUM, WEIGHT_DIM)
    w = hyperdream_pallas(packed, patches, w0, iters)
    weights = w.reshape(B, WEIGHT_NUM, WEIGHT_DIM)
    # weights.split(1, dim=1) + squeeze(1)
    weight_list = [weights[:, i, :] for i in range(WEIGHT_NUM)]
    return weights, weight_list


# ----------------------------------------------------------------------------
if __name__ == "__main__":
    key = jax.random.PRNGKey(0)
    pkey, ikey = jax.random.split(key)
    params = make_params(pkey)
    packed = pack_params(params)
    ref_img = jax.random.normal(ikey, (BATCH, IN_CH, IMG_SIZE, IMG_SIZE), jnp.float32)
    # weight=None in the reference -> zeros init
    weight0 = jnp.zeros((BATCH, WEIGHT_NUM, WEIGHT_DIM), jnp.float32)

    weights, weight_list = hyperdream_forward(packed, ref_img, weight0)
    weights = jax.block_until_ready(weights)
    weight_list = [jax.block_until_ready(w) for w in weight_list]

    assert weights.shape == (BATCH, WEIGHT_NUM, WEIGHT_DIM)
    assert len(weight_list) == WEIGHT_NUM
    assert all(w.shape == (BATCH, WEIGHT_DIM) for w in weight_list)
    assert bool(jnp.all(jnp.isfinite(weights)))
    print("KERNEL_OK")
</pallas_src>

<mosaic_0001>
module attributes {stable_mosaic.version = 11 : i64} {
  func.func @_hyperdream_kernel(%arg0: memref<8x768xf32, #tpu.memory_space<vmem>>, %arg1: memref<16x128xf32, #tpu.memory_space<vmem>>, %arg2: memref<768x128xbf16, #tpu.memory_space<vmem>>, %arg3: memref<1x128xf32, #tpu.memory_space<vmem>>, %arg4: memref<8x128xf32, #tpu.memory_space<vmem>>, %arg5: memref<6x128xf32, #tpu.memory_space<vmem>>, %arg6: memref<6x128xf32, #tpu.memory_space<vmem>>, %arg7: memref<2x128x384xbf16, #tpu.memory_space<vmem>>, %arg8: memref<2x128x128xbf16, #tpu.memory_space<vmem>>, %arg9: memref<2x128xf32, #tpu.memory_space<vmem>>, %arg10: memref<2x128x128xbf16, #tpu.memory_space<vmem>>, %arg11: memref<128x512xbf16, #tpu.memory_space<vmem>>, %arg12: memref<2x128x128xbf16, #tpu.memory_space<vmem>>, %arg13: memref<2x128xf32, #tpu.memory_space<vmem>>, %arg14: memref<2x128x512xbf16, #tpu.memory_space<vmem>>, %arg15: memref<2x512xf32, #tpu.memory_space<vmem>>, %arg16: memref<2x512x128xbf16, #tpu.memory_space<vmem>>, %arg17: memref<2x128xf32, #tpu.memory_space<vmem>>, %arg18: memref<1x128xf32, #tpu.memory_space<vmem>>, %arg19: memref<1x128xf32, #tpu.memory_space<vmem>>, %arg20: memref<128x128xbf16, #tpu.memory_space<vmem>>, %arg21: memref<16x128xf32, #tpu.memory_space<vmem>>) attributes {dimension_semantics = [], scalar_prefetch = 0 : i64, scratch_operands = 0 : i64, tpu.core_type = #tpu.core_type<tc>} {
    %c0 = arith.constant 0 : index
    %c0_0 = arith.constant 0 : index
    %0 = vector.load %arg0[%c0, %c0_0] : memref<8x768xf32, #tpu.memory_space<vmem>>, vector<8x768xf32>
    %c0_1 = arith.constant 0 : index
    %c0_2 = arith.constant 0 : index
    %1 = vector.load %arg2[%c0_1, %c0_2] : memref<768x128xbf16, #tpu.memory_space<vmem>>, vector<768x128xbf16>
    %2 = arith.truncf %0 : vector<8x768xf32> to vector<8x768xbf16>
    %cst = arith.constant dense<0.000000e+00> : vector<8x128xf32>
    %3 = tpu.matmul %2, %1, %cst {dimension_numbers = #tpu.dot_dimension_numbers<[1], [0], [0], [1], [0, 0, 1, 1], [], []>} : vector<8x768xbf16>, vector<768x128xbf16>, vector<8x128xf32> -> vector<8x128xf32>
    %c0_3 = arith.constant 0 : index
    %c0_4 = arith.constant 0 : index
    %4 = vector.load %arg3[%c0_3, %c0_4] : memref<1x128xf32, #tpu.memory_space<vmem>>, vector<1x128xf32>
    %5 = vector.broadcast %4 : vector<1x128xf32> to vector<8x128xf32>
    %6 = arith.addf %3, %5 : vector<8x128xf32>
    %c0_5 = arith.constant 0 : index
    %c0_6 = arith.constant 0 : index
    %7 = vector.load %arg11[%c0_5, %c0_6] : memref<128x512xbf16, #tpu.memory_space<vmem>>, vector<128x512xbf16>
    %8 = arith.truncf %6 : vector<8x128xf32> to vector<8x128xbf16>
    %cst_7 = arith.constant dense<0.000000e+00> : vector<8x512xf32>
    %9 = tpu.matmul %8, %7, %cst_7 {dimension_numbers = #tpu.dot_dimension_numbers<[1], [0], [0], [1], [0, 0, 1, 1], [], []>} : vector<8x128xbf16>, vector<128x512xbf16>, vector<8x512xf32> -> vector<8x512xf32>
    %c0_8 = arith.constant 0 : index
    %c0_9 = arith.constant 0 : index
    %10 = vector.load %arg4[%c0_8, %c0_9] : memref<8x128xf32, #tpu.memory_space<vmem>>, vector<8x128xf32>
    %11 = tpu.concatenate %10, %10 in 0 : vector<8x128xf32>, vector<8x128xf32> -> vector<16x128xf32>
    %c0_10 = arith.constant 0 : index
    %c0_11 = arith.constant 0 : index
    %12 = vector.load %arg1[%c0_10, %c0_11] : memref<16x128xf32, #tpu.memory_space<vmem>>, vector<16x128xf32>
    %13 = arith.addf %12, %11 : vector<16x128xf32>
    %c0_12 = arith.constant 0 : index
    %c0_13 = arith.constant 0 : index
    %14 = vector.load %arg5[%c0_12, %c0_13] : memref<6x128xf32, #tpu.memory_space<vmem>>, vector<1x128xf32>
    %c0_14 = arith.constant 0 : index
    %c0_15 = arith.constant 0 : index
    %15 = vector.load %arg6[%c0_14, %c0_15] : memref<6x128xf32, #tpu.memory_space<vmem>>, vector<1x128xf32>
    %cst_16 = arith.constant dense<0.000000e+00> : vector<16xf32>
    %16 = vector.multi_reduction <add>, %13, %cst_16 [1] : vector<16x128xf32> to vector<16xf32>
    %17 = vector.shape_cast %16 : vector<16xf32> to vector<16x1xf32>
    %cst_17 = arith.constant 1.280000e+02 : f32
    %18 = vector.broadcast %cst_17 : f32 to vector<16x1xf32>
    %19 = arith.divf %17, %18 : vector<16x1xf32>
    %20 = vector.broadcast %19 : vector<16x1xf32> to vector<16x128xf32>
    %21 = arith.subf %13, %20 : vector<16x128xf32>
    %22 = vector.broadcast %19 : vector<16x1xf32> to vector<16x128xf32>
    %23 = arith.subf %13, %22 : vector<16x128xf32>
    %24 = arith.mulf %21, %23 : vector<16x128xf32>
    %cst_18 = arith.constant dense<0.000000e+00> : vector<16xf32>
    %25 = vector.multi_reduction <add>, %24, %cst_18 [1] : vector<16x128xf32> to vector<16xf32>
    %26 = vector.shape_cast %25 : vector<16xf32> to vector<16x1xf32>
    %cst_19 = arith.constant 1.280000e+02 : f32
    %27 = vector.broadcast %cst_19 : f32 to vector<16x1xf32>
    %28 = arith.divf %26, %27 : vector<16x1xf32>
    %29 = vector.broadcast %19 : vector<16x1xf32> to vector<16x128xf32>
    %30 = arith.subf %13, %29 : vector<16x128xf32>
    %cst_20 = arith.constant 9.99999974E-6 : f32
    %31 = vector.broadcast %cst_20 : f32 to vector<16x1xf32>
    %32 = arith.addf %28, %31 : vector<16x1xf32>
    %33 = math.rsqrt %32 : vector<16x1xf32>
    %34 = vector.broadcast %33 : vector<16x1xf32> to vector<16x128xf32>
    %35 = arith.mulf %30, %34 : vector<16x128xf32>
    %36 = vector.broadcast %14 : vector<1x128xf32> to vector<16x128xf32>
    %37 = arith.mulf %35, %36 : vector<16x128xf32>
    %38 = vector.broadcast %15 : vector<1x128xf32> to vector<16x128xf32>
    %39 = arith.addf %37, %38 : vector<16x128xf32>
    %c0_21 = arith.constant 0 : index
    %c0_22 = arith.constant 0 : index
    %c0_23 = arith.constant 0 : index
    %40 = vector.load %arg7[%c0_21, %c0_22, %c0_23] : memref<2x128x384xbf16, #tpu.memory_space<vmem>>, vector<1x128x384xbf16>
    %41 = vector.shape_cast %40 : vector<1x128x384xbf16> to vector<128x384xbf16>
    %42 = arith.truncf %39 : vector<16x128xf32> to vector<16x128xbf16>
    %cst_24 = arith.constant dense<0.000000e+00> : vector<16x384xf32>
    %43 = tpu.matmul %42, %41, %cst_24 {dimension_numbers = #tpu.dot_dimension_numbers<[1], [0], [0], [1], [0, 0, 1, 1], [], []>} : vector<16x128xbf16>, vector<128x384xbf16>, vector<16x384xf32> -> vector<16x384xf32>
    %44 = vector.extract_strided_slice %43 {offsets = [0, 0], sizes = [16, 128], strides = [1, 1]} : vector<16x384xf32> to vector<16x128xf32>
    %45 = vector.extract_strided_slice %43 {offsets = [0, 128], sizes = [16, 128], strides = [1, 1]} : vector<16x384xf32> to vector<16x128xf32>
    %46 = vector.extract_strided_slice %43 {offsets = [0, 256], sizes = [16, 128], strides = [1, 1]} : vector<16x384xf32> to vector<16x128xf32>
    %47 = vector.extract_strided_slice %44 {offsets = [0, 0], sizes = [8, 128], strides = [1, 1]} : vector<16x128xf32> to vector<8x128xf32>
    %48 = vector.extract_strided_slice %45 {offsets = [0, 0], sizes = [8, 128], strides = [1, 1]} : vector<16x128xf32> to vector<8x128xf32>
    %49 = vector.extract_strided_slice %46 {offsets = [0, 0], sizes = [8, 128], strides = [1, 1]} : vector<16x128xf32> to vector<8x128xf32>
    %cst_25 = arith.constant dense<0.000000e+00> : vector<8x8xf32>
    %50 = tpu.matmul %47, %48, %cst_25 {dimension_numbers = #tpu.dot_dimension_numbers<[1], [1], [0], [0], [0, 0, 1, 0], [], []>} : vector<8x128xf32>, vector<8x128xf32>, vector<8x8xf32> -> vector<8x8xf32>
    %cst_26 = arith.constant 0.0883883461 : f32
    %51 = vector.broadcast %cst_26 : f32 to vector<8x8xf32>
    %52 = arith.mulf %50, %51 : vector<8x8xf32>
    %cst_27 = arith.constant dense<0xFF800000> : vector<8xf32>
    %53 = vector.multi_reduction <maximumf>, %52, %cst_27 [1] : vector<8x8xf32> to vector<8xf32>
    %54 = vector.shape_cast %53 : vector<8xf32> to vector<8x1xf32>
    %55 = vector.broadcast %54 : vector<8x1xf32> to vector<8x8xf32>
    %56 = arith.subf %52, %55 : vector<8x8xf32>
    %57 = math.exp %56 : vector<8x8xf32>
    %cst_28 = arith.constant dense<0.000000e+00> : vector<8xf32>
    %58 = vector.multi_reduction <add>, %57, %cst_28 [1] : vector<8x8xf32> to vector<8xf32>
    %59 = vector.shape_cast %58 : vector<8xf32> to vector<8x1xf32>
    %60 = tpu.reciprocal %59 {approx = true} : vector<8x1xf32> -> vector<8x1xf32>
    %61 = vector.broadcast %60 : vector<8x1xf32> to vector<8x8xf32>
    %62 = arith.mulf %57, %61 : vector<8x8xf32>
    %cst_29 = arith.constant dense<0.000000e+00> : vector<8x128xf32>
    %63 = tpu.matmul %62, %49, %cst_29 {dimension_numbers = #tpu.dot_dimension_numbers<[1], [0], [0], [1], [0, 0, 1, 1], [], []>} : vector<8x8xf32>, vector<8x128xf32>, vector<8x128xf32> -> vector<8x128xf32>
    %64 = vector.extract_strided_slice %44 {offsets = [8, 0], sizes = [8, 128], strides = [1, 1]} : vector<16x128xf32> to vector<8x128xf32>
    %65 = vector.extract_strided_slice %45 {offsets = [8, 0], sizes = [8, 128], strides = [1, 1]} : vector<16x128xf32> to vector<8x128xf32>
    %66 = vector.extract_strided_slice %46 {offsets = [8, 0], sizes = [8, 128], strides = [1, 1]} : vector<16x128xf32> to vector<8x128xf32>
    %cst_30 = arith.constant dense<0.000000e+00> : vector<8x8xf32>
    %67 = tpu.matmul %64, %65, %cst_30 {dimension_numbers = #tpu.dot_dimension_numbers<[1], [1], [0], [0], [0, 0, 1, 0], [], []>} : vector<8x128xf32>, vector<8x128xf32>, vector<8x8xf32> -> vector<8x8xf32>
    %cst_31 = arith.constant 0.0883883461 : f32
    %68 = vector.broadcast %cst_31 : f32 to vector<8x8xf32>
    %69 = arith.mulf %67, %68 : vector<8x8xf32>
    %cst_32 = arith.constant dense<0xFF800000> : vector<8xf32>
    %70 = vector.multi_reduction <maximumf>, %69, %cst_32 [1] : vector<8x8xf32> to vector<8xf32>
    %71 = vector.shape_cast %70 : vector<8xf32> to vector<8x1xf32>
    %72 = vector.broadcast %71 : vector<8x1xf32> to vector<8x8xf32>
    %73 = arith.subf %69, %72 : vector<8x8xf32>
    %74 = math.exp %73 : vector<8x8xf32>
    %cst_33 = arith.constant dense<0.000000e+00> : vector<8xf32>
    %75 = vector.multi_reduction <add>, %74, %cst_33 [1] : vector<8x8xf32> to vector<8xf32>
    %76 = vector.shape_cast %75 : vector<8xf32> to vector<8x1xf32>
    %77 = tpu.reciprocal %76 {approx = true} : vector<8x1xf32> -> vector<8x1xf32>
    %78 = vector.broadcast %77 : vector<8x1xf32> to vector<8x8xf32>
    %79 = arith.mulf %74, %78 : vector<8x8xf32>
    %cst_34 = arith.constant dense<0.000000e+00> : vector<8x128xf32>
    %80 = tpu.matmul %79, %66, %cst_34 {dimension_numbers = #tpu.dot_dimension_numbers<[1], [0], [0], [1], [0, 0, 1, 1], [], []>} : vector<8x8xf32>, vector<8x128xf32>, vector<8x128xf32> -> vector<8x128xf32>
    %81 = tpu.concatenate %63, %80 in 0 : vector<8x128xf32>, vector<8x128xf32> -> vector<16x128xf32>
    %c0_35 = arith.constant 0 : index
    %c0_36 = arith.constant 0 : index
    %c0_37 = arith.constant 0 : index
    %82 = vector.load %arg8[%c0_35, %c0_36, %c0_37] : memref<2x128x128xbf16, #tpu.memory_space<vmem>>, vector<1x128x128xbf16>
    %83 = vector.shape_cast %82 : vector<1x128x128xbf16> to vector<128x128xbf16>
    %84 = arith.truncf %81 : vector<16x128xf32> to vector<16x128xbf16>
    %cst_38 = arith.constant dense<0.000000e+00> : vector<16x128xf32>
    %85 = tpu.matmul %84, %83, %cst_38 {dimension_numbers = #tpu.dot_dimension_numbers<[1], [0], [0], [1], [0, 0, 1, 1], [], []>} : vector<16x128xbf16>, vector<128x128xbf16>, vector<16x128xf32> -> vector<16x128xf32>
    %c0_39 = arith.constant 0 : index
    %c0_40 = arith.constant 0 : index
    %86 = vector.load %arg9[%c0_39, %c0_40] : memref<2x128xf32, #tpu.memory_space<vmem>>, vector<1x128xf32>
    %87 = vector.broadcast %86 : vector<1x128xf32> to vector<16x128xf32>
    %88 = arith.addf %85, %87 : vector<16x128xf32>
    %89 = arith.addf %88, %13 : vector<16x128xf32>
    %c1 = arith.constant 1 : index
    %c0_41 = arith.constant 0 : index
    %90 = vector.load %arg5[%c1, %c0_41] : memref<6x128xf32, #tpu.memory_space<vmem>>, vector<1x128xf32>
    %c1_42 = arith.constant 1 : index
    %c0_43 = arith.constant 0 : index
    %91 = vector.load %arg6[%c1_42, %c0_43] : memref<6x128xf32, #tpu.memory_space<vmem>>, vector<1x128xf32>
    %cst_44 = arith.constant dense<0.000000e+00> : vector<16xf32>
    %92 = vector.multi_reduction <add>, %89, %cst_44 [1] : vector<16x128xf32> to vector<16xf32>
    %93 = vector.shape_cast %92 : vector<16xf32> to vector<16x1xf32>
    %cst_45 = arith.constant 1.280000e+02 : f32
    %94 = vector.broadcast %cst_45 : f32 to vector<16x1xf32>
    %95 = arith.divf %93, %94 : vector<16x1xf32>
    %96 = vector.broadcast %95 : vector<16x1xf32> to vector<16x128xf32>
    %97 = arith.subf %89, %96 : vector<16x128xf32>
    %98 = vector.broadcast %95 : vector<16x1xf32> to vector<16x128xf32>
    %99 = arith.subf %89, %98 : vector<16x128xf32>
    %100 = arith.mulf %97, %99 : vector<16x128xf32>
    %cst_46 = arith.constant dense<0.000000e+00> : vector<16xf32>
    %101 = vector.multi_reduction <add>, %100, %cst_46 [1] : vector<16x128xf32> to vector<16xf32>
    %102 = vector.shape_cast %101 : vector<16xf32> to vector<16x1xf32>
    %cst_47 = arith.constant 1.280000e+02 : f32
    %103 = vector.broadcast %cst_47 : f32 to vector<16x1xf32>
    %104 = arith.divf %102, %103 : vector<16x1xf32>
    %105 = vector.broadcast %95 : vector<16x1xf32> to vector<16x128xf32>
    %106 = arith.subf %89, %105 : vector<16x128xf32>
    %cst_48 = arith.constant 9.99999974E-6 : f32
    %107 = vector.broadcast %cst_48 : f32 to vector<16x1xf32>
    %108 = arith.addf %104, %107 : vector<16x1xf32>
    %109 = math.rsqrt %108 : vector<16x1xf32>
    %110 = vector.broadcast %109 : vector<16x1xf32> to vector<16x128xf32>
    %111 = arith.mulf %106, %110 : vector<16x128xf32>
    %112 = vector.broadcast %90 : vector<1x128xf32> to vector<16x128xf32>
    %113 = arith.mulf %111, %112 : vector<16x128xf32>
    %114 = vector.broadcast %91 : vector<1x128xf32> to vector<16x128xf32>
    %115 = arith.addf %113, %114 : vector<16x128xf32>
    %c0_49 = arith.constant 0 : index
    %c0_50 = arith.constant 0 : index
    %c0_51 = arith.constant 0 : index
    %116 = vector.load %arg10[%c0_49, %c0_50, %c0_51] : memref<2x128x128xbf16, #tpu.memory_space<vmem>>, vector<1x128x128xbf16>
    %117 = vector.shape_cast %116 : vector<1x128x128xbf16> to vector<128x128xbf16>
    %118 = arith.truncf %115 : vector<16x128xf32> to vector<16x128xbf16>
    %cst_52 = arith.constant dense<0.000000e+00> : vector<16x128xf32>
    %119 = tpu.matmul %118, %117, %cst_52 {dimension_numbers = #tpu.dot_dimension_numbers<[1], [0], [0], [1], [0, 0, 1, 1], [], []>} : vector<16x128xbf16>, vector<128x128xbf16>, vector<16x128xf32> -> vector<16x128xf32>
    %120 = vector.extract_strided_slice %9 {offsets = [0, 0], sizes = [8, 128], strides = [1, 1]} : vector<8x512xf32> to vector<8x128xf32>
    %121 = vector.extract_strided_slice %9 {offsets = [0, 128], sizes = [8, 128], strides = [1, 1]} : vector<8x512xf32> to vector<8x128xf32>
    %122 = vector.extract_strided_slice %119 {offsets = [0, 0], sizes = [8, 128], strides = [1, 1]} : vector<16x128xf32> to vector<8x128xf32>
    %123 = vector.extract_strided_slice %120 {offsets = [0, 0], sizes = [4, 128], strides = [1, 1]} : vector<8x128xf32> to vector<4x128xf32>
    %124 = vector.extract_strided_slice %121 {offsets = [0, 0], sizes = [4, 128], strides = [1, 1]} : vector<8x128xf32> to vector<4x128xf32>
    %cst_53 = arith.constant dense<0.000000e+00> : vector<8x4xf32>
    %125 = tpu.matmul %122, %123, %cst_53 {dimension_numbers = #tpu.dot_dimension_numbers<[1], [1], [0], [0], [0, 0, 1, 0], [], []>} : vector<8x128xf32>, vector<4x128xf32>, vector<8x4xf32> -> vector<8x4xf32>
    %cst_54 = arith.constant 0.0883883461 : f32
    %126 = vector.broadcast %cst_54 : f32 to vector<8x4xf32>
    %127 = arith.mulf %125, %126 : vector<8x4xf32>
    %cst_55 = arith.constant dense<0xFF800000> : vector<8xf32>
    %128 = vector.multi_reduction <maximumf>, %127, %cst_55 [1] : vector<8x4xf32> to vector<8xf32>
    %129 = vector.shape_cast %128 : vector<8xf32> to vector<8x1xf32>
    %130 = vector.broadcast %129 : vector<8x1xf32> to vector<8x4xf32>
    %131 = arith.subf %127, %130 : vector<8x4xf32>
    %132 = math.exp %131 : vector<8x4xf32>
    %cst_56 = arith.constant dense<0.000000e+00> : vector<8xf32>
    %133 = vector.multi_reduction <add>, %132, %cst_56 [1] : vector<8x4xf32> to vector<8xf32>
    %134 = vector.shape_cast %133 : vector<8xf32> to vector<8x1xf32>
    %135 = tpu.reciprocal %134 {approx = true} : vector<8x1xf32> -> vector<8x1xf32>
    %136 = vector.broadcast %135 : vector<8x1xf32> to vector<8x4xf32>
    %137 = arith.mulf %132, %136 : vector<8x4xf32>
    %cst_57 = arith.constant dense<0.000000e+00> : vector<8x128xf32>
    %138 = tpu.matmul %137, %124, %cst_57 {dimension_numbers = #tpu.dot_dimension_numbers<[1], [0], [0], [1], [0, 0, 1, 1], [], []>} : vector<8x4xf32>, vector<4x128xf32>, vector<8x128xf32> -> vector<8x128xf32>
    %139 = vector.extract_strided_slice %119 {offsets = [8, 0], sizes = [8, 128], strides = [1, 1]} : vector<16x128xf32> to vector<8x128xf32>
    %140 = vector.extract_strided_slice %120 {offsets = [4, 0], sizes = [4, 128], strides = [1, 1]} : vector<8x128xf32> to vector<4x128xf32>
    %141 = vector.extract_strided_slice %121 {offsets = [4, 0], sizes = [4, 128], strides = [1, 1]} : vector<8x128xf32> to vector<4x128xf32>
    %cst_58 = arith.constant dense<0.000000e+00> : vector<8x4xf32>
    %142 = tpu.matmul %139, %140, %cst_58 {dimension_numbers = #tpu.dot_dimension_numbers<[1], [1], [0], [0], [0, 0, 1, 0], [], []>} : vector<8x128xf32>, vector<4x128xf32>, vector<8x4xf32> -> vector<8x4xf32>
    %cst_59 = arith.constant 0.0883883461 : f32
    %143 = vector.broadcast %cst_59 : f32 to vector<8x4xf32>
    %144 = arith.mulf %142, %143 : vector<8x4xf32>
    %cst_60 = arith.constant dense<0xFF800000> : vector<8xf32>
    %145 = vector.multi_reduction <maximumf>, %144, %cst_60 [1] : vector<8x4xf32> to vector<8xf32>
    %146 = vector.shape_cast %145 : vector<8xf32> to vector<8x1xf32>
    %147 = vector.broadcast %146 : vector<8x1xf32> to vector<8x4xf32>
    %148 = arith.subf %144, %147 : vector<8x4xf32>
    %149 = math.exp %148 : vector<8x4xf32>
    %cst_61 = arith.constant dense<0.000000e+00> : vector<8xf32>
    %150 = vector.multi_reduction <add>, %149, %cst_61 [1] : vector<8x4xf32> to vector<8xf32>
    %151 = vector.shape_cast %150 : vector<8xf32> to vector<8x1xf32>
    %152 = tpu.reciprocal %151 {approx = true} : vector<8x1xf32> -> vector<8x1xf32>
    %153 = vector.broadcast %152 : vector<8x1xf32> to vector<8x4xf32>
    %154 = arith.mulf %149, %153 : vector<8x4xf32>
    %cst_62 = arith.constant dense<0.000000e+00> : vector<8x128xf32>
    %155 = tpu.matmul %154, %141, %cst_62 {dimension_numbers = #tpu.dot_dimension_numbers<[1], [0], [0], [1], [0, 0, 1, 1], [], []>} : vector<8x4xf32>, vector<4x128xf32>, vector<8x128xf32> -> vector<8x128xf32>
    %156 = tpu.concatenate %138, %155 in 0 : vector<8x128xf32>, vector<8x128xf32> -> vector<16x128xf32>
    %c0_63 = arith.constant 0 : index
    %c0_64 = arith.constant 0 : index
    %c0_65 = arith.constant 0 : index
    %157 = vector.load %arg12[%c0_63, %c0_64, %c0_65] : memref<2x128x128xbf16, #tpu.memory_space<vmem>>, vector<1x128x128xbf16>
    %158 = vector.shape_cast %157 : vector<1x128x128xbf16> to vector<128x128xbf16>
    %159 = arith.truncf %156 : vector<16x128xf32> to vector<16x128xbf16>
    %cst_66 = arith.constant dense<0.000000e+00> : vector<16x128xf32>
    %160 = tpu.matmul %159, %158, %cst_66 {dimension_numbers = #tpu.dot_dimension_numbers<[1], [0], [0], [1], [0, 0, 1, 1], [], []>} : vector<16x128xbf16>, vector<128x128xbf16>, vector<16x128xf32> -> vector<16x128xf32>
    %c0_67 = arith.constant 0 : index
    %c0_68 = arith.constant 0 : index
    %161 = vector.load %arg13[%c0_67, %c0_68] : memref<2x128xf32, #tpu.memory_space<vmem>>, vector<1x128xf32>
    %162 = vector.broadcast %161 : vector<1x128xf32> to vector<16x128xf32>
    %163 = arith.addf %160, %162 : vector<16x128xf32>
    %164 = arith.addf %163, %89 : vector<16x128xf32>
    %c2 = arith.constant 2 : index
    %c0_69 = arith.constant 0 : index
    %165 = vector.load %arg5[%c2, %c0_69] : memref<6x128xf32, #tpu.memory_space<vmem>>, vector<1x128xf32>
    %c2_70 = arith.constant 2 : index
    %c0_71 = arith.constant 0 : index
    %166 = vector.load %arg6[%c2_70, %c0_71] : memref<6x128xf32, #tpu.memory_space<vmem>>, vector<1x128xf32>
    %cst_72 = arith.constant dense<0.000000e+00> : vector<16xf32>
    %167 = vector.multi_reduction <add>, %164, %cst_72 [1] : vector<16x128xf32> to vector<16xf32>
    %168 = vector.shape_cast %167 : vector<16xf32> to vector<16x1xf32>
    %cst_73 = arith.constant 1.280000e+02 : f32
    %169 = vector.broadcast %cst_73 : f32 to vector<16x1xf32>
    %170 = arith.divf %168, %169 : vector<16x1xf32>
    %171 = vector.broadcast %170 : vector<16x1xf32> to vector<16x128xf32>
    %172 = arith.subf %164, %171 : vector<16x128xf32>
    %173 = vector.broadcast %170 : vector<16x1xf32> to vector<16x128xf32>
    %174 = arith.subf %164, %173 : vector<16x128xf32>
    %175 = arith.mulf %172, %174 : vector<16x128xf32>
    %cst_74 = arith.constant dense<0.000000e+00> : vector<16xf32>
    %176 = vector.multi_reduction <add>, %175, %cst_74 [1] : vector<16x128xf32> to vector<16xf32>
    %177 = vector.shape_cast %176 : vector<16xf32> to vector<16x1xf32>
    %cst_75 = arith.constant 1.280000e+02 : f32
    %178 = vector.broadcast %cst_75 : f32 to vector<16x1xf32>
    %179 = arith.divf %177, %178 : vector<16x1xf32>
    %180 = vector.broadcast %170 : vector<16x1xf32> to vector<16x128xf32>
    %181 = arith.subf %164, %180 : vector<16x128xf32>
    %cst_76 = arith.constant 9.99999974E-6 : f32
    %182 = vector.broadcast %cst_76 : f32 to vector<16x1xf32>
    %183 = arith.addf %179, %182 : vector<16x1xf32>
    %184 = math.rsqrt %183 : vector<16x1xf32>
    %185 = vector.broadcast %184 : vector<16x1xf32> to vector<16x128xf32>
    %186 = arith.mulf %181, %185 : vector<16x128xf32>
    %187 = vector.broadcast %165 : vector<1x128xf32> to vector<16x128xf32>
    %188 = arith.mulf %186, %187 : vector<16x128xf32>
    %189 = vector.broadcast %166 : vector<1x128xf32> to vector<16x128xf32>
    %190 = arith.addf %188, %189 : vector<16x128xf32>
    %c0_77 = arith.constant 0 : index
    %c0_78 = arith.constant 0 : index
    %c0_79 = arith.constant 0 : index
    %191 = vector.load %arg14[%c0_77, %c0_78, %c0_79] : memref<2x128x512xbf16, #tpu.memory_space<vmem>>, vector<1x128x512xbf16>
    %192 = vector.shape_cast %191 : vector<1x128x512xbf16> to vector<128x512xbf16>
    %193 = arith.truncf %190 : vector<16x128xf32> to vector<16x128xbf16>
    %cst_80 = arith.constant dense<0.000000e+00> : vector<16x512xf32>
    %194 = tpu.matmul %193, %192, %cst_80 {dimension_numbers = #tpu.dot_dimension_numbers<[1], [0], [0], [1], [0, 0, 1, 1], [], []>} : vector<16x128xbf16>, vector<128x512xbf16>, vector<16x512xf32> -> vector<16x512xf32>
    %c0_81 = arith.constant 0 : index
    %c0_82 = arith.constant 0 : index
    %195 = vector.load %arg15[%c0_81, %c0_82] : memref<2x512xf32, #tpu.memory_space<vmem>>, vector<1x512xf32>
    %196 = vector.broadcast %195 : vector<1x512xf32> to vector<16x512xf32>
    %197 = arith.addf %194, %196 : vector<16x512xf32>
    %198 = arith.mulf %197, %197 : vector<16x512xf32>
    %199 = arith.mulf %197, %198 : vector<16x512xf32>
    %cst_83 = arith.constant 4.471500e-02 : f32
    %200 = vector.broadcast %cst_83 : f32 to vector<16x512xf32>
    %201 = arith.mulf %200, %199 : vector<16x512xf32>
    %202 = arith.addf %197, %201 : vector<16x512xf32>
    %cst_84 = arith.constant 0.797884583 : f32
    %203 = vector.broadcast %cst_84 : f32 to vector<16x512xf32>
    %204 = arith.mulf %203, %202 : vector<16x512xf32>
    %205 = math.tanh %204 : vector<16x512xf32>
    %cst_85 = arith.constant 1.000000e+00 : f32
    %206 = vector.broadcast %cst_85 : f32 to vector<16x512xf32>
    %207 = arith.addf %206, %205 : vector<16x512xf32>
    %cst_86 = arith.constant 5.000000e-01 : f32
    %208 = vector.broadcast %cst_86 : f32 to vector<16x512xf32>
    %209 = arith.mulf %208, %207 : vector<16x512xf32>
    %210 = arith.mulf %197, %209 : vector<16x512xf32>
    %c0_87 = arith.constant 0 : index
    %c0_88 = arith.constant 0 : index
    %c0_89 = arith.constant 0 : index
    %211 = vector.load %arg16[%c0_87, %c0_88, %c0_89] : memref<2x512x128xbf16, #tpu.memory_space<vmem>>, vector<1x512x128xbf16>
    %212 = vector.shape_cast %211 : vector<1x512x128xbf16> to vector<512x128xbf16>
    %213 = arith.truncf %210 : vector<16x512xf32> to vector<16x512xbf16>
    %cst_90 = arith.constant dense<0.000000e+00> : vector<16x128xf32>
    %214 = tpu.matmul %213, %212, %cst_90 {dimension_numbers = #tpu.dot_dimension_numbers<[1], [0], [0], [1], [0, 0, 1, 1], [], []>} : vector<16x512xbf16>, vector<512x128xbf16>, vector<16x128xf32> -> vector<16x128xf32>
    %c0_91 = arith.constant 0 : index
    %c0_92 = arith.constant 0 : index
    %215 = vector.load %arg17[%c0_91, %c0_92] : memref<2x128xf32, #tpu.memory_space<vmem>>, vector<1x128xf32>
    %216 = vector.broadcast %215 : vector<1x128xf32> to vector<16x128xf32>
    %217 = arith.addf %214, %216 : vector<16x128xf32>
    %218 = arith.addf %217, %164 : vector<16x128xf32>
    %c3 = arith.constant 3 : index
    %c0_93 = arith.constant 0 : index
    %219 = vector.load %arg5[%c3, %c0_93] : memref<6x128xf32, #tpu.memory_space<vmem>>, vector<1x128xf32>
    %c3_94 = arith.constant 3 : index
    %c0_95 = arith.constant 0 : index
    %220 = vector.load %arg6[%c3_94, %c0_95] : memref<6x128xf32, #tpu.memory_space<vmem>>, vector<1x128xf32>
    %cst_96 = arith.constant dense<0.000000e+00> : vector<16xf32>
    %221 = vector.multi_reduction <add>, %218, %cst_96 [1] : vector<16x128xf32> to vector<16xf32>
    %222 = vector.shape_cast %221 : vector<16xf32> to vector<16x1xf32>
    %cst_97 = arith.constant 1.280000e+02 : f32
    %223 = vector.broadcast %cst_97 : f32 to vector<16x1xf32>
    %224 = arith.divf %222, %223 : vector<16x1xf32>
    %225 = vector.broadcast %224 : vector<16x1xf32> to vector<16x128xf32>
    %226 = arith.subf %218, %225 : vector<16x128xf32>
    %227 = vector.broadcast %224 : vector<16x1xf32> to vector<16x128xf32>
    %228 = arith.subf %218, %227 : vector<16x128xf32>
    %229 = arith.mulf %226, %228 : vector<16x128xf32>
    %cst_98 = arith.constant dense<0.000000e+00> : vector<16xf32>
    %230 = vector.multi_reduction <add>, %229, %cst_98 [1] : vector<16x128xf32> to vector<16xf32>
    %231 = vector.shape_cast %230 : vector<16xf32> to vector<16x1xf32>
    %cst_99 = arith.constant 1.280000e+02 : f32
    %232 = vector.broadcast %cst_99 : f32 to vector<16x1xf32>
    %233 = arith.divf %231, %232 : vector<16x1xf32>
    %234 = vector.broadcast %224 : vector<16x1xf32> to vector<16x128xf32>
    %235 = arith.subf %218, %234 : vector<16x128xf32>
    %cst_100 = arith.constant 9.99999974E-6 : f32
    %236 = vector.broadcast %cst_100 : f32 to vector<16x1xf32>
    %237 = arith.addf %233, %236 : vector<16x1xf32>
    %238 = math.rsqrt %237 : vector<16x1xf32>
    %239 = vector.broadcast %238 : vector<16x1xf32> to vector<16x128xf32>
    %240 = arith.mulf %235, %239 : vector<16x128xf32>
    %241 = vector.broadcast %219 : vector<1x128xf32> to vector<16x128xf32>
    %242 = arith.mulf %240, %241 : vector<16x128xf32>
    %243 = vector.broadcast %220 : vector<1x128xf32> to vector<16x128xf32>
    %244 = arith.addf %242, %243 : vector<16x128xf32>
    %c1_101 = arith.constant 1 : index
    %c0_102 = arith.constant 0 : index
    %c0_103 = arith.constant 0 : index
    %245 = vector.load %arg7[%c1_101, %c0_102, %c0_103] : memref<2x128x384xbf16, #tpu.memory_space<vmem>>, vector<1x128x384xbf16>
    %246 = vector.shape_cast %245 : vector<1x128x384xbf16> to vector<128x384xbf16>
    %247 = arith.truncf %244 : vector<16x128xf32> to vector<16x128xbf16>
    %cst_104 = arith.constant dense<0.000000e+00> : vector<16x384xf32>
    %248 = tpu.matmul %247, %246, %cst_104 {dimension_numbers = #tpu.dot_dimension_numbers<[1], [0], [0], [1], [0, 0, 1, 1], [], []>} : vector<16x128xbf16>, vector<128x384xbf16>, vector<16x384xf32> -> vector<16x384xf32>
    %249 = vector.extract_strided_slice %248 {offsets = [0, 0], sizes = [16, 128], strides = [1, 1]} : vector<16x384xf32> to vector<16x128xf32>
    %250 = vector.extract_strided_slice %248 {offsets = [0, 128], sizes = [16, 128], strides = [1, 1]} : vector<16x384xf32> to vector<16x128xf32>
    %251 = vector.extract_strided_slice %248 {offsets = [0, 256], sizes = [16, 128], strides = [1, 1]} : vector<16x384xf32> to vector<16x128xf32>
    %252 = vector.extract_strided_slice %249 {offsets = [0, 0], sizes = [8, 128], strides = [1, 1]} : vector<16x128xf32> to vector<8x128xf32>
    %253 = vector.extract_strided_slice %250 {offsets = [0, 0], sizes = [8, 128], strides = [1, 1]} : vector<16x128xf32> to vector<8x128xf32>
    %254 = vector.extract_strided_slice %251 {offsets = [0, 0], sizes = [8, 128], strides = [1, 1]} : vector<16x128xf32> to vector<8x128xf32>
    %cst_105 = arith.constant dense<0.000000e+00> : vector<8x8xf32>
    %255 = tpu.matmul %252, %253, %cst_105 {dimension_numbers = #tpu.dot_dimension_numbers<[1], [1], [0], [0], [0, 0, 1, 0], [], []>} : vector<8x128xf32>, vector<8x128xf32>, vector<8x8xf32> -> vector<8x8xf32>
    %cst_106 = arith.constant 0.0883883461 : f32
    %256 = vector.broadcast %cst_106 : f32 to vector<8x8xf32>
    %257 = arith.mulf %255, %256 : vector<8x8xf32>
    %cst_107 = arith.constant dense<0xFF800000> : vector<8xf32>
    %258 = vector.multi_reduction <maximumf>, %257, %cst_107 [1] : vector<8x8xf32> to vector<8xf32>
    %259 = vector.shape_cast %258 : vector<8xf32> to vector<8x1xf32>
    %260 = vector.broadcast %259 : vector<8x1xf32> to vector<8x8xf32>
    %261 = arith.subf %257, %260 : vector<8x8xf32>
    %262 = math.exp %261 : vector<8x8xf32>
    %cst_108 = arith.constant dense<0.000000e+00> : vector<8xf32>
    %263 = vector.multi_reduction <add>, %262, %cst_108 [1] : vector<8x8xf32> to vector<8xf32>
    %264 = vector.shape_cast %263 : vector<8xf32> to vector<8x1xf32>
    %265 = tpu.reciprocal %264 {approx = true} : vector<8x1xf32> -> vector<8x1xf32>
    %266 = vector.broadcast %265 : vector<8x1xf32> to vector<8x8xf32>
    %267 = arith.mulf %262, %266 : vector<8x8xf32>
    %cst_109 = arith.constant dense<0.000000e+00> : vector<8x128xf32>
    %268 = tpu.matmul %267, %254, %cst_109 {dimension_numbers = #tpu.dot_dimension_numbers<[1], [0], [0], [1], [0, 0, 1, 1], [], []>} : vector<8x8xf32>, vector<8x128xf32>, vector<8x128xf32> -> vector<8x128xf32>
    %269 = vector.extract_strided_slice %249 {offsets = [8, 0], sizes = [8, 128], strides = [1, 1]} : vector<16x128xf32> to vector<8x128xf32>
    %270 = vector.extract_strided_slice %250 {offsets = [8, 0], sizes = [8, 128], strides = [1, 1]} : vector<16x128xf32> to vector<8x128xf32>
    %271 = vector.extract_strided_slice %251 {offsets = [8, 0], sizes = [8, 128], strides = [1, 1]} : vector<16x128xf32> to vector<8x128xf32>
    %cst_110 = arith.constant dense<0.000000e+00> : vector<8x8xf32>
    %272 = tpu.matmul %269, %270, %cst_110 {dimension_numbers = #tpu.dot_dimension_numbers<[1], [1], [0], [0], [0, 0, 1, 0], [], []>} : vector<8x128xf32>, vector<8x128xf32>, vector<8x8xf32> -> vector<8x8xf32>
    %cst_111 = arith.constant 0.0883883461 : f32
    %273 = vector.broadcast %cst_111 : f32 to vector<8x8xf32>
    %274 = arith.mulf %272, %273 : vector<8x8xf32>
    %cst_112 = arith.constant dense<0xFF800000> : vector<8xf32>
    %275 = vector.multi_reduction <maximumf>, %274, %cst_112 [1] : vector<8x8xf32> to vector<8xf32>
    %276 = vector.shape_cast %275 : vector<8xf32> to vector<8x1xf32>
    %277 = vector.broadcast %276 : vector<8x1xf32> to vector<8x8xf32>
    %278 = arith.subf %274, %277 : vector<8x8xf32>
    %279 = math.exp %278 : vector<8x8xf32>
    %cst_113 = arith.constant dense<0.000000e+00> : vector<8xf32>
    %280 = vector.multi_reduction <add>, %279, %cst_113 [1] : vector<8x8xf32> to vector<8xf32>
    %281 = vector.shape_cast %280 : vector<8xf32> to vector<8x1xf32>
    %282 = tpu.reciprocal %281 {approx = true} : vector<8x1xf32> -> vector<8x1xf32>
    %283 = vector.broadcast %282 : vector<8x1xf32> to vector<8x8xf32>
    %284 = arith.mulf %279, %283 : vector<8x8xf32>
    %cst_114 = arith.constant dense<0.000000e+00> : vector<8x128xf32>
    %285 = tpu.matmul %284, %271, %cst_114 {dimension_numbers = #tpu.dot_dimension_numbers<[1], [0], [0], [1], [0, 0, 1, 1], [], []>} : vector<8x8xf32>, vector<8x128xf32>, vector<8x128xf32> -> vector<8x128xf32>
    %286 = tpu.concatenate %268, %285 in 0 : vector<8x128xf32>, vector<8x128xf32> -> vector<16x128xf32>
    %c1_115 = arith.constant 1 : index
    %c0_116 = arith.constant 0 : index
    %c0_117 = arith.constant 0 : index
    %287 = vector.load %arg8[%c1_115, %c0_116, %c0_117] : memref<2x128x128xbf16, #tpu.memory_space<vmem>>, vector<1x128x128xbf16>
    %288 = vector.shape_cast %287 : vector<1x128x128xbf16> to vector<128x128xbf16>
    %289 = arith.truncf %286 : vector<16x128xf32> to vector<16x128xbf16>
    %cst_118 = arith.constant dense<0.000000e+00> : vector<16x128xf32>
    %290 = tpu.matmul %289, %288, %cst_118 {dimension_numbers = #tpu.dot_dimension_numbers<[1], [0], [0], [1], [0, 0, 1, 1], [], []>} : vector<16x128xbf16>, vector<128x128xbf16>, vector<16x128xf32> -> vector<16x128xf32>
    %c1_119 = arith.constant 1 : index
    %c0_120 = arith.constant 0 : index
    %291 = vector.load %arg9[%c1_119, %c0_120] : memref<2x128xf32, #tpu.memory_space<vmem>>, vector<1x128xf32>
    %292 = vector.broadcast %291 : vector<1x128xf32> to vector<16x128xf32>
    %293 = arith.addf %290, %292 : vector<16x128xf32>
    %294 = arith.addf %293, %218 : vector<16x128xf32>
    %c4 = arith.constant 4 : index
    %c0_121 = arith.constant 0 : index
    %295 = vector.load %arg5[%c4, %c0_121] : memref<6x128xf32, #tpu.memory_space<vmem>>, vector<1x128xf32>
    %c4_122 = arith.constant 4 : index
    %c0_123 = arith.constant 0 : index
    %296 = vector.load %arg6[%c4_122, %c0_123] : memref<6x128xf32, #tpu.memory_space<vmem>>, vector<1x128xf32>
    %cst_124 = arith.constant dense<0.000000e+00> : vector<16xf32>
    %297 = vector.multi_reduction <add>, %294, %cst_124 [1] : vector<16x128xf32> to vector<16xf32>
    %298 = vector.shape_cast %297 : vector<16xf32> to vector<16x1xf32>
    %cst_125 = arith.constant 1.280000e+02 : f32
    %299 = vector.broadcast %cst_125 : f32 to vector<16x1xf32>
    %300 = arith.divf %298, %299 : vector<16x1xf32>
    %301 = vector.broadcast %300 : vector<16x1xf32> to vector<16x128xf32>
    %302 = arith.subf %294, %301 : vector<16x128xf32>
    %303 = vector.broadcast %300 : vector<16x1xf32> to vector<16x128xf32>
    %304 = arith.subf %294, %303 : vector<16x128xf32>
    %305 = arith.mulf %302, %304 : vector<16x128xf32>
    %cst_126 = arith.constant dense<0.000000e+00> : vector<16xf32>
    %306 = vector.multi_reduction <add>, %305, %cst_126 [1] : vector<16x128xf32> to vector<16xf32>
    %307 = vector.shape_cast %306 : vector<16xf32> to vector<16x1xf32>
    %cst_127 = arith.constant 1.280000e+02 : f32
    %308 = vector.broadcast %cst_127 : f32 to vector<16x1xf32>
    %309 = arith.divf %307, %308 : vector<16x1xf32>
    %310 = vector.broadcast %300 : vector<16x1xf32> to vector<16x128xf32>
    %311 = arith.subf %294, %310 : vector<16x128xf32>
    %cst_128 = arith.constant 9.99999974E-6 : f32
    %312 = vector.broadcast %cst_128 : f32 to vector<16x1xf32>
    %313 = arith.addf %309, %312 : vector<16x1xf32>
    %314 = math.rsqrt %313 : vector<16x1xf32>
    %315 = vector.broadcast %314 : vector<16x1xf32> to vector<16x128xf32>
    %316 = arith.mulf %311, %315 : vector<16x128xf32>
    %317 = vector.broadcast %295 : vector<1x128xf32> to vector<16x128xf32>
    %318 = arith.mulf %316, %317 : vector<16x128xf32>
    %319 = vector.broadcast %296 : vector<1x128xf32> to vector<16x128xf32>
    %320 = arith.addf %318, %319 : vector<16x128xf32>
    %c1_129 = arith.constant 1 : index
    %c0_130 = arith.constant 0 : index
    %c0_131 = arith.constant 0 : index
    %321 = vector.load %arg10[%c1_129, %c0_130, %c0_131] : memref<2x128x128xbf16, #tpu.memory_space<vmem>>, vector<1x128x128xbf16>
    %322 = vector.shape_cast %321 : vector<1x128x128xbf16> to vector<128x128xbf16>
    %323 = arith.truncf %320 : vector<16x128xf32> to vector<16x128xbf16>
    %cst_132 = arith.constant dense<0.000000e+00> : vector<16x128xf32>
    %324 = tpu.matmul %323, %322, %cst_132 {dimension_numbers = #tpu.dot_dimension_numbers<[1], [0], [0], [1], [0, 0, 1, 1], [], []>} : vector<16x128xbf16>, vector<128x128xbf16>, vector<16x128xf32> -> vector<16x128xf32>
    %325 = vector.extract_strided_slice %9 {offsets = [0, 256], sizes = [8, 128], strides = [1, 1]} : vector<8x512xf32> to vector<8x128xf32>
    %326 = vector.extract_strided_slice %9 {offsets = [0, 384], sizes = [8, 128], strides = [1, 1]} : vector<8x512xf32> to vector<8x128xf32>
    %327 = vector.extract_strided_slice %324 {offsets = [0, 0], sizes = [8, 128], strides = [1, 1]} : vector<16x128xf32> to vector<8x128xf32>
    %328 = vector.extract_strided_slice %325 {offsets = [0, 0], sizes = [4, 128], strides = [1, 1]} : vector<8x128xf32> to vector<4x128xf32>
    %329 = vector.extract_strided_slice %326 {offsets = [0, 0], sizes = [4, 128], strides = [1, 1]} : vector<8x128xf32> to vector<4x128xf32>
    %cst_133 = arith.constant dense<0.000000e+00> : vector<8x4xf32>
    %330 = tpu.matmul %327, %328, %cst_133 {dimension_numbers = #tpu.dot_dimension_numbers<[1], [1], [0], [0], [0, 0, 1, 0], [], []>} : vector<8x128xf32>, vector<4x128xf32>, vector<8x4xf32> -> vector<8x4xf32>
    %cst_134 = arith.constant 0.0883883461 : f32
    %331 = vector.broadcast %cst_134 : f32 to vector<8x4xf32>
    %332 = arith.mulf %330, %331 : vector<8x4xf32>
    %cst_135 = arith.constant dense<0xFF800000> : vector<8xf32>
    %333 = vector.multi_reduction <maximumf>, %332, %cst_135 [1] : vector<8x4xf32> to vector<8xf32>
    %334 = vector.shape_cast %333 : vector<8xf32> to vector<8x1xf32>
    %335 = vector.broadcast %334 : vector<8x1xf32> to vector<8x4xf32>
    %336 = arith.subf %332, %335 : vector<8x4xf32>
    %337 = math.exp %336 : vector<8x4xf32>
    %cst_136 = arith.constant dense<0.000000e+00> : vector<8xf32>
    %338 = vector.multi_reduction <add>, %337, %cst_136 [1] : vector<8x4xf32> to vector<8xf32>
    %339 = vector.shape_cast %338 : vector<8xf32> to vector<8x1xf32>
    %340 = tpu.reciprocal %339 {approx = true} : vector<8x1xf32> -> vector<8x1xf32>
    %341 = vector.broadcast %340 : vector<8x1xf32> to vector<8x4xf32>
    %342 = arith.mulf %337, %341 : vector<8x4xf32>
    %cst_137 = arith.constant dense<0.000000e+00> : vector<8x128xf32>
    %343 = tpu.matmul %342, %329, %cst_137 {dimension_numbers = #tpu.dot_dimension_numbers<[1], [0], [0], [1], [0, 0, 1, 1], [], []>} : vector<8x4xf32>, vector<4x128xf32>, vector<8x128xf32> -> vector<8x128xf32>
    %344 = vector.extract_strided_slice %324 {offsets = [8, 0], sizes = [8, 128], strides = [1, 1]} : vector<16x128xf32> to vector<8x128xf32>
    %345 = vector.extract_strided_slice %325 {offsets = [4, 0], sizes = [4, 128], strides = [1, 1]} : vector<8x128xf32> to vector<4x128xf32>
    %346 = vector.extract_strided_slice %326 {offsets = [4, 0], sizes = [4, 128], strides = [1, 1]} : vector<8x128xf32> to vector<4x128xf32>
    %cst_138 = arith.constant dense<0.000000e+00> : vector<8x4xf32>
    %347 = tpu.matmul %344, %345, %cst_138 {dimension_numbers = #tpu.dot_dimension_numbers<[1], [1], [0], [0], [0, 0, 1, 0], [], []>} : vector<8x128xf32>, vector<4x128xf32>, vector<8x4xf32> -> vector<8x4xf32>
    %cst_139 = arith.constant 0.0883883461 : f32
    %348 = vector.broadcast %cst_139 : f32 to vector<8x4xf32>
    %349 = arith.mulf %347, %348 : vector<8x4xf32>
    %cst_140 = arith.constant dense<0xFF800000> : vector<8xf32>
    %350 = vector.multi_reduction <maximumf>, %349, %cst_140 [1] : vector<8x4xf32> to vector<8xf32>
    %351 = vector.shape_cast %350 : vector<8xf32> to vector<8x1xf32>
    %352 = vector.broadcast %351 : vector<8x1xf32> to vector<8x4xf32>
    %353 = arith.subf %349, %352 : vector<8x4xf32>
    %354 = math.exp %353 : vector<8x4xf32>
    %cst_141 = arith.constant dense<0.000000e+00> : vector<8xf32>
    %355 = vector.multi_reduction <add>, %354, %cst_141 [1] : vector<8x4xf32> to vector<8xf32>
    %356 = vector.shape_cast %355 : vector<8xf32> to vector<8x1xf32>
    %357 = tpu.reciprocal %356 {approx = true} : vector<8x1xf32> -> vector<8x1xf32>
    %358 = vector.broadcast %357 : vector<8x1xf32> to vector<8x4xf32>
    %359 = arith.mulf %354, %358 : vector<8x4xf32>
    %cst_142 = arith.constant dense<0.000000e+00> : vector<8x128xf32>
    %360 = tpu.matmul %359, %346, %cst_142 {dimension_numbers = #tpu.dot_dimension_numbers<[1], [0], [0], [1], [0, 0, 1, 1], [], []>} : vector<8x4xf32>, vector<4x128xf32>, vector<8x128xf32> -> vector<8x128xf32>
    %361 = tpu.concatenate %343, %360 in 0 : vector<8x128xf32>, vector<8x128xf32> -> vector<16x128xf32>
    %c1_143 = arith.constant 1 : index
    %c0_144 = arith.constant 0 : index
    %c0_145 = arith.constant 0 : index
    %362 = vector.load %arg12[%c1_143, %c0_144, %c0_145] : memref<2x128x128xbf16, #tpu.memory_space<vmem>>, vector<1x128x128xbf16>
    %363 = vector.shape_cast %362 : vector<1x128x128xbf16> to vector<128x128xbf16>
    %364 = arith.truncf %361 : vector<16x128xf32> to vector<16x128xbf16>
    %cst_146 = arith.constant dense<0.000000e+00> : vector<16x128xf32>
    %365 = tpu.matmul %364, %363, %cst_146 {dimension_numbers = #tpu.dot_dimension_numbers<[1], [0], [0], [1], [0, 0, 1, 1], [], []>} : vector<16x128xbf16>, vector<128x128xbf16>, vector<16x128xf32> -> vector<16x128xf32>
    %c1_147 = arith.constant 1 : index
    %c0_148 = arith.constant 0 : index
    %366 = vector.load %arg13[%c1_147, %c0_148] : memref<2x128xf32, #tpu.memory_space<vmem>>, vector<1x128xf32>
    %367 = vector.broadcast %366 : vector<1x128xf32> to vector<16x128xf32>
    %368 = arith.addf %365, %367 : vector<16x128xf32>
    %369 = arith.addf %368, %294 : vector<16x128xf32>
    %c5 = arith.constant 5 : index
    %c0_149 = arith.constant 0 : index
    %370 = vector.load %arg5[%c5, %c0_149] : memref<6x128xf32, #tpu.memory_space<vmem>>, vector<1x128xf32>
    %c5_150 = arith.constant 5 : index
    %c0_151 = arith.constant 0 : index
    %371 = vector.load %arg6[%c5_150, %c0_151] : memref<6x128xf32, #tpu.memory_space<vmem>>, vector<1x128xf32>
    %cst_152 = arith.constant dense<0.000000e+00> : vector<16xf32>
    %372 = vector.multi_reduction <add>, %369, %cst_152 [1] : vector<16x128xf32> to vector<16xf32>
    %373 = vector.shape_cast %372 : vector<16xf32> to vector<16x1xf32>
    %cst_153 = arith.constant 1.280000e+02 : f32
    %374 = vector.broadcast %cst_153 : f32 to vector<16x1xf32>
    %375 = arith.divf %373, %374 : vector<16x1xf32>
    %376 = vector.broadcast %375 : vector<16x1xf32> to vector<16x128xf32>
    %377 = arith.subf %369, %376 : vector<16x128xf32>
    %378 = vector.broadcast %375 : vector<16x1xf32> to vector<16x128xf32>
    %379 = arith.subf %369, %378 : vector<16x128xf32>
    %380 = arith.mulf %377, %379 : vector<16x128xf32>
    %cst_154 = arith.constant dense<0.000000e+00> : vector<16xf32>
    %381 = vector.multi_reduction <add>, %380, %cst_154 [1] : vector<16x128xf32> to vector<16xf32>
    %382 = vector.shape_cast %381 : vector<16xf32> to vector<16x1xf32>
    %cst_155 = arith.constant 1.280000e+02 : f32
    %383 = vector.broadcast %cst_155 : f32 to vector<16x1xf32>
    %384 = arith.divf %382, %383 : vector<16x1xf32>
    %385 = vector.broadcast %375 : vector<16x1xf32> to vector<16x128xf32>
    %386 = arith.subf %369, %385 : vector<16x128xf32>
    %cst_156 = arith.constant 9.99999974E-6 : f32
    %387 = vector.broadcast %cst_156 : f32 to vector<16x1xf32>
    %388 = arith.addf %384, %387 : vector<16x1xf32>
    %389 = math.rsqrt %388 : vector<16x1xf32>
    %390 = vector.broadcast %389 : vector<16x1xf32> to vector<16x128xf32>
    %391 = arith.mulf %386, %390 : vector<16x128xf32>
    %392 = vector.broadcast %370 : vector<1x128xf32> to vector<16x128xf32>
    %393 = arith.mulf %391, %392 : vector<16x128xf32>
    %394 = vector.broadcast %371 : vector<1x128xf32> to vector<16x128xf32>
    %395 = arith.addf %393, %394 : vector<16x128xf32>
    %c1_157 = arith.constant 1 : index
    %c0_158 = arith.constant 0 : index
    %c0_159 = arith.constant 0 : index
    %396 = vector.load %arg14[%c1_157, %c0_158, %c0_159] : memref<2x128x512xbf16, #tpu.memory_space<vmem>>, vector<1x128x512xbf16>
    %397 = vector.shape_cast %396 : vector<1x128x512xbf16> to vector<128x512xbf16>
    %398 = arith.truncf %395 : vector<16x128xf32> to vector<16x128xbf16>
    %cst_160 = arith.constant dense<0.000000e+00> : vector<16x512xf32>
    %399 = tpu.matmul %398, %397, %cst_160 {dimension_numbers = #tpu.dot_dimension_numbers<[1], [0], [0], [1], [0, 0, 1, 1], [], []>} : vector<16x128xbf16>, vector<128x512xbf16>, vector<16x512xf32> -> vector<16x512xf32>
    %c1_161 = arith.constant 1 : index
    %c0_162 = arith.constant 0 : index
    %400 = vector.load %arg15[%c1_161, %c0_162] : memref<2x512xf32, #tpu.memory_space<vmem>>, vector<1x512xf32>
    %401 = vector.broadcast %400 : vector<1x512xf32> to vector<16x512xf32>
    %402 = arith.addf %399, %401 : vector<16x512xf32>
    %403 = arith.mulf %402, %402 : vector<16x512xf32>
    %404 = arith.mulf %402, %403 : vector<16x512xf32>
    %cst_163 = arith.constant 4.471500e-02 : f32
    %405 = vector.broadcast %cst_163 : f32 to vector<16x512xf32>
    %406 = arith.mulf %405, %404 : vector<16x512xf32>
    %407 = arith.addf %402, %406 : vector<16x512xf32>
    %cst_164 = arith.constant 0.797884583 : f32
    %408 = vector.broadcast %cst_164 : f32 to vector<16x512xf32>
    %409 = arith.mulf %408, %407 : vector<16x512xf32>
    %410 = math.tanh %409 : vector<16x512xf32>
    %cst_165 = arith.constant 1.000000e+00 : f32
    %411 = vector.broadcast %cst_165 : f32 to vector<16x512xf32>
    %412 = arith.addf %411, %410 : vector<16x512xf32>
    %cst_166 = arith.constant 5.000000e-01 : f32
    %413 = vector.broadcast %cst_166 : f32 to vector<16x512xf32>
    %414 = arith.mulf %413, %412 : vector<16x512xf32>
    %415 = arith.mulf %402, %414 : vector<16x512xf32>
    %c1_167 = arith.constant 1 : index
    %c0_168 = arith.constant 0 : index
    %c0_169 = arith.constant 0 : index
    %416 = vector.load %arg16[%c1_167, %c0_168, %c0_169] : memref<2x512x128xbf16, #tpu.memory_space<vmem>>, vector<1x512x128xbf16>
    %417 = vector.shape_cast %416 : vector<1x512x128xbf16> to vector<512x128xbf16>
    %418 = arith.truncf %415 : vector<16x512xf32> to vector<16x512xbf16>
    %cst_170 = arith.constant dense<0.000000e+00> : vector<16x128xf32>
    %419 = tpu.matmul %418, %417, %cst_170 {dimension_numbers = #tpu.dot_dimension_numbers<[1], [0], [0], [1], [0, 0, 1, 1], [], []>} : vector<16x512xbf16>, vector<512x128xbf16>, vector<16x128xf32> -> vector<16x128xf32>
    %c1_171 = arith.constant 1 : index
    %c0_172 = arith.constant 0 : index
    %420 = vector.load %arg17[%c1_171, %c0_172] : memref<2x128xf32, #tpu.memory_space<vmem>>, vector<1x128xf32>
    %421 = vector.broadcast %420 : vector<1x128xf32> to vector<16x128xf32>
    %422 = arith.addf %419, %421 : vector<16x128xf32>
    %423 = arith.addf %422, %369 : vector<16x128xf32>
    %c0_173 = arith.constant 0 : index
    %c0_174 = arith.constant 0 : index
    %424 = vector.load %arg18[%c0_173, %c0_174] : memref<1x128xf32, #tpu.memory_space<vmem>>, vector<1x128xf32>
    %c0_175 = arith.constant 0 : index
    %c0_176 = arith.constant 0 : index
    %425 = vector.load %arg19[%c0_175, %c0_176] : memref<1x128xf32, #tpu.memory_space<vmem>>, vector<1x128xf32>
    %cst_177 = arith.constant dense<0.000000e+00> : vector<16xf32>
    %426 = vector.multi_reduction <add>, %423, %cst_177 [1] : vector<16x128xf32> to vector<16xf32>
    %427 = vector.shape_cast %426 : vector<16xf32> to vector<16x1xf32>
    %cst_178 = arith.constant 1.280000e+02 : f32
    %428 = vector.broadcast %cst_178 : f32 to vector<16x1xf32>
    %429 = arith.divf %427, %428 : vector<16x1xf32>
    %430 = vector.broadcast %429 : vector<16x1xf32> to vector<16x128xf32>
    %431 = arith.subf %423, %430 : vector<16x128xf32>
    %432 = vector.broadcast %429 : vector<16x1xf32> to vector<16x128xf32>
    %433 = arith.subf %423, %432 : vector<16x128xf32>
    %434 = arith.mulf %431, %433 : vector<16x128xf32>
    %cst_179 = arith.constant dense<0.000000e+00> : vector<16xf32>
    %435 = vector.multi_reduction <add>, %434, %cst_179 [1] : vector<16x128xf32> to vector<16xf32>
    %436 = vector.shape_cast %435 : vector<16xf32> to vector<16x1xf32>
    %cst_180 = arith.constant 1.280000e+02 : f32
    %437 = vector.broadcast %cst_180 : f32 to vector<16x1xf32>
    %438 = arith.divf %436, %437 : vector<16x1xf32>
    %439 = vector.broadcast %429 : vector<16x1xf32> to vector<16x128xf32>
    %440 = arith.subf %423, %439 : vector<16x128xf32>
    %cst_181 = arith.constant 9.99999974E-6 : f32
    %441 = vector.broadcast %cst_181 : f32 to vector<16x1xf32>
    %442 = arith.addf %438, %441 : vector<16x1xf32>
    %443 = math.rsqrt %442 : vector<16x1xf32>
    %444 = vector.broadcast %443 : vector<16x1xf32> to vector<16x128xf32>
    %445 = arith.mulf %440, %444 : vector<16x128xf32>
    %446 = vector.broadcast %424 : vector<1x128xf32> to vector<16x128xf32>
    %447 = arith.mulf %445, %446 : vector<16x128xf32>
    %448 = vector.broadcast %425 : vector<1x128xf32> to vector<16x128xf32>
    %449 = arith.addf %447, %448 : vector<16x128xf32>
    %c0_182 = arith.constant 0 : index
    %c0_183 = arith.constant 0 : index
    %450 = vector.load %arg20[%c0_182, %c0_183] : memref<128x128xbf16, #tpu.memory_space<vmem>>, vector<128x128xbf16>
    %451 = arith.truncf %449 : vector<16x128xf32> to vector<16x128xbf16>
    %cst_184 = arith.constant dense<0.000000e+00> : vector<16x128xf32>
    %452 = tpu.matmul %451, %450, %cst_184 {dimension_numbers = #tpu.dot_dimension_numbers<[1], [0], [0], [1], [0, 0, 1, 1], [], []>} : vector<16x128xbf16>, vector<128x128xbf16>, vector<16x128xf32> -> vector<16x128xf32>
    %453 = arith.addf %12, %452 : vector<16x128xf32>
    %454 = arith.addf %453, %11 : vector<16x128xf32>
    %c0_185 = arith.constant 0 : index
    %c0_186 = arith.constant 0 : index
    %455 = vector.load %arg5[%c0_185, %c0_186] : memref<6x128xf32, #tpu.memory_space<vmem>>, vector<1x128xf32>
    %c0_187 = arith.constant 0 : index
    %c0_188 = arith.constant 0 : index
    %456 = vector.load %arg6[%c0_187, %c0_188] : memref<6x128xf32, #tpu.memory_space<vmem>>, vector<1x128xf32>
    %cst_189 = arith.constant dense<0.000000e+00> : vector<16xf32>
    %457 = vector.multi_reduction <add>, %454, %cst_189 [1] : vector<16x128xf32> to vector<16xf32>
    %458 = vector.shape_cast %457 : vector<16xf32> to vector<16x1xf32>
    %cst_190 = arith.constant 1.280000e+02 : f32
    %459 = vector.broadcast %cst_190 : f32 to vector<16x1xf32>
    %460 = arith.divf %458, %459 : vector<16x1xf32>
    %461 = vector.broadcast %460 : vector<16x1xf32> to vector<16x128xf32>
    %462 = arith.subf %454, %461 : vector<16x128xf32>
    %463 = vector.broadcast %460 : vector<16x1xf32> to vector<16x128xf32>
    %464 = arith.subf %454, %463 : vector<16x128xf32>
    %465 = arith.mulf %462, %464 : vector<16x128xf32>
    %cst_191 = arith.constant dense<0.000000e+00> : vector<16xf32>
    %466 = vector.multi_reduction <add>, %465, %cst_191 [1] : vector<16x128xf32> to vector<16xf32>
    %467 = vector.shape_cast %466 : vector<16xf32> to vector<16x1xf32>
    %cst_192 = arith.constant 1.280000e+02 : f32
    %468 = vector.broadcast %cst_192 : f32 to vector<16x1xf32>
    %469 = arith.divf %467, %468 : vector<16x1xf32>
    %470 = vector.broadcast %460 : vector<16x1xf32> to vector<16x128xf32>
    %471 = arith.subf %454, %470 : vector<16x128xf32>
    %cst_193 = arith.constant 9.99999974E-6 : f32
    %472 = vector.broadcast %cst_193 : f32 to vector<16x1xf32>
    %473 = arith.addf %469, %472 : vector<16x1xf32>
    %474 = math.rsqrt %473 : vector<16x1xf32>
    %475 = vector.broadcast %474 : vector<16x1xf32> to vector<16x128xf32>
    %476 = arith.mulf %471, %475 : vector<16x128xf32>
    %477 = vector.broadcast %455 : vector<1x128xf32> to vector<16x128xf32>
    %478 = arith.mulf %476, %477 : vector<16x128xf32>
    %479 = vector.broadcast %456 : vector<1x128xf32> to vector<16x128xf32>
    %480 = arith.addf %478, %479 : vector<16x128xf32>
    %c0_194 = arith.constant 0 : index
    %c0_195 = arith.constant 0 : index
    %c0_196 = arith.constant 0 : index
    %481 = vector.load %arg7[%c0_194, %c0_195, %c0_196] : memref<2x128x384xbf16, #tpu.memory_space<vmem>>, vector<1x128x384xbf16>
    %482 = vector.shape_cast %481 : vector<1x128x384xbf16> to vector<128x384xbf16>
    %483 = arith.truncf %480 : vector<16x128xf32> to vector<16x128xbf16>
    %cst_197 = arith.constant dense<0.000000e+00> : vector<16x384xf32>
    %484 = tpu.matmul %483, %482, %cst_197 {dimension_numbers = #tpu.dot_dimension_numbers<[1], [0], [0], [1], [0, 0, 1, 1], [], []>} : vector<16x128xbf16>, vector<128x384xbf16>, vector<16x384xf32> -> vector<16x384xf32>
    %485 = vector.extract_strided_slice %484 {offsets = [0, 0], sizes = [16, 128], strides = [1, 1]} : vector<16x384xf32> to vector<16x128xf32>
    %486 = vector.extract_strided_slice %484 {offsets = [0, 128], sizes = [16, 128], strides = [1, 1]} : vector<16x384xf32> to vector<16x128xf32>
    %487 = vector.extract_strided_slice %484 {offsets = [0, 256], sizes = [16, 128], strides = [1, 1]} : vector<16x384xf32> to vector<16x128xf32>
    %488 = vector.extract_strided_slice %485 {offsets = [0, 0], sizes = [8, 128], strides = [1, 1]} : vector<16x128xf32> to vector<8x128xf32>
    %489 = vector.extract_strided_slice %486 {offsets = [0, 0], sizes = [8, 128], strides = [1, 1]} : vector<16x128xf32> to vector<8x128xf32>
    %490 = vector.extract_strided_slice %487 {offsets = [0, 0], sizes = [8, 128], strides = [1, 1]} : vector<16x128xf32> to vector<8x128xf32>
    %cst_198 = arith.constant dense<0.000000e+00> : vector<8x8xf32>
    %491 = tpu.matmul %488, %489, %cst_198 {dimension_numbers = #tpu.dot_dimension_numbers<[1], [1], [0], [0], [0, 0, 1, 0], [], []>} : vector<8x128xf32>, vector<8x128xf32>, vector<8x8xf32> -> vector<8x8xf32>
    %cst_199 = arith.constant 0.0883883461 : f32
    %492 = vector.broadcast %cst_199 : f32 to vector<8x8xf32>
    %493 = arith.mulf %491, %492 : vector<8x8xf32>
    %cst_200 = arith.constant dense<0xFF800000> : vector<8xf32>
    %494 = vector.multi_reduction <maximumf>, %493, %cst_200 [1] : vector<8x8xf32> to vector<8xf32>
    %495 = vector.shape_cast %494 : vector<8xf32> to vector<8x1xf32>
    %496 = vector.broadcast %495 : vector<8x1xf32> to vector<8x8xf32>
    %497 = arith.subf %493, %496 : vector<8x8xf32>
    %498 = math.exp %497 : vector<8x8xf32>
    %cst_201 = arith.constant dense<0.000000e+00> : vector<8xf32>
    %499 = vector.multi_reduction <add>, %498, %cst_201 [1] : vector<8x8xf32> to vector<8xf32>
    %500 = vector.shape_cast %499 : vector<8xf32> to vector<8x1xf32>
    %501 = tpu.reciprocal %500 {approx = true} : vector<8x1xf32> -> vector<8x1xf32>
    %502 = vector.broadcast %501 : vector<8x1xf32> to vector<8x8xf32>
    %503 = arith.mulf %498, %502 : vector<8x8xf32>
    %cst_202 = arith.constant dense<0.000000e+00> : vector<8x128xf32>
    %504 = tpu.matmul %503, %490, %cst_202 {dimension_numbers = #tpu.dot_dimension_numbers<[1], [0], [0], [1], [0, 0, 1, 1], [], []>} : vector<8x8xf32>, vector<8x128xf32>, vector<8x128xf32> -> vector<8x128xf32>
    %505 = vector.extract_strided_slice %485 {offsets = [8, 0], sizes = [8, 128], strides = [1, 1]} : vector<16x128xf32> to vector<8x128xf32>
    %506 = vector.extract_strided_slice %486 {offsets = [8, 0], sizes = [8, 128], strides = [1, 1]} : vector<16x128xf32> to vector<8x128xf32>
    %507 = vector.extract_strided_slice %487 {offsets = [8, 0], sizes = [8, 128], strides = [1, 1]} : vector<16x128xf32> to vector<8x128xf32>
    %cst_203 = arith.constant dense<0.000000e+00> : vector<8x8xf32>
    %508 = tpu.matmul %505, %506, %cst_203 {dimension_numbers = #tpu.dot_dimension_numbers<[1], [1], [0], [0], [0, 0, 1, 0], [], []>} : vector<8x128xf32>, vector<8x128xf32>, vector<8x8xf32> -> vector<8x8xf32>
    %cst_204 = arith.constant 0.0883883461 : f32
    %509 = vector.broadcast %cst_204 : f32 to vector<8x8xf32>
    %510 = arith.mulf %508, %509 : vector<8x8xf32>
    %cst_205 = arith.constant dense<0xFF800000> : vector<8xf32>
    %511 = vector.multi_reduction <maximumf>, %510, %cst_205 [1] : vector<8x8xf32> to vector<8xf32>
    %512 = vector.shape_cast %511 : vector<8xf32> to vector<8x1xf32>
    %513 = vector.broadcast %512 : vector<8x1xf32> to vector<8x8xf32>
    %514 = arith.subf %510, %513 : vector<8x8xf32>
    %515 = math.exp %514 : vector<8x8xf32>
    %cst_206 = arith.constant dense<0.000000e+00> : vector<8xf32>
    %516 = vector.multi_reduction <add>, %515, %cst_206 [1] : vector<8x8xf32> to vector<8xf32>
    %517 = vector.shape_cast %516 : vector<8xf32> to vector<8x1xf32>
    %518 = tpu.reciprocal %517 {approx = true} : vector<8x1xf32> -> vector<8x1xf32>
    %519 = vector.broadcast %518 : vector<8x1xf32> to vector<8x8xf32>
    %520 = arith.mulf %515, %519 : vector<8x8xf32>
    %cst_207 = arith.constant dense<0.000000e+00> : vector<8x128xf32>
    %521 = tpu.matmul %520, %507, %cst_207 {dimension_numbers = #tpu.dot_dimension_numbers<[1], [0], [0], [1], [0, 0, 1, 1], [], []>} : vector<8x8xf32>, vector<8x128xf32>, vector<8x128xf32> -> vector<8x128xf32>
    %522 = tpu.concatenate %504, %521 in 0 : vector<8x128xf32>, vector<8x128xf32> -> vector<16x128xf32>
    %c0_208 = arith.constant 0 : index
    %c0_209 = arith.constant 0 : index
    %c0_210 = arith.constant 0 : index
    %523 = vector.load %arg8[%c0_208, %c0_209, %c0_210] : memref<2x128x128xbf16, #tpu.memory_space<vmem>>, vector<1x128x128xbf16>
    %524 = vector.shape_cast %523 : vector<1x128x128xbf16> to vector<128x128xbf16>
    %525 = arith.truncf %522 : vector<16x128xf32> to vector<16x128xbf16>
    %cst_211 = arith.constant dense<0.000000e+00> : vector<16x128xf32>
    %526 = tpu.matmul %525, %524, %cst_211 {dimension_numbers = #tpu.dot_dimension_numbers<[1], [0], [0], [1], [0, 0, 1, 1], [], []>} : vector<16x128xbf16>, vector<128x128xbf16>, vector<16x128xf32> -> vector<16x128xf32>
    %c0_212 = arith.constant 0 : index
    %c0_213 = arith.constant 0 : index
    %527 = vector.load %arg9[%c0_212, %c0_213] : memref<2x128xf32, #tpu.memory_space<vmem>>, vector<1x128xf32>
    %528 = vector.broadcast %527 : vector<1x128xf32> to vector<16x128xf32>
    %529 = arith.addf %526, %528 : vector<16x128xf32>
    %530 = arith.addf %529, %454 : vector<16x128xf32>
    %c1_214 = arith.constant 1 : index
    %c0_215 = arith.constant 0 : index
    %531 = vector.load %arg5[%c1_214, %c0_215] : memref<6x128xf32, #tpu.memory_space<vmem>>, vector<1x128xf32>
    %c1_216 = arith.constant 1 : index
    %c0_217 = arith.constant 0 : index
    %532 = vector.load %arg6[%c1_216, %c0_217] : memref<6x128xf32, #tpu.memory_space<vmem>>, vector<1x128xf32>
    %cst_218 = arith.constant dense<0.000000e+00> : vector<16xf32>
    %533 = vector.multi_reduction <add>, %530, %cst_218 [1] : vector<16x128xf32> to vector<16xf32>
    %534 = vector.shape_cast %533 : vector<16xf32> to vector<16x1xf32>
    %cst_219 = arith.constant 1.280000e+02 : f32
    %535 = vector.broadcast %cst_219 : f32 to vector<16x1xf32>
    %536 = arith.divf %534, %535 : vector<16x1xf32>
    %537 = vector.broadcast %536 : vector<16x1xf32> to vector<16x128xf32>
    %538 = arith.subf %530, %537 : vector<16x128xf32>
    %539 = vector.broadcast %536 : vector<16x1xf32> to vector<16x128xf32>
    %540 = arith.subf %530, %539 : vector<16x128xf32>
    %541 = arith.mulf %538, %540 : vector<16x128xf32>
    %cst_220 = arith.constant dense<0.000000e+00> : vector<16xf32>
    %542 = vector.multi_reduction <add>, %541, %cst_220 [1] : vector<16x128xf32> to vector<16xf32>
    %543 = vector.shape_cast %542 : vector<16xf32> to vector<16x1xf32>
    %cst_221 = arith.constant 1.280000e+02 : f32
    %544 = vector.broadcast %cst_221 : f32 to vector<16x1xf32>
    %545 = arith.divf %543, %544 : vector<16x1xf32>
    %546 = vector.broadcast %536 : vector<16x1xf32> to vector<16x128xf32>
    %547 = arith.subf %530, %546 : vector<16x128xf32>
    %cst_222 = arith.constant 9.99999974E-6 : f32
    %548 = vector.broadcast %cst_222 : f32 to vector<16x1xf32>
    %549 = arith.addf %545, %548 : vector<16x1xf32>
    %550 = math.rsqrt %549 : vector<16x1xf32>
    %551 = vector.broadcast %550 : vector<16x1xf32> to vector<16x128xf32>
    %552 = arith.mulf %547, %551 : vector<16x128xf32>
    %553 = vector.broadcast %531 : vector<1x128xf32> to vector<16x128xf32>
    %554 = arith.mulf %552, %553 : vector<16x128xf32>
    %555 = vector.broadcast %532 : vector<1x128xf32> to vector<16x128xf32>
    %556 = arith.addf %554, %555 : vector<16x128xf32>
    %c0_223 = arith.constant 0 : index
    %c0_224 = arith.constant 0 : index
    %c0_225 = arith.constant 0 : index
    %557 = vector.load %arg10[%c0_223, %c0_224, %c0_225] : memref<2x128x128xbf16, #tpu.memory_space<vmem>>, vector<1x128x128xbf16>
    %558 = vector.shape_cast %557 : vector<1x128x128xbf16> to vector<128x128xbf16>
    %559 = arith.truncf %556 : vector<16x128xf32> to vector<16x128xbf16>
    %cst_226 = arith.constant dense<0.000000e+00> : vector<16x128xf32>
    %560 = tpu.matmul %559, %558, %cst_226 {dimension_numbers = #tpu.dot_dimension_numbers<[1], [0], [0], [1], [0, 0, 1, 1], [], []>} : vector<16x128xbf16>, vector<128x128xbf16>, vector<16x128xf32> -> vector<16x128xf32>
    %561 = vector.extract_strided_slice %9 {offsets = [0, 0], sizes = [8, 128], strides = [1, 1]} : vector<8x512xf32> to vector<8x128xf32>
    %562 = vector.extract_strided_slice %9 {offsets = [0, 128], sizes = [8, 128], strides = [1, 1]} : vector<8x512xf32> to vector<8x128xf32>
    %563 = vector.extract_strided_slice %560 {offsets = [0, 0], sizes = [8, 128], strides = [1, 1]} : vector<16x128xf32> to vector<8x128xf32>
    %564 = vector.extract_strided_slice %561 {offsets = [0, 0], sizes = [4, 128], strides = [1, 1]} : vector<8x128xf32> to vector<4x128xf32>
    %565 = vector.extract_strided_slice %562 {offsets = [0, 0], sizes = [4, 128], strides = [1, 1]} : vector<8x128xf32> to vector<4x128xf32>
    %cst_227 = arith.constant dense<0.000000e+00> : vector<8x4xf32>
    %566 = tpu.matmul %563, %564, %cst_227 {dimension_numbers = #tpu.dot_dimension_numbers<[1], [1], [0], [0], [0, 0, 1, 0], [], []>} : vector<8x128xf32>, vector<4x128xf32>, vector<8x4xf32> -> vector<8x4xf32>
    %cst_228 = arith.constant 0.0883883461 : f32
    %567 = vector.broadcast %cst_228 : f32 to vector<8x4xf32>
    %568 = arith.mulf %566, %567 : vector<8x4xf32>
    %cst_229 = arith.constant dense<0xFF800000> : vector<8xf32>
    %569 = vector.multi_reduction <maximumf>, %568, %cst_229 [1] : vector<8x4xf32> to vector<8xf32>
    %570 = vector.shape_cast %569 : vector<8xf32> to vector<8x1xf32>
    %571 = vector.broadcast %570 : vector<8x1xf32> to vector<8x4xf32>
    %572 = arith.subf %568, %571 : vector<8x4xf32>
    %573 = math.exp %572 : vector<8x4xf32>
    %cst_230 = arith.constant dense<0.000000e+00> : vector<8xf32>
    %574 = vector.multi_reduction <add>, %573, %cst_230 [1] : vector<8x4xf32> to vector<8xf32>
    %575 = vector.shape_cast %574 : vector<8xf32> to vector<8x1xf32>
    %576 = tpu.reciprocal %575 {approx = true} : vector<8x1xf32> -> vector<8x1xf32>
    %577 = vector.broadcast %576 : vector<8x1xf32> to vector<8x4xf32>
    %578 = arith.mulf %573, %577 : vector<8x4xf32>
    %cst_231 = arith.constant dense<0.000000e+00> : vector<8x128xf32>
    %579 = tpu.matmul %578, %565, %cst_231 {dimension_numbers = #tpu.dot_dimension_numbers<[1], [0], [0], [1], [0, 0, 1, 1], [], []>} : vector<8x4xf32>, vector<4x128xf32>, vector<8x128xf32> -> vector<8x128xf32>
    %580 = vector.extract_strided_slice %560 {offsets = [8, 0], sizes = [8, 128], strides = [1, 1]} : vector<16x128xf32> to vector<8x128xf32>
    %581 = vector.extract_strided_slice %561 {offsets = [4, 0], sizes = [4, 128], strides = [1, 1]} : vector<8x128xf32> to vector<4x128xf32>
    %582 = vector.extract_strided_slice %562 {offsets = [4, 0], sizes = [4, 128], strides = [1, 1]} : vector<8x128xf32> to vector<4x128xf32>
    %cst_232 = arith.constant dense<0.000000e+00> : vector<8x4xf32>
    %583 = tpu.matmul %580, %581, %cst_232 {dimension_numbers = #tpu.dot_dimension_numbers<[1], [1], [0], [0], [0, 0, 1, 0], [], []>} : vector<8x128xf32>, vector<4x128xf32>, vector<8x4xf32> -> vector<8x4xf32>
    %cst_233 = arith.constant 0.0883883461 : f32
    %584 = vector.broadcast %cst_233 : f32 to vector<8x4xf32>
    %585 = arith.mulf %583, %584 : vector<8x4xf32>
    %cst_234 = arith.constant dense<0xFF800000> : vector<8xf32>
    %586 = vector.multi_reduction <maximumf>, %585, %cst_234 [1] : vector<8x4xf32> to vector<8xf32>
    %587 = vector.shape_cast %586 : vector<8xf32> to vector<8x1xf32>
    %588 = vector.broadcast %587 : vector<8x1xf32> to vector<8x4xf32>
    %589 = arith.subf %585, %588 : vector<8x4xf32>
    %590 = math.exp %589 : vector<8x4xf32>
    %cst_235 = arith.constant dense<0.000000e+00> : vector<8xf32>
    %591 = vector.multi_reduction <add>, %590, %cst_235 [1] : vector<8x4xf32> to vector<8xf32>
    %592 = vector.shape_cast %591 : vector<8xf32> to vector<8x1xf32>
    %593 = tpu.reciprocal %592 {approx = true} : vector<8x1xf32> -> vector<8x1xf32>
    %594 = vector.broadcast %593 : vector<8x1xf32> to vector<8x4xf32>
    %595 = arith.mulf %590, %594 : vector<8x4xf32>
    %cst_236 = arith.constant dense<0.000000e+00> : vector<8x128xf32>
    %596 = tpu.matmul %595, %582, %cst_236 {dimension_numbers = #tpu.dot_dimension_numbers<[1], [0], [0], [1], [0, 0, 1, 1], [], []>} : vector<8x4xf32>, vector<4x128xf32>, vector<8x128xf32> -> vector<8x128xf32>
    %597 = tpu.concatenate %579, %596 in 0 : vector<8x128xf32>, vector<8x128xf32> -> vector<16x128xf32>
    %c0_237 = arith.constant 0 : index
    %c0_238 = arith.constant 0 : index
    %c0_239 = arith.constant 0 : index
    %598 = vector.load %arg12[%c0_237, %c0_238, %c0_239] : memref<2x128x128xbf16, #tpu.memory_space<vmem>>, vector<1x128x128xbf16>
    %599 = vector.shape_cast %598 : vector<1x128x128xbf16> to vector<128x128xbf16>
    %600 = arith.truncf %597 : vector<16x128xf32> to vector<16x128xbf16>
    %cst_240 = arith.constant dense<0.000000e+00> : vector<16x128xf32>
    %601 = tpu.matmul %600, %599, %cst_240 {dimension_numbers = #tpu.dot_dimension_numbers<[1], [0], [0], [1], [0, 0, 1, 1], [], []>} : vector<16x128xbf16>, vector<128x128xbf16>, vector<16x128xf32> -> vector<16x128xf32>
    %c0_241 = arith.constant 0 : index
    %c0_242 = arith.constant 0 : index
    %602 = vector.load %arg13[%c0_241, %c0_242] : memref<2x128xf32, #tpu.memory_space<vmem>>, vector<1x128xf32>
    %603 = vector.broadcast %602 : vector<1x128xf32> to vector<16x128xf32>
    %604 = arith.addf %601, %603 : vector<16x128xf32>
    %605 = arith.addf %604, %530 : vector<16x128xf32>
    %c2_243 = arith.constant 2 : index
    %c0_244 = arith.constant 0 : index
    %606 = vector.load %arg5[%c2_243, %c0_244] : memref<6x128xf32, #tpu.memory_space<vmem>>, vector<1x128xf32>
    %c2_245 = arith.constant 2 : index
    %c0_246 = arith.constant 0 : index
    %607 = vector.load %arg6[%c2_245, %c0_246] : memref<6x128xf32, #tpu.memory_space<vmem>>, vector<1x128xf32>
    %cst_247 = arith.constant dense<0.000000e+00> : vector<16xf32>
    %608 = vector.multi_reduction <add>, %605, %cst_247 [1] : vector<16x128xf32> to vector<16xf32>
    %609 = vector.shape_cast %608 : vector<16xf32> to vector<16x1xf32>
    %cst_248 = arith.constant 1.280000e+02 : f32
    %610 = vector.broadcast %cst_248 : f32 to vector<16x1xf32>
    %611 = arith.divf %609, %610 : vector<16x1xf32>
    %612 = vector.broadcast %611 : vector<16x1xf32> to vector<16x128xf32>
    %613 = arith.subf %605, %612 : vector<16x128xf32>
    %614 = vector.broadcast %611 : vector<16x1xf32> to vector<16x128xf32>
    %615 = arith.subf %605, %614 : vector<16x128xf32>
    %616 = arith.mulf %613, %615 : vector<16x128xf32>
    %cst_249 = arith.constant dense<0.000000e+00> : vector<16xf32>
    %617 = vector.multi_reduction <add>, %616, %cst_249 [1] : vector<16x128xf32> to vector<16xf32>
    %618 = vector.shape_cast %617 : vector<16xf32> to vector<16x1xf32>
    %cst_250 = arith.constant 1.280000e+02 : f32
    %619 = vector.broadcast %cst_250 : f32 to vector<16x1xf32>
    %620 = arith.divf %618, %619 : vector<16x1xf32>
    %621 = vector.broadcast %611 : vector<16x1xf32> to vector<16x128xf32>
    %622 = arith.subf %605, %621 : vector<16x128xf32>
    %cst_251 = arith.constant 9.99999974E-6 : f32
    %623 = vector.broadcast %cst_251 : f32 to vector<16x1xf32>
    %624 = arith.addf %620, %623 : vector<16x1xf32>
    %625 = math.rsqrt %624 : vector<16x1xf32>
    %626 = vector.broadcast %625 : vector<16x1xf32> to vector<16x128xf32>
    %627 = arith.mulf %622, %626 : vector<16x128xf32>
    %628 = vector.broadcast %606 : vector<1x128xf32> to vector<16x128xf32>
    %629 = arith.mulf %627, %628 : vector<16x128xf32>
    %630 = vector.broadcast %607 : vector<1x128xf32> to vector<16x128xf32>
    %631 = arith.addf %629, %630 : vector<16x128xf32>
    %c0_252 = arith.constant 0 : index
    %c0_253 = arith.constant 0 : index
    %c0_254 = arith.constant 0 : index
    %632 = vector.load %arg14[%c0_252, %c0_253, %c0_254] : memref<2x128x512xbf16, #tpu.memory_space<vmem>>, vector<1x128x512xbf16>
    %633 = vector.shape_cast %632 : vector<1x128x512xbf16> to vector<128x512xbf16>
    %634 = arith.truncf %631 : vector<16x128xf32> to vector<16x128xbf16>
    %cst_255 = arith.constant dense<0.000000e+00> : vector<16x512xf32>
    %635 = tpu.matmul %634, %633, %cst_255 {dimension_numbers = #tpu.dot_dimension_numbers<[1], [0], [0], [1], [0, 0, 1, 1], [], []>} : vector<16x128xbf16>, vector<128x512xbf16>, vector<16x512xf32> -> vector<16x512xf32>
    %c0_256 = arith.constant 0 : index
    %c0_257 = arith.constant 0 : index
    %636 = vector.load %arg15[%c0_256, %c0_257] : memref<2x512xf32, #tpu.memory_space<vmem>>, vector<1x512xf32>
    %637 = vector.broadcast %636 : vector<1x512xf32> to vector<16x512xf32>
    %638 = arith.addf %635, %637 : vector<16x512xf32>
    %639 = arith.mulf %638, %638 : vector<16x512xf32>
    %640 = arith.mulf %638, %639 : vector<16x512xf32>
    %cst_258 = arith.constant 4.471500e-02 : f32
    %641 = vector.broadcast %cst_258 : f32 to vector<16x512xf32>
    %642 = arith.mulf %641, %640 : vector<16x512xf32>
    %643 = arith.addf %638, %642 : vector<16x512xf32>
    %cst_259 = arith.constant 0.797884583 : f32
    %644 = vector.broadcast %cst_259 : f32 to vector<16x512xf32>
    %645 = arith.mulf %644, %643 : vector<16x512xf32>
    %646 = math.tanh %645 : vector<16x512xf32>
    %cst_260 = arith.constant 1.000000e+00 : f32
    %647 = vector.broadcast %cst_260 : f32 to vector<16x512xf32>
    %648 = arith.addf %647, %646 : vector<16x512xf32>
    %cst_261 = arith.constant 5.000000e-01 : f32
    %649 = vector.broadcast %cst_261 : f32 to vector<16x512xf32>
    %650 = arith.mulf %649, %648 : vector<16x512xf32>
    %651 = arith.mulf %638, %650 : vector<16x512xf32>
    %c0_262 = arith.constant 0 : index
    %c0_263 = arith.constant 0 : index
    %c0_264 = arith.constant 0 : index
    %652 = vector.load %arg16[%c0_262, %c0_263, %c0_264] : memref<2x512x128xbf16, #tpu.memory_space<vmem>>, vector<1x512x128xbf16>
    %653 = vector.shape_cast %652 : vector<1x512x128xbf16> to vector<512x128xbf16>
    %654 = arith.truncf %651 : vector<16x512xf32> to vector<16x512xbf16>
    %cst_265 = arith.constant dense<0.000000e+00> : vector<16x128xf32>
    %655 = tpu.matmul %654, %653, %cst_265 {dimension_numbers = #tpu.dot_dimension_numbers<[1], [0], [0], [1], [0, 0, 1, 1], [], []>} : vector<16x512xbf16>, vector<512x128xbf16>, vector<16x128xf32> -> vector<16x128xf32>
    %c0_266 = arith.constant 0 : index
    %c0_267 = arith.constant 0 : index
    %656 = vector.load %arg17[%c0_266, %c0_267] : memref<2x128xf32, #tpu.memory_space<vmem>>, vector<1x128xf32>
    %657 = vector.broadcast %656 : vector<1x128xf32> to vector<16x128xf32>
    %658 = arith.addf %655, %657 : vector<16x128xf32>
    %659 = arith.addf %658, %605 : vector<16x128xf32>
    %c3_268 = arith.constant 3 : index
    %c0_269 = arith.constant 0 : index
    %660 = vector.load %arg5[%c3_268, %c0_269] : memref<6x128xf32, #tpu.memory_space<vmem>>, vector<1x128xf32>
    %c3_270 = arith.constant 3 : index
    %c0_271 = arith.constant 0 : index
    %661 = vector.load %arg6[%c3_270, %c0_271] : memref<6x128xf32, #tpu.memory_space<vmem>>, vector<1x128xf32>
    %cst_272 = arith.constant dense<0.000000e+00> : vector<16xf32>
    %662 = vector.multi_reduction <add>, %659, %cst_272 [1] : vector<16x128xf32> to vector<16xf32>
    %663 = vector.shape_cast %662 : vector<16xf32> to vector<16x1xf32>
    %cst_273 = arith.constant 1.280000e+02 : f32
    %664 = vector.broadcast %cst_273 : f32 to vector<16x1xf32>
    %665 = arith.divf %663, %664 : vector<16x1xf32>
    %666 = vector.broadcast %665 : vector<16x1xf32> to vector<16x128xf32>
    %667 = arith.subf %659, %666 : vector<16x128xf32>
    %668 = vector.broadcast %665 : vector<16x1xf32> to vector<16x128xf32>
    %669 = arith.subf %659, %668 : vector<16x128xf32>
    %670 = arith.mulf %667, %669 : vector<16x128xf32>
    %cst_274 = arith.constant dense<0.000000e+00> : vector<16xf32>
    %671 = vector.multi_reduction <add>, %670, %cst_274 [1] : vector<16x128xf32> to vector<16xf32>
    %672 = vector.shape_cast %671 : vector<16xf32> to vector<16x1xf32>
    %cst_275 = arith.constant 1.280000e+02 : f32
    %673 = vector.broadcast %cst_275 : f32 to vector<16x1xf32>
    %674 = arith.divf %672, %673 : vector<16x1xf32>
    %675 = vector.broadcast %665 : vector<16x1xf32> to vector<16x128xf32>
    %676 = arith.subf %659, %675 : vector<16x128xf32>
    %cst_276 = arith.constant 9.99999974E-6 : f32
    %677 = vector.broadcast %cst_276 : f32 to vector<16x1xf32>
    %678 = arith.addf %674, %677 : vector<16x1xf32>
    %679 = math.rsqrt %678 : vector<16x1xf32>
    %680 = vector.broadcast %679 : vector<16x1xf32> to vector<16x128xf32>
    %681 = arith.mulf %676, %680 : vector<16x128xf32>
    %682 = vector.broadcast %660 : vector<1x128xf32> to vector<16x128xf32>
    %683 = arith.mulf %681, %682 : vector<16x128xf32>
    %684 = vector.broadcast %661 : vector<1x128xf32> to vector<16x128xf32>
    %685 = arith.addf %683, %684 : vector<16x128xf32>
    %c1_277 = arith.constant 1 : index
    %c0_278 = arith.constant 0 : index
    %c0_279 = arith.constant 0 : index
    %686 = vector.load %arg7[%c1_277, %c0_278, %c0_279] : memref<2x128x384xbf16, #tpu.memory_space<vmem>>, vector<1x128x384xbf16>
    %687 = vector.shape_cast %686 : vector<1x128x384xbf16> to vector<128x384xbf16>
    %688 = arith.truncf %685 : vector<16x128xf32> to vector<16x128xbf16>
    %cst_280 = arith.constant dense<0.000000e+00> : vector<16x384xf32>
    %689 = tpu.matmul %688, %687, %cst_280 {dimension_numbers = #tpu.dot_dimension_numbers<[1], [0], [0], [1], [0, 0, 1, 1], [], []>} : vector<16x128xbf16>, vector<128x384xbf16>, vector<16x384xf32> -> vector<16x384xf32>
    %690 = vector.extract_strided_slice %689 {offsets = [0, 0], sizes = [16, 128], strides = [1, 1]} : vector<16x384xf32> to vector<16x128xf32>
    %691 = vector.extract_strided_slice %689 {offsets = [0, 128], sizes = [16, 128], strides = [1, 1]} : vector<16x384xf32> to vector<16x128xf32>
    %692 = vector.extract_strided_slice %689 {offsets = [0, 256], sizes = [16, 128], strides = [1, 1]} : vector<16x384xf32> to vector<16x128xf32>
    %693 = vector.extract_strided_slice %690 {offsets = [0, 0], sizes = [8, 128], strides = [1, 1]} : vector<16x128xf32> to vector<8x128xf32>
    %694 = vector.extract_strided_slice %691 {offsets = [0, 0], sizes = [8, 128], strides = [1, 1]} : vector<16x128xf32> to vector<8x128xf32>
    %695 = vector.extract_strided_slice %692 {offsets = [0, 0], sizes = [8, 128], strides = [1, 1]} : vector<16x128xf32> to vector<8x128xf32>
    %cst_281 = arith.constant dense<0.000000e+00> : vector<8x8xf32>
    %696 = tpu.matmul %693, %694, %cst_281 {dimension_numbers = #tpu.dot_dimension_numbers<[1], [1], [0], [0], [0, 0, 1, 0], [], []>} : vector<8x128xf32>, vector<8x128xf32>, vector<8x8xf32> -> vector<8x8xf32>
    %cst_282 = arith.constant 0.0883883461 : f32
    %697 = vector.broadcast %cst_282 : f32 to vector<8x8xf32>
    %698 = arith.mulf %696, %697 : vector<8x8xf32>
    %cst_283 = arith.constant dense<0xFF800000> : vector<8xf32>
    %699 = vector.multi_reduction <maximumf>, %698, %cst_283 [1] : vector<8x8xf32> to vector<8xf32>
    %700 = vector.shape_cast %699 : vector<8xf32> to vector<8x1xf32>
    %701 = vector.broadcast %700 : vector<8x1xf32> to vector<8x8xf32>
    %702 = arith.subf %698, %701 : vector<8x8xf32>
    %703 = math.exp %702 : vector<8x8xf32>
    %cst_284 = arith.constant dense<0.000000e+00> : vector<8xf32>
    %704 = vector.multi_reduction <add>, %703, %cst_284 [1] : vector<8x8xf32> to vector<8xf32>
    %705 = vector.shape_cast %704 : vector<8xf32> to vector<8x1xf32>
    %706 = tpu.reciprocal %705 {approx = true} : vector<8x1xf32> -> vector<8x1xf32>
    %707 = vector.broadcast %706 : vector<8x1xf32> to vector<8x8xf32>
    %708 = arith.mulf %703, %707 : vector<8x8xf32>
    %cst_285 = arith.constant dense<0.000000e+00> : vector<8x128xf32>
    %709 = tpu.matmul %708, %695, %cst_285 {dimension_numbers = #tpu.dot_dimension_numbers<[1], [0], [0], [1], [0, 0, 1, 1], [], []>} : vector<8x8xf32>, vector<8x128xf32>, vector<8x128xf32> -> vector<8x128xf32>
    %710 = vector.extract_strided_slice %690 {offsets = [8, 0], sizes = [8, 128], strides = [1, 1]} : vector<16x128xf32> to vector<8x128xf32>
    %711 = vector.extract_strided_slice %691 {offsets = [8, 0], sizes = [8, 128], strides = [1, 1]} : vector<16x128xf32> to vector<8x128xf32>
    %712 = vector.extract_strided_slice %692 {offsets = [8, 0], sizes = [8, 128], strides = [1, 1]} : vector<16x128xf32> to vector<8x128xf32>
    %cst_286 = arith.constant dense<0.000000e+00> : vector<8x8xf32>
    %713 = tpu.matmul %710, %711, %cst_286 {dimension_numbers = #tpu.dot_dimension_numbers<[1], [1], [0], [0], [0, 0, 1, 0], [], []>} : vector<8x128xf32>, vector<8x128xf32>, vector<8x8xf32> -> vector<8x8xf32>
    %cst_287 = arith.constant 0.0883883461 : f32
    %714 = vector.broadcast %cst_287 : f32 to vector<8x8xf32>
    %715 = arith.mulf %713, %714 : vector<8x8xf32>
    %cst_288 = arith.constant dense<0xFF800000> : vector<8xf32>
    %716 = vector.multi_reduction <maximumf>, %715, %cst_288 [1] : vector<8x8xf32> to vector<8xf32>
    %717 = vector.shape_cast %716 : vector<8xf32> to vector<8x1xf32>
    %718 = vector.broadcast %717 : vector<8x1xf32> to vector<8x8xf32>
    %719 = arith.subf %715, %718 : vector<8x8xf32>
    %720 = math.exp %719 : vector<8x8xf32>
    %cst_289 = arith.constant dense<0.000000e+00> : vector<8xf32>
    %721 = vector.multi_reduction <add>, %720, %cst_289 [1] : vector<8x8xf32> to vector<8xf32>
    %722 = vector.shape_cast %721 : vector<8xf32> to vector<8x1xf32>
    %723 = tpu.reciprocal %722 {approx = true} : vector<8x1xf32> -> vector<8x1xf32>
    %724 = vector.broadcast %723 : vector<8x1xf32> to vector<8x8xf32>
    %725 = arith.mulf %720, %724 : vector<8x8xf32>
    %cst_290 = arith.constant dense<0.000000e+00> : vector<8x128xf32>
    %726 = tpu.matmul %725, %712, %cst_290 {dimension_numbers = #tpu.dot_dimension_numbers<[1], [0], [0], [1], [0, 0, 1, 1], [], []>} : vector<8x8xf32>, vector<8x128xf32>, vector<8x128xf32> -> vector<8x128xf32>
    %727 = tpu.concatenate %709, %726 in 0 : vector<8x128xf32>, vector<8x128xf32> -> vector<16x128xf32>
    %c1_291 = arith.constant 1 : index
    %c0_292 = arith.constant 0 : index
    %c0_293 = arith.constant 0 : index
    %728 = vector.load %arg8[%c1_291, %c0_292, %c0_293] : memref<2x128x128xbf16, #tpu.memory_space<vmem>>, vector<1x128x128xbf16>
    %729 = vector.shape_cast %728 : vector<1x128x128xbf16> to vector<128x128xbf16>
    %730 = arith.truncf %727 : vector<16x128xf32> to vector<16x128xbf16>
    %cst_294 = arith.constant dense<0.000000e+00> : vector<16x128xf32>
    %731 = tpu.matmul %730, %729, %cst_294 {dimension_numbers = #tpu.dot_dimension_numbers<[1], [0], [0], [1], [0, 0, 1, 1], [], []>} : vector<16x128xbf16>, vector<128x128xbf16>, vector<16x128xf32> -> vector<16x128xf32>
    %c1_295 = arith.constant 1 : index
    %c0_296 = arith.constant 0 : index
    %732 = vector.load %arg9[%c1_295, %c0_296] : memref<2x128xf32, #tpu.memory_space<vmem>>, vector<1x128xf32>
    %733 = vector.broadcast %732 : vector<1x128xf32> to vector<16x128xf32>
    %734 = arith.addf %731, %733 : vector<16x128xf32>
    %735 = arith.addf %734, %659 : vector<16x128xf32>
    %c4_297 = arith.constant 4 : index
    %c0_298 = arith.constant 0 : index
    %736 = vector.load %arg5[%c4_297, %c0_298] : memref<6x128xf32, #tpu.memory_space<vmem>>, vector<1x128xf32>
    %c4_299 = arith.constant 4 : index
    %c0_300 = arith.constant 0 : index
    %737 = vector.load %arg6[%c4_299, %c0_300] : memref<6x128xf32, #tpu.memory_space<vmem>>, vector<1x128xf32>
    %cst_301 = arith.constant dense<0.000000e+00> : vector<16xf32>
    %738 = vector.multi_reduction <add>, %735, %cst_301 [1] : vector<16x128xf32> to vector<16xf32>
    %739 = vector.shape_cast %738 : vector<16xf32> to vector<16x1xf32>
    %cst_302 = arith.constant 1.280000e+02 : f32
    %740 = vector.broadcast %cst_302 : f32 to vector<16x1xf32>
    %741 = arith.divf %739, %740 : vector<16x1xf32>
    %742 = vector.broadcast %741 : vector<16x1xf32> to vector<16x128xf32>
    %743 = arith.subf %735, %742 : vector<16x128xf32>
    %744 = vector.broadcast %741 : vector<16x1xf32> to vector<16x128xf32>
    %745 = arith.subf %735, %744 : vector<16x128xf32>
    %746 = arith.mulf %743, %745 : vector<16x128xf32>
    %cst_303 = arith.constant dense<0.000000e+00> : vector<16xf32>
    %747 = vector.multi_reduction <add>, %746, %cst_303 [1] : vector<16x128xf32> to vector<16xf32>
    %748 = vector.shape_cast %747 : vector<16xf32> to vector<16x1xf32>
    %cst_304 = arith.constant 1.280000e+02 : f32
    %749 = vector.broadcast %cst_304 : f32 to vector<16x1xf32>
    %750 = arith.divf %748, %749 : vector<16x1xf32>
    %751 = vector.broadcast %741 : vector<16x1xf32> to vector<16x128xf32>
    %752 = arith.subf %735, %751 : vector<16x128xf32>
    %cst_305 = arith.constant 9.99999974E-6 : f32
    %753 = vector.broadcast %cst_305 : f32 to vector<16x1xf32>
    %754 = arith.addf %750, %753 : vector<16x1xf32>
    %755 = math.rsqrt %754 : vector<16x1xf32>
    %756 = vector.broadcast %755 : vector<16x1xf32> to vector<16x128xf32>
    %757 = arith.mulf %752, %756 : vector<16x128xf32>
    %758 = vector.broadcast %736 : vector<1x128xf32> to vector<16x128xf32>
    %759 = arith.mulf %757, %758 : vector<16x128xf32>
    %760 = vector.broadcast %737 : vector<1x128xf32> to vector<16x128xf32>
    %761 = arith.addf %759, %760 : vector<16x128xf32>
    %c1_306 = arith.constant 1 : index
    %c0_307 = arith.constant 0 : index
    %c0_308 = arith.constant 0 : index
    %762 = vector.load %arg10[%c1_306, %c0_307, %c0_308] : memref<2x128x128xbf16, #tpu.memory_space<vmem>>, vector<1x128x128xbf16>
    %763 = vector.shape_cast %762 : vector<1x128x128xbf16> to vector<128x128xbf16>
    %764 = arith.truncf %761 : vector<16x128xf32> to vector<16x128xbf16>
    %cst_309 = arith.constant dense<0.000000e+00> : vector<16x128xf32>
    %765 = tpu.matmul %764, %763, %cst_309 {dimension_numbers = #tpu.dot_dimension_numbers<[1], [0], [0], [1], [0, 0, 1, 1], [], []>} : vector<16x128xbf16>, vector<128x128xbf16>, vector<16x128xf32> -> vector<16x128xf32>
    %766 = vector.extract_strided_slice %9 {offsets = [0, 256], sizes = [8, 128], strides = [1, 1]} : vector<8x512xf32> to vector<8x128xf32>
    %767 = vector.extract_strided_slice %9 {offsets = [0, 384], sizes = [8, 128], strides = [1, 1]} : vector<8x512xf32> to vector<8x128xf32>
    %768 = vector.extract_strided_slice %765 {offsets = [0, 0], sizes = [8, 128], strides = [1, 1]} : vector<16x128xf32> to vector<8x128xf32>
    %769 = vector.extract_strided_slice %766 {offsets = [0, 0], sizes = [4, 128], strides = [1, 1]} : vector<8x128xf32> to vector<4x128xf32>
    %770 = vector.extract_strided_slice %767 {offsets = [0, 0], sizes = [4, 128], strides = [1, 1]} : vector<8x128xf32> to vector<4x128xf32>
    %cst_310 = arith.constant dense<0.000000e+00> : vector<8x4xf32>
    %771 = tpu.matmul %768, %769, %cst_310 {dimension_numbers = #tpu.dot_dimension_numbers<[1], [1], [0], [0], [0, 0, 1, 0], [], []>} : vector<8x128xf32>, vector<4x128xf32>, vector<8x4xf32> -> vector<8x4xf32>
    %cst_311 = arith.constant 0.0883883461 : f32
    %772 = vector.broadcast %cst_311 : f32 to vector<8x4xf32>
    %773 = arith.mulf %771, %772 : vector<8x4xf32>
    %cst_312 = arith.constant dense<0xFF800000> : vector<8xf32>
    %774 = vector.multi_reduction <maximumf>, %773, %cst_312 [1] : vector<8x4xf32> to vector<8xf32>
    %775 = vector.shape_cast %774 : vector<8xf32> to vector<8x1xf32>
    %776 = vector.broadcast %775 : vector<8x1xf32> to vector<8x4xf32>
    %777 = arith.subf %773, %776 : vector<8x4xf32>
    %778 = math.exp %777 : vector<8x4xf32>
    %cst_313 = arith.constant dense<0.000000e+00> : vector<8xf32>
    %779 = vector.multi_reduction <add>, %778, %cst_313 [1] : vector<8x4xf32> to vector<8xf32>
    %780 = vector.shape_cast %779 : vector<8xf32> to vector<8x1xf32>
    %781 = tpu.reciprocal %780 {approx = true} : vector<8x1xf32> -> vector<8x1xf32>
    %782 = vector.broadcast %781 : vector<8x1xf32> to vector<8x4xf32>
    %783 = arith.mulf %778, %782 : vector<8x4xf32>
    %cst_314 = arith.constant dense<0.000000e+00> : vector<8x128xf32>
    %784 = tpu.matmul %783, %770, %cst_314 {dimension_numbers = #tpu.dot_dimension_numbers<[1], [0], [0], [1], [0, 0, 1, 1], [], []>} : vector<8x4xf32>, vector<4x128xf32>, vector<8x128xf32> -> vector<8x128xf32>
    %785 = vector.extract_strided_slice %765 {offsets = [8, 0], sizes = [8, 128], strides = [1, 1]} : vector<16x128xf32> to vector<8x128xf32>
    %786 = vector.extract_strided_slice %766 {offsets = [4, 0], sizes = [4, 128], strides = [1, 1]} : vector<8x128xf32> to vector<4x128xf32>
    %787 = vector.extract_strided_slice %767 {offsets = [4, 0], sizes = [4, 128], strides = [1, 1]} : vector<8x128xf32> to vector<4x128xf32>
    %cst_315 = arith.constant dense<0.000000e+00> : vector<8x4xf32>
    %788 = tpu.matmul %785, %786, %cst_315 {dimension_numbers = #tpu.dot_dimension_numbers<[1], [1], [0], [0], [0, 0, 1, 0], [], []>} : vector<8x128xf32>, vector<4x128xf32>, vector<8x4xf32> -> vector<8x4xf32>
    %cst_316 = arith.constant 0.0883883461 : f32
    %789 = vector.broadcast %cst_316 : f32 to vector<8x4xf32>
    %790 = arith.mulf %788, %789 : vector<8x4xf32>
    %cst_317 = arith.constant dense<0xFF800000> : vector<8xf32>
    %791 = vector.multi_reduction <maximumf>, %790, %cst_317 [1] : vector<8x4xf32> to vector<8xf32>
    %792 = vector.shape_cast %791 : vector<8xf32> to vector<8x1xf32>
    %793 = vector.broadcast %792 : vector<8x1xf32> to vector<8x4xf32>
    %794 = arith.subf %790, %793 : vector<8x4xf32>
    %795 = math.exp %794 : vector<8x4xf32>
    %cst_318 = arith.constant dense<0.000000e+00> : vector<8xf32>
    %796 = vector.multi_reduction <add>, %795, %cst_318 [1] : vector<8x4xf32> to vector<8xf32>
    %797 = vector.shape_cast %796 : vector<8xf32> to vector<8x1xf32>
    %798 = tpu.reciprocal %797 {approx = true} : vector<8x1xf32> -> vector<8x1xf32>
    %799 = vector.broadcast %798 : vector<8x1xf32> to vector<8x4xf32>
    %800 = arith.mulf %795, %799 : vector<8x4xf32>
    %cst_319 = arith.constant dense<0.000000e+00> : vector<8x128xf32>
    %801 = tpu.matmul %800, %787, %cst_319 {dimension_numbers = #tpu.dot_dimension_numbers<[1], [0], [0], [1], [0, 0, 1, 1], [], []>} : vector<8x4xf32>, vector<4x128xf32>, vector<8x128xf32> -> vector<8x128xf32>
    %802 = tpu.concatenate %784, %801 in 0 : vector<8x128xf32>, vector<8x128xf32> -> vector<16x128xf32>
    %c1_320 = arith.constant 1 : index
    %c0_321 = arith.constant 0 : index
    %c0_322 = arith.constant 0 : index
    %803 = vector.load %arg12[%c1_320, %c0_321, %c0_322] : memref<2x128x128xbf16, #tpu.memory_space<vmem>>, vector<1x128x128xbf16>
    %804 = vector.shape_cast %803 : vector<1x128x128xbf16> to vector<128x128xbf16>
    %805 = arith.truncf %802 : vector<16x128xf32> to vector<16x128xbf16>
    %cst_323 = arith.constant dense<0.000000e+00> : vector<16x128xf32>
    %806 = tpu.matmul %805, %804, %cst_323 {dimension_numbers = #tpu.dot_dimension_numbers<[1], [0], [0], [1], [0, 0, 1, 1], [], []>} : vector<16x128xbf16>, vector<128x128xbf16>, vector<16x128xf32> -> vector<16x128xf32>
    %c1_324 = arith.constant 1 : index
    %c0_325 = arith.constant 0 : index
    %807 = vector.load %arg13[%c1_324, %c0_325] : memref<2x128xf32, #tpu.memory_space<vmem>>, vector<1x128xf32>
    %808 = vector.broadcast %807 : vector<1x128xf32> to vector<16x128xf32>
    %809 = arith.addf %806, %808 : vector<16x128xf32>
    %810 = arith.addf %809, %735 : vector<16x128xf32>
    %c5_326 = arith.constant 5 : index
    %c0_327 = arith.constant 0 : index
    %811 = vector.load %arg5[%c5_326, %c0_327] : memref<6x128xf32, #tpu.memory_space<vmem>>, vector<1x128xf32>
    %c5_328 = arith.constant 5 : index
    %c0_329 = arith.constant 0 : index
    %812 = vector.load %arg6[%c5_328, %c0_329] : memref<6x128xf32, #tpu.memory_space<vmem>>, vector<1x128xf32>
    %cst_330 = arith.constant dense<0.000000e+00> : vector<16xf32>
    %813 = vector.multi_reduction <add>, %810, %cst_330 [1] : vector<16x128xf32> to vector<16xf32>
    %814 = vector.shape_cast %813 : vector<16xf32> to vector<16x1xf32>
    %cst_331 = arith.constant 1.280000e+02 : f32
    %815 = vector.broadcast %cst_331 : f32 to vector<16x1xf32>
    %816 = arith.divf %814, %815 : vector<16x1xf32>
    %817 = vector.broadcast %816 : vector<16x1xf32> to vector<16x128xf32>
    %818 = arith.subf %810, %817 : vector<16x128xf32>
    %819 = vector.broadcast %816 : vector<16x1xf32> to vector<16x128xf32>
    %820 = arith.subf %810, %819 : vector<16x128xf32>
    %821 = arith.mulf %818, %820 : vector<16x128xf32>
    %cst_332 = arith.constant dense<0.000000e+00> : vector<16xf32>
    %822 = vector.multi_reduction <add>, %821, %cst_332 [1] : vector<16x128xf32> to vector<16xf32>
    %823 = vector.shape_cast %822 : vector<16xf32> to vector<16x1xf32>
    %cst_333 = arith.constant 1.280000e+02 : f32
    %824 = vector.broadcast %cst_333 : f32 to vector<16x1xf32>
    %825 = arith.divf %823, %824 : vector<16x1xf32>
    %826 = vector.broadcast %816 : vector<16x1xf32> to vector<16x128xf32>
    %827 = arith.subf %810, %826 : vector<16x128xf32>
    %cst_334 = arith.constant 9.99999974E-6 : f32
    %828 = vector.broadcast %cst_334 : f32 to vector<16x1xf32>
    %829 = arith.addf %825, %828 : vector<16x1xf32>
    %830 = math.rsqrt %829 : vector<16x1xf32>
    %831 = vector.broadcast %830 : vector<16x1xf32> to vector<16x128xf32>
    %832 = arith.mulf %827, %831 : vector<16x128xf32>
    %833 = vector.broadcast %811 : vector<1x128xf32> to vector<16x128xf32>
    %834 = arith.mulf %832, %833 : vector<16x128xf32>
    %835 = vector.broadcast %812 : vector<1x128xf32> to vector<16x128xf32>
    %836 = arith.addf %834, %835 : vector<16x128xf32>
    %c1_335 = arith.constant 1 : index
    %c0_336 = arith.constant 0 : index
    %c0_337 = arith.constant 0 : index
    %837 = vector.load %arg14[%c1_335, %c0_336, %c0_337] : memref<2x128x512xbf16, #tpu.memory_space<vmem>>, vector<1x128x512xbf16>
    %838 = vector.shape_cast %837 : vector<1x128x512xbf16> to vector<128x512xbf16>
    %839 = arith.truncf %836 : vector<16x128xf32> to vector<16x128xbf16>
    %cst_338 = arith.constant dense<0.000000e+00> : vector<16x512xf32>
    %840 = tpu.matmul %839, %838, %cst_338 {dimension_numbers = #tpu.dot_dimension_numbers<[1], [0], [0], [1], [0, 0, 1, 1], [], []>} : vector<16x128xbf16>, vector<128x512xbf16>, vector<16x512xf32> -> vector<16x512xf32>
    %c1_339 = arith.constant 1 : index
    %c0_340 = arith.constant 0 : index
    %841 = vector.load %arg15[%c1_339, %c0_340] : memref<2x512xf32, #tpu.memory_space<vmem>>, vector<1x512xf32>
    %842 = vector.broadcast %841 : vector<1x512xf32> to vector<16x512xf32>
    %843 = arith.addf %840, %842 : vector<16x512xf32>
    %844 = arith.mulf %843, %843 : vector<16x512xf32>
    %845 = arith.mulf %843, %844 : vector<16x512xf32>
    %cst_341 = arith.constant 4.471500e-02 : f32
    %846 = vector.broadcast %cst_341 : f32 to vector<16x512xf32>
    %847 = arith.mulf %846, %845 : vector<16x512xf32>
    %848 = arith.addf %843, %847 : vector<16x512xf32>
    %cst_342 = arith.constant 0.797884583 : f32
    %849 = vector.broadcast %cst_342 : f32 to vector<16x512xf32>
    %850 = arith.mulf %849, %848 : vector<16x512xf32>
    %851 = math.tanh %850 : vector<16x512xf32>
    %cst_343 = arith.constant 1.000000e+00 : f32
    %852 = vector.broadcast %cst_343 : f32 to vector<16x512xf32>
    %853 = arith.addf %852, %851 : vector<16x512xf32>
    %cst_344 = arith.constant 5.000000e-01 : f32
    %854 = vector.broadcast %cst_344 : f32 to vector<16x512xf32>
    %855 = arith.mulf %854, %853 : vector<16x512xf32>
    %856 = arith.mulf %843, %855 : vector<16x512xf32>
    %c1_345 = arith.constant 1 : index
    %c0_346 = arith.constant 0 : index
    %c0_347 = arith.constant 0 : index
    %857 = vector.load %arg16[%c1_345, %c0_346, %c0_347] : memref<2x512x128xbf16, #tpu.memory_space<vmem>>, vector<1x512x128xbf16>
    %858 = vector.shape_cast %857 : vector<1x512x128xbf16> to vector<512x128xbf16>
    %859 = arith.truncf %856 : vector<16x512xf32> to vector<16x512xbf16>
    %cst_348 = arith.constant dense<0.000000e+00> : vector<16x128xf32>
    %860 = tpu.matmul %859, %858, %cst_348 {dimension_numbers = #tpu.dot_dimension_numbers<[1], [0], [0], [1], [0, 0, 1, 1], [], []>} : vector<16x512xbf16>, vector<512x128xbf16>, vector<16x128xf32> -> vector<16x128xf32>
    %c1_349 = arith.constant 1 : index
    %c0_350 = arith.constant 0 : index
    %861 = vector.load %arg17[%c1_349, %c0_350] : memref<2x128xf32, #tpu.memory_space<vmem>>, vector<1x128xf32>
    %862 = vector.broadcast %861 : vector<1x128xf32> to vector<16x128xf32>
    %863 = arith.addf %860, %862 : vector<16x128xf32>
    %864 = arith.addf %863, %810 : vector<16x128xf32>
    %c0_351 = arith.constant 0 : index
    %c0_352 = arith.constant 0 : index
    %865 = vector.load %arg18[%c0_351, %c0_352] : memref<1x128xf32, #tpu.memory_space<vmem>>, vector<1x128xf32>
    %c0_353 = arith.constant 0 : index
    %c0_354 = arith.constant 0 : index
    %866 = vector.load %arg19[%c0_353, %c0_354] : memref<1x128xf32, #tpu.memory_space<vmem>>, vector<1x128xf32>
    %cst_355 = arith.constant dense<0.000000e+00> : vector<16xf32>
    %867 = vector.multi_reduction <add>, %864, %cst_355 [1] : vector<16x128xf32> to vector<16xf32>
    %868 = vector.shape_cast %867 : vector<16xf32> to vector<16x1xf32>
    %cst_356 = arith.constant 1.280000e+02 : f32
    %869 = vector.broadcast %cst_356 : f32 to vector<16x1xf32>
    %870 = arith.divf %868, %869 : vector<16x1xf32>
    %871 = vector.broadcast %870 : vector<16x1xf32> to vector<16x128xf32>
    %872 = arith.subf %864, %871 : vector<16x128xf32>
    %873 = vector.broadcast %870 : vector<16x1xf32> to vector<16x128xf32>
    %874 = arith.subf %864, %873 : vector<16x128xf32>
    %875 = arith.mulf %872, %874 : vector<16x128xf32>
    %cst_357 = arith.constant dense<0.000000e+00> : vector<16xf32>
    %876 = vector.multi_reduction <add>, %875, %cst_357 [1] : vector<16x128xf32> to vector<16xf32>
    %877 = vector.shape_cast %876 : vector<16xf32> to vector<16x1xf32>
    %cst_358 = arith.constant 1.280000e+02 : f32
    %878 = vector.broadcast %cst_358 : f32 to vector<16x1xf32>
    %879 = arith.divf %877, %878 : vector<16x1xf32>
    %880 = vector.broadcast %870 : vector<16x1xf32> to vector<16x128xf32>
    %881 = arith.subf %864, %880 : vector<16x128xf32>
    %cst_359 = arith.constant 9.99999974E-6 : f32
    %882 = vector.broadcast %cst_359 : f32 to vector<16x1xf32>
    %883 = arith.addf %879, %882 : vector<16x1xf32>
    %884 = math.rsqrt %883 : vector<16x1xf32>
    %885 = vector.broadcast %884 : vector<16x1xf32> to vector<16x128xf32>
    %886 = arith.mulf %881, %885 : vector<16x128xf32>
    %887 = vector.broadcast %865 : vector<1x128xf32> to vector<16x128xf32>
    %888 = arith.mulf %886, %887 : vector<16x128xf32>
    %889 = vector.broadcast %866 : vector<1x128xf32> to vector<16x128xf32>
    %890 = arith.addf %888, %889 : vector<16x128xf32>
    %c0_360 = arith.constant 0 : index
    %c0_361 = arith.constant 0 : index
    %891 = vector.load %arg20[%c0_360, %c0_361] : memref<128x128xbf16, #tpu.memory_space<vmem>>, vector<128x128xbf16>
    %892 = arith.truncf %890 : vector<16x128xf32> to vector<16x128xbf16>
    %cst_362 = arith.constant dense<0.000000e+00> : vector<16x128xf32>
    %893 = tpu.matmul %892, %891, %cst_362 {dimension_numbers = #tpu.dot_dimension_numbers<[1], [0], [0], [1], [0, 0, 1, 1], [], []>} : vector<16x128xbf16>, vector<128x128xbf16>, vector<16x128xf32> -> vector<16x128xf32>
    %894 = arith.addf %453, %893 : vector<16x128xf32>
    %c0_363 = arith.constant 0 : index
    %c0_364 = arith.constant 0 : index
    %895 = vector.load %arg21[%c0_363, %c0_364] : memref<16x128xf32, #tpu.memory_space<vmem>>, vector<16x128xf32>
    tpu.vector_store %arg21[%c0_363, %c0_364], %894 {strides = array<i32>} : memref<16x128xf32, #tpu.memory_space<vmem>>, vector<16x128xf32>,
    return
  }
}

</mosaic_0001>

<bundles_post_ra>
// kernel: hyperdream_forward.1
= control target key start
LH: loop header
LB: loop body
LE: loop exit
PB: predicated region body
PF: predicated region fallthrough
CT: control target
= control target key end

     0   :  { %s12510_s0 = inlined_call_operand.vmem [shape: f32[8,768], index: 0, kind: input, shape index: {}]   ;;  %s12511_s1 = inlined_call_operand.vmem [shape: f32[16,128], index: 1, kind: input, shape index: {}]   ;;  %s12512_s2 = inlined_call_operand.vmem [shape: bf16[768,128], index: 2, kind: input, shape index: {}]   ;;  %s12513_s3 = inlined_call_operand.hbm [shape: f32[1,128], index: 3, kind: input, shape index: {}]   ;;  %s12514_s4 = inlined_call_operand.vmem [shape: f32[8,128], index: 4, kind: input, shape index: {}]   ;;  %s12515_s5 = inlined_call_operand.vmem [shape: f32[6,128], index: 5, kind: input, shape index: {}]   ;;  %s12516_s6 = inlined_call_operand.vmem [shape: f32[6,128], index: 6, kind: input, shape index: {}]   ;;  %s12517_s7 = inlined_call_operand.hbm [shape: bf16[2,128,384], index: 7, kind: input, shape index: {}]   ;;  %s12518_s8 = inlined_call_operand.hbm [shape: bf16[2,128,128], index: 8, kind: input, shape index: {}]   ;;  %s12519_s9 = inlined_call_operand.hbm [shape: f32[2,128], index: 9, kind: input, shape index: {}]   ;;  %s12520_s10 = inlined_call_operand.vmem [shape: bf16[2,128,128], index: 10, kind: input, shape index: {}]   ;;  %s12521_s11 = inlined_call_operand.vmem [shape: bf16[128,512], index: 11, kind: input, shape index: {}]   ;;  %s12522_s12 = inlined_call_operand.hbm [shape: bf16[2,128,128], index: 12, kind: input, shape index: {}]   ;;  %s12523_s13 = inlined_call_operand.hbm [shape: f32[2,128], index: 13, kind: input, shape index: {}]   ;;  %s12524_s14 = inlined_call_operand.vmem [shape: bf16[2,128,512], index: 14, kind: input, shape index: {}]   ;;  %s12525_s15 = inlined_call_operand.hbm [shape: f32[2,512], index: 15, kind: input, shape index: {}]   ;;  %s12526_s16 = inlined_call_operand.vmem [shape: bf16[2,512,128], index: 16, kind: input, shape index: {}]   ;;  %s12527_s17 = inlined_call_operand.hbm [shape: f32[2,128], index: 17, kind: input, shape index: {}]   ;;  %s12528_s18 = inlined_call_operand.hbm [shape: f32[1,128], index: 18, kind: input, shape index: {}]   ;;  %s12529_s19 = inlined_call_operand.hbm [shape: f32[1,128], index: 19, kind: input, shape index: {}]   ;;  %s12530_s20 = inlined_call_operand.hbm [shape: bf16[128,128], index: 20, kind: input, shape index: {}]   ;;  %s12531_s21 = inlined_call_operand.vmem [shape: f32[16,128], index: 21, kind: output, shape index: {}]  }
   0x1   :  { %12539 = sst [smem:[#allocation25_spill]] %s12510_s0 }
   0x2   :  { %12540 = sst [smem:[#allocation26_spill]] %s12511_s1 }
   0x3   :  { %12541 = sst [smem:[#allocation27_spill]] %s12512_s2 }
   0x4   :  { %12542 = sst [smem:[#allocation28_spill]] %s12513_s3 }
   0x5   :  { %12543 = sst [smem:[#allocation29_spill]] %s12514_s4 }
   0x6   :  { %12544 = sst [smem:[#allocation30_spill]] %s12515_s5 }
   0x7   :  { %12545 = sst [smem:[#allocation31_spill]] %s12531_s21 }
   0x8   :  { %26 = vsyncpa [#allocation3], 0 }
   0x9   :  { %27 = vsyncpa [#allocation5], 0 }
   0xa   :  { %28 = vsyncpa [#allocation8], 0 }
   0xb   :  { %29 = vsyncpa [#allocation11], 0 }
   0xc   :  { %30 = vsyncpa [#allocation14], 0 }
   0xd   :  { %31 = vsyncpa [#allocation17], 0  ;;  %s10186_s2 = smov [#allocation4]   ;;  %s9932_s3 = scalar_lea.hbm %s12517_s7, 6144 }
   0xe   :  { %s59_s25 = sshll.u32 %s10186_s2, 4  ;;  %p9933_p0 = scmp.ne.s32.totalorder %s12517_s7, %s9932_s3  ;;  %s60_s25 = int_to_ptr.vmem [resolvable:$true] %s59_s25 }
   0xf   :  { %p9936_p1 = scmp.lt.u32.totalorder %s9932_s3, %s12517_s7 }
  0x11   :  { %p9938_p2 = pnand %p9936_p1, %p9933_p0 }
  0x13   :  { %9941 = shalt.err (!%p9938_p2)
}
  0x14   :  { %s9942_s30 = scalar_lea.vmem %s60_s25, 6144  ;;  %p9947_p4 = scmp.lt.s32.totalorder %s60_s25, %s60_s25 }
  0x15   :  { %p9943_p3 = scmp.ne.s32.totalorder %s60_s25, %s9942_s30  ;;  %p9948_p5 = scmp.lt.s32.totalorder %s9942_s30, %s9942_s30 }
  0x17   :  { %p9949_p6 = por %p9948_p5, %p9947_p4 }
  0x19   :  { %p9950_p7 = pnand %p9949_p6, %p9943_p3 }
  0x1b   :  { %9953 = shalt.err (!%p9950_p7)
}
  0x1c   :  { %s10187_s5 = smov 192   ;;  %s10188_s22 = smov 12  }
  0x1d   :  { %65 = dma.hbm_to_vmem [thread:$0]  %s12517_s7, 6144, %s60_s25, [#allocation5], %s10187_s5, %s10187_s5, %s10188_s22  }
  0x1e   :  { %s10189_s24 = smov [#allocation7]   ;;  %s10190_s26 = smov [#allocation10]  }
  0x1f   :  { %s84_s2 = sshll.u32 %s10189_s24, 4  ;;  %s110_s27 = sshll.u32 %s10190_s26, 4  ;;  %s85_s2 = int_to_ptr.vmem [resolvable:$true] %s84_s2  ;;  %s111_s27 = int_to_ptr.vmem [resolvable:$true] %s110_s27 }
  0x20   :  { %s9954_s29 = scalar_lea.hbm %s12519_s9, 32 }
  0x21   :  { %p9955_p8 = scmp.ne.s32.totalorder %s12519_s9, %s9954_s29  ;;  %p9958_p9 = scmp.lt.u32.totalorder %s9954_s29, %s12519_s9 }
  0x23   :  { %p9960_p10 = pnand %p9958_p9, %p9955_p8 }
  0x25   :  { %9963 = shalt.err (!%p9960_p10)
}
  0x26   :  { %s9964_s7 = scalar_lea.vmem %s85_s2, 32  ;;  %p9969_p12 = scmp.lt.s32.totalorder %s85_s2, %s85_s2 }
  0x27   :  { %p9965_p11 = scmp.ne.s32.totalorder %s85_s2, %s9964_s7  ;;  %p9970_p13 = scmp.lt.s32.totalorder %s9964_s7, %s9964_s7 }
  0x29   :  { %p9971_p0 = por %p9970_p13, %p9969_p12 }
  0x2b   :  { %p9972_p1 = pnand %p9971_p0, %p9965_p11 }
  0x2d   :  { %9975 = shalt.err (!%p9972_p1)
}
  0x2e   :  { %87 = dma.hbm_to_vmem [thread:$0]  %s12519_s9, 32, %s85_s2, [#allocation8]  }
  0x2f   :  { %s9976_s1 = scalar_lea.hbm %s12523_s13, 32 }
  0x30   :  { %p9977_p2 = scmp.ne.s32.totalorder %s12523_s13, %s9976_s1  ;;  %p9980_p3 = scmp.lt.u32.totalorder %s9976_s1, %s12523_s13 }
  0x32   :  { %p9982_p4 = pnand %p9980_p3, %p9977_p2 }
  0x34   :  { %9985 = shalt.err (!%p9982_p4)
}
  0x35   :  { %s9986_s28 = scalar_lea.vmem %s111_s27, 32  ;;  %p9991_p6 = scmp.lt.s32.totalorder %s111_s27, %s111_s27 }
  0x36   :  { %p9987_p5 = scmp.ne.s32.totalorder %s111_s27, %s9986_s28  ;;  %p9992_p7 = scmp.lt.s32.totalorder %s9986_s28, %s9986_s28 }
  0x38   :  { %p9993_p8 = por %p9992_p7, %p9991_p6 }
  0x3a   :  { %p9994_p9 = pnand %p9993_p8, %p9987_p5 }
  0x3c   :  { %9997 = shalt.err (!%p9994_p9)
}
  0x3d   :  { %113 = dma.hbm_to_vmem [thread:$0]  %s12523_s13, 32, %s111_s27, [#allocation11]  }
  0x3e   :  { %s10191_s29 = smov [#allocation13]   ;;  %s10192_s4 = smov [#allocation16]  }
  0x3f   :  { %s134_s0 = sshll.u32 %s10191_s29, 4  ;;  %s154_s30 = sshll.u32 %s10192_s4, 4  ;;  %s135_s0 = int_to_ptr.vmem [resolvable:$true] %s134_s0  ;;  %s155_s30 = int_to_ptr.vmem [resolvable:$true] %s154_s30 }
  0x40   :  { %s9998_s5 = scalar_lea.hbm %s12527_s17, 32 }
  0x41   :  { %p9999_p10 = scmp.ne.s32.totalorder %s12527_s17, %s9998_s5  ;;  %p10002_p11 = scmp.lt.u32.totalorder %s9998_s5, %s12527_s17 }
  0x43   :  { %p10004_p12 = pnand %p10002_p11, %p9999_p10 }
  0x45   :  { %10007 = shalt.err (!%p10004_p12)
}
  0x46   :  { %s10008_s13 = scalar_lea.vmem %s135_s0, 32  ;;  %p10013_p0 = scmp.lt.s32.totalorder %s135_s0, %s135_s0 }
  0x47   :  { %p10009_p13 = scmp.ne.s32.totalorder %s135_s0, %s10008_s13  ;;  %p10014_p1 = scmp.lt.s32.totalorder %s10008_s13, %s10008_s13 }
  0x49   :  { %p10015_p2 = por %p10014_p1, %p10013_p0 }
  0x4b   :  { %p10016_p3 = pnand %p10015_p2, %p10009_p13 }
  0x4d   :  { %10019 = shalt.err (!%p10016_p3)
}
  0x4e   :  { %137 = dma.hbm_to_vmem [thread:$0]  %s12527_s17, 32, %s135_s0, [#allocation14]  }
  0x4f   :  { %s10020_s28 = scalar_lea.hbm %s12529_s19, 16 }
  0x50   :  { %p10021_p4 = scmp.ne.s32.totalorder %s12529_s19, %s10020_s28  ;;  %p10024_p5 = scmp.lt.u32.totalorder %s10020_s28, %s12529_s19 }
  0x52   :  { %p10026_p6 = pnand %p10024_p5, %p10021_p4 }
  0x54   :  { %10029 = shalt.err (!%p10026_p6)
}
  0x55   :  { %s10030_s7 = scalar_lea.vmem %s155_s30, 16  ;;  %s10034_s25 = scalar_lea.vmem %s155_s30, 32 }
  0x56   :  { %p10031_p7 = scmp.ne.s32.totalorder %s155_s30, %s10030_s7  ;;  %p10035_p8 = scmp.lt.s32.totalorder %s155_s30, %s155_s30 }
  0x57   :  { %p10036_p9 = scmp.lt.s32.totalorder %s10034_s25, %s10030_s7 }
  0x59   :  { %p10037_p10 = por %p10036_p9, %p10035_p8 }
  0x5b   :  { %p10038_p11 = pnand %p10037_p10, %p10031_p7 }
  0x5d   :  { %10041 = shalt.err (!%p10038_p11)
}
  0x5e   :  { %157 = dma.hbm_to_vmem [thread:$0]  %s12529_s19, 16, %s155_s30, [#allocation17]  }
  0x5f   :  { %s10193_s5 = smov [#allocation2]   ;;  %s10194_s23 = smov [#allocation6]  }
  0x60   :  { %s44_s22 = sshll.u32 %s10193_s5, 4  ;;  %s71_s1 = sshll.u32 %s10194_s23, 4  ;;  %s45_s22 = int_to_ptr.vmem [resolvable:$true] %s44_s22  ;;  %s72_s1 = int_to_ptr.vmem [resolvable:$true] %s71_s1 }
  0x61   :  { %s12546_s27 = sld [smem:[#allocation28_spill]] }
  0x67   :  { %s10042_s24 = scalar_lea.hbm %s12546_s27, 16 }
  0x68   :  { %p10043_p12 = scmp.ne.s32.totalorder %s12546_s27, %s10042_s24  ;;  %p10046_p13 = scmp.lt.u32.totalorder %s10042_s24, %s12546_s27 }
  0x6a   :  { %p10048_p0 = pnand %p10046_p13, %p10043_p12 }
  0x6c   :  { %10051 = shalt.err (!%p10048_p0)
}
  0x6d   :  { %s10052_s19 = scalar_lea.vmem %s45_s22, 16  ;;  %s10056_s30 = scalar_lea.vmem %s45_s22, 32 }
  0x6e   :  { %p10053_p1 = scmp.ne.s32.totalorder %s45_s22, %s10052_s19  ;;  %p10057_p2 = scmp.lt.s32.totalorder %s45_s22, %s45_s22 }
  0x6f   :  { %p10058_p3 = scmp.lt.s32.totalorder %s10056_s30, %s10052_s19 }
  0x71   :  { %p10059_p4 = por %p10058_p3, %p10057_p2 }
  0x73   :  { %p10060_p5 = pnand %p10059_p4, %p10053_p1 }
  0x75   :  { %10063 = shalt.err (!%p10060_p5)
}
  0x76   :  { %47 = dma.hbm_to_vmem [thread:$0]  %s12546_s27, 16, %s45_s22, [#allocation3]  }
  0x77   :  { %s10064_s25 = scalar_lea.hbm %s12518_s8, 2048 }
  0x78   :  { %p10065_p6 = scmp.ne.s32.totalorder %s12518_s8, %s10064_s25  ;;  %p10068_p7 = scmp.lt.u32.totalorder %s10064_s25, %s12518_s8 }
  0x7a   :  { %p10070_p8 = pnand %p10068_p7, %p10065_p6 }
  0x7c   :  { %10073 = shalt.err (!%p10070_p8)
}
  0x7d   :  { %s10074_s21 = scalar_lea.vmem %s72_s1, 2048  ;;  %p10079_p10 = scmp.lt.s32.totalorder %s72_s1, %s72_s1 }
  0x7e   :  { %p10075_p9 = scmp.ne.s32.totalorder %s72_s1, %s10074_s21  ;;  %p10080_p11 = scmp.lt.s32.totalorder %s10074_s21, %s10074_s21 }
  0x80   :  { %p10081_p12 = por %p10080_p11, %p10079_p10 }
  0x82   :  { %p10082_p13 = pnand %p10081_p12, %p10075_p9 }
  0x84   :  { %10085 = shalt.err (!%p10082_p13)
}
  0x85   :  { %s10195_s22 = smov 64   ;;  %s10196_s13 = smov 4  }
  0x86   :  { %77 = dma.hbm_to_vmem [thread:$0]  %s12518_s8, 2048, %s72_s1, [#allocation5], %s10195_s22, %s10195_s22, %s10196_s13  }
  0x87   :  { %s10197_s26 = smov [#allocation9]   ;;  %s10198_s28 = smov [#allocation12]  }
  0x88   :  { %s97_s3 = sshll.u32 %s10197_s26, 4  ;;  %s122_s9 = sshll.u32 %s10198_s28, 4  ;;  %s98_s3 = int_to_ptr.vmem [resolvable:$true] %s97_s3  ;;  %s123_s9 = int_to_ptr.vmem [resolvable:$true] %s122_s9 }
  0x89   :  { %s10086_s2 = scalar_lea.hbm %s12522_s12, 2048 }
  0x8a   :  { %p10087_p0 = scmp.ne.s32.totalorder %s12522_s12, %s10086_s2  ;;  %p10090_p1 = scmp.lt.u32.totalorder %s10086_s2, %s12522_s12 }
  0x8c   :  { %p10092_p2 = pnand %p10090_p1, %p10087_p0 }
  0x8e   :  { %10095 = shalt.err (!%p10092_p2)
}
  0x8f   :  { %s10096_s8 = scalar_lea.vmem %s98_s3, 2048  ;;  %p10101_p4 = scmp.lt.s32.totalorder %s98_s3, %s98_s3 }
  0x90   :  { %p10097_p3 = scmp.ne.s32.totalorder %s98_s3, %s10096_s8  ;;  %p10102_p5 = scmp.lt.s32.totalorder %s10096_s8, %s10096_s8 }
  0x92   :  { %p10103_p6 = por %p10102_p5, %p10101_p4 }
  0x94   :  { %p10104_p7 = pnand %p10103_p6, %p10097_p3 }
  0x96   :  { %10107 = shalt.err (!%p10104_p7)
}
  0x97   :  { %103 = dma.hbm_to_vmem [thread:$0]  %s12522_s12, 2048, %s98_s3, [#allocation8], %s10195_s22, %s10195_s22, %s10196_s13  }
  0x98   :  { %s10108_s23 = scalar_lea.hbm %s12525_s15, 128 }
  0x99   :  { %p10109_p8 = scmp.ne.s32.totalorder %s12525_s15, %s10108_s23  ;;  %p10112_p9 = scmp.lt.u32.totalorder %s10108_s23, %s12525_s15 }
  0x9b   :  { %p10114_p10 = pnand %p10112_p9, %p10109_p8 }
  0x9d   :  { %10117 = shalt.err (!%p10114_p10)
}
  0x9e   :  { %s10118_s28 = scalar_lea.vmem %s123_s9, 128  ;;  %p10123_p12 = scmp.lt.s32.totalorder %s123_s9, %s123_s9 }
  0x9f   :  { %p10119_p11 = scmp.ne.s32.totalorder %s123_s9, %s10118_s28  ;;  %p10124_p13 = scmp.lt.s32.totalorder %s10118_s28, %s10118_s28 }
  0xa1   :  { %p10125_p0 = por %p10124_p13, %p10123_p12 }
  0xa3   :  { %p10126_p1 = pnand %p10125_p0, %p10119_p11 }
  0xa5   :  { %10129 = shalt.err (!%p10126_p1)
}
  0xa6   :  { %125 = dma.hbm_to_vmem [thread:$0]  %s12525_s15, 128, %s123_s9, [#allocation11]  }
  0xa7   :  { %s10199_s19 = smov [#allocation15]   ;;  %s10200_s2 = smov [#allocation18]  }
  0xa8   :  { %s144_s30 = sshll.u32 %s10199_s19, 4  ;;  %s163_s29 = sshll.u32 %s10200_s2, 4  ;;  %s145_s30 = int_to_ptr.vmem [resolvable:$true] %s144_s30  ;;  %s164_s29 = int_to_ptr.vmem [resolvable:$true] %s163_s29 }
  0xa9   :  { %s10130_s25 = scalar_lea.hbm %s12528_s18, 16 }
  0xaa   :  { %p10131_p2 = scmp.ne.s32.totalorder %s12528_s18, %s10130_s25  ;;  %p10134_p3 = scmp.lt.u32.totalorder %s10130_s25, %s12528_s18 }
  0xac   :  { %p10136_p4 = pnand %p10134_p3, %p10131_p2 }
  0xae   :  { %10139 = shalt.err (!%p10136_p4)
}
  0xaf   :  { %s10140_s15 = scalar_lea.vmem %s145_s30, 16  ;;  %s10144_s9 = scalar_lea.vmem %s145_s30, 32 }
  0xb0   :  { %p10141_p5 = scmp.ne.s32.totalorder %s145_s30, %s10140_s15  ;;  %p10145_p6 = scmp.lt.s32.totalorder %s145_s30, %s145_s30 }
  0xb1   :  { %p10146_p7 = scmp.lt.s32.totalorder %s10144_s9, %s10140_s15 }
  0xb3   :  { %p10147_p8 = por %p10146_p7, %p10145_p6 }
  0xb5   :  { %p10148_p9 = pnand %p10147_p8, %p10141_p5 }
  0xb7   :  { %10151 = shalt.err (!%p10148_p9)
}
  0xb8   :  { %147 = dma.hbm_to_vmem [thread:$0]  %s12528_s18, 16, %s145_s30, [#allocation14]  }
  0xb9   :  { %s10152_s24 = scalar_lea.hbm %s12530_s20, 1024 }
  0xba   :  { %p10153_p10 = scmp.ne.s32.totalorder %s12530_s20, %s10152_s24  ;;  %p10156_p11 = scmp.lt.u32.totalorder %s10152_s24, %s12530_s20 }
  0xbc   :  { %p10158_p12 = pnand %p10156_p11, %p10153_p10 }
  0xbe   :  { %10161 = shalt.err (!%p10158_p12)
}
  0xbf   :  { %s10162_s19 = scalar_lea.vmem %s164_s29, 1024  ;;  %p10167_p0 = scmp.lt.s32.totalorder %s164_s29, %s164_s29 }
  0xc0   :  { %p10163_p13 = scmp.ne.s32.totalorder %s164_s29, %s10162_s19  ;;  %p10168_p1 = scmp.lt.s32.totalorder %s10162_s19, %s10162_s19 }
  0xc2   :  { %p10169_p2 = por %p10168_p1, %p10167_p0 }
  0xc4   :  { %p10170_p3 = pnand %p10169_p2, %p10163_p13 }
  0xc6   :  { %10173 = shalt.err (!%p10170_p3)
}
  0xc7   :  { %169 = dma.hbm_to_vmem [thread:$0]  %s12530_s20, 1024, %s164_s29, [#allocation17], %s10195_s22, %s10195_s22, %s10196_s13  }
  0xc8   :  { %10174 = dma.done.wait [#allocation3], 16  }
  0xc9   :  { %10175 = vsyncadd [#allocation3], 4294967280 }
  0xca   :  { %10176 = dma.done.wait [#allocation5], 8192  }
  0xcb   :  { %10177 = vsyncadd [#allocation5], 4294959104 }
  0xcc   :  { %10178 = dma.done.wait [#allocation8], 2080  }
  0xcd   :  { %10179 = vsyncadd [#allocation8], 4294965216 }
  0xce   :  { %10180 = dma.done.wait [#allocation11], 160  }
  0xcf   :  { %10181 = vsyncadd [#allocation11], 4294967136 }
  0xd0   :  { %10182 = dma.done.wait [#allocation14], 48  }
  0xd1   :  { %10183 = vsyncadd [#allocation14], 4294967248 }
  0xd2   :  { %10184 = dma.done.wait [#allocation17], 1040  }
  0xd3   :  { %10185 = vsyncadd [#allocation17], 4294966256  ;;  %s12547_s7 = sld [smem:[#allocation29_spill]]  ;;  %s12548_s1 = sld [smem:[#allocation26_spill]]  ;;  %vm10203_vm0 = vmmov 0   ;;  %vm1360_vm1 = vcmask 64512  }
  0xd4   :  { %s12549_s13 = sld [smem:[#allocation27_spill]]  ;;  %s12550_s30 = sld [smem:[#allocation25_spill]]  ;;  %vm1941_vm2 = vcmask 1043456   ;;  %vm1926_vm3 = vcmask 31744  }
  0xd5   :  { %s12551_s28 = sld [smem:[#allocation30_spill]]  ;;  %s12552_s5 = sld [smem:[#allocation31_spill]] }
  0xd9   :  { %v1002_v0 = vld [vmem:[%s12547_s7] sm:$0xff]  ;;  %v1004_v5 = vld [vmem:[%s12548_s1 + $0x8] sm:$0xff] }
  0xda   :  { %v1003_v1 = vld [vmem:[%s12548_s1] sm:$0xff]  ;;  %v10473_v6 = vadd.f32 %v1004_v5, %v1002_v0  ;;  %v9119_v7 = vld [vmem:[%s12549_s13 + $0x48] sm:$0xff]   ;;  %v9123_v11 = vld [vmem:[%s12549_s13 + $0x50] sm:$0xff]  }
  0xdb   :  { %v10461_v2 = vadd.f32 %v1003_v1, %v1002_v0  ;;  %v9117_v3 = vld [vmem:[%s12549_s13 + $0x40] sm:$0xff]   ;;  %v9120_v8 = vld [vmem:[%s12549_s13 + $0x8] sm:$0xff]   ;;  %v9124_v12 = vld [vmem:[%s12549_s13 + $0x10] sm:$0xff]  }
  0xdc   :  { %v9118_v4 = vld [vmem:[%s12549_s13] sm:$0xff]   ;;  %8111 = vmatprep.subr.bf16.mxu0 %v9117_v3  ;;  %v9125_v13 = vld [vmem:[%s12549_s13 + $0xc8] sm:$0xff]   ;;  %v9127_v15 = vld [vmem:[%s12549_s13 + $0x58] sm:$0xff]  }
  0xdd   :  { %1009 = vadd.xlane.f32.xlu0 %v10461_v2  ;;  %8112 = vmatpush3.bf16.msra.mxu0 %v9118_v4  ;;  %v9121_v9 = vld [vmem:[%s12549_s13 + $0xc0] sm:$0xff]   ;;  %v9126_v14 = vld [vmem:[%s12549_s13 + $0x88] sm:$0xff]   ;;  %v9128_v16 = vld [vmem:[%s12549_s13 + $0x18] sm:$0xff]  }
  0xde   :  { %8113 = vmatprep.subr.bf16.mxu0 %v9119_v7  ;;  %v9122_v10 = vld [vmem:[%s12549_s13 + $0x80] sm:$0xff]   ;;  %8133 = vmatprep.subr.bf16.mxu1 %v9121_v9  ;;  %v9129_v17 = vld [vmem:[%s12549_s13 + $0xd0] sm:$0xff]   ;;  %v9133_v21 = vld [vmem:[%s12549_s13 + $0xd8] sm:$0xff]  }
  0xdf   :  { %8134 = vmatpush3.bf16.msra.mxu1 %v9122_v10  ;;  %v9130_v18 = vld [vmem:[%s12549_s13 + $0x90] sm:$0xff]   ;;  %v9131_v19 = vld [vmem:[%s12549_s13 + $0x60] sm:$0xff]   ;;  %v9134_v22 = vld [vmem:[%s12549_s13 + $0x98] sm:$0xff]  }
  0xe0   :  { %8135 = vmatprep.subr.bf16.mxu1 %v9125_v13  ;;  %v9132_v20 = vld [vmem:[%s12549_s13 + $0x20] sm:$0xff]   ;;  %v9135_v23 = vld [vmem:[%s12549_s13 + $0x68] sm:$0xff]   ;;  %v9139_v27 = vld [vmem:[%s12549_s13 + $0x70] sm:$0xff]  }
  0xe1   :  { %1011 = vadd.xlane.f32.xlu0 %v10473_v6  ;;  %8114 = vmatpush3.bf16.msra.mxu0 %v9120_v8  ;;  %v9136_v24 = vld [vmem:[%s12549_s13 + $0x28] sm:$0xff]   ;;  %v9137_v25 = vld [vmem:[%s12549_s13 + $0xe0] sm:$0xff]   ;;  %v9140_v28 = vld [vmem:[%s12549_s13 + $0x30] sm:$0xff]  }
  0xe2   :  { %8115 = vmatprep.subr.bf16.mxu0 %v9123_v11  ;;  %v9138_v26 = vld [vmem:[%s12549_s13 + $0xa0] sm:$0xff]   ;;  %v9141_v29 = vld [vmem:[%s12549_s13 + $0xe8] sm:$0xff]   ;;  %v9143_v31 = vld [vmem:[%s12549_s13 + $0x78] sm:$0xff]  }
  0xe3   :  { %8136 = vmatpush3.bf16.msra.mxu1 %v9126_v14  ;;  %v9142_v30 = vld [vmem:[%s12549_s13 + $0xa8] sm:$0xff]   ;;  %v9144_v32 = vld [vmem:[%s12549_s13 + $0x38] sm:$0xff]   ;;  %v9145_v33 = vld [vmem:[%s12549_s13 + $0xf0] sm:$0xff]  }
  0xe4   :  { %8137 = vmatprep.subr.bf16.mxu1 %v9129_v17  ;;  %v9146_v34 = vld [vmem:[%s12549_s13 + $0xb0] sm:$0xff]   ;;  %v205_v35 = vld [vmem:[%s12550_s30 + $0x8] sm:$0xff]  ;;  %v9147_v37 = vld [vmem:[%s12549_s13 + $0x140] sm:$0xff]  }
  0xe5   :  { %8116 = vmatpush3.bf16.msra.mxu0 %v9124_v12  ;;  %v307_v36 = vpack.c.bf16 %v205_v35, %v205_v35  ;;  %v204_v38 = vld [vmem:[%s12550_s30] sm:$0xff]  ;;  %v9148_v40 = vld [vmem:[%s12549_s13 + $0xf8] sm:$0xff]   ;;  %v9151_v45 = vld [vmem:[%s12549_s13 + $0x148] sm:$0xff]  }
  0xe6   :  { %8117 = vmatprep.subr.bf16.mxu0 %v9127_v15  ;;  %v306_v39 = vpack.c.bf16 %v204_v38, %v204_v38  ;;  %v9149_v41 = vld [vmem:[%s12549_s13 + $0x100] sm:$0xff]   ;;  %v9150_v42 = vld [vmem:[%s12549_s13 + $0xb8] sm:$0xff]   ;;  %v206_v46 = vld [vmem:[%s12550_s30 + $0x10] sm:$0xff] }
  0xe7   :  { %8138 = vmatpush3.bf16.msra.mxu1 %v9130_v18  ;;  %639 = vmatprep.mubr.bf16.mxu0 %v307_v36  ;;  %v207_v43 = vld [vmem:[%s12550_s30 + $0x18] sm:$0xff]  ;;  %v308_v47 = vpack.c.bf16 %v206_v46, %v206_v46  ;;  %v9152_v48 = vld [vmem:[%s12549_s13 + $0x108] sm:$0xff]   ;;  %v9153_v49 = vld [vmem:[%s12549_s13 + $0x150] sm:$0xff]  }
  0xe8   :  { %8139 = vmatprep.subr.bf16.mxu1 %v9133_v21  ;;  %v309_v44 = vpack.c.bf16 %v207_v43, %v207_v43  ;;  %v9154_v50 = vld [vmem:[%s12549_s13 + $0x110] sm:$0xff]   ;;  %v9155_v51 = vld [vmem:[%s12549_s13 + $0x158] sm:$0xff]   ;;  %v9157_v53 = vld [vmem:[%s12549_s13 + $0x160] sm:$0xff]   ;;  %v10201_v43 = vmov 0  }
  0xe9   :  { %8118 = vmatpush3.bf16.msra.mxu0 %v9128_v16  ;;  %v9156_v52 = vld [vmem:[%s12549_s13 + $0x118] sm:$0xff]   ;;  %v9158_v54 = vld [vmem:[%s12549_s13 + $0x120] sm:$0xff]   ;;  %v9159_v55 = vld [vmem:[%s12549_s13 + $0x168] sm:$0xff]  }
  0xea   :  { %8119 = vmatprep.subr.bf16.mxu0 %v9131_v19  ;;  %679 = vmatprep.mubr.bf16.mxu1 %v309_v44  ;;  %v9160_v56 = vld [vmem:[%s12549_s13 + $0x128] sm:$0xff]   ;;  %v9161_v58 = vld [vmem:[%s12549_s13 + $0x170] sm:$0xff]   ;;  %v9163_v61 = vld [vmem:[%s12549_s13 + $0x178] sm:$0xff]  }
  0xeb   :  { %8140 = vmatpush3.bf16.msra.mxu1 %v9134_v22  ;;  %v209_v57 = vld [vmem:[%s12550_s30 + $0x28] sm:$0xff]  ;;  %v9162_v60 = vld [vmem:[%s12549_s13 + $0x130] sm:$0xff]   ;;  %v9164_v62 = vld [vmem:[%s12549_s13 + $0x138] sm:$0xff]  }
  0xec   :  { %8141 = vmatprep.subr.bf16.mxu1 %v9137_v25  ;;  %v311_v59 = vpack.c.bf16 %v209_v57, %v209_v57  ;;  %v208_v63 = vld [vmem:[%s12550_s30 + $0x20] sm:$0xff]  ;;  %v9170_v3 = vld [vmem:[%s12521_s11 + $0xc] ss:$16 sps:$4 sm:$0xff]   ;;  %v9168_v5 = vld [vmem:[%s12521_s11 + $0x8] ss:$16 sps:$4 sm:$0xff]  }
  0xed   :  { %8120 = vmatpush3.bf16.msra.mxu0 %v9132_v20  ;;  %v310_v0 = vpack.c.bf16 %v208_v63, %v208_v63  ;;  %v9167_v1 = vld [vmem:[%s12521_s11 + $0x4] ss:$16 sps:$4 sm:$0xff]   ;;  %v9165_v4 = vld [vmem:[%s12521_s11] ss:$16 sps:$4 sm:$0xff]   ;;  %v9174_v9 = vld [vmem:[%s12521_s11 + $0x28] ss:$16 sps:$4 sm:$0xff]  }
  0xee   :  { %8121 = vmatprep.subr.bf16.mxu0 %v9135_v23  ;;  %v9171_v7 = vld [vmem:[%s12521_s11 + $0x20] ss:$16 sps:$4 sm:$0xff]   ;;  %v9173_v8 = vld [vmem:[%s12521_s11 + $0x24] ss:$16 sps:$4 sm:$0xff]   ;;  %v9176_v10 = vld [vmem:[%s12521_s11 + $0x2c] ss:$16 sps:$4 sm:$0xff]  }
  0xef   :  { %8142 = vmatpush3.bf16.msra.mxu1 %v9138_v26  ;;  %v9179_v11 = vld [vmem:[%s12521_s11 + $0x44] ss:$16 sps:$4 sm:$0xff]   ;;  %v9182_v12 = vld [vmem:[%s12521_s11 + $0x4c] ss:$16 sps:$4 sm:$0xff]   ;;  %v9177_v13 = vld [vmem:[%s12521_s11 + $0x40] ss:$16 sps:$4 sm:$0xff]  }
  0xf0   :  { %8143 = vmatprep.subr.bf16.mxu1 %v9141_v29  ;;  %v9180_v14 = vld [vmem:[%s12521_s11 + $0x48] ss:$16 sps:$4 sm:$0xff]   ;;  %v9185_v15 = vld [vmem:[%s12521_s11 + $0x64] ss:$16 sps:$4 sm:$0xff]   ;;  %v9188_v16 = vld [vmem:[%s12521_s11 + $0x6c] ss:$16 sps:$4 sm:$0xff]  }
  0xf1   :  { %8122 = vmatpush3.bf16.msra.mxu0 %v9136_v24  ;;  %v9183_v17 = vld [vmem:[%s12521_s11 + $0x60] ss:$16 sps:$4 sm:$0xff]   ;;  %v9186_v18 = vld [vmem:[%s12521_s11 + $0x68] ss:$16 sps:$4 sm:$0xff]   ;;  %v9191_v19 = vld [vmem:[%s12521_s11 + $0x84] ss:$16 sps:$4 sm:$0xff]  }
  0xf2   :  { %8123 = vmatprep.subr.bf16.mxu0 %v9139_v27  ;;  %v9194_v20 = vld [vmem:[%s12521_s11 + $0x8c] ss:$16 sps:$4 sm:$0xff]   ;;  %v9189_v21 = vld [vmem:[%s12521_s11 + $0x80] ss:$16 sps:$4 sm:$0xff]   ;;  %v9192_v22 = vld [vmem:[%s12521_s11 + $0x88] ss:$16 sps:$4 sm:$0xff]  }
  0xf3   :  { %8144 = vmatpush3.bf16.msra.mxu1 %v9142_v30  ;;  %v9197_v23 = vld [vmem:[%s12521_s11 + $0xa4] ss:$16 sps:$4 sm:$0xff]   ;;  %v9200_v24 = vld [vmem:[%s12521_s11 + $0xac] ss:$16 sps:$4 sm:$0xff]   ;;  %v9195_v25 = vld [vmem:[%s12521_s11 + $0xa0] ss:$16 sps:$4 sm:$0xff]  }
  0xf4   :  { %8145 = vmatprep.subr.bf16.mxu1 %v9145_v33  ;;  %v9198_v26 = vld [vmem:[%s12521_s11 + $0xa8] ss:$16 sps:$4 sm:$0xff]   ;;  %v9201_v35 = vld [vmem:[%s12521_s11 + $0xc0] ss:$16 sps:$4 sm:$0xff]   ;;  %v9209_v38 = vld [vmem:[%s12521_s11 + $0xe4] ss:$16 sps:$4 sm:$0xff]  }
  0xf5   :  { %8124 = vmatpush3.bf16.msra.mxu0 %v9140_v28  ;;  %v9204_v36 = vld [vmem:[%s12521_s11 + $0xc8] ss:$16 sps:$4 sm:$0xff]  }
  0xf6   :  { %8125 = vmatprep.subr.bf16.mxu0 %v9143_v31  ;;  %v9203_v31 = vld [vmem:[%s12521_s11 + $0xc4] ss:$16 sps:$4 sm:$0xff]  }
  0xf7   :  { %8146 = vmatpush3.bf16.msra.mxu1 %v9146_v34  ;;  %v9215_v44 = vld [vmem:[#allocation4 + $0x4] ss:$12 sps:$4 sm:$0xff]  }
  0xf8   :  { %8147 = vmatprep.subr.bf16.mxu1 %v9148_v40 }
  0xf9   :  { %8126 = vmatpush3.bf16.msra.mxu0 %v9144_v32  ;;  %v9206_v32 = vld [vmem:[%s12521_s11 + $0xcc] ss:$16 sps:$4 sm:$0xff]  }
  0xfa   :  { %8155 = vmatprep.subr.bf16.mxu0 %v9147_v37 }
  0xfb   :  { %8148 = vmatpush3.bf16.msra.mxu1 %v9150_v42  ;;  %v9210_v42 = vld [vmem:[%s12521_s11 + $0xe8] ss:$16 sps:$4 sm:$0xff]  }
  0xfc   :  { %640 = vmatmul.mubr.bf16.vlgmr.msra.gmra.mrb[0].mxu0 %v306_v39  ;;  %920 = vmatprep.subr.bf16.mxu1 %v9167_v1  ;;  %v9212_v39 = vld [vmem:[%s12521_s11 + $0xec] ss:$16 sps:$4 sm:$0xff]  }
  0xfd   :  { %8156 = vmatpush3.bf16.msra.mxu0 %v9149_v41  ;;  %719 = vmatprep.mubr.bf16.mxu0 %v311_v59  ;;  %v9207_v41 = vld [vmem:[%s12521_s11 + $0xe0] ss:$16 sps:$4 sm:$0xff]  }
  0xfe   :  { %8157 = vmatprep.subr.bf16.mxu0 %v9151_v45  ;;  %680 = vmatmul.mubr.bf16.vlgmr.msra.gmra.mrb[0].mxu1 %v308_v47  ;;  %v10202_v45 = vmov 0.0   ;;  %v9213_v1 = vld [vmem:[#allocation4] ss:$12 sps:$4 sm:$0xff]  }
  0xff   :  { %921 = vmatpush1.bf16.msra.mxu1 %v9165_v4  ;;  %952 = vmatprep.mubr.bf16.mxu1 %v10201_v43 }
 0x100   :  { %922 = vmatprep.subr.bf16.mxu1 %v9173_v8  ;;  %v9220_v8 = vld [vmem:[#allocation4 + $0x20] ss:$12 sps:$4 sm:$0xff]  }
 0x101   :  { %8158 = vmatpush3.bf16.msra.mxu0 %v9152_v48  ;;  %v7642_v48 = vld [vmem:[#allocation2] ss:$0 sm:$0xff] }
 0x102   :  { %8159 = vmatprep.subr.bf16.mxu0 %v9153_v49 }
 0x103   :  { %923 = vmatpush1.bf16.msra.mxu1 %v9171_v7  ;;  %v9217_v7 = vld [vmem:[#allocation4 + $0x18] ss:$12 sps:$4 sm:$0xff]  }
 0x104   :  { %924 = vmatprep.subr.bf16.mxu1 %v9179_v11  ;;  %v9224_v11 = vld [vmem:[#allocation4 + $0x38] ss:$12 sps:$4 sm:$0xff]  }
 0x105   :  { %8160 = vmatpush3.bf16.msra.mxu0 %v9154_v50 }
 0x106   :  { %8161 = vmatprep.subr.bf16.mxu0 %v9155_v51 }
 0x107   :  { %925 = vmatpush1.bf16.msra.mxu1 %v9177_v13  ;;  %v9227_v13 = vld [vmem:[#allocation4 + $0x4c] ss:$12 sps:$4 sm:$0xff]  }
 0x108   :  { %926 = vmatprep.subr.bf16.mxu1 %v9185_v15 }
 0x109   :  { %8162 = vmatpush3.bf16.msra.mxu0 %v9156_v52 }
 0x10a   :  { %8163 = vmatprep.subr.bf16.mxu0 %v9157_v53 }
 0x10b   :  { %927 = vmatpush1.bf16.msra.mxu1 %v9183_v17  ;;  %v9228_v17 = vld [vmem:[#allocation4 + $0x50] ss:$12 sps:$4 sm:$0xff]  }
 0x10c   :  { %928 = vmatprep.subr.bf16.mxu1 %v9191_v19  ;;  %v9231_v19 = vld [vmem:[#allocation4 + $0x64] ss:$12 sps:$4 sm:$0xff]  }
 0x10d   :  { %8164 = vmatpush3.bf16.msra.mxu0 %v9158_v54 }
 0x10e   :  { %8165 = vmatprep.subr.bf16.mxu0 %v9159_v55 }
 0x10f   :  { %929 = vmatpush1.bf16.msra.mxu1 %v9189_v21 }
 0x110   :  { %930 = vmatprep.subr.bf16.mxu1 %v9197_v23  ;;  %v9232_v23 = vld [vmem:[#allocation4 + $0x68] ss:$12 sps:$4 sm:$0xff]  }
 0x111   :  { %8166 = vmatpush3.bf16.msra.mxu0 %v9160_v56 }
 0x112   :  { %8167 = vmatprep.subr.bf16.mxu0 %v9161_v58 }
 0x113   :  { %931 = vmatpush1.bf16.msra.mxu1 %v9195_v25  ;;  %v9233_v25 = vld [vmem:[#allocation4 + $0x78] ss:$12 sps:$4 sm:$0xff]  }
 0x114   :  { %932 = vmatprep.subr.bf16.mxu1 %v9203_v31  ;;  %v9240_v31 = vld [vmem:[#allocation4 + $0x98] ss:$12 sps:$4 sm:$0xff]  }
 0x115   :  { %8168 = vmatpush3.bf16.msra.mxu0 %v9162_v60 }
 0x116   :  { %8169 = vmatprep.subr.bf16.mxu0 %v9163_v61 }
 0x117   :  { %933 = vmatpush1.bf16.msra.mxu1 %v9201_v35 }
 0x118   :  { %934 = vmatprep.subr.bf16.mxu1 %v9209_v38  ;;  %v9244_v38 = vld [vmem:[#allocation4 + $0xb0] ss:$12 sps:$4 sm:$0xff]  }
 0x119   :  { %8170 = vmatpush3.bf16.msra.mxu0 %v9164_v62 }
 0x11a   :  { %961 = vmatprep.subr.bf16.mxu0 %v9170_v3  ;;  %v9216_v3 = vld [vmem:[#allocation4 + $0x8] ss:$12 sps:$4 sm:$0xff]  }
 0x11b   :  { %935 = vmatpush1.bf16.msra.mxu1 %v9207_v41 }
 0x11c   :  { %720 = vmatmul.mubr.bf16.vlgmr.msra.gmra.mrb[4].mxu0 %v310_v0  ;;  %1205 = vmatprep.subr.bf16.mxu1 %v9215_v44 }
 0x11d   :  { %962 = vmatpush1.bf16.msra.mxu0 %v9168_v5  ;;  %993 = vmatprep.mubr.bf16.mxu0 %v10201_v43  ;;  %v9219_v5 = vld [vmem:[#allocation4 + $0x1c] ss:$12 sps:$4 sm:$0xff]  }
 0x11e   :  { %963 = vmatprep.subr.bf16.mxu0 %v9176_v10  ;;  %v9221_v10 = vld [vmem:[#allocation4 + $0x30] ss:$12 sps:$4 sm:$0xff]  }
 0x121   :  { %964 = vmatpush1.bf16.msra.mxu0 %v9174_v9  ;;  %v9223_v9 = vld [vmem:[#allocation4 + $0x34] ss:$12 sps:$4 sm:$0xff]  }
 0x122   :  { %965 = vmatprep.subr.bf16.mxu0 %v9182_v12 }
 0x125   :  { %966 = vmatpush1.bf16.msra.mxu0 %v9180_v14 }
 0x126   :  { %967 = vmatprep.subr.bf16.mxu0 %v9188_v16  ;;  %v9225_v16 = vld [vmem:[#allocation4 + $0x48] ss:$12 sps:$4 sm:$0xff]  }
 0x129   :  { %968 = vmatpush1.bf16.msra.mxu0 %v9186_v18 }
 0x12a   :  { %969 = vmatprep.subr.bf16.mxu0 %v9194_v20 }
 0x12d   :  { %970 = vmatpush1.bf16.msra.mxu0 %v9192_v22  ;;  %v9229_v22 = vld [vmem:[#allocation4 + $0x60] ss:$12 sps:$4 sm:$0xff]  }
 0x12e   :  { %971 = vmatprep.subr.bf16.mxu0 %v9200_v24  ;;  %v9235_v24 = vld [vmem:[#allocation4 + $0x7c] ss:$12 sps:$4 sm:$0xff]  }
 0x131   :  { %972 = vmatpush1.bf16.msra.mxu0 %v9198_v26  ;;  %v9236_v26 = vld [vmem:[#allocation4 + $0x80] ss:$12 sps:$4 sm:$0xff]  }
 0x132   :  { %973 = vmatprep.subr.bf16.mxu0 %v9206_v32 }
 0x135   :  { %974 = vmatpush1.bf16.msra.mxu0 %v9204_v36  ;;  %v9241_v36 = vld [vmem:[#allocation4 + $0xa8] ss:$12 sps:$4 sm:$0xff]  }
 0x136   :  { %975 = vmatprep.subr.bf16.mxu0 %v9212_v39 }
 0x139   :  { %976 = vmatpush1.bf16.msra.mxu0 %v9210_v42 }
 0x13a   :  { %8579 = vmatprep.subr.bf16.mxu0 %v10202_v45 }
 0x16a   :  { %v1010_v27 = vpop.xlane.xlu0 %1009 }
 0x16b   :  { %v1014_v28 = vmul.f32 0.0078125, %v1010_v27  ;;  %v9239_v27 = vld [vmem:[#allocation4 + $0x94] ss:$12 sps:$4 sm:$0xff]  }
 0x16d   :  { %v10705_v29 = vsub.f32 %v10461_v2, %v1014_v28 }
 0x16e   :  { %v1012_v30 = vpop.xlane.xlu0 %1011 }
 0x16f   :  { %v1015_v33 = vmul.f32 0.0078125, %v1012_v30  ;;  %v1018_v34 = vmul.f32 %v10705_v29, %v10705_v29  ;;  %v9237_v30 = vld [vmem:[#allocation4 + $0x90] ss:$12 sps:$4 sm:$0xff]  }
 0x171   :  { %v10722_v37 = vsub.f32 %v10473_v6, %v1015_v33  ;;  %1020 = vadd.xlane.f32.xlu1 %v1018_v34  ;;  %v9243_v33 = vld [vmem:[#allocation4 + $0xac] ss:$12 sps:$4 sm:$0xff]   ;;  %v7723_v34 = vld [vmem:[%s12551_s28] ss:$0 sm:$0xff] }
 0x173   :  { %v1019_v40 = vmul.f32 %v10722_v37, %v10722_v37 }
 0x175   :  { %1022 = vadd.xlane.f32.xlu1 %v1019_v40 }
 0x1cf   :  { %v8127_v46 = vpop.f32.mrb[0].mxu0 }
 0x1d0   :  { %v8128_v47 = vpop.f32.mrb[1].mxu0 }
 0x1d1   :  { %v8129_v49 = vadd.f32 %v8128_v47, %v8127_v46  ;;  %v8130_v50 = vpop.f32.mrb[2].mxu0  ;;  %v8149_v53 = vpop.f32.mrb[0].mxu1 }
 0x1d2   :  { %v8131_v51 = vpop.f32.mrb[3].mxu0  ;;  %v8150_v54 = vpop.f32.mrb[1].mxu1 }
 0x1d3   :  { %v642_v52 = vadd.f32 %v8129_v49, %v7642_v48  ;;  %v8151_v55 = vadd.f32 %v8150_v54, %v8149_v53  ;;  %v8152_v56 = vpop.f32.mrb[2].mxu1 }
 0x1d4   :  { %v8153_v57 = vpop.f32.mrb[3].mxu1 }
 0x1d5   :  { %v682_v58 = vadd.f32 %v8151_v55, %v642_v52 }
 0x1ef   :  { %v8171_v59 = vpop.f32.mrb[4].mxu0 }
 0x1f0   :  { %v8172_v60 = vpop.f32.mrb[5].mxu0 }
 0x1f1   :  { %v8173_v61 = vadd.f32 %v8172_v60, %v8171_v59  ;;  %v8174_v62 = vpop.f32.mrb[6].mxu0 }
 0x1f2   :  { %v8175_v63 = vpop.f32.mrb[7].mxu0 }
 0x1f3   :  { %v722_v0 = vadd.f32 %v8173_v61, %v682_v58 }
 0x1f5   :  { %v759_v4 = vpack.c.bf16 %v722_v0, %v722_v0 }
 0x1f7   :  { %953 = vmatmul.mubr.bf16.vlgmr.msra.gmra.mrb[4].mxu1 %v759_v4  ;;  %994 = vmatmul.mubr.bf16.vlgmr.msra.gmra.mrb[8].mxu0 %v759_v4 }
 0x1f8   :  { %1206 = vmatpush1.bf16.msra.mxu1 %v9213_v1  ;;  %8580 = vmatpush3.bf16.msra.mxu0 %v9216_v3 }
 0x1f9   :  { %1207 = vmatprep.subr.bf16.mxu1 %v9219_v5  ;;  %8581 = vmatprep.subr.bf16.mxu0 %v10202_v45 }
 0x1fa   :  { %1237 = vmatprep.mubr.bf16.mxu1 %v10201_v43  ;;  %8595 = vmatprep.mubr.msk.bf16.mxu0 %vm10203_vm0, %v10202_v45 }
 0x1fc   :  { %1208 = vmatpush1.bf16.msra.mxu1 %v9217_v7  ;;  %8582 = vmatpush3.bf16.msra.mxu0 %v9220_v8 }
 0x1fd   :  { %1209 = vmatprep.subr.bf16.mxu1 %v9223_v9  ;;  %8583 = vmatprep.subr.bf16.mxu0 %v10202_v45 }
 0x1fe   :  { %v1021_v12 = vpop.xlane.xlu1 %1020 }
 0x1ff   :  { %v1024_v14 = vmul.f32 0.0078125, %v1021_v12 }
 0x200   :  { %1210 = vmatpush1.bf16.msra.mxu1 %v9221_v10  ;;  %8584 = vmatpush3.bf16.msra.mxu0 %v9224_v11 }
 0x201   :  { %v1026_v15 = vadd.f32 1e-05, %v1024_v14  ;;  %1211 = vmatprep.subr.bf16.mxu1 %v9227_v13  ;;  %8585 = vmatprep.subr.bf16.mxu0 %v10202_v45 }
 0x202   :  { %v1023_v18 = vpop.xlane.xlu1 %1022 }
 0x203   :  { %9493 = vrsqrt.f32 %v1026_v15  ;;  %v1025_v20 = vmul.f32 0.0078125, %v1023_v18 }
 0x204   :  { %1212 = vmatpush1.bf16.msra.mxu1 %v9225_v16  ;;  %8586 = vmatpush3.bf16.msra.mxu0 %v9228_v17 }
 0x205   :  { %v1027_v21 = vadd.f32 1e-05, %v1025_v20  ;;  %1213 = vmatprep.subr.bf16.mxu1 %v9231_v19  ;;  %8587 = vmatprep.subr.bf16.mxu0 %v10202_v45 }
 0x207   :  { %9495 = vrsqrt.f32 %v1027_v21 }
 0x208   :  { %1214 = vmatpush1.bf16.msra.mxu1 %v9229_v22  ;;  %8588 = vmatpush3.bf16.msra.mxu0 %v9232_v23 }
 0x209   :  { %1215 = vmatprep.subr.bf16.mxu1 %v9235_v24  ;;  %8589 = vmatprep.subr.bf16.mxu0 %v10202_v45 }
 0x20c   :  { %1216 = vmatpush1.bf16.msra.mxu1 %v9233_v25  ;;  %8590 = vmatpush3.bf16.msra.mxu0 %v9236_v26  ;;  %v9245_v25 = vld [vmem:[#allocation6] sm:$0xff]  }
 0x20d   :  { %v9494_v28 = vpop.eup %9493  ;;  %1217 = vmatprep.subr.bf16.mxu1 %v9239_v27  ;;  %8591 = vmatprep.subr.bf16.mxu0 %v10202_v45  ;;  %v9246_v27 = vld [vmem:[#allocation6 + $0x8] sm:$0xff]  }
 0x20e   :  { %v1030_v32 = vmul.f32 %v9494_v28, %v10705_v29  ;;  %v7724_v29 = vld [vmem:[%s12516_s6] ss:$0 sm:$0xff]  ;;  %v9247_v28 = vld [vmem:[#allocation6 + $0x10] sm:$0xff]  }
 0x210   :  { %1218 = vmatpush1.bf16.msra.mxu1 %v9237_v30  ;;  %8592 = vmatpush3.bf16.msra.mxu0 %v9240_v31  ;;  %v1036_v40 = vmul.f32 %v7723_v34, %v1030_v32  ;;  %v9248_v30 = vld [vmem:[#allocation6 + $0x18] sm:$0xff]   ;;  %v9249_v31 = vld [vmem:[#allocation6 + $0x20] sm:$0xff]   ;;  %v9250_v32 = vld [vmem:[#allocation6 + $0x28] sm:$0xff]  }
 0x211   :  { %v9496_v35 = vpop.eup %9495  ;;  %1219 = vmatprep.subr.bf16.mxu1 %v9243_v33  ;;  %8593 = vmatprep.subr.bf16.mxu0 %v10202_v45  ;;  %v9251_v33 = vld [vmem:[#allocation6 + $0x30] sm:$0xff]  }
 0x212   :  { %v1031_v39 = vmul.f32 %v9496_v35, %v10722_v37  ;;  %v1042_v42 = vadd.f32 %v7724_v29, %v1036_v40 }
 0x214   :  { %v1037_v41 = vmul.f32 %v7723_v34, %v1031_v39  ;;  %1220 = vmatpush1.bf16.msra.mxu1 %v9241_v36  ;;  %8594 = vmatpush3.bf16.msra.mxu0 %v9244_v38  ;;  %v9252_v34 = vld [vmem:[#allocation6 + $0x38] sm:$0xff]   ;;  %v7751_v39 = vld [vmem:[#allocation7] ss:$0 sm:$0xff] }
 0x215   :  { %8599 = vmatprep.subr.mxu1 %v10202_v45  ;;  %8639 = vmatprep.subr.bf16.mxu0 %v10202_v45 }
 0x216   :  { %v1043_v44 = vadd.f32 %v7724_v29, %v1037_v41 }
 0x218   :  { %v1076_v46 = vpack.c.bf16 %v1043_v44, %v1042_v42 }
 0x21a   :  { %1238 = vmatmul.mubr.bf16.vlgmr.msra.gmra.mrb[8].mxu1 %v1076_v46  ;;  %8596 = vmatmul.mubr.bf16.vlgmr.msra.gmra.mrb[12].mxu0 %v1076_v46 }
 0x21b   :  { %8601 = vmatprep.mubr.msk.f32.mxu1 %vm10203_vm0, %v10202_v45  ;;  %8655 = vmatprep.mubr.msk.bf16.mxu0 %vm10203_vm0, %v10202_v45 }
 0x2ca   :  { %v10765_v37 = vpop.f32.mrb[4].mxu1  ;;  %v10767_v47 = vpop.f32.mrb[8].mxu0 }
 0x2cb   :  { %v10769_v48 = vpop.f32.mrb[5].mxu1  ;;  %v10771_v49 = vpop.f32.mrb[9].mxu0 }
 0x2cc   :  { %v958_v50 = vpop.f32.mrb[6].mxu1  ;;  %v999_v51 = vpop.f32.mrb[10].mxu0 }
 0x2cd   :  { %v959_v52 = vpop.f32.mrb[7].mxu1  ;;  %v1000_v53 = vpop.f32.mrb[11].mxu0 }
 0x2ce   :  { %v9253_v52 = vld [vmem:[%s12520_s10] sm:$0xff]   ;;  %v9254_v53 = vld [vmem:[%s12520_s10 + $0x8] sm:$0xff]  }
 0x2cf   :  { %8640 = vmatpush3.bf16.msra.mxu0 %v9253_v52 }
 0x2d0   :  { %8641 = vmatprep.subr.bf16.mxu0 %v10202_v45 }
 0x2d3   :  { %8642 = vmatpush3.bf16.msra.mxu0 %v9254_v53 }
 0x2d4   :  { %8643 = vmatprep.subr.bf16.mxu0 %v10202_v45 }
 0x2ed   :  { %v1239_v54 = vpop.f32.mrb[8].mxu1  ;;  %v1282_v55 = vpop.f32.mrb[12].mxu0 }
 0x2ee   :  { %v1241_v56 = vpop.f32.mrb[9].mxu1  ;;  %v8597_v57 = vpop.f32.mrb[13].mxu0 }
 0x2ef   :  { %v1243_v58 = vpop.f32.mrb[10].mxu1  ;;  %v1285_v59 = vpop.f32.mrb[14].mxu0  ;;  %8600 = vmatpush3.xpose.msra.mxu1 %v1241_v56 }
 0x2f0   :  { %v1245_v60 = vpop.f32.mrb[11].mxu1  ;;  %v8598_v61 = vpop.f32.mrb[15].mxu0  ;;  %8604 = vmatprep.subr.mxu1 %v10202_v45 }
 0x2f1   :  { %v9256_v61 = vld [vmem:[%s12520_s10 + $0x18] sm:$0xff]  }
 0x2f2   :  { %8602 = vmatmul.mubr.f32.vlgmr.msra.gmra.mrb[12].mxu1 %v1239_v54 }
 0x2f3   :  { %8605 = vmatpush3.msra.mxu1 %v1282_v55  ;;  %8606 = vmatprep.mubr.msk.f32.mxu1 %vm10203_vm0, %v10202_v45 }
 0x2f4   :  { %8609 = vmatprep.subr.mxu1 %v10202_v45 }
 0x3c5   :  { %v1355_v62 = vpop.f32.mrb[12].mxu1 }
 0x3c6   :  { %v1359_v63 = vmul.f32 0.088388346, %v1355_v62  ;;  %v8603_v0 = vpop.f32.mrb[13].mxu1  ;;  %v9257_v62 = vld [vmem:[%s12520_s10 + $0x20] sm:$0xff]  }
 0x3c7   :  { %v9259_v0 = vld [vmem:[%s12520_s10 + $0x30] sm:$0xff]  }
 0x3c8   :  { %v1361_v1 = vsel %vm1360_vm1, %v1359_v63, -inf }
 0x3c9   :  { %1362 = vmax.xlane.f32.xlu0 %v1361_v1  ;;  %v9260_v1 = vld [vmem:[%s12520_s10 + $0x38] sm:$0xff]  }
 0x456   :  { %v1363_v3 = vpop.xlane.xlu0 %1362 }
 0x457   :  { %v1364_v4 = vsub.f32 %v1359_v63, %v1363_v3  ;;  %v9258_v63 = vld [vmem:[%s12520_s10 + $0x28] sm:$0xff]  }
 0x459   :  { %v1365_v5 = vmul.f32 1.442695, %v1364_v4 }
 0x45b   :  { %9497 = vpow2.f32 %v1365_v5 }
 0x465   :  { %v9498_v7 = vpop.eup %9497 }
 0x466   :  { %v1367_v8 = vsel %vm1360_vm1, %v9498_v7, 0.0 }
 0x467   :  { %1368 = vadd.xlane.f32.xlu1 %v1367_v8 }
 0x4f4   :  { %v1369_v9 = vpop.xlane.xlu1 %1368 }
 0x4f5   :  { %9499 = vrcp.f32 %v1369_v9 }
 0x4ff   :  { %v9500_v10 = vpop.eup %9499 }
 0x500   :  { %v1371_v11 = vmul.f32 %v9500_v10, %v9498_v7 }
 0x502   :  { %8607 = vmatmul.mubr.msk.f32.vlgmr.msra.gmra.mrb[14].mxu1 %vm1360_vm1, %v1371_v11  ;;  %v7760_v11 = vld [vmem:[%s12551_s28 + $0x1] ss:$0 sm:$0xff] }
 0x503   :  { %8610 = vmatpush3.xpose.msra.mxu1 %v1245_v60  ;;  %8611 = vmatprep.mubr.msk.f32.mxu1 %vm10203_vm0, %v10202_v45  ;;  %v9255_v60 = vld [vmem:[%s12520_s10 + $0x10] sm:$0xff]  }
 0x504   :  { %8614 = vmatprep.subr.mxu1 %v10202_v45  ;;  %8644 = vmatpush3.bf16.msra.mxu0 %v9255_v60  ;;  %v9265_v60 = vld [vmem:[#allocation9 + $0x20] sm:$0xff]  }
 0x505   :  { %8645 = vmatprep.subr.bf16.mxu0 %v10202_v45 }
 0x506   :  { %8612 = vmatmul.mubr.f32.vlgmr.msra.gmra.mrb[16].mxu1 %v1243_v58 }
 0x507   :  { %8615 = vmatpush3.msra.mxu1 %v1285_v59  ;;  %8616 = vmatprep.mubr.msk.f32.mxu1 %vm10203_vm0, %v10202_v45 }
 0x508   :  { %8619 = vmatprep.subr.bf16.mxu1 %v10202_v45  ;;  %8646 = vmatpush3.bf16.msra.mxu0 %v9256_v61  ;;  %v9266_v61 = vld [vmem:[#allocation9 + $0x28] sm:$0xff]  }
 0x509   :  { %8647 = vmatprep.subr.bf16.mxu0 %v10202_v45 }
 0x50c   :  { %8648 = vmatpush3.bf16.msra.mxu0 %v9257_v62  ;;  %v9267_v62 = vld [vmem:[#allocation9 + $0x30] sm:$0xff]  }
 0x50d   :  { %8649 = vmatprep.subr.bf16.mxu0 %v10202_v45 }
 0x510   :  { %8650 = vmatpush3.bf16.msra.mxu0 %v9258_v63 }
 0x511   :  { %8651 = vmatprep.subr.bf16.mxu0 %v10202_v45 }
 0x514   :  { %8652 = vmatpush3.bf16.msra.mxu0 %v9259_v0 }
 0x515   :  { %8653 = vmatprep.subr.bf16.mxu0 %v10202_v45 }
 0x518   :  { %8654 = vmatpush3.bf16.msra.mxu0 %v9260_v1 }
 0x519   :  { %8674 = vmatprep.subr.mxu0 %v10202_v45 }
 0x5d5   :  { %v1441_v12 = vpop.f32.mrb[14].mxu1 }
 0x5d6   :  { %v8608_v13 = vpop.f32.mrb[15].mxu1 }
 0x5d9   :  { %v1511_v14 = vpop.f32.mrb[16].mxu1 }
 0x5da   :  { %v1515_v15 = vmul.f32 0.088388346, %v1511_v14  ;;  %v8613_v16 = vpop.f32.mrb[17].mxu1 }
 0x5db   :  { %v7761_v16 = vld [vmem:[%s12516_s6 + $0x1] ss:$0 sm:$0xff] }
 0x5dc   :  { %v1516_v17 = vsel %vm1360_vm1, %v1515_v15, -inf }
 0x5dd   :  { %1517 = vmax.xlane.f32.xlu0 %v1516_v17 }
 0x66a   :  { %v1518_v18 = vpop.xlane.xlu0 %1517 }
 0x66b   :  { %v1519_v19 = vsub.f32 %v1515_v15, %v1518_v18 }
 0x66d   :  { %v1520_v20 = vmul.f32 1.442695, %v1519_v19 }
 0x66f   :  { %9501 = vpow2.f32 %v1520_v20 }
 0x679   :  { %v9502_v21 = vpop.eup %9501 }
 0x67a   :  { %v1522_v22 = vsel %vm1360_vm1, %v9502_v21, 0.0 }
 0x67b   :  { %1523 = vadd.xlane.f32.xlu1 %v1522_v22 }
 0x708   :  { %v1524_v23 = vpop.xlane.xlu1 %1523 }
 0x709   :  { %9503 = vrcp.f32 %v1524_v23 }
 0x713   :  { %v9504_v24 = vpop.eup %9503 }
 0x714   :  { %v1526_v26 = vmul.f32 %v9504_v24, %v9502_v21  ;;  %v2100_v21 = vrot.slane %v10769_v48, 4 }
 0x716   :  { %8617 = vmatmul.mubr.msk.f32.vlgmr.msra.gmra.mrb[18].mxu1 %vm1360_vm1, %v1526_v26 }
 0x717   :  { %8620 = vmatpush3.bf16.msra.mxu1 %v9245_v25  ;;  %8635 = vmatprep.mubr.msk.bf16.mxu1 %vm10203_vm0, %v10202_v45 }
 0x718   :  { %8621 = vmatprep.subr.bf16.mxu1 %v10202_v45 }
 0x71b   :  { %8622 = vmatpush3.bf16.msra.mxu1 %v9246_v27 }
 0x71c   :  { %8623 = vmatprep.subr.bf16.mxu1 %v10202_v45 }
 0x71f   :  { %8624 = vmatpush3.bf16.msra.mxu1 %v9247_v28 }
 0x720   :  { %8625 = vmatprep.subr.bf16.mxu1 %v10202_v45 }
 0x723   :  { %8626 = vmatpush3.bf16.msra.mxu1 %v9248_v30 }
 0x724   :  { %8627 = vmatprep.subr.bf16.mxu1 %v10202_v45 }
 0x727   :  { %8628 = vmatpush3.bf16.msra.mxu1 %v9249_v31 }
 0x728   :  { %8629 = vmatprep.subr.bf16.mxu1 %v10202_v45 }
 0x72b   :  { %8630 = vmatpush3.bf16.msra.mxu1 %v9250_v32 }
 0x72c   :  { %8631 = vmatprep.subr.bf16.mxu1 %v10202_v45 }
 0x72f   :  { %8632 = vmatpush3.bf16.msra.mxu1 %v9251_v33 }
 0x730   :  { %8633 = vmatprep.subr.bf16.mxu1 %v10202_v45 }
 0x733   :  { %8634 = vmatpush3.bf16.msra.mxu1 %v9252_v34 }
 0x734   :  { %8659 = vmatprep.subr.mxu1 %v10202_v45 }
 0x7e9   :  { %v1596_v35 = vpop.f32.mrb[18].mxu1 }
 0x7ea   :  { %v1616_v36 = vpack.c.bf16 %v1596_v35, %v1441_v12  ;;  %v8618_v38 = vpop.f32.mrb[19].mxu1 }
 0x7ec   :  { %8636 = vmatmul.mubr.bf16.vlgmr.msra.gmra.mrb[20].mxu1 %v1616_v36 }
 0x7ed   :  { %8660 = vmatpush3.xpose.msra.mxu1 %v10765_v37  ;;  %8661 = vmatprep.mubr.msk.f32.mxu1 %vm10203_vm0, %v10202_v45 }
 0x7ee   :  { %8664 = vmatprep.subr.mxu1 %v10202_v45 }
 0x8bf   :  { %v1704_v40 = vpop.f32.mrb[20].mxu1 }
 0x8c0   :  { %v1705_v29 = vadd.f32 %v7751_v39, %v1704_v40  ;;  %v8637_v41 = vpop.f32.mrb[21].mxu1  ;;  %v2016_v40 = vrot.slane %v10765_v37, 4 }
 0x8c1   :  { %v1707_v42 = vpop.f32.mrb[22].mxu1 }
 0x8c2   :  { %v10804_v44 = vadd.f32 %v1705_v29, %v10461_v2  ;;  %v1708_v46 = vadd.f32 %v7751_v39, %v1707_v42  ;;  %v8638_v50 = vpop.f32.mrb[23].mxu1 }
 0x8c4   :  { %v10807_v51 = vadd.f32 %v1708_v46, %v10473_v6  ;;  %1715 = vadd.xlane.f32.xlu0 %v10804_v44 }
 0x8c6   :  { %1717 = vadd.xlane.f32.xlu1 %v10807_v51 }
 0x951   :  { %v1716_v2 = vpop.xlane.xlu0 %1715 }
 0x952   :  { %v1719_v6 = vmul.f32 0.0078125, %v1716_v2 }
 0x953   :  { %v1718_v54 = vpop.xlane.xlu1 %1717 }
 0x954   :  { %v1721_v55 = vsub.f32 %v10804_v44, %v1719_v6  ;;  %v1720_v56 = vmul.f32 0.0078125, %v1718_v54 }
 0x956   :  { %v1722_v57 = vsub.f32 %v10807_v51, %v1720_v56  ;;  %v1723_v58 = vmul.f32 %v1721_v55, %v1721_v55  ;;  %v9261_v56 = vld [vmem:[#allocation9] sm:$0xff]  }
 0x958   :  { %1725 = vadd.xlane.f32.xlu0 %v1723_v58  ;;  %v1724_v59 = vmul.f32 %v1722_v57, %v1722_v57  ;;  %v9263_v58 = vld [vmem:[#allocation9 + $0x10] sm:$0xff]  }
 0x95a   :  { %1727 = vadd.xlane.f32.xlu1 %v1724_v59  ;;  %v9264_v59 = vld [vmem:[#allocation9 + $0x18] sm:$0xff]  }
 0x9e5   :  { %v1726_v3 = vpop.xlane.xlu0 %1725 }
 0x9e6   :  { %v1729_v4 = vmul.f32 0.0078125, %v1726_v3  ;;  %v9268_v3 = vld [vmem:[#allocation9 + $0x38] sm:$0xff]  }
 0x9e7   :  { %v1728_v5 = vpop.xlane.xlu1 %1727 }
 0x9e8   :  { %v1731_v7 = vadd.f32 1e-05, %v1729_v4  ;;  %v1730_v8 = vmul.f32 0.0078125, %v1728_v5 }
 0x9ea   :  { %9505 = vrsqrt.f32 %v1731_v7  ;;  %v1732_v9 = vadd.f32 1e-05, %v1730_v8  ;;  %v7774_v8 = vld [vmem:[#allocation10] ss:$0 sm:$0xff] }
 0x9ec   :  { %9507 = vrsqrt.f32 %v1732_v9 }
 0x9f4   :  { %v9506_v10 = vpop.eup %9505 }
 0x9f5   :  { %v1735_v12 = vmul.f32 %v9506_v10, %v1721_v55 }
 0x9f6   :  { %v9508_v13 = vpop.eup %9507 }
 0x9f7   :  { %v1736_v14 = vmul.f32 %v9508_v13, %v1722_v57  ;;  %v1741_v15 = vmul.f32 %v7760_v11, %v1735_v12  ;;  %v9262_v57 = vld [vmem:[#allocation9 + $0x8] sm:$0xff]  }
 0x9f9   :  { %v1742_v17 = vmul.f32 %v7760_v11, %v1736_v14  ;;  %v1747_v18 = vadd.f32 %v7761_v16, %v1741_v15 }
 0x9fb   :  { %v1748_v19 = vadd.f32 %v7761_v16, %v1742_v17  ;;  %v9269_v17 = vld [vmem:[%s12524_s14] ss:$16 sps:$4 sm:$0xff]  }
 0x9fd   :  { %v1765_v20 = vpack.c.bf16 %v1748_v19, %v1747_v18  ;;  %v9271_v18 = vld [vmem:[%s12524_s14 + $0x4] ss:$16 sps:$4 sm:$0xff]  }
 0x9fe   :  { %v9277_v19 = vld [vmem:[%s12524_s14 + $0x24] ss:$16 sps:$4 sm:$0xff]  }
 0x9ff   :  { %8656 = vmatmul.mubr.bf16.vlgmr.msra.gmra.mrb[16].mxu0 %v1765_v20  ;;  %v9280_v20 = vld [vmem:[%s12524_s14 + $0x2c] ss:$16 sps:$4 sm:$0xff]  }
 0xa00   :  { %8675 = vmatpush3.msk.msra.mxu0 %vm1941_vm2, %v2100_v21  ;;  %8676 = vmatprep.mubr.msk.f32.mxu0 %vm10203_vm0, %v10202_v45 }
 0xa01   :  { %2540 = vmatprep.subr.bf16.mxu0 %v9271_v18 }
 0xad2   :  { %v1848_v22 = vpop.f32.mrb[16].mxu0 }
 0xad3   :  { %v8657_v23 = vpop.f32.mrb[17].mxu0  ;;  %8662 = vmatmul.mubr.f32.vlgmr.msra.gmra.mrb[24].mxu1 %v1848_v22  ;;  %v9275_v22 = vld [vmem:[%s12524_s14 + $0x20] ss:$16 sps:$4 sm:$0xff]  }
 0xad4   :  { %8665 = vmatpush3.msk.msra.mxu1 %vm1941_vm2, %v10769_v48  ;;  %v1851_v24 = vpop.f32.mrb[18].mxu0  ;;  %8666 = vmatprep.mubr.msk.f32.mxu1 %vm10203_vm0, %v10202_v45  ;;  %v9278_v23 = vld [vmem:[%s12524_s14 + $0x28] ss:$16 sps:$4 sm:$0xff]  }
 0xad5   :  { %v8658_v25 = vpop.f32.mrb[19].mxu0  ;;  %8669 = vmatprep.subr.mxu1 %v10202_v45 }
 0xba6   :  { %v1921_v26 = vpop.f32.mrb[24].mxu1 }
 0xba7   :  { %v1925_v27 = vmul.f32 0.088388346, %v1921_v26  ;;  %v8663_v28 = vpop.f32.mrb[25].mxu1 }
 0xba9   :  { %v1927_v30 = vsel %vm1926_vm3, %v1925_v27, -inf }
 0xbaa   :  { %1928 = vmax.xlane.f32.xlu0 %v1927_v30 }
 0xc37   :  { %v1929_v31 = vpop.xlane.xlu0 %1928 }
 0xc38   :  { %v1930_v32 = vsub.f32 %v1925_v27, %v1929_v31 }
 0xc3a   :  { %v1931_v33 = vmul.f32 1.442695, %v1930_v32 }
 0xc3c   :  { %9509 = vpow2.f32 %v1931_v33  ;;  %v9283_v33 = vld [vmem:[%s12524_s14 + $0x44] ss:$16 sps:$4 sm:$0xff]  }
 0xc46   :  { %v9510_v34 = vpop.eup %9509 }
 0xc47   :  { %v1933_v35 = vsel %vm1926_vm3, %v9510_v34, 0.0 }
 0xc48   :  { %1934 = vadd.xlane.f32.xlu1 %v1933_v35  ;;  %v9281_v35 = vld [vmem:[%s12524_s14 + $0x40] ss:$16 sps:$4 sm:$0xff]  }
 0xcd5   :  { %v1935_v36 = vpop.xlane.xlu1 %1934 }
 0xcd6   :  { %9511 = vrcp.f32 %v1935_v36  ;;  %v9284_v36 = vld [vmem:[%s12524_s14 + $0x48] ss:$16 sps:$4 sm:$0xff]  }
 0xce0   :  { %v9512_v38 = vpop.eup %9511 }
 0xce1   :  { %v1937_v39 = vmul.f32 %v9512_v38, %v9510_v34  ;;  %v9286_v34 = vld [vmem:[%s12524_s14 + $0x4c] ss:$16 sps:$4 sm:$0xff]   ;;  %v9289_v38 = vld [vmem:[%s12524_s14 + $0x64] ss:$16 sps:$4 sm:$0xff]  }
 0xce3   :  { %8667 = vmatmul.mubr.msk.f32.vlgmr.msra.gmra.mrb[26].mxu1 %vm1926_vm3, %v1937_v39  ;;  %v9292_v39 = vld [vmem:[%s12524_s14 + $0x6c] ss:$16 sps:$4 sm:$0xff]  }
 0xce4   :  { %8670 = vmatpush3.xpose.msra.mxu1 %v2016_v40  ;;  %8671 = vmatprep.mubr.msk.f32.mxu1 %vm10203_vm0, %v10202_v45 }
 0xce5   :  { %8679 = vmatprep.subr.bf16.mxu1 %v10202_v45 }
 0xce7   :  { %8672 = vmatmul.mubr.f32.vlgmr.msra.gmra.mrb[28].mxu1 %v1851_v24 }
 0xce8   :  { %8695 = vmatprep.mubr.msk.bf16.mxu1 %vm10203_vm0, %v10202_v45  ;;  %8680 = vmatpush3.bf16.msra.mxu1 %v9261_v56  ;;  %v9310_v56 = vld [vmem:[%s12524_s14 + $0xcc] ss:$16 sps:$4 sm:$0xff]  }
 0xce9   :  { %8681 = vmatprep.subr.bf16.mxu1 %v10202_v45 }
 0xcec   :  { %8682 = vmatpush3.bf16.msra.mxu1 %v9262_v57  ;;  %v9305_v57 = vld [vmem:[%s12524_s14 + $0xc0] ss:$16 sps:$4 sm:$0xff]  }
 0xced   :  { %8683 = vmatprep.subr.bf16.mxu1 %v10202_v45 }
 0xcf0   :  { %8684 = vmatpush3.bf16.msra.mxu1 %v9263_v58  ;;  %v9308_v58 = vld [vmem:[%s12524_s14 + $0xc8] ss:$16 sps:$4 sm:$0xff]  }
 0xcf1   :  { %8685 = vmatprep.subr.bf16.mxu1 %v10202_v45 }
 0xcf4   :  { %8686 = vmatpush3.bf16.msra.mxu1 %v9264_v59  ;;  %v9313_v59 = vld [vmem:[%s12524_s14 + $0xe4] ss:$16 sps:$4 sm:$0xff]  }
 0xcf5   :  { %8687 = vmatprep.subr.bf16.mxu1 %v10202_v45 }
 0xcf8   :  { %8688 = vmatpush3.bf16.msra.mxu1 %v9265_v60  ;;  %v9316_v60 = vld [vmem:[%s12524_s14 + $0xec] ss:$16 sps:$4 sm:$0xff]  }
 0xcf9   :  { %8689 = vmatprep.subr.bf16.mxu1 %v10202_v45 }
 0xcfc   :  { %8690 = vmatpush3.bf16.msra.mxu1 %v9266_v61  ;;  %v9311_v61 = vld [vmem:[%s12524_s14 + $0xe0] ss:$16 sps:$4 sm:$0xff]  }
 0xcfd   :  { %8691 = vmatprep.subr.bf16.mxu1 %v10202_v45 }
 0xd00   :  { %8692 = vmatpush3.bf16.msra.mxu1 %v9267_v62  ;;  %v9314_v62 = vld [vmem:[%s12524_s14 + $0xe8] ss:$16 sps:$4 sm:$0xff]  }
 0xd01   :  { %8693 = vmatprep.subr.bf16.mxu1 %v10202_v45 }
 0xd04   :  { %8694 = vmatpush3.bf16.msra.mxu1 %v9268_v3 }
 0xdb6   :  { %v2011_v29 = vpop.f32.mrb[26].mxu1 }
 0xdb7   :  { %v8668_v41 = vpop.f32.mrb[27].mxu1 }
 0xdb8   :  { %v9290_v41 = vld [vmem:[%s12524_s14 + $0x68] ss:$16 sps:$4 sm:$0xff]  }
 0xdba   :  { %v2084_v42 = vpop.f32.mrb[28].mxu1 }
 0xdbb   :  { %v2088_v46 = vmul.f32 0.088388346, %v2084_v42  ;;  %v8673_v50 = vpop.f32.mrb[29].mxu1  ;;  %v9295_v42 = vld [vmem:[%s12524_s14 + $0x84] ss:$16 sps:$4 sm:$0xff]  }
 0xdbc   :  { %v9293_v50 = vld [vmem:[%s12524_s14 + $0x80] ss:$16 sps:$4 sm:$0xff]  }
 0xdbd   :  { %v2089_v52 = vsel %vm1926_vm3, %v2088_v46, -inf }
 0xdbe   :  { %2090 = vmax.xlane.f32.xlu0 %v2089_v52  ;;  %v9296_v52 = vld [vmem:[%s12524_s14 + $0x88] ss:$16 sps:$4 sm:$0xff]  }
 0xe4b   :  { %v2091_v53 = vpop.xlane.xlu0 %2090 }
 0xe4c   :  { %v2092_v2 = vsub.f32 %v2088_v46, %v2091_v53  ;;  %v9298_v46 = vld [vmem:[%s12524_s14 + $0x8c] ss:$16 sps:$4 sm:$0xff]   ;;  %v9301_v53 = vld [vmem:[%s12524_s14 + $0xa4] ss:$16 sps:$4 sm:$0xff]  }
 0xe4e   :  { %v2093_v6 = vmul.f32 1.442695, %v2092_v2  ;;  %v9304_v2 = vld [vmem:[%s12524_s14 + $0xac] ss:$16 sps:$4 sm:$0xff]  }
 0xe50   :  { %9513 = vpow2.f32 %v2093_v6  ;;  %v9299_v6 = vld [vmem:[%s12524_s14 + $0xa0] ss:$16 sps:$4 sm:$0xff]  }
 0xe5a   :  { %v9514_v54 = vpop.eup %9513 }
 0xe5b   :  { %v2095_v55 = vsel %vm1926_vm3, %v9514_v54, 0.0 }
 0xe5c   :  { %2096 = vadd.xlane.f32.xlu1 %v2095_v55  ;;  %v9307_v55 = vld [vmem:[%s12524_s14 + $0xc4] ss:$16 sps:$4 sm:$0xff]  }
 0xee9   :  { %v2097_v63 = vpop.xlane.xlu1 %2096 }
 0xeea   :  { %9515 = vrcp.f32 %v2097_v63 }
 0xef4   :  { %v9516_v0 = vpop.eup %9515 }
 0xef5   :  { %v2099_v1 = vmul.f32 %v9516_v0, %v9514_v54  ;;  %v9302_v54 = vld [vmem:[%s12524_s14 + $0xa8] ss:$16 sps:$4 sm:$0xff]  }
 0xef7   :  { %8677 = vmatmul.mubr.msk.f32.vlgmr.msra.gmra.mrb[20].mxu0 %vm1926_vm3, %v2099_v1 }
 0xef8   :  { %2572 = vmatprep.mubr.bf16.mxu0 %v10201_v43  ;;  %2541 = vmatpush1.bf16.msra.mxu0 %v9269_v17 }
 0xef9   :  { %2542 = vmatprep.subr.bf16.mxu0 %v9277_v19  ;;  %v9318_v19 = vld [vmem:[%s12526_s16 + $0xc0] sm:$0xff]  }
 0xefc   :  { %2543 = vmatpush1.bf16.msra.mxu0 %v9275_v22  ;;  %v9320_v22 = vld [vmem:[%s12526_s16 + $0x80] sm:$0xff]  }
 0xefd   :  { %2544 = vmatprep.subr.bf16.mxu0 %v9283_v33  ;;  %v9330_v33 = vld [vmem:[%s12526_s16 + $0xd8] sm:$0xff]  }
 0xf00   :  { %2545 = vmatpush1.bf16.msra.mxu0 %v9281_v35  ;;  %v9332_v35 = vld [vmem:[%s12526_s16 + $0x98] sm:$0xff]  }
 0xf01   :  { %2546 = vmatprep.subr.bf16.mxu0 %v9289_v38  ;;  %v9334_v38 = vld [vmem:[%s12526_s16 + $0xe0] sm:$0xff]  }
 0xfca   :  { %v2172_v4 = vpop.f32.mrb[20].mxu0 }
 0xfcb   :  { %v2192_v5 = vpack.c.bf16 %v2172_v4, %v2011_v29  ;;  %v8678_v7 = vpop.f32.mrb[21].mxu0  ;;  %v9287_v29 = vld [vmem:[%s12524_s14 + $0x60] ss:$16 sps:$4 sm:$0xff]  }
 0xfcc   :  { %2547 = vmatpush1.bf16.msra.mxu0 %v9287_v29  ;;  %v9336_v29 = vld [vmem:[%s12526_s16 + $0xa0] sm:$0xff]  }
 0xfcd   :  { %8696 = vmatmul.mubr.bf16.vlgmr.msra.gmra.mrb[32].mxu1 %v2192_v5  ;;  %2548 = vmatprep.subr.bf16.mxu0 %v9295_v42  ;;  %v9338_v42 = vld [vmem:[%s12526_s16 + $0xe8] sm:$0xff]  }
 0xfce   :  { %2615 = vmatprep.mubr.bf16.mxu1 %v10201_v43 }
 0xfd0   :  { %2549 = vmatpush1.bf16.msra.mxu0 %v9293_v50  ;;  %v9340_v50 = vld [vmem:[%s12526_s16 + $0xa8] sm:$0xff]  }
 0xfd1   :  { %2550 = vmatprep.subr.bf16.mxu0 %v9301_v53  ;;  %v9342_v53 = vld [vmem:[%s12526_s16 + $0xf0] sm:$0xff]  }
 0xfd4   :  { %2551 = vmatpush1.bf16.msra.mxu0 %v9299_v6  ;;  %v9344_v6 = vld [vmem:[%s12526_s16 + $0xb0] sm:$0xff]  }
 0xfd5   :  { %2552 = vmatprep.subr.bf16.mxu0 %v9307_v55  ;;  %v9346_v55 = vld [vmem:[%s12526_s16 + $0xf8] sm:$0xff]  }
 0xfd8   :  { %2553 = vmatpush1.bf16.msra.mxu0 %v9305_v57  ;;  %v9348_v57 = vld [vmem:[%s12526_s16 + $0xb8] sm:$0xff]  }
 0xfd9   :  { %2554 = vmatprep.subr.bf16.mxu0 %v9313_v59 }
 0xfdc   :  { %2555 = vmatpush1.bf16.msra.mxu0 %v9311_v61 }
0x10a0   :  { %v2280_v9 = vpop.f32.mrb[32].mxu1 }
0x10a1   :  { %v2281_v10 = vadd.f32 %v7774_v8, %v2280_v9  ;;  %v8697_v11 = vpop.f32.mrb[33].mxu1 }
0x10a2   :  { %v2283_v12 = vpop.f32.mrb[34].mxu1 }
0x10a3   :  { %v10886_v13 = vadd.f32 %v2281_v10, %v10804_v44  ;;  %v2284_v14 = vadd.f32 %v7774_v8, %v2283_v12  ;;  %v8698_v15 = vpop.f32.mrb[35].mxu1  ;;  %v9272_v44 = vld [vmem:[%s12524_s14 + $0x8] ss:$16 sps:$4 sm:$0xff]   ;;  %v7783_v8 = vld [vmem:[%s12551_s28 + $0x2] ss:$0 sm:$0xff] }
0x10a5   :  { %v10889_v16 = vadd.f32 %v2284_v14, %v10807_v51  ;;  %2291 = vadd.xlane.f32.xlu0 %v10886_v13  ;;  %v9274_v51 = vld [vmem:[%s12524_s14 + $0xc] ss:$16 sps:$4 sm:$0xff]   ;;  %v7784_v14 = vld [vmem:[%s12516_s6 + $0x2] ss:$0 sm:$0xff] }
0x10a6   :  { %2583 = vmatprep.subr.bf16.mxu1 %v9274_v51  ;;  %v9317_v51 = vld [vmem:[%s12526_s16 + $0x40] sm:$0xff]  }
0x10a7   :  { %2293 = vadd.xlane.f32.xlu1 %v10889_v16  ;;  %2584 = vmatpush1.bf16.msra.mxu1 %v9272_v44 }
0x10a8   :  { %2585 = vmatprep.subr.bf16.mxu1 %v9280_v20  ;;  %v9319_v20 = vld [vmem:[%s12526_s16] sm:$0xff]   ;;  %8229 = vmatprep.subr.bf16.mxu0 %v9317_v51 }
0x10ab   :  { %2586 = vmatpush1.bf16.msra.mxu1 %v9278_v23  ;;  %v9321_v23 = vld [vmem:[%s12526_s16 + $0x48] sm:$0xff]  }
0x10ac   :  { %2587 = vmatprep.subr.bf16.mxu1 %v9286_v34  ;;  %v9331_v34 = vld [vmem:[%s12526_s16 + $0x18] sm:$0xff]  }
0x10af   :  { %2588 = vmatpush1.bf16.msra.mxu1 %v9284_v36  ;;  %v9333_v36 = vld [vmem:[%s12526_s16 + $0x60] sm:$0xff]  }
0x10b0   :  { %2589 = vmatprep.subr.bf16.mxu1 %v9292_v39  ;;  %v9335_v39 = vld [vmem:[%s12526_s16 + $0x20] sm:$0xff]  }
0x10b3   :  { %2590 = vmatpush1.bf16.msra.mxu1 %v9290_v41  ;;  %v9337_v41 = vld [vmem:[%s12526_s16 + $0x68] sm:$0xff]  }
0x10b4   :  { %2591 = vmatprep.subr.bf16.mxu1 %v9298_v46  ;;  %v9339_v46 = vld [vmem:[%s12526_s16 + $0x28] sm:$0xff]  }
0x10b7   :  { %2592 = vmatpush1.bf16.msra.mxu1 %v9296_v52  ;;  %v9341_v52 = vld [vmem:[%s12526_s16 + $0x70] sm:$0xff]  }
0x10b8   :  { %2593 = vmatprep.subr.bf16.mxu1 %v9304_v2  ;;  %v9343_v2 = vld [vmem:[%s12526_s16 + $0x30] sm:$0xff]  }
0x10bb   :  { %2594 = vmatpush1.bf16.msra.mxu1 %v9302_v54  ;;  %v9345_v54 = vld [vmem:[%s12526_s16 + $0x78] sm:$0xff]  }
0x10bc   :  { %2595 = vmatprep.subr.bf16.mxu1 %v9310_v56  ;;  %v9347_v56 = vld [vmem:[%s12526_s16 + $0x38] sm:$0xff]  }
0x10bf   :  { %2596 = vmatpush1.bf16.msra.mxu1 %v9308_v58  ;;  %v2360_v58 = vlaneseq }
0x10c0   :  { %2597 = vmatprep.subr.bf16.mxu1 %v9316_v60 }
0x10c1   :  { %v11104_v59 = vshrl.u32 %v2360_v58, 7 }
0x10c3   :  { %2598 = vmatpush1.bf16.msra.mxu1 %v9314_v62  ;;  %v2362_v60 = vsub.s32 0, %v11104_v59  ;;  %v2370_v61 = vsub.s32 2, %v11104_v59  ;;  %v2358_v62 = vld [vmem:[#allocation12] ss:$2 sm:$0xf] }
0x10c4   :  { %8251 = vmatprep.subr.bf16.mxu1 %v9318_v19 }
0x1132   :  { %v2292_v24 = vpop.xlane.xlu0 %2291 }
0x1133   :  { %v2295_v25 = vmul.f32 0.0078125, %v2292_v24  ;;  %v9322_v24 = vld [vmem:[%s12526_s16 + $0xc8] sm:$0xff]  }
0x1134   :  { %v2294_v26 = vpop.xlane.xlu1 %2293 }
0x1135   :  { %v10918_v27 = vsub.f32 %v10886_v13, %v2295_v25  ;;  %v2296_v28 = vmul.f32 0.0078125, %v2294_v26  ;;  %v9323_v25 = vld [vmem:[%s12526_s16 + $0x8] sm:$0xff]  }
0x1136   :  { %v9324_v26 = vld [vmem:[%s12526_s16 + $0x88] sm:$0xff]  }
0x1137   :  { %v10921_v30 = vsub.f32 %v10889_v16, %v2296_v28  ;;  %v2299_v31 = vmul.f32 %v10918_v27, %v10918_v27  ;;  %v9326_v28 = vld [vmem:[%s12526_s16 + $0xd0] sm:$0xff]  }
0x1139   :  { %2301 = vadd.xlane.f32.xlu0 %v2299_v31  ;;  %v2300_v32 = vmul.f32 %v10921_v30, %v10921_v30  ;;  %v9328_v31 = vld [vmem:[%s12526_s16 + $0x90] sm:$0xff]  }
0x113b   :  { %2303 = vadd.xlane.f32.xlu1 %v2300_v32  ;;  %v9329_v32 = vld [vmem:[%s12526_s16 + $0x58] sm:$0xff]  }
0x11c6   :  { %v2302_v63 = vpop.xlane.xlu0 %2301 }
0x11c7   :  { %v2305_v0 = vmul.f32 0.0078125, %v2302_v63  ;;  %v2366_v63 = vsub.s32 1, %v11104_v59 }
0x11c8   :  { %v2304_v1 = vpop.xlane.xlu1 %2303 }
0x11c9   :  { %v2307_v3 = vadd.f32 1e-05, %v2305_v0  ;;  %v2306_v4 = vmul.f32 0.0078125, %v2304_v1  ;;  %v2374_v0 = vsub.s32 3, %v11104_v59  ;;  %v11112_v1 = vrot.slane %v2358_v62, %v2362_v60 }
0x11cb   :  { %9517 = vrsqrt.f32 %v2307_v3  ;;  %v2308_v5 = vadd.f32 1e-05, %v2306_v4  ;;  %v11116_v3 = vrot.slane %v2358_v62, %v2370_v61  ;;  %v11120_v4 = vrot.slane %v2358_v62, %v2366_v63 }
0x11cd   :  { %9519 = vrsqrt.f32 %v2308_v5  ;;  %v11124_v5 = vrot.slane %v2358_v62, %v2374_v0 }
0x11d5   :  { %v9518_v7 = vpop.eup %9517 }
0x11d6   :  { %v2311_v9 = vmul.f32 %v9518_v7, %v10918_v27  ;;  %v9325_v27 = vld [vmem:[%s12526_s16 + $0x50] sm:$0xff]  }
0x11d7   :  { %v9520_v10 = vpop.eup %9519 }
0x11d8   :  { %v2312_v11 = vmul.f32 %v9520_v10, %v10921_v30  ;;  %v2317_v12 = vmul.f32 %v7783_v8, %v2311_v9  ;;  %v9327_v30 = vld [vmem:[%s12526_s16 + $0x10] sm:$0xff]  }
0x11da   :  { %v2318_v15 = vmul.f32 %v7783_v8, %v2312_v11  ;;  %v2323_v17 = vadd.f32 %v7784_v14, %v2317_v12 }
0x11dc   :  { %v2324_v18 = vadd.f32 %v7784_v14, %v2318_v15 }
0x11de   :  { %v2357_v44 = vpack.c.bf16 %v2324_v18, %v2323_v17 }
0x11e0   :  { %2573 = vmatmul.mubr.bf16.vlgmr.msra.gmra.mrb[24].mxu0 %v2357_v44  ;;  %2616 = vmatmul.mubr.bf16.vlgmr.msra.gmra.mrb[36].mxu1 %v2357_v44 }
0x11e1   :  { %8230 = vmatpush3.bf16.msra.mxu0 %v9319_v20  ;;  %8252 = vmatpush3.bf16.msra.mxu1 %v9320_v22 }
0x11e2   :  { %8231 = vmatprep.subr.bf16.mxu0 %v9321_v23  ;;  %8253 = vmatprep.subr.bf16.mxu1 %v9322_v24 }
0x11e5   :  { %8232 = vmatpush3.bf16.msra.mxu0 %v9323_v25  ;;  %8254 = vmatpush3.bf16.msra.mxu1 %v9324_v26 }
0x11e6   :  { %8233 = vmatprep.subr.bf16.mxu0 %v9325_v27  ;;  %8255 = vmatprep.subr.bf16.mxu1 %v9326_v28 }
0x11e9   :  { %8234 = vmatpush3.bf16.msra.mxu0 %v9327_v30  ;;  %8256 = vmatpush3.bf16.msra.mxu1 %v9328_v31 }
0x11ea   :  { %8235 = vmatprep.subr.bf16.mxu0 %v9329_v32  ;;  %8257 = vmatprep.subr.bf16.mxu1 %v9330_v33 }
0x11ed   :  { %8236 = vmatpush3.bf16.msra.mxu0 %v9331_v34  ;;  %8258 = vmatpush3.bf16.msra.mxu1 %v9332_v35 }
0x11ee   :  { %8237 = vmatprep.subr.bf16.mxu0 %v9333_v36  ;;  %8259 = vmatprep.subr.bf16.mxu1 %v9334_v38 }
0x11f1   :  { %8238 = vmatpush3.bf16.msra.mxu0 %v9335_v39  ;;  %8260 = vmatpush3.bf16.msra.mxu1 %v9336_v29 }
0x11f2   :  { %8239 = vmatprep.subr.bf16.mxu0 %v9337_v41  ;;  %8261 = vmatprep.subr.bf16.mxu1 %v9338_v42 }
0x11f5   :  { %8240 = vmatpush3.bf16.msra.mxu0 %v9339_v46  ;;  %8262 = vmatpush3.bf16.msra.mxu1 %v9340_v50 }
0x11f6   :  { %8241 = vmatprep.subr.bf16.mxu0 %v9341_v52  ;;  %8263 = vmatprep.subr.bf16.mxu1 %v9342_v53 }
0x11f9   :  { %8242 = vmatpush3.bf16.msra.mxu0 %v9343_v2  ;;  %8264 = vmatpush3.bf16.msra.mxu1 %v9344_v6 }
0x11fa   :  { %8243 = vmatprep.subr.bf16.mxu0 %v9345_v54  ;;  %8265 = vmatprep.subr.bf16.mxu1 %v9346_v55 }
0x11fd   :  { %8244 = vmatpush3.bf16.msra.mxu0 %v9347_v56  ;;  %8266 = vmatpush3.bf16.msra.mxu1 %v9348_v57 }
0x11fe   :  { %8699 = vmatprep.subr.bf16.mxu1 %v10202_v45 }
0x12b3   :  { %v2574_v7 = vpop.f32.mrb[24].mxu0  ;;  %v2617_v8 = vpop.f32.mrb[36].mxu1 }
0x12b4   :  { %v11127_v9 = vadd.f32 %v2574_v7, %v11112_v1  ;;  %v11130_v10 = vadd.f32 %v2617_v8, %v11116_v3  ;;  %v2576_v11 = vpop.f32.mrb[25].mxu0  ;;  %v2619_v12 = vpop.f32.mrb[37].mxu1 }
0x12b5   :  { %v11133_v14 = vadd.f32 %v2576_v11, %v11120_v4  ;;  %v11136_v15 = vadd.f32 %v2619_v12, %v11124_v5  ;;  %v2578_v17 = vpop.f32.mrb[26].mxu0  ;;  %v2621_v18 = vpop.f32.mrb[38].mxu1 }
0x12b6   :  { %v2626_v44 = vmul.f32 %v11127_v9, %v11127_v9  ;;  %v2628_v51 = vmul.f32 %v11130_v10, %v11130_v10  ;;  %v11143_v19 = vadd.f32 %v2578_v17, %v11112_v1  ;;  %v11146_v20 = vadd.f32 %v2621_v18, %v11116_v3  ;;  %v2580_v22 = vpop.f32.mrb[27].mxu0  ;;  %v2623_v23 = vpop.f32.mrb[39].mxu1 }
0x12b7   :  { %v2627_v24 = vmul.f32 %v11133_v14, %v11133_v14  ;;  %v2629_v25 = vmul.f32 %v11136_v15, %v11136_v15  ;;  %v11153_v26 = vadd.f32 %v2580_v22, %v11120_v4  ;;  %v11156_v27 = vadd.f32 %v2623_v23, %v11124_v5 }
0x12b8   :  { %v2634_v28 = vmul.f32 %v2626_v44, %v11127_v9  ;;  %v2636_v30 = vmul.f32 %v2628_v51, %v11130_v10  ;;  %v2630_v31 = vmul.f32 %v11143_v19, %v11143_v19  ;;  %v2632_v32 = vmul.f32 %v11146_v20, %v11146_v20 }
0x12b9   :  { %v2635_v33 = vmul.f32 %v2627_v24, %v11133_v14  ;;  %v2637_v34 = vmul.f32 %v2629_v25, %v11136_v15  ;;  %v2631_v35 = vmul.f32 %v11153_v26, %v11153_v26  ;;  %v2633_v36 = vmul.f32 %v11156_v27, %v11156_v27 }
0x12ba   :  { %v2642_v38 = vmul.f32 0.044715, %v2634_v28  ;;  %v2644_v39 = vmul.f32 0.044715, %v2636_v30  ;;  %v2638_v29 = vmul.f32 %v2630_v31, %v11143_v19  ;;  %v2640_v41 = vmul.f32 %v2632_v32, %v11146_v20 }
0x12bb   :  { %v2643_v42 = vmul.f32 0.044715, %v2635_v33  ;;  %v2645_v46 = vmul.f32 0.044715, %v2637_v34  ;;  %v2639_v50 = vmul.f32 %v2631_v35, %v11153_v26  ;;  %v2641_v52 = vmul.f32 %v2633_v36, %v11156_v27 }
0x12bc   :  { %v2650_v53 = vadd.f32 %v2642_v38, %v11127_v9  ;;  %v2652_v2 = vadd.f32 %v2644_v39, %v11130_v10  ;;  %v2646_v6 = vmul.f32 0.044715, %v2638_v29  ;;  %v2648_v54 = vmul.f32 0.044715, %v2640_v41 }
0x12bd   :  { %v2651_v55 = vadd.f32 %v2643_v42, %v11133_v14  ;;  %v2653_v56 = vadd.f32 %v2645_v46, %v11136_v15  ;;  %v2647_v57 = vmul.f32 0.044715, %v2639_v50  ;;  %v2649_v58 = vmul.f32 0.044715, %v2641_v52 }
0x12be   :  { %v2658_v62 = vmul.f32 0.7978846, %v2650_v53  ;;  %v2660_v7 = vmul.f32 0.7978846, %v2652_v2  ;;  %v2654_v8 = vadd.f32 %v2646_v6, %v11143_v19  ;;  %v2656_v11 = vadd.f32 %v2648_v54, %v11146_v20 }
0x12bf   :  { %v2659_v12 = vmul.f32 0.7978846, %v2651_v55  ;;  %v2661_v17 = vmul.f32 0.7978846, %v2653_v56  ;;  %v2655_v18 = vadd.f32 %v2647_v57, %v11153_v26  ;;  %v2657_v44 = vadd.f32 %v2649_v58, %v11156_v27 }
0x12c0   :  { %9521 = vtanh.f32 %v2658_v62  ;;  %v2662_v51 = vmul.f32 0.7978846, %v2654_v8  ;;  %v2664_v22 = vmul.f32 0.7978846, %v2656_v11 }
0x12c1   :  { %9523 = vtanh.f32 %v2660_v7  ;;  %v2663_v23 = vmul.f32 0.7978846, %v2655_v18  ;;  %v2665_v24 = vmul.f32 0.7978846, %v2657_v44 }
0x12c2   :  { %9525 = vtanh.f32 %v2659_v12 }
0x12c3   :  { %9527 = vtanh.f32 %v2661_v17 }
0x12c4   :  { %9529 = vtanh.f32 %v2662_v51 }
0x12c5   :  { %9531 = vtanh.f32 %v2664_v22 }
0x12c6   :  { %9533 = vtanh.f32 %v2663_v23 }
0x12c7   :  { %9535 = vtanh.f32 %v2665_v24 }
0x12ca   :  { %v9522_v25 = vpop.eup %9521 }
0x12cb   :  { %v9524_v28 = vpop.eup %9523  ;;  %v2674_v30 = vadd.f32 1.0, %v9522_v25 }
0x12cc   :  { %v9526_v31 = vpop.eup %9525  ;;  %v2676_v32 = vadd.f32 1.0, %v9524_v28 }
0x12cd   :  { %v9528_v33 = vpop.eup %9527  ;;  %v2675_v34 = vadd.f32 1.0, %v9526_v31  ;;  %v2682_v39 = vmul.f32 0.5, %v2674_v30 }
0x12ce   :  { %v9530_v35 = vpop.eup %9529  ;;  %v2677_v36 = vadd.f32 1.0, %v9528_v33  ;;  %v2684_v42 = vmul.f32 0.5, %v2676_v32 }
0x12cf   :  { %v9532_v38 = vpop.eup %9531  ;;  %v2678_v29 = vadd.f32 1.0, %v9530_v35  ;;  %v2683_v2 = vmul.f32 0.5, %v2675_v34  ;;  %v2690_v56 = vmul.f32 %v2682_v39, %v11127_v9  ;;  %v9349_v39 = vld [vmem:[#allocation4 + $0xc0] ss:$12 sps:$4 sm:$0xff]  }
0x12d0   :  { %v9534_v41 = vpop.eup %9533  ;;  %v2680_v46 = vadd.f32 1.0, %v9532_v38  ;;  %v2685_v55 = vmul.f32 0.5, %v2677_v36  ;;  %v2692_v62 = vmul.f32 %v2684_v42, %v11130_v10  ;;  %v9355_v42 = vld [vmem:[#allocation4 + $0xdc] ss:$12 sps:$4 sm:$0xff]  }
0x12d1   :  { %v9536_v50 = vpop.eup %9535  ;;  %v2686_v52 = vmul.f32 0.5, %v2678_v29  ;;  %v2679_v53 = vadd.f32 1.0, %v9534_v41  ;;  %v2691_v11 = vmul.f32 %v2683_v2, %v11133_v14  ;;  %v9351_v29 = vld [vmem:[#allocation4 + $0xc4] ss:$12 sps:$4 sm:$0xff]   ;;  %v9352_v41 = vld [vmem:[#allocation4 + $0xc8] ss:$12 sps:$4 sm:$0xff]  }
0x12d2   :  { %v2688_v6 = vmul.f32 0.5, %v2680_v46  ;;  %v2681_v54 = vadd.f32 1.0, %v9536_v50  ;;  %v2693_v18 = vmul.f32 %v2685_v55, %v11136_v15  ;;  %3245 = vmatprep.subr.bf16.mxu0 %v9351_v29  ;;  %v9356_v46 = vld [vmem:[#allocation4 + $0xe0] ss:$12 sps:$4 sm:$0xff]   ;;  %v9353_v50 = vld [vmem:[#allocation4 + $0xd8] ss:$12 sps:$4 sm:$0xff]  }
0x12d3   :  { %v2694_v57 = vmul.f32 %v2686_v52, %v11143_v19  ;;  %v2687_v58 = vmul.f32 0.5, %v2679_v53  ;;  %v7817_v19 = vld [vmem:[#allocation13] ss:$0 sm:$0xff] }
0x12d4   :  { %v2696_v7 = vmul.f32 %v2688_v6, %v11146_v20  ;;  %v2689_v8 = vmul.f32 0.5, %v2681_v54 }
0x12d5   :  { %v2695_v12 = vmul.f32 %v2687_v58, %v11153_v26  ;;  %v2762_v17 = vpack.c.bf16 %v2694_v57, %v2690_v56  ;;  %v9359_v56 = vld [vmem:[#allocation4 + $0xf4] ss:$12 sps:$4 sm:$0xff]   ;;  %v9357_v57 = vld [vmem:[#allocation4 + $0xf0] ss:$12 sps:$4 sm:$0xff]   ;;  %v9360_v58 = vld [vmem:[#allocation4 + $0xf8] ss:$12 sps:$4 sm:$0xff]  }
0x12d6   :  { %v2697_v44 = vmul.f32 %v2689_v8, %v11156_v27  ;;  %v2764_v51 = vpack.c.bf16 %v2696_v7, %v2692_v62  ;;  %v9363_v62 = vld [vmem:[#allocation4 + $0x10c] ss:$12 sps:$4 sm:$0xff]   ;;  %v9361_v7 = vld [vmem:[#allocation4 + $0x108] ss:$12 sps:$4 sm:$0xff]   ;;  %v9364_v8 = vld [vmem:[#allocation4 + $0x110] ss:$12 sps:$4 sm:$0xff]  }
0x12d7   :  { %v2763_v22 = vpack.c.bf16 %v2695_v12, %v2691_v11  ;;  %v9367_v11 = vld [vmem:[#allocation4 + $0x124] ss:$12 sps:$4 sm:$0xff]   ;;  %v9365_v12 = vld [vmem:[#allocation4 + $0x120] ss:$12 sps:$4 sm:$0xff]  }
0x12d8   :  { %v2765_v9 = vpack.c.bf16 %v2697_v44, %v2693_v18  ;;  %v9371_v18 = vld [vmem:[#allocation4 + $0x13c] ss:$12 sps:$4 sm:$0xff]   ;;  %v9369_v44 = vld [vmem:[#allocation4 + $0x138] ss:$12 sps:$4 sm:$0xff]  }
0x12d9   :  { %2995 = vmatprep.mubr.bf16.mxu0 %v2763_v22  ;;  %v9375_v22 = vld [vmem:[#allocation4 + $0x154] ss:$12 sps:$4 sm:$0xff]  }
0x12da   :  { %3036 = vmatprep.mubr.bf16.mxu1 %v2765_v9  ;;  %2996 = vmatmul.mubr.bf16.vlgmr.msra.gmra.mrb[28].mxu0 %v2762_v17  ;;  %v9368_v17 = vld [vmem:[#allocation4 + $0x128] ss:$12 sps:$4 sm:$0xff]   ;;  %v9373_v9 = vld [vmem:[#allocation4 + $0x150] ss:$12 sps:$4 sm:$0xff]  }
0x12db   :  { %3037 = vmatmul.mubr.bf16.vlgmr.msra.gmra.mrb[40].mxu1 %v2764_v51  ;;  %3277 = vmatprep.mubr.bf16.mxu0 %v10201_v43  ;;  %v9372_v51 = vld [vmem:[#allocation4 + $0x140] ss:$12 sps:$4 sm:$0xff]  }
0x12dc   :  { %8715 = vmatprep.mubr.msk.bf16.mxu1 %vm10203_vm0, %v10202_v45  ;;  %8700 = vmatpush3.bf16.msra.mxu1 %v9352_v41 }
0x12dd   :  { %3246 = vmatpush1.bf16.msra.mxu0 %v9349_v39  ;;  %8701 = vmatprep.subr.bf16.mxu1 %v10202_v45 }
0x12de   :  { %3247 = vmatprep.subr.bf16.mxu0 %v9355_v42 }
0x12e0   :  { %8702 = vmatpush3.bf16.msra.mxu1 %v9356_v46 }
0x12e1   :  { %3248 = vmatpush1.bf16.msra.mxu0 %v9353_v50  ;;  %8703 = vmatprep.subr.bf16.mxu1 %v10202_v45 }
0x12e2   :  { %3249 = vmatprep.subr.bf16.mxu0 %v9359_v56 }
0x12e4   :  { %8704 = vmatpush3.bf16.msra.mxu1 %v9360_v58 }
0x12e5   :  { %3250 = vmatpush1.bf16.msra.mxu0 %v9357_v57  ;;  %8705 = vmatprep.subr.bf16.mxu1 %v10202_v45 }
0x12e6   :  { %3251 = vmatprep.subr.bf16.mxu0 %v9363_v62 }
0x12e8   :  { %8706 = vmatpush3.bf16.msra.mxu1 %v9364_v8 }
0x12e9   :  { %3252 = vmatpush1.bf16.msra.mxu0 %v9361_v7  ;;  %8707 = vmatprep.subr.bf16.mxu1 %v10202_v45 }
0x12ea   :  { %3253 = vmatprep.subr.bf16.mxu0 %v9367_v11 }
0x12ec   :  { %8708 = vmatpush3.bf16.msra.mxu1 %v9368_v17 }
0x12ed   :  { %3254 = vmatpush1.bf16.msra.mxu0 %v9365_v12  ;;  %8709 = vmatprep.subr.bf16.mxu1 %v10202_v45 }
0x12ee   :  { %3255 = vmatprep.subr.bf16.mxu0 %v9371_v18 }
0x12f0   :  { %8710 = vmatpush3.bf16.msra.mxu1 %v9372_v51 }
0x12f1   :  { %3256 = vmatpush1.bf16.msra.mxu0 %v9369_v44  ;;  %8711 = vmatprep.subr.bf16.mxu1 %v10202_v45 }
0x12f2   :  { %3257 = vmatprep.subr.bf16.mxu0 %v9375_v22 }
0x12f5   :  { %3258 = vmatpush1.bf16.msra.mxu0 %v9373_v9 }
0x13ad   :  { %v8245_v10 = vpop.f32.mrb[28].mxu0 }
0x13ae   :  { %v8267_v14 = vpop.f32.mrb[40].mxu1  ;;  %v8246_v20 = vpop.f32.mrb[29].mxu0 }
0x13af   :  { %v8247_v26 = vadd.f32 %v8246_v20, %v8245_v10  ;;  %v8268_v15 = vpop.f32.mrb[41].mxu1  ;;  %v8248_v23 = vpop.f32.mrb[30].mxu0  ;;  %v9376_v10 = vld [vmem:[#allocation4 + $0x158] ss:$12 sps:$4 sm:$0xff]   ;;  %v9380_v20 = vld [vmem:[#allocation4 + $0x170] ss:$12 sps:$4 sm:$0xff]  }
0x13b0   :  { %v8269_v27 = vadd.f32 %v8268_v15, %v8267_v14  ;;  %v8270_v24 = vpop.f32.mrb[42].mxu1  ;;  %v8249_v25 = vpop.f32.mrb[31].mxu0  ;;  %v9379_v14 = vld [vmem:[#allocation4 + $0x16c] ss:$12 sps:$4 sm:$0xff]   ;;  %8712 = vmatpush3.bf16.msra.mxu1 %v9376_v10 }
0x13b1   :  { %v2998_v28 = vadd.f32 %v8247_v26, %v7817_v19  ;;  %v8250_v30 = vadd.f32 %v8249_v25, %v8248_v23  ;;  %v8271_v31 = vpop.f32.mrb[43].mxu1  ;;  %3259 = vmatprep.subr.bf16.mxu0 %v9379_v14  ;;  %8713 = vmatprep.subr.bf16.mxu1 %v10202_v45 }
0x13b2   :  { %v8272_v32 = vadd.f32 %v8271_v31, %v8270_v24 }
0x13b3   :  { %v3039_v33 = vadd.f32 %v8269_v27, %v2998_v28  ;;  %v3001_v34 = vadd.f32 %v8250_v30, %v7817_v19  ;;  %v9377_v19 = vld [vmem:[#allocation4 + $0x168] ss:$12 sps:$4 sm:$0xff]   ;;  %v7850_v30 = vld [vmem:[%s12551_s28 + $0x3] ss:$0 sm:$0xff] }
0x13b4   :  { %3260 = vmatpush1.bf16.msra.mxu0 %v9377_v19  ;;  %8714 = vmatpush3.bf16.msra.mxu1 %v9380_v20 }
0x13b5   :  { %v3042_v35 = vadd.f32 %v8272_v32, %v3001_v34  ;;  %v11194_v36 = vadd.f32 %v3039_v33, %v10886_v13  ;;  %8719 = vmatprep.subr.mxu0 %v10202_v45  ;;  %8759 = vmatprep.subr.bf16.mxu1 %v10202_v45 }
0x13b7   :  { %3049 = vadd.xlane.f32.xlu0 %v11194_v36  ;;  %v11198_v38 = vadd.f32 %v3042_v35, %v10889_v16  ;;  %v7851_v35 = vld [vmem:[%s12516_s6 + $0x3] ss:$0 sm:$0xff] }
0x13b9   :  { %3051 = vadd.xlane.f32.xlu1 %v11198_v38 }
0x1444   :  { %v3050_v13 = vpop.xlane.xlu0 %3049 }
0x1445   :  { %v3053_v16 = vmul.f32 0.0078125, %v3050_v13 }
0x1446   :  { %v3052_v52 = vpop.xlane.xlu1 %3051 }
0x1447   :  { %v3055_v53 = vsub.f32 %v11194_v36, %v3053_v16  ;;  %v3054_v2 = vmul.f32 0.0078125, %v3052_v52 }
0x1449   :  { %v3056_v6 = vsub.f32 %v11198_v38, %v3054_v2  ;;  %v3057_v54 = vmul.f32 %v3055_v53, %v3055_v53 }
0x144b   :  { %3059 = vadd.xlane.f32.xlu0 %v3057_v54  ;;  %v3058_v55 = vmul.f32 %v3056_v6, %v3056_v6 }
0x144d   :  { %3061 = vadd.xlane.f32.xlu1 %v3058_v55 }
0x14d8   :  { %v3060_v26 = vpop.xlane.xlu0 %3059 }
0x14d9   :  { %v3063_v15 = vmul.f32 0.0078125, %v3060_v26 }
0x14da   :  { %v3062_v23 = vpop.xlane.xlu1 %3061 }
0x14db   :  { %v3065_v27 = vadd.f32 1e-05, %v3063_v15  ;;  %v3064_v24 = vmul.f32 0.0078125, %v3062_v23 }
0x14dd   :  { %9537 = vrsqrt.f32 %v3065_v27  ;;  %v3066_v25 = vadd.f32 1e-05, %v3064_v24 }
0x14df   :  { %9539 = vrsqrt.f32 %v3066_v25  ;;  %v9381_v25 = vld [vmem:[#allocation6 + $0x40] sm:$0xff]  }
0x14e7   :  { %v9538_v28 = vpop.eup %9537 }
0x14e8   :  { %v3069_v31 = vmul.f32 %v9538_v28, %v3055_v53 }
0x14e9   :  { %v9540_v32 = vpop.eup %9539 }
0x14ea   :  { %v3070_v33 = vmul.f32 %v9540_v32, %v3056_v6  ;;  %v3075_v34 = vmul.f32 %v7850_v30, %v3069_v31  ;;  %v9383_v31 = vld [vmem:[#allocation6 + $0x50] sm:$0xff]   ;;  %v9384_v32 = vld [vmem:[#allocation6 + $0x58] sm:$0xff]  }
0x14ec   :  { %v3076_v39 = vmul.f32 %v7850_v30, %v3070_v33  ;;  %v3081_v29 = vadd.f32 %v7851_v35, %v3075_v34  ;;  %v9382_v30 = vld [vmem:[#allocation6 + $0x48] sm:$0xff]   ;;  %v9385_v33 = vld [vmem:[#allocation6 + $0x60] sm:$0xff]  }
0x14ed   :  { %v9386_v34 = vld [vmem:[#allocation6 + $0x68] sm:$0xff]  }
0x14ee   :  { %v3082_v41 = vadd.f32 %v7851_v35, %v3076_v39  ;;  %v9387_v35 = vld [vmem:[#allocation6 + $0x70] sm:$0xff]   ;;  %v9388_v39 = vld [vmem:[#allocation6 + $0x78] sm:$0xff]  }
0x14f0   :  { %v3116_v42 = vpack.c.bf16 %v3082_v41, %v3081_v29 }
0x14f2   :  { %3278 = vmatmul.mubr.bf16.vlgmr.msra.gmra.mrb[32].mxu0 %v3116_v42  ;;  %8716 = vmatmul.mubr.bf16.vlgmr.msra.gmra.mrb[44].mxu1 %v3116_v42 }
0x14f3   :  { %8721 = vmatprep.mubr.msk.f32.mxu0 %vm10203_vm0, %v10202_v45  ;;  %8775 = vmatprep.mubr.msk.bf16.mxu1 %vm10203_vm0, %v10202_v45 }
0x15c5   :  { %v3279_v46 = vpop.f32.mrb[32].mxu0  ;;  %v3322_v50 = vpop.f32.mrb[44].mxu1 }
0x15c6   :  { %v3281_v13 = vpop.f32.mrb[33].mxu0  ;;  %v8717_v16 = vpop.f32.mrb[45].mxu1 }
0x15c7   :  { %v3283_v52 = vpop.f32.mrb[34].mxu0  ;;  %v3325_v53 = vpop.f32.mrb[46].mxu1  ;;  %8720 = vmatpush3.xpose.msra.mxu0 %v3281_v13 }
0x15c8   :  { %v3285_v2 = vpop.f32.mrb[35].mxu0  ;;  %v8718_v6 = vpop.f32.mrb[47].mxu1  ;;  %8724 = vmatprep.subr.mxu0 %v10202_v45 }
0x15ca   :  { %8722 = vmatmul.mubr.f32.vlgmr.msra.gmra.mrb[22].mxu0 %v3279_v46  ;;  %v7878_v46 = vld [vmem:[#allocation7 + $0x1] ss:$0 sm:$0xff] }
0x15cb   :  { %8725 = vmatpush3.msra.mxu0 %v3322_v50  ;;  %8726 = vmatprep.mubr.msk.f32.mxu0 %vm10203_vm0, %v10202_v45 }
0x15cc   :  { %8729 = vmatprep.subr.mxu0 %v10202_v45 }
0x169d   :  { %v3395_v54 = vpop.f32.mrb[22].mxu0 }
0x169e   :  { %v3399_v55 = vmul.f32 0.088388346, %v3395_v54  ;;  %v8723_v56 = vpop.f32.mrb[23].mxu0 }
0x169f   :  { %v9390_v56 = vld [vmem:[%s12520_s10 + $0x48] sm:$0xff]  }
0x16a0   :  { %v3400_v57 = vsel %vm1360_vm1, %v3399_v55, -inf }
0x16a1   :  { %3401 = vmax.xlane.f32.xlu0 %v3400_v57 }
0x172e   :  { %v3402_v58 = vpop.xlane.xlu0 %3401 }
0x172f   :  { %v3403_v62 = vsub.f32 %v3399_v55, %v3402_v58  ;;  %v9389_v55 = vld [vmem:[%s12520_s10 + $0x40] sm:$0xff]  }
0x1730   :  { %8760 = vmatpush3.bf16.msra.mxu1 %v9389_v55 }
0x1731   :  { %v3404_v7 = vmul.f32 1.442695, %v3403_v62  ;;  %8761 = vmatprep.subr.bf16.mxu1 %v10202_v45 }
0x1733   :  { %9541 = vpow2.f32 %v3404_v7 }
0x1734   :  { %8762 = vmatpush3.bf16.msra.mxu1 %v9390_v56 }
0x1735   :  { %8763 = vmatprep.subr.bf16.mxu1 %v10202_v45 }
0x173d   :  { %v9542_v8 = vpop.eup %9541 }
0x173e   :  { %v3406_v11 = vsel %vm1360_vm1, %v9542_v8, 0.0 }
0x173f   :  { %3407 = vadd.xlane.f32.xlu1 %v3406_v11 }
0x17cc   :  { %v3408_v12 = vpop.xlane.xlu1 %3407 }
0x17cd   :  { %9543 = vrcp.f32 %v3408_v12  ;;  %v9391_v12 = vld [vmem:[%s12520_s10 + $0x50] sm:$0xff]  }
0x17ce   :  { %8764 = vmatpush3.bf16.msra.mxu1 %v9391_v12 }
0x17cf   :  { %8765 = vmatprep.subr.bf16.mxu1 %v10202_v45 }
0x17d7   :  { %v9544_v17 = vpop.eup %9543 }
0x17d8   :  { %v3410_v18 = vmul.f32 %v9544_v17, %v9542_v8  ;;  %v9392_v17 = vld [vmem:[%s12520_s10 + $0x58] sm:$0xff]  }
0x17d9   :  { %8766 = vmatpush3.bf16.msra.mxu1 %v9392_v17 }
0x17da   :  { %8727 = vmatmul.mubr.msk.f32.vlgmr.msra.gmra.mrb[36].mxu0 %vm1360_vm1, %v3410_v18  ;;  %8767 = vmatprep.subr.bf16.mxu1 %v10202_v45  ;;  %v9393_v18 = vld [vmem:[%s12520_s10 + $0x60] sm:$0xff]  }
0x17db   :  { %8730 = vmatpush3.xpose.msra.mxu0 %v3285_v2  ;;  %8731 = vmatprep.mubr.msk.f32.mxu0 %vm10203_vm0, %v10202_v45 }
0x17dc   :  { %8734 = vmatprep.subr.mxu0 %v10202_v45 }
0x17dd   :  { %8768 = vmatpush3.bf16.msra.mxu1 %v9393_v18 }
0x17de   :  { %8732 = vmatmul.mubr.f32.vlgmr.msra.gmra.mrb[38].mxu0 %v3283_v52  ;;  %8769 = vmatprep.subr.bf16.mxu1 %v10202_v45 }
0x17df   :  { %8735 = vmatpush3.msra.mxu0 %v3325_v53  ;;  %8736 = vmatprep.mubr.msk.f32.mxu0 %vm10203_vm0, %v10202_v45 }
0x17e0   :  { %8739 = vmatprep.subr.bf16.mxu0 %v10202_v45 }
0x18ad   :  { %v3480_v44 = vpop.f32.mrb[36].mxu0 }
0x18ae   :  { %v8728_v51 = vpop.f32.mrb[37].mxu0 }
0x18af   :  { %v9395_v51 = vld [vmem:[%s12520_s10 + $0x70] sm:$0xff]  }
0x18b1   :  { %v3550_v22 = vpop.f32.mrb[38].mxu0 }
0x18b2   :  { %v3554_v9 = vmul.f32 0.088388346, %v3550_v22  ;;  %v8733_v10 = vpop.f32.mrb[39].mxu0  ;;  %v9396_v22 = vld [vmem:[%s12520_s10 + $0x78] sm:$0xff]  }
0x18b4   :  { %v3555_v14 = vsel %vm1360_vm1, %v3554_v9, -inf }
0x18b5   :  { %3556 = vmax.xlane.f32.xlu0 %v3555_v14 }
0x1942   :  { %v3557_v19 = vpop.xlane.xlu0 %3556 }
0x1943   :  { %v3558_v20 = vsub.f32 %v3554_v9, %v3557_v19 }
0x1945   :  { %v3559_v26 = vmul.f32 1.442695, %v3558_v20 }
0x1947   :  { %9545 = vpow2.f32 %v3559_v26 }
0x1951   :  { %v9546_v15 = vpop.eup %9545 }
0x1952   :  { %v3561_v23 = vsel %vm1360_vm1, %v9546_v15, 0.0 }
0x1953   :  { %3562 = vadd.xlane.f32.xlu1 %v3561_v23  ;;  %v7887_v23 = vld [vmem:[%s12551_s28 + $0x4] ss:$0 sm:$0xff] }
0x19e0   :  { %v3563_v27 = vpop.xlane.xlu1 %3562 }
0x19e1   :  { %9547 = vrcp.f32 %v3563_v27 }
0x19eb   :  { %v9548_v24 = vpop.eup %9547 }
0x19ec   :  { %v3565_v28 = vmul.f32 %v9548_v24, %v9546_v15 }
0x19ee   :  { %8737 = vmatmul.mubr.msk.f32.vlgmr.msra.gmra.mrb[40].mxu0 %vm1360_vm1, %v3565_v28 }
0x19ef   :  { %8740 = vmatpush3.bf16.msra.mxu0 %v9381_v25  ;;  %8755 = vmatprep.mubr.msk.bf16.mxu0 %vm10203_vm0, %v10202_v45 }
0x19f0   :  { %8741 = vmatprep.subr.bf16.mxu0 %v10202_v45 }
0x19f3   :  { %8742 = vmatpush3.bf16.msra.mxu0 %v9382_v30  ;;  %v7888_v30 = vld [vmem:[%s12516_s6 + $0x4] ss:$0 sm:$0xff] }
0x19f4   :  { %8743 = vmatprep.subr.bf16.mxu0 %v10202_v45 }
0x19f7   :  { %8744 = vmatpush3.bf16.msra.mxu0 %v9383_v31 }
0x19f8   :  { %8745 = vmatprep.subr.bf16.mxu0 %v10202_v45 }
0x19fb   :  { %8746 = vmatpush3.bf16.msra.mxu0 %v9384_v32 }
0x19fc   :  { %8747 = vmatprep.subr.bf16.mxu0 %v10202_v45 }
0x19ff   :  { %8748 = vmatpush3.bf16.msra.mxu0 %v9385_v33 }
0x1a00   :  { %8749 = vmatprep.subr.bf16.mxu0 %v10202_v45 }
0x1a03   :  { %8750 = vmatpush3.bf16.msra.mxu0 %v9386_v34 }
0x1a04   :  { %8751 = vmatprep.subr.bf16.mxu0 %v10202_v45 }
0x1a07   :  { %8752 = vmatpush3.bf16.msra.mxu0 %v9387_v35  ;;  %v4139_v35 = vrot.slane %v10771_v49, 4 }
0x1a08   :  { %8753 = vmatprep.subr.bf16.mxu0 %v10202_v45 }
0x1a0b   :  { %8754 = vmatpush3.bf16.msra.mxu0 %v9388_v39 }
0x1a0c   :  { %8779 = vmatprep.subr.mxu0 %v10202_v45 }
0x1ac1   :  { %v3635_v29 = vpop.f32.mrb[40].mxu0 }
0x1ac2   :  { %v3656_v41 = vpack.c.bf16 %v3635_v29, %v3480_v44  ;;  %v8738_v42 = vpop.f32.mrb[41].mxu0  ;;  %v9394_v44 = vld [vmem:[%s12520_s10 + $0x68] sm:$0xff]  }
0x1ac3   :  { %8770 = vmatpush3.bf16.msra.mxu1 %v9394_v44 }
0x1ac4   :  { %8756 = vmatmul.mubr.bf16.vlgmr.msra.gmra.mrb[44].mxu0 %v3656_v41  ;;  %8771 = vmatprep.subr.bf16.mxu1 %v10202_v45 }
0x1ac5   :  { %8780 = vmatpush3.xpose.msra.mxu0 %v10767_v47  ;;  %8781 = vmatprep.mubr.msk.f32.mxu0 %vm10203_vm0, %v10202_v45 }
0x1ac6   :  { %8784 = vmatprep.subr.mxu0 %v10202_v45 }
0x1ac7   :  { %8772 = vmatpush3.bf16.msra.mxu1 %v9395_v51 }
0x1ac8   :  { %8773 = vmatprep.subr.bf16.mxu1 %v10202_v45 }
0x1acb   :  { %8774 = vmatpush3.bf16.msra.mxu1 %v9396_v22 }
0x1acc   :  { %8794 = vmatprep.subr.mxu1 %v10202_v45 }
0x1b97   :  { %v3744_v50 = vpop.f32.mrb[44].mxu0 }
0x1b98   :  { %v3745_v13 = vadd.f32 %v7878_v46, %v3744_v50  ;;  %v8757_v16 = vpop.f32.mrb[45].mxu0 }
0x1b99   :  { %v3747_v52 = vpop.f32.mrb[46].mxu0 }
0x1b9a   :  { %v11253_v53 = vadd.f32 %v3745_v13, %v11194_v36  ;;  %v3748_v2 = vadd.f32 %v7878_v46, %v3747_v52  ;;  %v8758_v6 = vpop.f32.mrb[47].mxu0 }
0x1b9c   :  { %v11256_v54 = vadd.f32 %v3748_v2, %v11198_v38  ;;  %3755 = vadd.xlane.f32.xlu0 %v11253_v53 }
0x1b9e   :  { %3757 = vadd.xlane.f32.xlu1 %v11256_v54 }
0x1c29   :  { %v3756_v36 = vpop.xlane.xlu0 %3755 }
0x1c2a   :  { %v3759_v38 = vmul.f32 0.0078125, %v3756_v36 }
0x1c2b   :  { %v3758_v57 = vpop.xlane.xlu1 %3757 }
0x1c2c   :  { %v3761_v58 = vsub.f32 %v11253_v53, %v3759_v38  ;;  %v3760_v62 = vmul.f32 0.0078125, %v3758_v57 }
0x1c2e   :  { %v3762_v7 = vsub.f32 %v11256_v54, %v3760_v62  ;;  %v3763_v8 = vmul.f32 %v3761_v58, %v3761_v58 }
0x1c30   :  { %3765 = vadd.xlane.f32.xlu0 %v3763_v8  ;;  %v3764_v11 = vmul.f32 %v3762_v7, %v3762_v7 }
0x1c32   :  { %3767 = vadd.xlane.f32.xlu1 %v3764_v11 }
0x1cbd   :  { %v3766_v9 = vpop.xlane.xlu0 %3765 }
0x1cbe   :  { %v3769_v10 = vmul.f32 0.0078125, %v3766_v9 }
0x1cbf   :  { %v3768_v14 = vpop.xlane.xlu1 %3767 }
0x1cc0   :  { %v3771_v19 = vadd.f32 1e-05, %v3769_v10  ;;  %v3770_v20 = vmul.f32 0.0078125, %v3768_v14  ;;  %v9397_v10 = vld [vmem:[#allocation9 + $0x40] sm:$0xff]   ;;  %v9398_v14 = vld [vmem:[#allocation9 + $0x48] sm:$0xff]  }
0x1cc2   :  { %9549 = vrsqrt.f32 %v3771_v19  ;;  %v3772_v26 = vadd.f32 1e-05, %v3770_v20  ;;  %v9399_v19 = vld [vmem:[#allocation9 + $0x50] sm:$0xff]   ;;  %v9400_v20 = vld [vmem:[#allocation9 + $0x58] sm:$0xff]  }
0x1cc4   :  { %9551 = vrsqrt.f32 %v3772_v26  ;;  %v9401_v26 = vld [vmem:[#allocation9 + $0x60] sm:$0xff]  }
0x1ccc   :  { %v9550_v15 = vpop.eup %9549 }
0x1ccd   :  { %v3775_v27 = vmul.f32 %v9550_v15, %v3761_v58  ;;  %v4055_v58 = vrot.slane %v10767_v47, 4  ;;  %v9402_v15 = vld [vmem:[#allocation9 + $0x68] sm:$0xff]  }
0x1cce   :  { %v9552_v24 = vpop.eup %9551 }
0x1ccf   :  { %v3776_v25 = vmul.f32 %v9552_v24, %v3762_v7  ;;  %v3781_v28 = vmul.f32 %v7887_v23, %v3775_v27 }
0x1cd1   :  { %v3782_v31 = vmul.f32 %v7887_v23, %v3776_v25  ;;  %v3787_v32 = vadd.f32 %v7888_v30, %v3781_v28  ;;  %v9403_v23 = vld [vmem:[#allocation9 + $0x70] sm:$0xff]   ;;  %v9404_v28 = vld [vmem:[#allocation9 + $0x78] sm:$0xff]  }
0x1cd3   :  { %v3788_v33 = vadd.f32 %v7888_v30, %v3782_v31 }
0x1cd5   :  { %v3806_v34 = vpack.c.bf16 %v3788_v33, %v3787_v32  ;;  %v7917_v33 = vld [vmem:[#allocation10 + $0x1] ss:$0 sm:$0xff] }
0x1cd7   :  { %8776 = vmatmul.mubr.bf16.vlgmr.msra.gmra.mrb[48].mxu1 %v3806_v34 }
0x1cd8   :  { %8795 = vmatpush3.msk.msra.mxu1 %vm1941_vm2, %v4139_v35  ;;  %8796 = vmatprep.mubr.msk.f32.mxu1 %vm10203_vm0, %v10202_v45 }
0x1daa   :  { %v3889_v39 = vpop.f32.mrb[48].mxu1 }
0x1dab   :  { %v8777_v29 = vpop.f32.mrb[49].mxu1  ;;  %8782 = vmatmul.mubr.f32.vlgmr.msra.gmra.mrb[42].mxu0 %v3889_v39 }
0x1dac   :  { %8785 = vmatpush3.msk.msra.mxu0 %vm1941_vm2, %v10771_v49  ;;  %v3892_v41 = vpop.f32.mrb[50].mxu1  ;;  %8786 = vmatprep.mubr.msk.f32.mxu0 %vm10203_vm0, %v10202_v45 }
0x1dad   :  { %v8778_v42 = vpop.f32.mrb[51].mxu1  ;;  %8789 = vmatprep.subr.mxu0 %v10202_v45 }
0x1e7e   :  { %v3962_v46 = vpop.f32.mrb[42].mxu0 }
0x1e7f   :  { %v3966_v50 = vmul.f32 0.088388346, %v3962_v46  ;;  %v8783_v13 = vpop.f32.mrb[43].mxu0 }
0x1e81   :  { %v3967_v16 = vsel %vm1926_vm3, %v3966_v50, -inf }
0x1e82   :  { %3968 = vmax.xlane.f32.xlu0 %v3967_v16  ;;  %v9405_v16 = vld [vmem:[%s12524_s14 + $0x100] ss:$16 sps:$4 sm:$0xff]  }
0x1f0f   :  { %v3969_v52 = vpop.xlane.xlu0 %3968 }
0x1f10   :  { %v3970_v2 = vsub.f32 %v3966_v50, %v3969_v52  ;;  %v9407_v52 = vld [vmem:[%s12524_s14 + $0x104] ss:$16 sps:$4 sm:$0xff]  }
0x1f11   :  { %4582 = vmatprep.subr.bf16.mxu1 %v9407_v52 }
0x1f12   :  { %v3971_v6 = vmul.f32 1.442695, %v3970_v2  ;;  %v9413_v2 = vld [vmem:[%s12524_s14 + $0x124] ss:$16 sps:$4 sm:$0xff]  }
0x1f14   :  { %9553 = vpow2.f32 %v3971_v6  ;;  %v9416_v6 = vld [vmem:[%s12524_s14 + $0x12c] ss:$16 sps:$4 sm:$0xff]  }
0x1f1e   :  { %v9554_v55 = vpop.eup %9553 }
0x1f1f   :  { %v3973_v56 = vsel %vm1926_vm3, %v9554_v55, 0.0 }
0x1f20   :  { %3974 = vadd.xlane.f32.xlu1 %v3973_v56  ;;  %v9414_v56 = vld [vmem:[%s12524_s14 + $0x128] ss:$16 sps:$4 sm:$0xff]  }
0x1fad   :  { %v3975_v36 = vpop.xlane.xlu1 %3974 }
0x1fae   :  { %9555 = vrcp.f32 %v3975_v36 }
0x1fb8   :  { %v9556_v38 = vpop.eup %9555 }
0x1fb9   :  { %v3977_v57 = vmul.f32 %v9556_v38, %v9554_v55  ;;  %v9411_v55 = vld [vmem:[%s12524_s14 + $0x120] ss:$16 sps:$4 sm:$0xff]  }
0x1fbb   :  { %8787 = vmatmul.mubr.msk.f32.vlgmr.msra.gmra.mrb[48].mxu0 %vm1926_vm3, %v3977_v57 }
0x1fbc   :  { %8790 = vmatpush3.xpose.msra.mxu0 %v4055_v58  ;;  %8791 = vmatprep.mubr.msk.f32.mxu0 %vm10203_vm0, %v10202_v45 }
0x1fbd   :  { %8799 = vmatprep.subr.bf16.mxu0 %v10202_v45 }
0x1fbf   :  { %8792 = vmatmul.mubr.f32.vlgmr.msra.gmra.mrb[50].mxu0 %v3892_v41 }
0x1fc0   :  { %8815 = vmatprep.mubr.msk.bf16.mxu0 %vm10203_vm0, %v10202_v45  ;;  %8800 = vmatpush3.bf16.msra.mxu0 %v9397_v10  ;;  %v9423_v10 = vld [vmem:[%s12524_s14 + $0x160] ss:$16 sps:$4 sm:$0xff]  }
0x1fc1   :  { %8801 = vmatprep.subr.bf16.mxu0 %v10202_v45 }
0x1fc4   :  { %8802 = vmatpush3.bf16.msra.mxu0 %v9398_v14  ;;  %v9426_v14 = vld [vmem:[%s12524_s14 + $0x168] ss:$16 sps:$4 sm:$0xff]  }
0x1fc5   :  { %8803 = vmatprep.subr.bf16.mxu0 %v10202_v45 }
0x1fc8   :  { %8804 = vmatpush3.bf16.msra.mxu0 %v9399_v19  ;;  %v9431_v19 = vld [vmem:[%s12524_s14 + $0x184] ss:$16 sps:$4 sm:$0xff]  }
0x1fc9   :  { %8805 = vmatprep.subr.bf16.mxu0 %v10202_v45 }
0x1fcc   :  { %8806 = vmatpush3.bf16.msra.mxu0 %v9400_v20  ;;  %v9434_v20 = vld [vmem:[%s12524_s14 + $0x18c] ss:$16 sps:$4 sm:$0xff]  }
0x1fcd   :  { %8807 = vmatprep.subr.bf16.mxu0 %v10202_v45 }
0x1fd0   :  { %8808 = vmatpush3.bf16.msra.mxu0 %v9401_v26  ;;  %v9429_v26 = vld [vmem:[%s12524_s14 + $0x180] ss:$16 sps:$4 sm:$0xff]  }
0x1fd1   :  { %8809 = vmatprep.subr.bf16.mxu0 %v10202_v45 }
0x1fd4   :  { %8810 = vmatpush3.bf16.msra.mxu0 %v9402_v15  ;;  %v9432_v15 = vld [vmem:[%s12524_s14 + $0x188] ss:$16 sps:$4 sm:$0xff]  }
0x1fd5   :  { %8811 = vmatprep.subr.bf16.mxu0 %v10202_v45 }
0x1fd8   :  { %8812 = vmatpush3.bf16.msra.mxu0 %v9403_v23  ;;  %v9437_v23 = vld [vmem:[%s12524_s14 + $0x1a4] ss:$16 sps:$4 sm:$0xff]  }
0x1fd9   :  { %8813 = vmatprep.subr.bf16.mxu0 %v10202_v45 }
0x1fdc   :  { %8814 = vmatpush3.bf16.msra.mxu0 %v9404_v28  ;;  %v9443_v28 = vld [vmem:[%s12524_s14 + $0x1c4] ss:$16 sps:$4 sm:$0xff]  }
0x208e   :  { %v4050_v62 = vpop.f32.mrb[48].mxu0 }
0x208f   :  { %v8788_v7 = vpop.f32.mrb[49].mxu0 }
0x2092   :  { %v4123_v8 = vpop.f32.mrb[50].mxu0 }
0x2093   :  { %v4127_v11 = vmul.f32 0.088388346, %v4123_v8  ;;  %v8793_v12 = vpop.f32.mrb[51].mxu0 }
0x2095   :  { %v4128_v17 = vsel %vm1926_vm3, %v4127_v11, -inf }
0x2096   :  { %4129 = vmax.xlane.f32.xlu0 %v4128_v17  ;;  %v9419_v17 = vld [vmem:[%s12524_s14 + $0x144] ss:$16 sps:$4 sm:$0xff]  }
0x2123   :  { %v4130_v18 = vpop.xlane.xlu0 %4129 }
0x2124   :  { %v4131_v44 = vsub.f32 %v4127_v11, %v4130_v18  ;;  %v9422_v18 = vld [vmem:[%s12524_s14 + $0x14c] ss:$16 sps:$4 sm:$0xff]  }
0x2126   :  { %v4132_v51 = vmul.f32 1.442695, %v4131_v44  ;;  %v9417_v44 = vld [vmem:[%s12524_s14 + $0x140] ss:$16 sps:$4 sm:$0xff]  }
0x2128   :  { %9557 = vpow2.f32 %v4132_v51  ;;  %v9420_v51 = vld [vmem:[%s12524_s14 + $0x148] ss:$16 sps:$4 sm:$0xff]  }
0x2132   :  { %v9558_v22 = vpop.eup %9557 }
0x2133   :  { %v4134_v9 = vsel %vm1926_vm3, %v9558_v22, 0.0 }
0x2134   :  { %4135 = vadd.xlane.f32.xlu1 %v4134_v9  ;;  %v9428_v9 = vld [vmem:[%s12524_s14 + $0x16c] ss:$16 sps:$4 sm:$0xff]  }
0x21c1   :  { %v4136_v27 = vpop.xlane.xlu1 %4135 }
0x21c2   :  { %9559 = vrcp.f32 %v4136_v27  ;;  %v9440_v27 = vld [vmem:[%s12524_s14 + $0x1ac] ss:$16 sps:$4 sm:$0xff]  }
0x21cc   :  { %v9560_v24 = vpop.eup %9559 }
0x21cd   :  { %v4138_v25 = vmul.f32 %v9560_v24, %v9558_v22  ;;  %v9425_v22 = vld [vmem:[%s12524_s14 + $0x164] ss:$16 sps:$4 sm:$0xff]   ;;  %v9435_v24 = vld [vmem:[%s12524_s14 + $0x1a0] ss:$16 sps:$4 sm:$0xff]  }
0x21cf   :  { %8797 = vmatmul.mubr.msk.f32.vlgmr.msra.gmra.mrb[30].mxu1 %vm1926_vm3, %v4138_v25  ;;  %v9438_v25 = vld [vmem:[%s12524_s14 + $0x1a8] ss:$16 sps:$4 sm:$0xff]  }
0x21d0   :  { %4614 = vmatprep.mubr.bf16.mxu1 %v10201_v43  ;;  %4583 = vmatpush1.bf16.msra.mxu1 %v9405_v16 }
0x21d1   :  { %4584 = vmatprep.subr.bf16.mxu1 %v9413_v2  ;;  %v7926_v2 = vld [vmem:[%s12551_s28 + $0x5] ss:$0 sm:$0xff] }
0x21d4   :  { %4585 = vmatpush1.bf16.msra.mxu1 %v9411_v55 }
0x21d5   :  { %4586 = vmatprep.subr.bf16.mxu1 %v9419_v17  ;;  %v9453_v17 = vld [vmem:[%s12526_s16 + $0x140] sm:$0xff]  }
0x21d8   :  { %4587 = vmatpush1.bf16.msra.mxu1 %v9417_v44  ;;  %v9457_v44 = vld [vmem:[%s12526_s16 + $0x148] sm:$0xff]  }
0x21d9   :  { %4588 = vmatprep.subr.bf16.mxu1 %v9425_v22  ;;  %v9459_v22 = vld [vmem:[%s12526_s16 + $0x108] sm:$0xff]  }
0x21dc   :  { %4589 = vmatpush1.bf16.msra.mxu1 %v9423_v10  ;;  %v9461_v10 = vld [vmem:[%s12526_s16 + $0x150] sm:$0xff]  }
0x21dd   :  { %4590 = vmatprep.subr.bf16.mxu1 %v9431_v19  ;;  %v9463_v19 = vld [vmem:[%s12526_s16 + $0x110] sm:$0xff]  }
0x21e0   :  { %4591 = vmatpush1.bf16.msra.mxu1 %v9429_v26  ;;  %v9465_v26 = vld [vmem:[%s12526_s16 + $0x158] sm:$0xff]  }
0x21e1   :  { %4592 = vmatprep.subr.bf16.mxu1 %v9437_v23  ;;  %v9467_v23 = vld [vmem:[%s12526_s16 + $0x118] sm:$0xff]  }
0x21e4   :  { %4593 = vmatpush1.bf16.msra.mxu1 %v9435_v24  ;;  %v9469_v24 = vld [vmem:[%s12526_s16 + $0x160] sm:$0xff]  }
0x21e5   :  { %4594 = vmatprep.subr.bf16.mxu1 %v9443_v28  ;;  %v9471_v28 = vld [vmem:[%s12526_s16 + $0x120] sm:$0xff]  }
0x22a2   :  { %v4211_v30 = vpop.f32.mrb[30].mxu1 }
0x22a3   :  { %v4232_v31 = vpack.c.bf16 %v4211_v30, %v4050_v62  ;;  %v8798_v32 = vpop.f32.mrb[31].mxu1  ;;  %v9446_v30 = vld [vmem:[%s12524_s14 + $0x1cc] ss:$16 sps:$4 sm:$0xff]  }
0x22a4   :  { %v9444_v32 = vld [vmem:[%s12524_s14 + $0x1c8] ss:$16 sps:$4 sm:$0xff]  }
0x22a5   :  { %8816 = vmatmul.mubr.bf16.vlgmr.msra.gmra.mrb[52].mxu0 %v4232_v31  ;;  %v9441_v31 = vld [vmem:[%s12524_s14 + $0x1c0] ss:$16 sps:$4 sm:$0xff]  }
0x22a6   :  { %4657 = vmatprep.mubr.bf16.mxu0 %v10201_v43  ;;  %4595 = vmatpush1.bf16.msra.mxu1 %v9441_v31  ;;  %v9473_v31 = vld [vmem:[%s12526_s16 + $0x168] sm:$0xff]  }
0x2378   :  { %v4320_v34 = vpop.f32.mrb[52].mxu0 }
0x2379   :  { %v4321_v39 = vadd.f32 %v7917_v33, %v4320_v34  ;;  %v8817_v29 = vpop.f32.mrb[53].mxu0  ;;  %v9452_v34 = vld [vmem:[%s12524_s14 + $0x1ec] ss:$16 sps:$4 sm:$0xff]  }
0x237a   :  { %v4323_v41 = vpop.f32.mrb[54].mxu0  ;;  %v9450_v29 = vld [vmem:[%s12524_s14 + $0x1e8] ss:$16 sps:$4 sm:$0xff]  }
0x237b   :  { %v11335_v42 = vadd.f32 %v4321_v39, %v11253_v53  ;;  %v4324_v46 = vadd.f32 %v7917_v33, %v4323_v41  ;;  %v8818_v50 = vpop.f32.mrb[55].mxu0  ;;  %v9408_v53 = vld [vmem:[%s12524_s14 + $0x108] ss:$16 sps:$4 sm:$0xff]   ;;  %v9449_v33 = vld [vmem:[%s12524_s14 + $0x1e4] ss:$16 sps:$4 sm:$0xff]  }
0x237c   :  { %v9447_v39 = vld [vmem:[%s12524_s14 + $0x1e0] ss:$16 sps:$4 sm:$0xff]   ;;  %4596 = vmatprep.subr.bf16.mxu1 %v9449_v33  ;;  %v9475_v33 = vld [vmem:[%s12526_s16 + $0x128] sm:$0xff]  }
0x237d   :  { %v11338_v13 = vadd.f32 %v4324_v46, %v11256_v54  ;;  %4331 = vadd.xlane.f32.xlu0 %v11335_v42  ;;  %v9410_v54 = vld [vmem:[%s12524_s14 + $0x10c] ss:$16 sps:$4 sm:$0xff]   ;;  %4597 = vmatpush1.bf16.msra.mxu1 %v9447_v39  ;;  %v9477_v39 = vld [vmem:[%s12526_s16 + $0x170] sm:$0xff]  }
0x237e   :  { %4625 = vmatprep.subr.bf16.mxu0 %v9410_v54  ;;  %8325 = vmatprep.subr.bf16.mxu1 %v9453_v17 }
0x237f   :  { %4333 = vadd.xlane.f32.xlu1 %v11338_v13  ;;  %4626 = vmatpush1.bf16.msra.mxu0 %v9408_v53 }
0x2380   :  { %4627 = vmatprep.subr.bf16.mxu0 %v9416_v6 }
0x2383   :  { %4628 = vmatpush1.bf16.msra.mxu0 %v9414_v56 }
0x2384   :  { %4629 = vmatprep.subr.bf16.mxu0 %v9422_v18  ;;  %v9456_v18 = vld [vmem:[%s12526_s16 + $0x180] sm:$0xff]  }
0x2387   :  { %4630 = vmatpush1.bf16.msra.mxu0 %v9420_v51  ;;  %v9458_v51 = vld [vmem:[%s12526_s16 + $0x1c8] sm:$0xff]  }
0x2388   :  { %4631 = vmatprep.subr.bf16.mxu0 %v9428_v9  ;;  %v9460_v9 = vld [vmem:[%s12526_s16 + $0x188] sm:$0xff]  }
0x238b   :  { %4632 = vmatpush1.bf16.msra.mxu0 %v9426_v14  ;;  %v9462_v14 = vld [vmem:[%s12526_s16 + $0x1d0] sm:$0xff]  }
0x238c   :  { %4633 = vmatprep.subr.bf16.mxu0 %v9434_v20  ;;  %v9464_v20 = vld [vmem:[%s12526_s16 + $0x190] sm:$0xff]  }
0x238f   :  { %4634 = vmatpush1.bf16.msra.mxu0 %v9432_v15  ;;  %v9466_v15 = vld [vmem:[%s12526_s16 + $0x1d8] sm:$0xff]  }
0x2390   :  { %4635 = vmatprep.subr.bf16.mxu0 %v9440_v27  ;;  %v9468_v27 = vld [vmem:[%s12526_s16 + $0x198] sm:$0xff]  }
0x2393   :  { %4636 = vmatpush1.bf16.msra.mxu0 %v9438_v25  ;;  %v9470_v25 = vld [vmem:[%s12526_s16 + $0x1e0] sm:$0xff]  }
0x2394   :  { %4637 = vmatprep.subr.bf16.mxu0 %v9446_v30  ;;  %v9472_v30 = vld [vmem:[%s12526_s16 + $0x1a0] sm:$0xff]  }
0x2397   :  { %4638 = vmatpush1.bf16.msra.mxu0 %v9444_v32  ;;  %v9474_v32 = vld [vmem:[%s12526_s16 + $0x1e8] sm:$0xff]  }
0x2398   :  { %4639 = vmatprep.subr.bf16.mxu0 %v9452_v34  ;;  %v9476_v34 = vld [vmem:[%s12526_s16 + $0x1a8] sm:$0xff]  }
0x239b   :  { %4640 = vmatpush1.bf16.msra.mxu0 %v9450_v29  ;;  %v9478_v29 = vld [vmem:[%s12526_s16 + $0x1f0] sm:$0xff]  }
0x240a   :  { %v4332_v36 = vpop.xlane.xlu0 %4331 }
0x240b   :  { %v4335_v38 = vmul.f32 0.0078125, %v4332_v36 }
0x240c   :  { %v4334_v57 = vpop.xlane.xlu1 %4333 }
0x240d   :  { %v11367_v62 = vsub.f32 %v11335_v42, %v4335_v38  ;;  %v4336_v7 = vmul.f32 0.0078125, %v4334_v57  ;;  %v7927_v38 = vld [vmem:[%s12516_s6 + $0x5] ss:$0 sm:$0xff] }
0x240f   :  { %v11370_v8 = vsub.f32 %v11338_v13, %v4336_v7  ;;  %v4339_v11 = vmul.f32 %v11367_v62, %v11367_v62 }
0x2411   :  { %4341 = vadd.xlane.f32.xlu0 %v4339_v11  ;;  %v4340_v12 = vmul.f32 %v11370_v8, %v11370_v8 }
0x2413   :  { %4343 = vadd.xlane.f32.xlu1 %v4340_v12 }
0x249e   :  { %v4342_v41 = vpop.xlane.xlu0 %4341 }
0x249f   :  { %v4345_v46 = vmul.f32 0.0078125, %v4342_v41  ;;  %v9479_v41 = vld [vmem:[%s12526_s16 + $0x130] sm:$0xff]  }
0x24a0   :  { %v4344_v50 = vpop.xlane.xlu1 %4343 }
0x24a1   :  { %v4347_v16 = vadd.f32 1e-05, %v4345_v46  ;;  %v4346_v52 = vmul.f32 0.0078125, %v4344_v50  ;;  %v9480_v46 = vld [vmem:[%s12526_s16 + $0x1b0] sm:$0xff]   ;;  %v9481_v50 = vld [vmem:[%s12526_s16 + $0x178] sm:$0xff]  }
0x24a3   :  { %9561 = vrsqrt.f32 %v4347_v16  ;;  %v4348_v53 = vadd.f32 1e-05, %v4346_v52  ;;  %v9482_v16 = vld [vmem:[%s12526_s16 + $0x1f8] sm:$0xff]  }
0x24a4   :  { %v9483_v52 = vld [vmem:[%s12526_s16 + $0x138] sm:$0xff]  }
0x24a5   :  { %9563 = vrsqrt.f32 %v4348_v53  ;;  %v9484_v53 = vld [vmem:[%s12526_s16 + $0x1b8] sm:$0xff]  }
0x24ad   :  { %v9562_v54 = vpop.eup %9561 }
0x24ae   :  { %v4351_v6 = vmul.f32 %v9562_v54, %v11367_v62  ;;  %v9454_v62 = vld [vmem:[%s12526_s16 + $0x1c0] sm:$0xff]  }
0x24af   :  { %v9564_v55 = vpop.eup %9563  ;;  %8347 = vmatprep.subr.bf16.mxu0 %v9454_v62  ;;  %v9677_v54 = vld [vmem:[#allocation4 + $0x4] ss:$12 sps:$4 sm:$0xff]  }
0x24b0   :  { %v4352_v56 = vmul.f32 %v9564_v55, %v11370_v8  ;;  %v4357_v36 = vmul.f32 %v7926_v2, %v4351_v6  ;;  %v9455_v8 = vld [vmem:[%s12526_s16 + $0x100] sm:$0xff]  }
0x24b2   :  { %v4358_v57 = vmul.f32 %v7926_v2, %v4352_v56  ;;  %v4363_v7 = vadd.f32 %v7927_v38, %v4357_v36  ;;  %v4400_v2 = vld [vmem:[#allocation12 + $0x1] ss:$2 sm:$0xf] }
0x24b3   :  { %v11555_v6 = vrot.slane %v4400_v2, %v2362_v60  ;;  %v11559_v55 = vrot.slane %v4400_v2, %v2370_v61  ;;  %v11563_v56 = vrot.slane %v4400_v2, %v2366_v63  ;;  %v11567_v36 = vrot.slane %v4400_v2, %v2374_v0 }
0x24b4   :  { %v4364_v11 = vadd.f32 %v7927_v38, %v4358_v57 }
0x24b6   :  { %v4398_v12 = vpack.c.bf16 %v4364_v11, %v4363_v7 }
0x24b8   :  { %4615 = vmatmul.mubr.bf16.vlgmr.msra.gmra.mrb[52].mxu1 %v4398_v12  ;;  %4658 = vmatmul.mubr.bf16.vlgmr.msra.gmra.mrb[56].mxu0 %v4398_v12 }
0x24b9   :  { %8326 = vmatpush3.bf16.msra.mxu1 %v9455_v8  ;;  %8348 = vmatpush3.bf16.msra.mxu0 %v9456_v18 }
0x24ba   :  { %8327 = vmatprep.subr.bf16.mxu1 %v9457_v44  ;;  %8349 = vmatprep.subr.bf16.mxu0 %v9458_v51 }
0x24bd   :  { %8328 = vmatpush3.bf16.msra.mxu1 %v9459_v22  ;;  %8350 = vmatpush3.bf16.msra.mxu0 %v9460_v9 }
0x24be   :  { %8329 = vmatprep.subr.bf16.mxu1 %v9461_v10  ;;  %8351 = vmatprep.subr.bf16.mxu0 %v9462_v14 }
0x24c1   :  { %8330 = vmatpush3.bf16.msra.mxu1 %v9463_v19  ;;  %8352 = vmatpush3.bf16.msra.mxu0 %v9464_v20 }
0x24c2   :  { %8331 = vmatprep.subr.bf16.mxu1 %v9465_v26  ;;  %8353 = vmatprep.subr.bf16.mxu0 %v9466_v15 }
0x24c5   :  { %8332 = vmatpush3.bf16.msra.mxu1 %v9467_v23  ;;  %8354 = vmatpush3.bf16.msra.mxu0 %v9468_v27 }
0x24c6   :  { %8333 = vmatprep.subr.bf16.mxu1 %v9469_v24  ;;  %8355 = vmatprep.subr.bf16.mxu0 %v9470_v25 }
0x24c9   :  { %8334 = vmatpush3.bf16.msra.mxu1 %v9471_v28  ;;  %8356 = vmatpush3.bf16.msra.mxu0 %v9472_v30 }
0x24ca   :  { %8335 = vmatprep.subr.bf16.mxu1 %v9473_v31  ;;  %8357 = vmatprep.subr.bf16.mxu0 %v9474_v32 }
0x24cd   :  { %8336 = vmatpush3.bf16.msra.mxu1 %v9475_v33  ;;  %8358 = vmatpush3.bf16.msra.mxu0 %v9476_v34 }
0x24ce   :  { %8337 = vmatprep.subr.bf16.mxu1 %v9477_v39  ;;  %8359 = vmatprep.subr.bf16.mxu0 %v9478_v29 }
0x24d1   :  { %8338 = vmatpush3.bf16.msra.mxu1 %v9479_v41  ;;  %8360 = vmatpush3.bf16.msra.mxu0 %v9480_v46 }
0x24d2   :  { %8339 = vmatprep.subr.bf16.mxu1 %v9481_v50  ;;  %8361 = vmatprep.subr.bf16.mxu0 %v9482_v16 }
0x24d5   :  { %8340 = vmatpush3.bf16.msra.mxu1 %v9483_v52  ;;  %8362 = vmatpush3.bf16.msra.mxu0 %v9484_v53 }
0x24d6   :  { %8819 = vmatprep.subr.bf16.mxu1 %v10202_v45  ;;  %5267 = vmatprep.subr.bf16.mxu0 %v9677_v54 }
0x258b   :  { %v4616_v38 = vpop.f32.mrb[52].mxu1  ;;  %v4659_v57 = vpop.f32.mrb[56].mxu0 }
0x258c   :  { %v11570_v7 = vadd.f32 %v4616_v38, %v11555_v6  ;;  %v11573_v60 = vadd.f32 %v4659_v57, %v11559_v55  ;;  %v4618_v11 = vpop.f32.mrb[53].mxu1  ;;  %v4661_v12 = vpop.f32.mrb[57].mxu0 }
0x258d   :  { %v11576_v61 = vadd.f32 %v4618_v11, %v11563_v56  ;;  %v11579_v63 = vadd.f32 %v4661_v12, %v11567_v36  ;;  %v4620_v17 = vpop.f32.mrb[54].mxu1  ;;  %v4663_v59 = vpop.f32.mrb[58].mxu0 }
0x258e   :  { %v4668_v0 = vmul.f32 %v11570_v7, %v11570_v7  ;;  %v4670_v62 = vmul.f32 %v11573_v60, %v11573_v60  ;;  %v11586_v8 = vadd.f32 %v4620_v17, %v11555_v6  ;;  %v11589_v18 = vadd.f32 %v4663_v59, %v11559_v55  ;;  %v4622_v44 = vpop.f32.mrb[55].mxu1  ;;  %v4665_v51 = vpop.f32.mrb[59].mxu0 }
0x258f   :  { %v4669_v22 = vmul.f32 %v11576_v61, %v11576_v61  ;;  %v4671_v9 = vmul.f32 %v11579_v63, %v11579_v63  ;;  %v11596_v10 = vadd.f32 %v4622_v44, %v11563_v56  ;;  %v11599_v14 = vadd.f32 %v4665_v51, %v11567_v36 }
0x2590   :  { %v4676_v19 = vmul.f32 %v4668_v0, %v11570_v7  ;;  %v4678_v20 = vmul.f32 %v4670_v62, %v11573_v60  ;;  %v4672_v26 = vmul.f32 %v11586_v8, %v11586_v8  ;;  %v4674_v15 = vmul.f32 %v11589_v18, %v11589_v18 }
0x2591   :  { %v4677_v23 = vmul.f32 %v4669_v22, %v11576_v61  ;;  %v4679_v27 = vmul.f32 %v4671_v9, %v11579_v63  ;;  %v4673_v24 = vmul.f32 %v11596_v10, %v11596_v10  ;;  %v4675_v25 = vmul.f32 %v11599_v14, %v11599_v14 }
0x2592   :  { %v4684_v28 = vmul.f32 0.044715, %v4676_v19  ;;  %v4686_v30 = vmul.f32 0.044715, %v4678_v20  ;;  %v4680_v31 = vmul.f32 %v4672_v26, %v11586_v8  ;;  %v4682_v32 = vmul.f32 %v4674_v15, %v11589_v18 }
0x2593   :  { %v4685_v33 = vmul.f32 0.044715, %v4677_v23  ;;  %v4687_v34 = vmul.f32 0.044715, %v4679_v27  ;;  %v4681_v39 = vmul.f32 %v4673_v24, %v11596_v10  ;;  %v4683_v29 = vmul.f32 %v4675_v25, %v11599_v14 }
0x2594   :  { %v4692_v41 = vadd.f32 %v4684_v28, %v11570_v7  ;;  %v4694_v46 = vadd.f32 %v4686_v30, %v11573_v60  ;;  %v4688_v50 = vmul.f32 0.044715, %v4680_v31  ;;  %v4690_v16 = vmul.f32 0.044715, %v4682_v32 }
0x2595   :  { %v4693_v52 = vadd.f32 %v4685_v33, %v11576_v61  ;;  %v4695_v53 = vadd.f32 %v4687_v34, %v11579_v63  ;;  %v4689_v54 = vmul.f32 0.044715, %v4681_v39  ;;  %v4691_v2 = vmul.f32 0.044715, %v4683_v29 }
0x2596   :  { %v4700_v38 = vmul.f32 0.7978846, %v4692_v41  ;;  %v4702_v57 = vmul.f32 0.7978846, %v4694_v46  ;;  %v4696_v11 = vadd.f32 %v4688_v50, %v11586_v8  ;;  %v4698_v12 = vadd.f32 %v4690_v16, %v11589_v18 }
0x2597   :  { %v4701_v17 = vmul.f32 0.7978846, %v4693_v52  ;;  %v4703_v59 = vmul.f32 0.7978846, %v4695_v53  ;;  %v4697_v0 = vadd.f32 %v4689_v54, %v11596_v10  ;;  %v4699_v62 = vadd.f32 %v4691_v2, %v11599_v14 }
0x2598   :  { %9565 = vtanh.f32 %v4700_v38  ;;  %v4704_v44 = vmul.f32 0.7978846, %v4696_v11  ;;  %v4706_v51 = vmul.f32 0.7978846, %v4698_v12 }
0x2599   :  { %9567 = vtanh.f32 %v4702_v57  ;;  %v4705_v22 = vmul.f32 0.7978846, %v4697_v0  ;;  %v4707_v9 = vmul.f32 0.7978846, %v4699_v62 }
0x259a   :  { %9569 = vtanh.f32 %v4701_v17 }
0x259b   :  { %9571 = vtanh.f32 %v4703_v59 }
0x259c   :  { %9573 = vtanh.f32 %v4704_v44 }
0x259d   :  { %9575 = vtanh.f32 %v4706_v51 }
0x259e   :  { %9577 = vtanh.f32 %v4705_v22 }
0x259f   :  { %9579 = vtanh.f32 %v4707_v9  ;;  %v9685_v9 = vld [vmem:[#allocation4 + $0x64] ss:$12 sps:$4 sm:$0xff]  }
0x25a2   :  { %v9566_v19 = vpop.eup %9565 }
0x25a3   :  { %v9568_v20 = vpop.eup %9567  ;;  %v4716_v26 = vadd.f32 1.0, %v9566_v19  ;;  %v9686_v19 = vld [vmem:[#allocation4 + $0x60] ss:$12 sps:$4 sm:$0xff]  }
0x25a4   :  { %v9570_v15 = vpop.eup %9569  ;;  %v4718_v23 = vadd.f32 1.0, %v9568_v20  ;;  %v9687_v20 = vld [vmem:[#allocation4 + $0x7c] ss:$12 sps:$4 sm:$0xff]  }
0x25a5   :  { %v9572_v27 = vpop.eup %9571  ;;  %v4717_v24 = vadd.f32 1.0, %v9570_v15  ;;  %v4724_v31 = vmul.f32 0.5, %v4716_v26  ;;  %v9688_v26 = vld [vmem:[#allocation4 + $0x78] ss:$12 sps:$4 sm:$0xff]   ;;  %v9689_v15 = vld [vmem:[#allocation4 + $0x94] ss:$12 sps:$4 sm:$0xff]  }
0x25a6   :  { %v9574_v25 = vpop.eup %9573  ;;  %v4719_v28 = vadd.f32 1.0, %v9572_v27  ;;  %v4726_v34 = vmul.f32 0.5, %v4718_v23  ;;  %v9690_v23 = vld [vmem:[#allocation4 + $0x90] ss:$12 sps:$4 sm:$0xff]   ;;  %v9691_v27 = vld [vmem:[#allocation4 + $0xac] ss:$12 sps:$4 sm:$0xff]  }
0x25a7   :  { %v9576_v30 = vpop.eup %9575  ;;  %v4720_v32 = vadd.f32 1.0, %v9574_v25  ;;  %v4725_v50 = vmul.f32 0.5, %v4717_v24  ;;  %v4732_v54 = vmul.f32 %v4724_v31, %v11570_v7  ;;  %v9692_v24 = vld [vmem:[#allocation4 + $0xa8] ss:$12 sps:$4 sm:$0xff]  }
0x25a8   :  { %v9578_v33 = vpop.eup %9577  ;;  %v4722_v39 = vadd.f32 1.0, %v9576_v30  ;;  %v4727_v53 = vmul.f32 0.5, %v4719_v28  ;;  %v4734_v57 = vmul.f32 %v4726_v34, %v11573_v60  ;;  %v9678_v60 = vld [vmem:[#allocation4] ss:$12 sps:$4 sm:$0xff]  }
0x25a9   :  { %v9580_v29 = vpop.eup %9579  ;;  %v4728_v41 = vmul.f32 0.5, %v4720_v32  ;;  %v4721_v46 = vadd.f32 1.0, %v9578_v33  ;;  %v4733_v17 = vmul.f32 %v4725_v50, %v11576_v61  ;;  %v9679_v61 = vld [vmem:[#allocation4 + $0x1c] ss:$12 sps:$4 sm:$0xff]   ;;  %v8056_v30 = vld [vmem:[#allocation13 + $0x1] ss:$0 sm:$0xff] }
0x25aa   :  { %v4730_v16 = vmul.f32 0.5, %v4722_v39  ;;  %v4723_v52 = vadd.f32 1.0, %v9580_v29  ;;  %v4735_v62 = vmul.f32 %v4727_v53, %v11579_v63  ;;  %v9681_v63 = vld [vmem:[#allocation4 + $0x34] ss:$12 sps:$4 sm:$0xff]  }
0x25ab   :  { %v4736_v2 = vmul.f32 %v4728_v41, %v11586_v8  ;;  %v4729_v38 = vmul.f32 0.5, %v4721_v46  ;;  %v9680_v8 = vld [vmem:[#allocation4 + $0x18] ss:$12 sps:$4 sm:$0xff]  }
0x25ac   :  { %v4738_v11 = vmul.f32 %v4730_v16, %v11589_v18  ;;  %v4731_v12 = vmul.f32 0.5, %v4723_v52  ;;  %v9682_v18 = vld [vmem:[#allocation4 + $0x30] ss:$12 sps:$4 sm:$0xff]  }
0x25ad   :  { %v4737_v59 = vmul.f32 %v4729_v38, %v11596_v10  ;;  %v4805_v0 = vpack.c.bf16 %v4736_v2, %v4732_v54  ;;  %v9683_v10 = vld [vmem:[#allocation4 + $0x4c] ss:$12 sps:$4 sm:$0xff]  }
0x25ae   :  { %v4739_v44 = vmul.f32 %v4731_v12, %v11599_v14  ;;  %v4807_v51 = vpack.c.bf16 %v4738_v11, %v4734_v57  ;;  %v9684_v14 = vld [vmem:[#allocation4 + $0x48] ss:$12 sps:$4 sm:$0xff]   ;;  %v9486_v12 = vld [vmem:[#allocation18 + $0x8] sm:$0xff]  }
0x25af   :  { %v4806_v22 = vpack.c.bf16 %v4737_v59, %v4733_v17  ;;  %v9485_v11 = vld [vmem:[#allocation18] sm:$0xff]  }
0x25b0   :  { %v4808_v7 = vpack.c.bf16 %v4739_v44, %v4735_v62 }
0x25b1   :  { %5038 = vmatprep.mubr.bf16.mxu1 %v4806_v22 }
0x25b2   :  { %5079 = vmatprep.mubr.bf16.mxu0 %v4808_v7  ;;  %5039 = vmatmul.mubr.bf16.vlgmr.msra.gmra.mrb[56].mxu1 %v4805_v0  ;;  %v9488_v7 = vld [vmem:[#allocation18 + $0x18] sm:$0xff]  }
0x25b3   :  { %5080 = vmatmul.mubr.bf16.vlgmr.msra.gmra.mrb[60].mxu0 %v4807_v51  ;;  %8835 = vmatprep.mubr.msk.bf16.mxu1 %vm10203_vm0, %v10202_v45 }
0x25b4   :  { %5268 = vmatpush1.bf16.msra.mxu0 %v9678_v60  ;;  %5299 = vmatprep.mubr.bf16.mxu0 %v10201_v43  ;;  %v9489_v60 = vld [vmem:[#allocation18 + $0x20] sm:$0xff]  }
0x25b5   :  { %5269 = vmatprep.subr.bf16.mxu0 %v9679_v61  ;;  %8820 = vmatpush3.bf16.msra.mxu1 %v9485_v11  ;;  %v9490_v61 = vld [vmem:[#allocation18 + $0x28] sm:$0xff]  }
0x25b6   :  { %8821 = vmatprep.subr.bf16.mxu1 %v10202_v45  ;;  %v9702_v11 = vld [vmem:[%s12547_s7] sm:$0xff] }
0x25b8   :  { %5270 = vmatpush1.bf16.msra.mxu0 %v9680_v8  ;;  %v9491_v8 = vld [vmem:[#allocation18 + $0x30] sm:$0xff]  }
0x25b9   :  { %5271 = vmatprep.subr.bf16.mxu0 %v9681_v63  ;;  %8822 = vmatpush3.bf16.msra.mxu1 %v9486_v12  ;;  %v9492_v63 = vld [vmem:[#allocation18 + $0x38] sm:$0xff]  }
0x25ba   :  { %8823 = vmatprep.subr.bf16.mxu1 %v10202_v45 }
0x25bc   :  { %5272 = vmatpush1.bf16.msra.mxu0 %v9682_v18 }
0x25bd   :  { %5273 = vmatprep.subr.bf16.mxu0 %v9683_v10 }
0x25c0   :  { %5274 = vmatpush1.bf16.msra.mxu0 %v9684_v14 }
0x25c1   :  { %5275 = vmatprep.subr.bf16.mxu0 %v9685_v9 }
0x25c4   :  { %5276 = vmatpush1.bf16.msra.mxu0 %v9686_v19 }
0x25c5   :  { %5277 = vmatprep.subr.bf16.mxu0 %v9687_v20 }
0x25c8   :  { %5278 = vmatpush1.bf16.msra.mxu0 %v9688_v26 }
0x25c9   :  { %5279 = vmatprep.subr.bf16.mxu0 %v9689_v15  ;;  %v8089_v15 = vld [vmem:[#allocation15] ss:$0 sm:$0xff] }
0x25cc   :  { %5280 = vmatpush1.bf16.msra.mxu0 %v9690_v23 }
0x25cd   :  { %5281 = vmatprep.subr.bf16.mxu0 %v9691_v27 }
0x25d0   :  { %5282 = vmatpush1.bf16.msra.mxu0 %v9692_v24 }
0x25d1   :  { %8859 = vmatprep.subr.mxu0 %v10202_v45 }
0x2685   :  { %v8341_v25 = vpop.f32.mrb[56].mxu1 }
0x2686   :  { %v8363_v28 = vpop.f32.mrb[60].mxu0  ;;  %v8342_v31 = vpop.f32.mrb[57].mxu1 }
0x2687   :  { %v8343_v32 = vadd.f32 %v8342_v31, %v8341_v25  ;;  %v8364_v33 = vpop.f32.mrb[61].mxu0  ;;  %v8344_v34 = vpop.f32.mrb[58].mxu1 }
0x2688   :  { %v8365_v39 = vadd.f32 %v8364_v33, %v8363_v28  ;;  %v8366_v29 = vpop.f32.mrb[62].mxu0  ;;  %v8345_v41 = vpop.f32.mrb[59].mxu1  ;;  %v8090_v28 = vld [vmem:[#allocation16] ss:$0 sm:$0xff] }
0x2689   :  { %v5041_v46 = vadd.f32 %v8343_v32, %v8056_v30  ;;  %v8346_v50 = vadd.f32 %v8345_v41, %v8344_v34  ;;  %v8367_v16 = vpop.f32.mrb[63].mxu0  ;;  %v9693_v34 = vld [vmem:[#allocation4 + $0x8] ss:$12 sps:$4 sm:$0xff]   ;;  %v9696_v41 = vld [vmem:[#allocation4 + $0x50] ss:$12 sps:$4 sm:$0xff]  }
0x268a   :  { %v8368_v52 = vadd.f32 %v8367_v16, %v8366_v29  ;;  %v9695_v29 = vld [vmem:[#allocation4 + $0x38] ss:$12 sps:$4 sm:$0xff]  }
0x268b   :  { %v5082_v53 = vadd.f32 %v8365_v39, %v5041_v46  ;;  %v5044_v54 = vadd.f32 %v8346_v50, %v8056_v30  ;;  %v9694_v39 = vld [vmem:[#allocation4 + $0x20] ss:$12 sps:$4 sm:$0xff]   ;;  %v9697_v46 = vld [vmem:[#allocation4 + $0x68] ss:$12 sps:$4 sm:$0xff]   ;;  %v9699_v16 = vld [vmem:[#allocation4 + $0x98] ss:$12 sps:$4 sm:$0xff]  }
0x268c   :  { %v9698_v50 = vld [vmem:[#allocation4 + $0x80] ss:$12 sps:$4 sm:$0xff]  }
0x268d   :  { %v5085_v2 = vadd.f32 %v8368_v52, %v5044_v54  ;;  %v5088_v38 = vadd.f32 %v5082_v53, %v11335_v42  ;;  %v9700_v52 = vld [vmem:[#allocation4 + $0xb0] ss:$12 sps:$4 sm:$0xff]  }
0x268e   :  { %v9701_v54 = vld [vmem:[%s12548_s1] sm:$0xff] }
0x268f   :  { %5092 = vadd.xlane.f32.xlu0 %v5088_v38  ;;  %v5089_v57 = vadd.f32 %v5085_v2, %v11338_v13  ;;  %v9487_v13 = vld [vmem:[#allocation18 + $0x10] sm:$0xff]  }
0x2690   :  { %8824 = vmatpush3.bf16.msra.mxu1 %v9487_v13 }
0x2691   :  { %5094 = vadd.xlane.f32.xlu1 %v5089_v57  ;;  %8825 = vmatprep.subr.bf16.mxu1 %v10202_v45 }
0x2694   :  { %8826 = vmatpush3.bf16.msra.mxu1 %v9488_v7 }
0x2695   :  { %8827 = vmatprep.subr.bf16.mxu1 %v10202_v45 }
0x2698   :  { %8828 = vmatpush3.bf16.msra.mxu1 %v9489_v60 }
0x2699   :  { %8829 = vmatprep.subr.bf16.mxu1 %v10202_v45 }
0x269c   :  { %8830 = vmatpush3.bf16.msra.mxu1 %v9490_v61 }
0x269d   :  { %8831 = vmatprep.subr.bf16.mxu1 %v10202_v45 }
0x26a0   :  { %8832 = vmatpush3.bf16.msra.mxu1 %v9491_v8 }
0x26a1   :  { %8833 = vmatprep.subr.bf16.mxu1 %v10202_v45 }
0x26a4   :  { %8834 = vmatpush3.bf16.msra.mxu1 %v9492_v63 }
0x26a5   :  { %8839 = vmatprep.subr.bf16.mxu1 %v10202_v45 }
0x271c   :  { %v5093_v17 = vpop.xlane.xlu0 %5092 }
0x271d   :  { %v5096_v59 = vmul.f32 0.0078125, %v5093_v17  ;;  %v9703_v17 = vld [vmem:[%s12548_s1 + $0x8] sm:$0xff] }
0x271e   :  { %v5095_v0 = vpop.xlane.xlu1 %5094 }
0x271f   :  { %v5098_v62 = vsub.f32 %v5088_v38, %v5096_v59  ;;  %v5097_v44 = vmul.f32 0.0078125, %v5095_v0 }
0x2721   :  { %v5099_v51 = vsub.f32 %v5089_v57, %v5097_v44  ;;  %v5100_v22 = vmul.f32 %v5098_v62, %v5098_v62 }
0x2723   :  { %5102 = vadd.xlane.f32.xlu0 %v5100_v22  ;;  %v5101_v42 = vmul.f32 %v5099_v51, %v5099_v51 }
0x2725   :  { %5104 = vadd.xlane.f32.xlu1 %v5101_v42 }
0x27b0   :  { %v5103_v18 = vpop.xlane.xlu0 %5102 }
0x27b1   :  { %v5106_v10 = vmul.f32 0.0078125, %v5103_v18 }
0x27b2   :  { %v5105_v14 = vpop.xlane.xlu1 %5104 }
0x27b3   :  { %v5108_v9 = vadd.f32 1e-05, %v5106_v10  ;;  %v5107_v19 = vmul.f32 0.0078125, %v5105_v14 }
0x27b5   :  { %9581 = vrsqrt.f32 %v5108_v9  ;;  %v5109_v20 = vadd.f32 1e-05, %v5107_v19 }
0x27b7   :  { %9583 = vrsqrt.f32 %v5109_v20 }
0x27bf   :  { %v9582_v26 = vpop.eup %9581 }
0x27c0   :  { %v5112_v23 = vmul.f32 %v9582_v26, %v5098_v62 }
0x27c1   :  { %v9584_v27 = vpop.eup %9583 }
0x27c2   :  { %v5113_v24 = vmul.f32 %v9584_v27, %v5099_v51  ;;  %v5120_v25 = vmul.f32 %v8089_v15, %v5112_v23  ;;  %v9704_v23 = vld [vmem:[%s12551_s28] ss:$0 sm:$0xff] }
0x27c4   :  { %v5121_v30 = vmul.f32 %v8089_v15, %v5113_v24  ;;  %v5128_v31 = vadd.f32 %v8090_v28, %v5120_v25  ;;  %v9705_v25 = vld [vmem:[%s12516_s6] ss:$0 sm:$0xff] }
0x27c6   :  { %v5129_v32 = vadd.f32 %v8090_v28, %v5121_v30 }
0x27c8   :  { %v5146_v33 = vpack.c.bf16 %v5129_v32, %v5128_v31 }
0x27ca   :  { %8836 = vmatmul.mubr.bf16.vlgmr.msra.gmra.mrb[60].mxu1 %v5146_v33 }
0x27cb   :  { %8840 = vmatpush3.bf16.msra.mxu1 %v9693_v34  ;;  %8855 = vmatprep.mubr.msk.bf16.mxu1 %vm10203_vm0, %v10202_v45 }
0x27cc   :  { %8841 = vmatprep.subr.bf16.mxu1 %v10202_v45 }
0x27cf   :  { %8842 = vmatpush3.bf16.msra.mxu1 %v9694_v39 }
0x27d0   :  { %8843 = vmatprep.subr.bf16.mxu1 %v10202_v45 }
0x27d3   :  { %8844 = vmatpush3.bf16.msra.mxu1 %v9695_v29 }
0x27d4   :  { %8845 = vmatprep.subr.bf16.mxu1 %v10202_v45 }
0x27d7   :  { %8846 = vmatpush3.bf16.msra.mxu1 %v9696_v41 }
0x27d8   :  { %8847 = vmatprep.subr.bf16.mxu1 %v10202_v45 }
0x27db   :  { %8848 = vmatpush3.bf16.msra.mxu1 %v9697_v46 }
0x27dc   :  { %8849 = vmatprep.subr.bf16.mxu1 %v10202_v45 }
0x27df   :  { %8850 = vmatpush3.bf16.msra.mxu1 %v9698_v50 }
0x27e0   :  { %8851 = vmatprep.subr.bf16.mxu1 %v10202_v45 }
0x27e3   :  { %8852 = vmatpush3.bf16.msra.mxu1 %v9699_v16  ;;  %v9706_v16 = vld [vmem:[#allocation6] sm:$0xff]  }
0x27e4   :  { %8853 = vmatprep.subr.bf16.mxu1 %v10202_v45 }
0x27e7   :  { %8854 = vmatpush3.bf16.msra.mxu1 %v9700_v52  ;;  %v9707_v52 = vld [vmem:[#allocation6 + $0x8] sm:$0xff]  }
0x27e8   :  { %8864 = vmatprep.subr.mxu1 %v10202_v45 }
0x289d   :  { %v5229_v53 = vpop.f32.mrb[60].mxu1 }
0x289e   :  { %v11660_v2 = vadd.f32 %v9701_v54, %v5229_v53  ;;  %v8837_v38 = vpop.f32.mrb[61].mxu1  ;;  %v9708_v53 = vld [vmem:[#allocation6 + $0x10] sm:$0xff]   ;;  %v9709_v54 = vld [vmem:[#allocation6 + $0x18] sm:$0xff]  }
0x289f   :  { %v5232_v57 = vpop.f32.mrb[62].mxu1  ;;  %v9710_v38 = vld [vmem:[#allocation6 + $0x20] sm:$0xff]  }
0x28a0   :  { %v11666_v12 = vadd.f32 %v9702_v11, %v11660_v2  ;;  %v11671_v59 = vadd.f32 %v9703_v17, %v5232_v57  ;;  %v8838_v0 = vpop.f32.mrb[63].mxu1  ;;  %v9711_v57 = vld [vmem:[#allocation6 + $0x28] sm:$0xff]   ;;  %v9713_v17 = vld [vmem:[#allocation6 + $0x38] sm:$0xff]  }
0x28a2   :  { %v11674_v62 = vadd.f32 %v9702_v11, %v11671_v59  ;;  %5240 = vadd.xlane.f32.xlu0 %v11666_v12  ;;  %v9712_v11 = vld [vmem:[#allocation6 + $0x30] sm:$0xff]  }
0x28a4   :  { %5242 = vadd.xlane.f32.xlu1 %v11674_v62 }
0x292f   :  { %v5241_v44 = vpop.xlane.xlu0 %5240 }
0x2930   :  { %v5244_v51 = vmul.f32 0.0078125, %v5241_v44 }
0x2931   :  { %v5243_v22 = vpop.xlane.xlu1 %5242 }
0x2932   :  { %v5246_v42 = vsub.f32 %v11666_v12, %v5244_v51  ;;  %v5245_v13 = vmul.f32 0.0078125, %v5243_v22 }
0x2934   :  { %v5247_v7 = vsub.f32 %v11674_v62, %v5245_v13  ;;  %v5248_v60 = vmul.f32 %v5246_v42, %v5246_v42 }
0x2936   :  { %5250 = vadd.xlane.f32.xlu0 %v5248_v60  ;;  %v5249_v61 = vmul.f32 %v5247_v7, %v5247_v7 }
0x2938   :  { %5252 = vadd.xlane.f32.xlu1 %v5249_v61 }
0x29c3   :  { %v5251_v8 = vpop.xlane.xlu0 %5250 }
0x29c4   :  { %v5254_v63 = vmul.f32 0.0078125, %v5251_v8 }
0x29c5   :  { %v5253_v18 = vpop.xlane.xlu1 %5252 }
0x29c6   :  { %v5256_v10 = vadd.f32 1e-05, %v5254_v63  ;;  %v5255_v14 = vmul.f32 0.0078125, %v5253_v18 }
0x29c8   :  { %9585 = vrsqrt.f32 %v5256_v10  ;;  %v5257_v9 = vadd.f32 1e-05, %v5255_v14 }
0x29ca   :  { %9587 = vrsqrt.f32 %v5257_v9 }
0x29d2   :  { %v9586_v19 = vpop.eup %9585 }
0x29d3   :  { %v5260_v20 = vmul.f32 %v9586_v19, %v5246_v42 }
0x29d4   :  { %v9588_v26 = vpop.eup %9587 }
0x29d5   :  { %v5261_v15 = vmul.f32 %v9588_v26, %v5247_v7  ;;  %v5262_v27 = vmul.f32 %v9704_v23, %v5260_v20 }
0x29d7   :  { %v5263_v24 = vmul.f32 %v9704_v23, %v5261_v15  ;;  %v5264_v28 = vadd.f32 %v9705_v25, %v5262_v27 }
0x29d9   :  { %v5265_v30 = vadd.f32 %v9705_v25, %v5263_v24 }
0x29db   :  { %v5266_v31 = vpack.c.bf16 %v5265_v30, %v5264_v28  ;;  %v9714_v30 = vld [vmem:[%s12520_s10] sm:$0xff]  }
0x29dd   :  { %5300 = vmatmul.mubr.bf16.vlgmr.msra.gmra.mrb[64].mxu0 %v5266_v31  ;;  %8856 = vmatmul.mubr.bf16.vlgmr.msra.gmra.mrb[64].mxu1 %v5266_v31  ;;  %v9715_v31 = vld [vmem:[%s12520_s10 + $0x8] sm:$0xff]  }
0x29de   :  { %8861 = vmatprep.mubr.msk.f32.mxu0 %vm10203_vm0, %v10202_v45  ;;  %8866 = vmatprep.mubr.msk.f32.mxu1 %vm10203_vm0, %v10202_v45 }
0x2ab0   :  { %v5301_v32 = vpop.f32.mrb[64].mxu0  ;;  %v5344_v33 = vpop.f32.mrb[64].mxu1 }
0x2ab1   :  { %v5303_v34 = vpop.f32.mrb[65].mxu0  ;;  %v8857_v39 = vpop.f32.mrb[65].mxu1  ;;  %8865 = vmatpush3.msra.mxu1 %v5344_v33  ;;  %v9717_v33 = vld [vmem:[%s12520_s10 + $0x18] sm:$0xff]  }
0x2ab2   :  { %v5305_v29 = vpop.f32.mrb[66].mxu0  ;;  %v11690_v41 = vpop.f32.mrb[66].mxu1  ;;  %8860 = vmatpush3.xpose.msra.mxu0 %v5303_v34  ;;  %8874 = vmatprep.subr.mxu1 %v10202_v45  ;;  %v9718_v34 = vld [vmem:[%s12520_s10 + $0x20] sm:$0xff]   ;;  %v9719_v39 = vld [vmem:[%s12520_s10 + $0x28] sm:$0xff]  }
0x2ab3   :  { %v5307_v46 = vpop.f32.mrb[67].mxu0  ;;  %v8858_v50 = vpop.f32.mrb[67].mxu1  ;;  %8869 = vmatprep.subr.mxu0 %v10202_v45 }
0x2ab5   :  { %8862 = vmatmul.mubr.f32.vlgmr.msra.gmra.mrb[68].mxu0 %v5301_v32  ;;  %v9716_v32 = vld [vmem:[%s12520_s10 + $0x10] sm:$0xff]  }
0x2ab6   :  { %8870 = vmatpush3.xpose.msra.mxu0 %v5307_v46  ;;  %8871 = vmatprep.mubr.msk.f32.mxu0 %vm10203_vm0, %v10202_v45 }
0x2ab7   :  { %8879 = vmatprep.subr.bf16.mxu0 %v10202_v45 }
0x2ab9   :  { %8872 = vmatmul.mubr.f32.vlgmr.msra.gmra.mrb[70].mxu0 %v5305_v29  ;;  %v9720_v29 = vld [vmem:[%s12520_s10 + $0x30] sm:$0xff]  }
0x2aba   :  { %8880 = vmatpush3.bf16.msra.mxu0 %v9706_v16  ;;  %8895 = vmatprep.mubr.msk.bf16.mxu0 %vm10203_vm0, %v10202_v45 }
0x2abb   :  { %8881 = vmatprep.subr.bf16.mxu0 %v10202_v45 }
0x2abe   :  { %8882 = vmatpush3.bf16.msra.mxu0 %v9707_v52 }
0x2abf   :  { %8883 = vmatprep.subr.bf16.mxu0 %v10202_v45 }
0x2ac2   :  { %8884 = vmatpush3.bf16.msra.mxu0 %v9708_v53 }
0x2ac3   :  { %8885 = vmatprep.subr.bf16.mxu0 %v10202_v45 }
0x2ac6   :  { %8886 = vmatpush3.bf16.msra.mxu0 %v9709_v54 }
0x2ac7   :  { %8887 = vmatprep.subr.bf16.mxu0 %v10202_v45 }
0x2aca   :  { %8888 = vmatpush3.bf16.msra.mxu0 %v9710_v38  ;;  %v9722_v38 = vld [vmem:[#allocation7] ss:$0 sm:$0xff] }
0x2acb   :  { %8889 = vmatprep.subr.bf16.mxu0 %v10202_v45 }
0x2ace   :  { %8890 = vmatpush3.bf16.msra.mxu0 %v9711_v57 }
0x2acf   :  { %8891 = vmatprep.subr.bf16.mxu0 %v10202_v45 }
0x2ad2   :  { %8892 = vmatpush3.bf16.msra.mxu0 %v9712_v11 }
0x2ad3   :  { %8893 = vmatprep.subr.bf16.mxu0 %v10202_v45 }
0x2ad6   :  { %8894 = vmatpush3.bf16.msra.mxu0 %v9713_v17 }
0x2ad7   :  { %8919 = vmatprep.subr.mxu0 %v10202_v45 }
0x2b88   :  { %v5417_v0 = vpop.f32.mrb[68].mxu0 }
0x2b89   :  { %v5421_v44 = vmul.f32 0.088388346, %v5417_v0  ;;  %v8863_v51 = vpop.f32.mrb[69].mxu0 }
0x2b8b   :  { %v5422_v22 = vsel %vm1360_vm1, %v5421_v44, -inf }
0x2b8c   :  { %5423 = vmax.xlane.f32.xlu0 %v5422_v22  ;;  %v5572_v42 = vpop.f32.mrb[70].mxu0 }
0x2b8d   :  { %v5576_v13 = vmul.f32 0.088388346, %v5572_v42  ;;  %v8873_v7 = vpop.f32.mrb[71].mxu0 }
0x2b8f   :  { %v5577_v60 = vsel %vm1360_vm1, %v5576_v13, -inf }
0x2b90   :  { %5578 = vmax.xlane.f32.xlu1 %v5577_v60 }
0x2c19   :  { %v5424_v61 = vpop.xlane.xlu0 %5423 }
0x2c1a   :  { %v5425_v8 = vsub.f32 %v5421_v44, %v5424_v61 }
0x2c1c   :  { %v5426_v63 = vmul.f32 1.442695, %v5425_v8 }
0x2c1d   :  { %v5579_v18 = vpop.xlane.xlu1 %5578 }
0x2c1e   :  { %9589 = vpow2.f32 %v5426_v63  ;;  %v5580_v10 = vsub.f32 %v5576_v13, %v5579_v18 }
0x2c20   :  { %v5581_v14 = vmul.f32 1.442695, %v5580_v10 }
0x2c22   :  { %9591 = vpow2.f32 %v5581_v14 }
0x2c28   :  { %v9590_v9 = vpop.eup %9589 }
0x2c29   :  { %v5428_v19 = vsel %vm1360_vm1, %v9590_v9, 0.0 }
0x2c2a   :  { %5429 = vadd.xlane.f32.xlu0 %v5428_v19 }
0x2c2c   :  { %v9592_v20 = vpop.eup %9591 }
0x2c2d   :  { %v5583_v26 = vsel %vm1360_vm1, %v9592_v20, 0.0 }
0x2c2e   :  { %5584 = vadd.xlane.f32.xlu1 %v5583_v26 }
0x2cb7   :  { %v5430_v15 = vpop.xlane.xlu0 %5429 }
0x2cb8   :  { %9593 = vrcp.f32 %v5430_v15 }
0x2cbb   :  { %v5585_v23 = vpop.xlane.xlu1 %5584 }
0x2cbc   :  { %9595 = vrcp.f32 %v5585_v23 }
0x2cc2   :  { %v9594_v27 = vpop.eup %9593 }
0x2cc3   :  { %v5432_v24 = vmul.f32 %v9594_v27, %v9590_v9  ;;  %v9723_v27 = vld [vmem:[%s12551_s28 + $0x1] ss:$0 sm:$0xff] }
0x2cc5   :  { %8867 = vmatmul.mubr.msk.f32.vlgmr.msra.gmra.mrb[68].mxu1 %vm1360_vm1, %v5432_v24 }
0x2cc6   :  { %v9596_v25 = vpop.eup %9595  ;;  %8875 = vmatpush3.msra.mxu1 %v11690_v41  ;;  %8876 = vmatprep.mubr.msk.f32.mxu1 %vm10203_vm0, %v10202_v45  ;;  %v9721_v41 = vld [vmem:[%s12520_s10 + $0x38] sm:$0xff]  }
0x2cc7   :  { %v5587_v28 = vmul.f32 %v9596_v25, %v9592_v20  ;;  %8899 = vmatprep.subr.bf16.mxu1 %v10202_v45 }
0x2cc9   :  { %8877 = vmatmul.mubr.msk.f32.vlgmr.msra.gmra.mrb[70].mxu1 %vm1360_vm1, %v5587_v28  ;;  %v9724_v28 = vld [vmem:[%s12516_s6 + $0x1] ss:$0 sm:$0xff] }
0x2cca   :  { %8900 = vmatpush3.bf16.msra.mxu1 %v9714_v30  ;;  %8915 = vmatprep.mubr.msk.bf16.mxu1 %vm10203_vm0, %v10202_v45 }
0x2ccb   :  { %8901 = vmatprep.subr.bf16.mxu1 %v10202_v45 }
0x2cce   :  { %8902 = vmatpush3.bf16.msra.mxu1 %v9715_v31 }
0x2ccf   :  { %8903 = vmatprep.subr.bf16.mxu1 %v10202_v45 }
0x2cd2   :  { %8904 = vmatpush3.bf16.msra.mxu1 %v9716_v32 }
0x2cd3   :  { %8905 = vmatprep.subr.bf16.mxu1 %v10202_v45 }
0x2cd6   :  { %8906 = vmatpush3.bf16.msra.mxu1 %v9717_v33 }
0x2cd7   :  { %8907 = vmatprep.subr.bf16.mxu1 %v10202_v45 }
0x2cda   :  { %8908 = vmatpush3.bf16.msra.mxu1 %v9718_v34 }
0x2cdb   :  { %8909 = vmatprep.subr.bf16.mxu1 %v10202_v45 }
0x2cde   :  { %8910 = vmatpush3.bf16.msra.mxu1 %v9719_v39 }
0x2cdf   :  { %8911 = vmatprep.subr.bf16.mxu1 %v10202_v45 }
0x2ce2   :  { %8912 = vmatpush3.bf16.msra.mxu1 %v9720_v29 }
0x2ce3   :  { %8913 = vmatprep.subr.bf16.mxu1 %v10202_v45 }
0x2ce6   :  { %8914 = vmatpush3.bf16.msra.mxu1 %v9721_v41  ;;  %v9725_v41 = vld [vmem:[#allocation9] sm:$0xff]  }
0x2ce7   :  { %8924 = vmatprep.subr.mxu1 %v10202_v45 }
0x2d98   :  { %v5502_v46 = vpop.f32.mrb[68].mxu1 }
0x2d99   :  { %v8868_v50 = vpop.f32.mrb[69].mxu1 }
0x2d9a   :  { %v9729_v50 = vld [vmem:[#allocation9 + $0x20] sm:$0xff]  }
0x2d9c   :  { %v5657_v16 = vpop.f32.mrb[70].mxu1 }
0x2d9d   :  { %v5661_v52 = vpack.c.bf16 %v5657_v16, %v5502_v46  ;;  %v8878_v53 = vpop.f32.mrb[71].mxu1  ;;  %v9726_v46 = vld [vmem:[#allocation9 + $0x8] sm:$0xff]  }
0x2d9e   :  { %v9730_v16 = vld [vmem:[#allocation9 + $0x28] sm:$0xff]   ;;  %v9732_v53 = vld [vmem:[#allocation9 + $0x38] sm:$0xff]  }
0x2d9f   :  { %8896 = vmatmul.mubr.bf16.vlgmr.msra.gmra.mrb[72].mxu0 %v5661_v52  ;;  %v9731_v52 = vld [vmem:[#allocation9 + $0x30] sm:$0xff]  }
0x2da0   :  { %8920 = vmatpush3.xpose.msra.mxu0 %v10765_v37  ;;  %8921 = vmatprep.mubr.msk.f32.mxu0 %vm10203_vm0, %v10202_v45  ;;  %v9727_v37 = vld [vmem:[#allocation9 + $0x10] sm:$0xff]  }
0x2da1   :  { %8929 = vmatprep.subr.mxu0 %v10202_v45 }
0x2e72   :  { %v5696_v54 = vpop.f32.mrb[72].mxu0 }
0x2e73   :  { %v5697_v57 = vadd.f32 %v9722_v38, %v5696_v54  ;;  %v8897_v11 = vpop.f32.mrb[73].mxu0  ;;  %v9733_v54 = vld [vmem:[%s12524_s14 + $0xc] ss:$16 sps:$4 sm:$0xff]  }
0x2e74   :  { %v5699_v17 = vpop.f32.mrb[74].mxu0 }
0x2e75   :  { %v11756_v0 = vadd.f32 %v5697_v57, %v11666_v12  ;;  %v5700_v44 = vadd.f32 %v9722_v38, %v5699_v17  ;;  %v8898_v51 = vpop.f32.mrb[75].mxu0 }
0x2e77   :  { %v11759_v22 = vadd.f32 %v5700_v44, %v11674_v62  ;;  %5705 = vadd.xlane.f32.xlu0 %v11756_v0 }
0x2e79   :  { %5707 = vadd.xlane.f32.xlu1 %v11759_v22 }
0x2f04   :  { %v5706_v42 = vpop.xlane.xlu0 %5705 }
0x2f05   :  { %v5709_v13 = vmul.f32 0.0078125, %v5706_v42 }
0x2f06   :  { %v5708_v7 = vpop.xlane.xlu1 %5707 }
0x2f07   :  { %v5711_v60 = vsub.f32 %v11756_v0, %v5709_v13  ;;  %v5710_v61 = vmul.f32 0.0078125, %v5708_v7 }
0x2f09   :  { %v5712_v8 = vsub.f32 %v11759_v22, %v5710_v61  ;;  %v5713_v63 = vmul.f32 %v5711_v60, %v5711_v60 }
0x2f0b   :  { %5715 = vadd.xlane.f32.xlu0 %v5713_v63  ;;  %v5714_v12 = vmul.f32 %v5712_v8, %v5712_v8 }
0x2f0d   :  { %5717 = vadd.xlane.f32.xlu1 %v5714_v12 }
0x2f98   :  { %v5716_v18 = vpop.xlane.xlu0 %5715 }
0x2f99   :  { %v5719_v10 = vmul.f32 0.0078125, %v5716_v18 }
0x2f9a   :  { %v5718_v62 = vpop.xlane.xlu1 %5717 }
0x2f9b   :  { %v5721_v14 = vadd.f32 1e-05, %v5719_v10  ;;  %v5720_v9 = vmul.f32 0.0078125, %v5718_v62 }
0x2f9d   :  { %9597 = vrsqrt.f32 %v5721_v14  ;;  %v5722_v19 = vadd.f32 1e-05, %v5720_v9 }
0x2f9f   :  { %9599 = vrsqrt.f32 %v5722_v19 }
0x2fa7   :  { %v9598_v20 = vpop.eup %9597 }
0x2fa8   :  { %v5725_v26 = vmul.f32 %v9598_v20, %v5711_v60 }
0x2fa9   :  { %v9600_v15 = vpop.eup %9599 }
0x2faa   :  { %v5726_v23 = vmul.f32 %v9600_v15, %v5712_v8  ;;  %v5727_v24 = vmul.f32 %v9723_v27, %v5725_v26 }
0x2fac   :  { %v5728_v25 = vmul.f32 %v9723_v27, %v5726_v23  ;;  %v5729_v30 = vadd.f32 %v9724_v28, %v5727_v24  ;;  %v9734_v27 = vld [vmem:[%s12524_s14 + $0x4] ss:$16 sps:$4 sm:$0xff]   ;;  %v9735_v24 = vld [vmem:[%s12524_s14] ss:$16 sps:$4 sm:$0xff]  }
0x2fae   :  { %v5730_v31 = vadd.f32 %v9724_v28, %v5728_v25  ;;  %v9738_v25 = vld [vmem:[%s12524_s14 + $0x44] ss:$16 sps:$4 sm:$0xff]   ;;  %v9739_v28 = vld [vmem:[%s12524_s14 + $0x40] ss:$16 sps:$4 sm:$0xff]  }
0x2fb0   :  { %v5731_v32 = vpack.c.bf16 %v5730_v31, %v5729_v30  ;;  %v9740_v30 = vld [vmem:[%s12524_s14 + $0x64] ss:$16 sps:$4 sm:$0xff]   ;;  %v9741_v31 = vld [vmem:[%s12524_s14 + $0x60] ss:$16 sps:$4 sm:$0xff]  }
0x2fb2   :  { %8916 = vmatmul.mubr.bf16.vlgmr.msra.gmra.mrb[72].mxu1 %v5731_v32  ;;  %v9742_v32 = vld [vmem:[%s12524_s14 + $0x84] ss:$16 sps:$4 sm:$0xff]  }
0x2fb3   :  { %8925 = vmatpush3.msk.msra.mxu1 %vm1941_vm2, %v10769_v48  ;;  %8926 = vmatprep.mubr.msk.f32.mxu1 %vm10203_vm0, %v10202_v45  ;;  %v9736_v48 = vld [vmem:[%s12524_s14 + $0x24] ss:$16 sps:$4 sm:$0xff]  }
0x2fb4   :  { %8934 = vmatprep.subr.mxu1 %v10202_v45 }
0x3085   :  { %v5766_v33 = vpop.f32.mrb[72].mxu1 }
0x3086   :  { %v8917_v34 = vpop.f32.mrb[73].mxu1  ;;  %8922 = vmatmul.mubr.f32.vlgmr.msra.gmra.mrb[76].mxu0 %v5766_v33  ;;  %v9743_v33 = vld [vmem:[%s12524_s14 + $0x80] ss:$16 sps:$4 sm:$0xff]  }
0x3087   :  { %8930 = vmatpush3.xpose.msra.mxu0 %v2016_v40  ;;  %v5769_v39 = vpop.f32.mrb[74].mxu1  ;;  %8931 = vmatprep.mubr.msk.f32.mxu0 %vm10203_vm0, %v10202_v45  ;;  %v9728_v40 = vld [vmem:[#allocation9 + $0x18] sm:$0xff]   ;;  %v9744_v34 = vld [vmem:[%s12524_s14 + $0xa4] ss:$16 sps:$4 sm:$0xff]  }
0x3088   :  { %v8918_v29 = vpop.f32.mrb[75].mxu1  ;;  %8939 = vmatprep.subr.bf16.mxu0 %v10202_v45 }
0x3089   :  { %v9746_v29 = vld [vmem:[%s12524_s14 + $0xc4] ss:$16 sps:$4 sm:$0xff]  }
0x308a   :  { %8932 = vmatmul.mubr.f32.vlgmr.msra.gmra.mrb[78].mxu0 %v5769_v39  ;;  %v9745_v39 = vld [vmem:[%s12524_s14 + $0xa0] ss:$16 sps:$4 sm:$0xff]  }
0x308b   :  { %8940 = vmatpush3.bf16.msra.mxu0 %v9725_v41  ;;  %8955 = vmatprep.mubr.msk.bf16.mxu0 %vm10203_vm0, %v10202_v45  ;;  %v9747_v41 = vld [vmem:[%s12524_s14 + $0xc0] ss:$16 sps:$4 sm:$0xff]  }
0x308c   :  { %8941 = vmatprep.subr.bf16.mxu0 %v10202_v45 }
0x308f   :  { %8942 = vmatpush3.bf16.msra.mxu0 %v9726_v46  ;;  %v9748_v46 = vld [vmem:[%s12524_s14 + $0xe4] ss:$16 sps:$4 sm:$0xff]  }
0x3090   :  { %8943 = vmatprep.subr.bf16.mxu0 %v10202_v45 }
0x3093   :  { %8944 = vmatpush3.bf16.msra.mxu0 %v9727_v37  ;;  %v9749_v37 = vld [vmem:[%s12524_s14 + $0xe0] ss:$16 sps:$4 sm:$0xff]  }
0x3094   :  { %8945 = vmatprep.subr.bf16.mxu0 %v10202_v45 }
0x3097   :  { %8946 = vmatpush3.bf16.msra.mxu0 %v9728_v40  ;;  %v9750_v40 = vld [vmem:[%s12526_s16 + $0x40] sm:$0xff]  }
0x3098   :  { %8947 = vmatprep.subr.bf16.mxu0 %v10202_v45 }
0x309b   :  { %8948 = vmatpush3.bf16.msra.mxu0 %v9729_v50 }
0x309c   :  { %8949 = vmatprep.subr.bf16.mxu0 %v10202_v45 }
0x309f   :  { %8950 = vmatpush3.bf16.msra.mxu0 %v9730_v16 }
0x30a0   :  { %8951 = vmatprep.subr.bf16.mxu0 %v10202_v45 }
0x30a3   :  { %8952 = vmatpush3.bf16.msra.mxu0 %v9731_v52 }
0x30a4   :  { %8953 = vmatprep.subr.bf16.mxu0 %v10202_v45 }
0x30a7   :  { %8954 = vmatpush3.bf16.msra.mxu0 %v9732_v53 }
0x30a8   :  { %6197 = vmatprep.subr.bf16.mxu0 %v9733_v54 }
0x3159   :  { %v5839_v38 = vpop.f32.mrb[76].mxu0 }
0x315a   :  { %v5843_v57 = vmul.f32 0.088388346, %v5839_v38  ;;  %v8923_v11 = vpop.f32.mrb[77].mxu0  ;;  %v9751_v38 = vld [vmem:[%s12524_s14 + $0x8] ss:$16 sps:$4 sm:$0xff]  }
0x315b   :  { %v9753_v11 = vld [vmem:[%s12524_s14 + $0x28] ss:$16 sps:$4 sm:$0xff]  }
0x315c   :  { %v5844_v17 = vsel %vm1926_vm3, %v5843_v57, -inf }
0x315d   :  { %5845 = vmax.xlane.f32.xlu0 %v5844_v17  ;;  %v5994_v44 = vpop.f32.mrb[78].mxu0  ;;  %v9754_v17 = vld [vmem:[%s12524_s14 + $0x4c] ss:$16 sps:$4 sm:$0xff]  }
0x315e   :  { %v5998_v51 = vmul.f32 0.088388346, %v5994_v44  ;;  %v8933_v42 = vpop.f32.mrb[79].mxu0  ;;  %v9755_v44 = vld [vmem:[%s12524_s14 + $0x48] ss:$16 sps:$4 sm:$0xff]  }
0x315f   :  { %v9757_v42 = vld [vmem:[%s12524_s14 + $0x68] ss:$16 sps:$4 sm:$0xff]  }
0x3160   :  { %v5999_v13 = vsel %vm1926_vm3, %v5998_v51, -inf }
0x3161   :  { %6000 = vmax.xlane.f32.xlu1 %v5999_v13  ;;  %v9758_v13 = vld [vmem:[%s12524_s14 + $0x8c] ss:$16 sps:$4 sm:$0xff]  }
0x31ea   :  { %v5846_v7 = vpop.xlane.xlu0 %5845 }
0x31eb   :  { %v5847_v60 = vsub.f32 %v5843_v57, %v5846_v7  ;;  %v9752_v57 = vld [vmem:[%s12524_s14 + $0x2c] ss:$16 sps:$4 sm:$0xff]   ;;  %v9759_v7 = vld [vmem:[%s12524_s14 + $0x88] ss:$16 sps:$4 sm:$0xff]  }
0x31ed   :  { %v5848_v61 = vmul.f32 1.442695, %v5847_v60  ;;  %v9760_v60 = vld [vmem:[%s12524_s14 + $0xac] ss:$16 sps:$4 sm:$0xff]  }
0x31ee   :  { %v6001_v8 = vpop.xlane.xlu1 %6000 }
0x31ef   :  { %9601 = vpow2.f32 %v5848_v61  ;;  %v6002_v63 = vsub.f32 %v5998_v51, %v6001_v8  ;;  %v9756_v51 = vld [vmem:[%s12524_s14 + $0x6c] ss:$16 sps:$4 sm:$0xff]   ;;  %v9761_v61 = vld [vmem:[%s12524_s14 + $0xa8] ss:$16 sps:$4 sm:$0xff]  }
0x31f0   :  { %v9762_v8 = vld [vmem:[%s12524_s14 + $0xcc] ss:$16 sps:$4 sm:$0xff]  }
0x31f1   :  { %v6003_v12 = vmul.f32 1.442695, %v6002_v63  ;;  %v9763_v63 = vld [vmem:[%s12524_s14 + $0xc8] ss:$16 sps:$4 sm:$0xff]  }
0x31f3   :  { %9603 = vpow2.f32 %v6003_v12  ;;  %v9764_v12 = vld [vmem:[%s12524_s14 + $0xec] ss:$16 sps:$4 sm:$0xff]  }
0x31f9   :  { %v9602_v18 = vpop.eup %9601 }
0x31fa   :  { %v5850_v10 = vsel %vm1926_vm3, %v9602_v18, 0.0 }
0x31fb   :  { %5851 = vadd.xlane.f32.xlu0 %v5850_v10  ;;  %v9766_v10 = vld [vmem:[%s12526_s16 + $0xc0] sm:$0xff]  }
0x31fd   :  { %v9604_v62 = vpop.eup %9603 }
0x31fe   :  { %v6005_v14 = vsel %vm1926_vm3, %v9604_v62, 0.0 }
0x31ff   :  { %6006 = vadd.xlane.f32.xlu1 %v6005_v14  ;;  %v9767_v14 = vld [vmem:[#allocation10] ss:$0 sm:$0xff] }
0x3288   :  { %v5852_v9 = vpop.xlane.xlu0 %5851 }
0x3289   :  { %9605 = vrcp.f32 %v5852_v9 }
0x328c   :  { %v6007_v19 = vpop.xlane.xlu1 %6006 }
0x328d   :  { %9607 = vrcp.f32 %v6007_v19 }
0x3293   :  { %v9606_v20 = vpop.eup %9605 }
0x3294   :  { %v5854_v26 = vmul.f32 %v9606_v20, %v9602_v18  ;;  %v9765_v18 = vld [vmem:[%s12524_s14 + $0xe8] ss:$16 sps:$4 sm:$0xff]  }
0x3296   :  { %8927 = vmatmul.mubr.msk.f32.vlgmr.msra.gmra.mrb[76].mxu1 %vm1926_vm3, %v5854_v26 }
0x3297   :  { %v9608_v15 = vpop.eup %9607  ;;  %8935 = vmatpush3.msk.msra.mxu1 %vm1941_vm2, %v2100_v21  ;;  %8936 = vmatprep.mubr.msk.f32.mxu1 %vm10203_vm0, %v10202_v45  ;;  %v9737_v21 = vld [vmem:[%s12524_s14 + $0x20] ss:$16 sps:$4 sm:$0xff]  }
0x3298   :  { %v6009_v23 = vmul.f32 %v9608_v15, %v9604_v62  ;;  %6154 = vmatprep.subr.bf16.mxu1 %v9734_v27 }
0x329a   :  { %8937 = vmatmul.mubr.msk.f32.vlgmr.msra.gmra.mrb[78].mxu1 %vm1926_vm3, %v6009_v23 }
0x329b   :  { %6155 = vmatpush1.bf16.msra.mxu1 %v9735_v24  ;;  %6186 = vmatprep.mubr.bf16.mxu1 %v10201_v43 }
0x329c   :  { %6156 = vmatprep.subr.bf16.mxu1 %v9736_v48 }
0x329f   :  { %6157 = vmatpush1.bf16.msra.mxu1 %v9737_v21 }
0x32a0   :  { %6158 = vmatprep.subr.bf16.mxu1 %v9738_v25 }
0x32a3   :  { %6159 = vmatpush1.bf16.msra.mxu1 %v9739_v28 }
0x32a4   :  { %6160 = vmatprep.subr.bf16.mxu1 %v9740_v30 }
0x32a7   :  { %6161 = vmatpush1.bf16.msra.mxu1 %v9741_v31 }
0x32a8   :  { %6162 = vmatprep.subr.bf16.mxu1 %v9742_v32 }
0x32ab   :  { %6163 = vmatpush1.bf16.msra.mxu1 %v9743_v33 }
0x32ac   :  { %6164 = vmatprep.subr.bf16.mxu1 %v9744_v34 }
0x32af   :  { %6165 = vmatpush1.bf16.msra.mxu1 %v9745_v39 }
0x32b0   :  { %6166 = vmatprep.subr.bf16.mxu1 %v9746_v29 }
0x32b3   :  { %6167 = vmatpush1.bf16.msra.mxu1 %v9747_v41 }
0x32b4   :  { %6168 = vmatprep.subr.bf16.mxu1 %v9748_v46 }
0x32b7   :  { %6169 = vmatpush1.bf16.msra.mxu1 %v9749_v37 }
0x32b8   :  { %8430 = vmatprep.subr.bf16.mxu1 %v9750_v40 }
0x3369   :  { %v5924_v50 = vpop.f32.mrb[76].mxu1 }
0x336a   :  { %v8928_v16 = vpop.f32.mrb[77].mxu1 }
0x336d   :  { %v6079_v52 = vpop.f32.mrb[78].mxu1 }
0x336e   :  { %v6083_v53 = vpack.c.bf16 %v6079_v52, %v5924_v50  ;;  %v8938_v54 = vpop.f32.mrb[79].mxu1  ;;  %v9768_v50 = vld [vmem:[%s12551_s28 + $0x2] ss:$0 sm:$0xff] }
0x3370   :  { %8956 = vmatmul.mubr.bf16.vlgmr.msra.gmra.mrb[80].mxu0 %v6083_v53  ;;  %v9769_v53 = vld [vmem:[%s12516_s6 + $0x2] ss:$0 sm:$0xff] }
0x3371   :  { %6198 = vmatpush1.bf16.msra.mxu0 %v9751_v38  ;;  %6229 = vmatprep.mubr.bf16.mxu0 %v10201_v43 }
0x3372   :  { %6199 = vmatprep.subr.bf16.mxu0 %v9752_v57 }
0x3375   :  { %6200 = vmatpush1.bf16.msra.mxu0 %v9753_v11  ;;  %v9770_v11 = vld [vmem:[%s12526_s16] sm:$0xff]  }
0x3376   :  { %6201 = vmatprep.subr.bf16.mxu0 %v9754_v17  ;;  %v9771_v17 = vld [vmem:[%s12526_s16 + $0x80] sm:$0xff]  }
0x3379   :  { %6202 = vmatpush1.bf16.msra.mxu0 %v9755_v44  ;;  %v9772_v44 = vld [vmem:[%s12526_s16 + $0x48] sm:$0xff]  }
0x337a   :  { %6203 = vmatprep.subr.bf16.mxu0 %v9756_v51  ;;  %v9773_v51 = vld [vmem:[%s12526_s16 + $0xc8] sm:$0xff]  }
0x337d   :  { %6204 = vmatpush1.bf16.msra.mxu0 %v9757_v42  ;;  %v9774_v42 = vld [vmem:[%s12526_s16 + $0x8] sm:$0xff]  }
0x337e   :  { %6205 = vmatprep.subr.bf16.mxu0 %v9758_v13  ;;  %v9775_v13 = vld [vmem:[%s12526_s16 + $0x88] sm:$0xff]  }
0x3381   :  { %6206 = vmatpush1.bf16.msra.mxu0 %v9759_v7  ;;  %v9776_v7 = vld [vmem:[%s12526_s16 + $0x50] sm:$0xff]  }
0x3382   :  { %6207 = vmatprep.subr.bf16.mxu0 %v9760_v60  ;;  %v9777_v60 = vld [vmem:[%s12526_s16 + $0xd0] sm:$0xff]  }
0x3385   :  { %6208 = vmatpush1.bf16.msra.mxu0 %v9761_v61  ;;  %v9778_v61 = vld [vmem:[%s12526_s16 + $0x10] sm:$0xff]  }
0x3386   :  { %6209 = vmatprep.subr.bf16.mxu0 %v9762_v8  ;;  %v9779_v8 = vld [vmem:[%s12526_s16 + $0x90] sm:$0xff]  }
0x3389   :  { %6210 = vmatpush1.bf16.msra.mxu0 %v9763_v63  ;;  %v9780_v63 = vld [vmem:[%s12526_s16 + $0x58] sm:$0xff]  }
0x338a   :  { %6211 = vmatprep.subr.bf16.mxu0 %v9764_v12  ;;  %v9781_v12 = vld [vmem:[%s12526_s16 + $0xd8] sm:$0xff]  }
0x338d   :  { %6212 = vmatpush1.bf16.msra.mxu0 %v9765_v18  ;;  %v9782_v18 = vld [vmem:[%s12526_s16 + $0x18] sm:$0xff]  }
0x338e   :  { %8452 = vmatprep.subr.bf16.mxu0 %v9766_v10  ;;  %v9783_v10 = vld [vmem:[%s12526_s16 + $0x98] sm:$0xff]  }
0x3443   :  { %v6118_v62 = vpop.f32.mrb[80].mxu0 }
0x3444   :  { %v6119_v9 = vadd.f32 %v9767_v14, %v6118_v62  ;;  %v8957_v19 = vpop.f32.mrb[81].mxu0  ;;  %v9784_v62 = vld [vmem:[%s12526_s16 + $0x60] sm:$0xff]  }
0x3445   :  { %v6121_v20 = vpop.f32.mrb[82].mxu0  ;;  %v9787_v19 = vld [vmem:[%s12526_s16 + $0xa0] sm:$0xff]  }
0x3446   :  { %v11906_v26 = vadd.f32 %v6119_v9, %v11756_v0  ;;  %v6122_v15 = vadd.f32 %v9767_v14, %v6121_v20  ;;  %v8958_v23 = vpop.f32.mrb[83].mxu0  ;;  %v9785_v14 = vld [vmem:[%s12526_s16 + $0xe0] sm:$0xff]   ;;  %v9788_v20 = vld [vmem:[%s12526_s16 + $0x68] sm:$0xff]  }
0x3447   :  { %v9786_v9 = vld [vmem:[%s12526_s16 + $0x20] sm:$0xff]   ;;  %v9790_v23 = vld [vmem:[%s12526_s16 + $0x28] sm:$0xff]  }
0x3448   :  { %v11909_v27 = vadd.f32 %v6122_v15, %v11759_v22  ;;  %6127 = vadd.xlane.f32.xlu0 %v11906_v26  ;;  %v9789_v15 = vld [vmem:[%s12526_s16 + $0xe8] sm:$0xff]  }
0x344a   :  { %6129 = vadd.xlane.f32.xlu1 %v11909_v27 }
0x34d5   :  { %v6128_v24 = vpop.xlane.xlu0 %6127 }
0x34d6   :  { %v6131_v48 = vmul.f32 0.0078125, %v6128_v24  ;;  %v9791_v24 = vld [vmem:[%s12526_s16 + $0xa8] sm:$0xff]  }
0x34d7   :  { %v6130_v21 = vpop.xlane.xlu1 %6129 }
0x34d8   :  { %v6133_v25 = vsub.f32 %v11906_v26, %v6131_v48  ;;  %v6132_v28 = vmul.f32 0.0078125, %v6130_v21  ;;  %v9792_v48 = vld [vmem:[%s12526_s16 + $0x70] sm:$0xff]  }
0x34d9   :  { %v9793_v21 = vld [vmem:[%s12526_s16 + $0xf0] sm:$0xff]  }
0x34da   :  { %v6134_v30 = vsub.f32 %v11909_v27, %v6132_v28  ;;  %v6135_v31 = vmul.f32 %v6133_v25, %v6133_v25  ;;  %v9795_v28 = vld [vmem:[%s12526_s16 + $0xb0] sm:$0xff]  }
0x34dc   :  { %6137 = vadd.xlane.f32.xlu0 %v6135_v31  ;;  %v6136_v0 = vmul.f32 %v6134_v30, %v6134_v30  ;;  %v9797_v31 = vld [vmem:[%s12526_s16 + $0xf8] sm:$0xff]  }
0x34de   :  { %6139 = vadd.xlane.f32.xlu1 %v6136_v0  ;;  %v9798_v0 = vld [vmem:[%s12526_s16 + $0x38] sm:$0xff]  }
0x3569   :  { %v6138_v32 = vpop.xlane.xlu0 %6137 }
0x356a   :  { %v6141_v33 = vmul.f32 0.0078125, %v6138_v32  ;;  %v9799_v32 = vld [vmem:[%s12526_s16 + $0xb8] sm:$0xff]  }
0x356b   :  { %v6140_v22 = vpop.xlane.xlu1 %6139 }
0x356c   :  { %v6143_v34 = vadd.f32 1e-05, %v6141_v33  ;;  %v6142_v39 = vmul.f32 0.0078125, %v6140_v22  ;;  %v9800_v33 = vld [vmem:[#allocation4 + $0xc4] ss:$12 sps:$4 sm:$0xff]  }
0x356e   :  { %9609 = vrsqrt.f32 %v6143_v34  ;;  %v6144_v29 = vadd.f32 1e-05, %v6142_v39 }
0x3570   :  { %9611 = vrsqrt.f32 %v6144_v29 }
0x3578   :  { %v9610_v41 = vpop.eup %9609 }
0x3579   :  { %v6147_v46 = vmul.f32 %v9610_v41, %v6133_v25  ;;  %v9794_v25 = vld [vmem:[%s12526_s16 + $0x30] sm:$0xff]  }
0x357a   :  { %v9612_v37 = vpop.eup %9611 }
0x357b   :  { %v6148_v40 = vmul.f32 %v9612_v37, %v6134_v30  ;;  %v6149_v16 = vmul.f32 %v9768_v50, %v6147_v46  ;;  %v9796_v30 = vld [vmem:[%s12526_s16 + $0x78] sm:$0xff]  }
0x357d   :  { %v6150_v52 = vmul.f32 %v9768_v50, %v6148_v40  ;;  %v6151_v54 = vadd.f32 %v9769_v53, %v6149_v16 }
0x357f   :  { %v6152_v38 = vadd.f32 %v9769_v53, %v6150_v52 }
0x3581   :  { %v6153_v57 = vpack.c.bf16 %v6152_v38, %v6151_v54 }
0x3583   :  { %6187 = vmatmul.mubr.bf16.vlgmr.msra.gmra.mrb[80].mxu1 %v6153_v57  ;;  %6230 = vmatmul.mubr.bf16.vlgmr.msra.gmra.mrb[84].mxu0 %v6153_v57 }
0x3584   :  { %8431 = vmatpush3.bf16.msra.mxu1 %v9770_v11  ;;  %8453 = vmatpush3.bf16.msra.mxu0 %v9771_v17 }
0x3585   :  { %8432 = vmatprep.subr.bf16.mxu1 %v9772_v44  ;;  %8454 = vmatprep.subr.bf16.mxu0 %v9773_v51 }
0x3588   :  { %8433 = vmatpush3.bf16.msra.mxu1 %v9774_v42  ;;  %8455 = vmatpush3.bf16.msra.mxu0 %v9775_v13 }
0x3589   :  { %8434 = vmatprep.subr.bf16.mxu1 %v9776_v7  ;;  %8456 = vmatprep.subr.bf16.mxu0 %v9777_v60 }
0x358c   :  { %8435 = vmatpush3.bf16.msra.mxu1 %v9778_v61  ;;  %8457 = vmatpush3.bf16.msra.mxu0 %v9779_v8 }
0x358d   :  { %8436 = vmatprep.subr.bf16.mxu1 %v9780_v63  ;;  %8458 = vmatprep.subr.bf16.mxu0 %v9781_v12 }
0x3590   :  { %8437 = vmatpush3.bf16.msra.mxu1 %v9782_v18  ;;  %8459 = vmatpush3.bf16.msra.mxu0 %v9783_v10 }
0x3591   :  { %8438 = vmatprep.subr.bf16.mxu1 %v9784_v62  ;;  %8460 = vmatprep.subr.bf16.mxu0 %v9785_v14 }
0x3594   :  { %8439 = vmatpush3.bf16.msra.mxu1 %v9786_v9  ;;  %8461 = vmatpush3.bf16.msra.mxu0 %v9787_v19 }
0x3595   :  { %8440 = vmatprep.subr.bf16.mxu1 %v9788_v20  ;;  %8462 = vmatprep.subr.bf16.mxu0 %v9789_v15 }
0x3598   :  { %8441 = vmatpush3.bf16.msra.mxu1 %v9790_v23  ;;  %8463 = vmatpush3.bf16.msra.mxu0 %v9791_v24 }
0x3599   :  { %8442 = vmatprep.subr.bf16.mxu1 %v9792_v48  ;;  %8464 = vmatprep.subr.bf16.mxu0 %v9793_v21 }
0x359c   :  { %8443 = vmatpush3.bf16.msra.mxu1 %v9794_v25  ;;  %8465 = vmatpush3.bf16.msra.mxu0 %v9795_v28 }
0x359d   :  { %8444 = vmatprep.subr.bf16.mxu1 %v9796_v30  ;;  %8466 = vmatprep.subr.bf16.mxu0 %v9797_v31 }
0x35a0   :  { %8445 = vmatpush3.bf16.msra.mxu1 %v9798_v0  ;;  %8467 = vmatpush3.bf16.msra.mxu0 %v9799_v32 }
0x35a1   :  { %6427 = vmatprep.subr.bf16.mxu1 %v9800_v33  ;;  %8959 = vmatprep.subr.bf16.mxu0 %v10202_v45 }
0x3656   :  { %v6188_v22 = vpop.f32.mrb[80].mxu1  ;;  %v6231_v34 = vpop.f32.mrb[84].mxu0 }
0x3657   :  { %v12013_v39 = vadd.f32 %v6188_v22, %v11112_v1  ;;  %v12016_v29 = vadd.f32 %v6231_v34, %v11116_v3  ;;  %v6190_v41 = vpop.f32.mrb[81].mxu1  ;;  %v6233_v46 = vpop.f32.mrb[85].mxu0 }
0x3658   :  { %v12019_v37 = vadd.f32 %v6190_v41, %v11120_v4  ;;  %v12022_v40 = vadd.f32 %v6233_v46, %v11124_v5  ;;  %v6192_v50 = vpop.f32.mrb[82].mxu1  ;;  %v6235_v16 = vpop.f32.mrb[86].mxu0 }
0x3659   :  { %v6240_v52 = vmul.f32 %v12013_v39, %v12013_v39  ;;  %v6242_v53 = vmul.f32 %v12016_v29, %v12016_v29  ;;  %v12029_v54 = vadd.f32 %v6192_v50, %v11112_v1  ;;  %v12032_v38 = vadd.f32 %v6235_v16, %v11116_v3  ;;  %v6194_v57 = vpop.f32.mrb[83].mxu1  ;;  %v6237_v11 = vpop.f32.mrb[87].mxu0 }
0x365a   :  { %v6241_v17 = vmul.f32 %v12019_v37, %v12019_v37  ;;  %v6243_v44 = vmul.f32 %v12022_v40, %v12022_v40  ;;  %v12039_v51 = vadd.f32 %v6194_v57, %v11120_v4  ;;  %v12042_v42 = vadd.f32 %v6237_v11, %v11124_v5 }
0x365b   :  { %v6248_v1 = vmul.f32 %v6240_v52, %v12013_v39  ;;  %v6250_v13 = vmul.f32 %v6242_v53, %v12016_v29  ;;  %v6244_v3 = vmul.f32 %v12029_v54, %v12029_v54  ;;  %v6246_v7 = vmul.f32 %v12032_v38, %v12032_v38 }
0x365c   :  { %v6249_v60 = vmul.f32 %v6241_v17, %v12019_v37  ;;  %v6251_v61 = vmul.f32 %v6243_v44, %v12022_v40  ;;  %v6245_v4 = vmul.f32 %v12039_v51, %v12039_v51  ;;  %v6247_v5 = vmul.f32 %v12042_v42, %v12042_v42 }
0x365d   :  { %v6256_v8 = vmul.f32 0.044715, %v6248_v1  ;;  %v6258_v63 = vmul.f32 0.044715, %v6250_v13  ;;  %v6252_v12 = vmul.f32 %v6244_v3, %v12029_v54  ;;  %v6254_v18 = vmul.f32 %v6246_v7, %v12032_v38 }
0x365e   :  { %v6257_v10 = vmul.f32 0.044715, %v6249_v60  ;;  %v6259_v62 = vmul.f32 0.044715, %v6251_v61  ;;  %v6253_v14 = vmul.f32 %v6245_v4, %v12039_v51  ;;  %v6255_v9 = vmul.f32 %v6247_v5, %v12042_v42 }
0x365f   :  { %v6264_v19 = vadd.f32 %v6256_v8, %v12013_v39  ;;  %v6266_v20 = vadd.f32 %v6258_v63, %v12016_v29  ;;  %v6260_v15 = vmul.f32 0.044715, %v6252_v12  ;;  %v6262_v23 = vmul.f32 0.044715, %v6254_v18 }
0x3660   :  { %v6265_v24 = vadd.f32 %v6257_v10, %v12019_v37  ;;  %v6267_v48 = vadd.f32 %v6259_v62, %v12022_v40  ;;  %v6261_v21 = vmul.f32 0.044715, %v6253_v14  ;;  %v6263_v25 = vmul.f32 0.044715, %v6255_v9 }
0x3661   :  { %v6272_v28 = vmul.f32 0.7978846, %v6264_v19  ;;  %v6274_v30 = vmul.f32 0.7978846, %v6266_v20  ;;  %v6268_v31 = vadd.f32 %v6260_v15, %v12029_v54  ;;  %v6270_v0 = vadd.f32 %v6262_v23, %v12032_v38 }
0x3662   :  { %v6273_v32 = vmul.f32 0.7978846, %v6265_v24  ;;  %v6275_v33 = vmul.f32 0.7978846, %v6267_v48  ;;  %v6269_v22 = vadd.f32 %v6261_v21, %v12039_v51  ;;  %v6271_v34 = vadd.f32 %v6263_v25, %v12042_v42 }
0x3663   :  { %9613 = vtanh.f32 %v6272_v28  ;;  %v6276_v41 = vmul.f32 0.7978846, %v6268_v31  ;;  %v6278_v46 = vmul.f32 0.7978846, %v6270_v0 }
0x3664   :  { %9615 = vtanh.f32 %v6274_v30  ;;  %v6277_v50 = vmul.f32 0.7978846, %v6269_v22  ;;  %v6279_v16 = vmul.f32 0.7978846, %v6271_v34  ;;  %v9809_v22 = vld [vmem:[#allocation4 + $0x10c] ss:$12 sps:$4 sm:$0xff]  }
0x3665   :  { %9617 = vtanh.f32 %v6273_v32  ;;  %v9810_v34 = vld [vmem:[#allocation4 + $0x108] ss:$12 sps:$4 sm:$0xff]  }
0x3666   :  { %9619 = vtanh.f32 %v6275_v33  ;;  %v9808_v33 = vld [vmem:[#allocation4 + $0xf8] ss:$12 sps:$4 sm:$0xff]  }
0x3667   :  { %9621 = vtanh.f32 %v6276_v41  ;;  %v9811_v41 = vld [vmem:[#allocation4 + $0x110] ss:$12 sps:$4 sm:$0xff]  }
0x3668   :  { %9623 = vtanh.f32 %v6278_v46  ;;  %v9812_v46 = vld [vmem:[#allocation4 + $0x124] ss:$12 sps:$4 sm:$0xff]  }
0x3669   :  { %9625 = vtanh.f32 %v6277_v50  ;;  %v9813_v50 = vld [vmem:[#allocation4 + $0x120] ss:$12 sps:$4 sm:$0xff]  }
0x366a   :  { %9627 = vtanh.f32 %v6279_v16  ;;  %v9814_v16 = vld [vmem:[#allocation4 + $0x128] ss:$12 sps:$4 sm:$0xff]  }
0x366d   :  { %v9614_v52 = vpop.eup %9613 }
0x366e   :  { %v9616_v53 = vpop.eup %9615  ;;  %v6288_v57 = vadd.f32 1.0, %v9614_v52  ;;  %v9815_v52 = vld [vmem:[#allocation4 + $0x13c] ss:$12 sps:$4 sm:$0xff]  }
0x366f   :  { %v9618_v11 = vpop.eup %9617  ;;  %v6290_v17 = vadd.f32 1.0, %v9616_v53  ;;  %v9816_v53 = vld [vmem:[#allocation4 + $0x138] ss:$12 sps:$4 sm:$0xff]  }
0x3670   :  { %v9620_v44 = vpop.eup %9619  ;;  %v6289_v1 = vadd.f32 1.0, %v9618_v11  ;;  %v6296_v60 = vmul.f32 0.5, %v6288_v57  ;;  %v9817_v57 = vld [vmem:[#allocation4 + $0x140] ss:$12 sps:$4 sm:$0xff]  }
0x3671   :  { %v9622_v13 = vpop.eup %9621  ;;  %v6291_v3 = vadd.f32 1.0, %v9620_v44  ;;  %v6298_v5 = vmul.f32 0.5, %v6290_v17  ;;  %v9818_v11 = vld [vmem:[#allocation4 + $0x154] ss:$12 sps:$4 sm:$0xff]   ;;  %v9819_v17 = vld [vmem:[#allocation4 + $0x150] ss:$12 sps:$4 sm:$0xff]  }
0x3672   :  { %v9624_v7 = vpop.eup %9623  ;;  %v6292_v61 = vadd.f32 1.0, %v9622_v13  ;;  %v6297_v10 = vmul.f32 0.5, %v6289_v1  ;;  %v6304_v19 = vmul.f32 %v6296_v60, %v12013_v39  ;;  %v9820_v44 = vld [vmem:[#allocation4 + $0x158] ss:$12 sps:$4 sm:$0xff]   ;;  %v9822_v13 = vld [vmem:[#allocation4 + $0x168] ss:$12 sps:$4 sm:$0xff]  }
0x3673   :  { %v9626_v4 = vpop.eup %9625  ;;  %v6294_v8 = vadd.f32 1.0, %v9624_v7  ;;  %v6299_v9 = vmul.f32 0.5, %v6291_v3  ;;  %v6306_v23 = vmul.f32 %v6298_v5, %v12016_v29  ;;  %v9801_v29 = vld [vmem:[#allocation4 + $0xc0] ss:$12 sps:$4 sm:$0xff]   ;;  %v9823_v3 = vld [vmem:[#allocation4 + $0x170] ss:$12 sps:$4 sm:$0xff]  }
0x3674   :  { %v9628_v63 = vpop.eup %9627  ;;  %v6300_v12 = vmul.f32 0.5, %v6292_v61  ;;  %v6293_v18 = vadd.f32 1.0, %v9626_v4  ;;  %v6305_v21 = vmul.f32 %v6297_v10, %v12019_v37  ;;  %v9804_v37 = vld [vmem:[#allocation4 + $0xd8] ss:$12 sps:$4 sm:$0xff]   ;;  %v9824_v10 = vld [vmem:[#allocation13] ss:$0 sm:$0xff] }
0x3675   :  { %v6302_v62 = vmul.f32 0.5, %v6294_v8  ;;  %v6295_v14 = vadd.f32 1.0, %v9628_v63  ;;  %v6307_v30 = vmul.f32 %v6299_v9, %v12022_v40  ;;  %v9805_v40 = vld [vmem:[#allocation4 + $0xe0] ss:$12 sps:$4 sm:$0xff]  }
0x3676   :  { %v6308_v20 = vmul.f32 %v6300_v12, %v12029_v54  ;;  %v6301_v15 = vmul.f32 0.5, %v6293_v18  ;;  %v9802_v54 = vld [vmem:[#allocation4 + $0xc8] ss:$12 sps:$4 sm:$0xff]   ;;  %v9821_v1 = vld [vmem:[#allocation4 + $0x16c] ss:$12 sps:$4 sm:$0xff]  }
0x3677   :  { %v6310_v24 = vmul.f32 %v6302_v62, %v12032_v38  ;;  %v6303_v48 = vmul.f32 0.5, %v6295_v14  ;;  %v9803_v38 = vld [vmem:[#allocation4 + $0xdc] ss:$12 sps:$4 sm:$0xff]  }
0x3678   :  { %v6309_v25 = vmul.f32 %v6301_v15, %v12039_v51  ;;  %v6312_v28 = vpack.c.bf16 %v6308_v20, %v6304_v19  ;;  %v9806_v51 = vld [vmem:[#allocation4 + $0xf4] ss:$12 sps:$4 sm:$0xff]  }
0x3679   :  { %v6311_v31 = vmul.f32 %v6303_v48, %v12042_v42  ;;  %v6314_v0 = vpack.c.bf16 %v6310_v24, %v6306_v23  ;;  %v9807_v42 = vld [vmem:[#allocation4 + $0xf0] ss:$12 sps:$4 sm:$0xff]  }
0x367a   :  { %v6313_v32 = vpack.c.bf16 %v6309_v25, %v6305_v21 }
0x367b   :  { %v6315_v39 = vpack.c.bf16 %v6311_v31, %v6307_v30 }
0x367c   :  { %6348 = vmatprep.mubr.bf16.mxu1 %v6313_v32 }
0x367d   :  { %6389 = vmatprep.mubr.bf16.mxu0 %v6315_v39  ;;  %6349 = vmatmul.mubr.bf16.vlgmr.msra.gmra.mrb[84].mxu1 %v6312_v28 }
0x367e   :  { %6390 = vmatmul.mubr.bf16.vlgmr.msra.gmra.mrb[88].mxu0 %v6314_v0  ;;  %6428 = vmatpush1.bf16.msra.mxu1 %v9801_v29 }
0x367f   :  { %8960 = vmatpush3.bf16.msra.mxu0 %v9802_v54  ;;  %6429 = vmatprep.subr.bf16.mxu1 %v9803_v38 }
0x3680   :  { %8961 = vmatprep.subr.bf16.mxu0 %v10202_v45  ;;  %6459 = vmatprep.mubr.bf16.mxu1 %v10201_v43 }
0x3681   :  { %8975 = vmatprep.mubr.msk.bf16.mxu0 %vm10203_vm0, %v10202_v45 }
0x3682   :  { %6430 = vmatpush1.bf16.msra.mxu1 %v9804_v37 }
0x3683   :  { %8962 = vmatpush3.bf16.msra.mxu0 %v9805_v40  ;;  %6431 = vmatprep.subr.bf16.mxu1 %v9806_v51 }
0x3684   :  { %8963 = vmatprep.subr.bf16.mxu0 %v10202_v45 }
0x3686   :  { %6432 = vmatpush1.bf16.msra.mxu1 %v9807_v42 }
0x3687   :  { %8964 = vmatpush3.bf16.msra.mxu0 %v9808_v33  ;;  %6433 = vmatprep.subr.bf16.mxu1 %v9809_v22  ;;  %v9825_v22 = vld [vmem:[%s12551_s28 + $0x3] ss:$0 sm:$0xff] }
0x3688   :  { %8965 = vmatprep.subr.bf16.mxu0 %v10202_v45 }
0x368a   :  { %6434 = vmatpush1.bf16.msra.mxu1 %v9810_v34 }
0x368b   :  { %8966 = vmatpush3.bf16.msra.mxu0 %v9811_v41  ;;  %6435 = vmatprep.subr.bf16.mxu1 %v9812_v46  ;;  %v9826_v46 = vld [vmem:[%s12516_s6 + $0x3] ss:$0 sm:$0xff] }
0x368c   :  { %8967 = vmatprep.subr.bf16.mxu0 %v10202_v45 }
0x368e   :  { %6436 = vmatpush1.bf16.msra.mxu1 %v9813_v50 }
0x368f   :  { %8968 = vmatpush3.bf16.msra.mxu0 %v9814_v16  ;;  %6437 = vmatprep.subr.bf16.mxu1 %v9815_v52 }
0x3690   :  { %8969 = vmatprep.subr.bf16.mxu0 %v10202_v45 }
0x3692   :  { %6438 = vmatpush1.bf16.msra.mxu1 %v9816_v53  ;;  %v9827_v53 = vld [vmem:[%s12520_s10 + $0x40] sm:$0xff]  }
0x3693   :  { %8970 = vmatpush3.bf16.msra.mxu0 %v9817_v57  ;;  %6439 = vmatprep.subr.bf16.mxu1 %v9818_v11  ;;  %v9828_v57 = vld [vmem:[%s12520_s10 + $0x48] sm:$0xff]   ;;  %v9829_v11 = vld [vmem:[%s12520_s10 + $0x50] sm:$0xff]  }
0x3694   :  { %8971 = vmatprep.subr.bf16.mxu0 %v10202_v45 }
0x3696   :  { %6440 = vmatpush1.bf16.msra.mxu1 %v9819_v17  ;;  %v9830_v17 = vld [vmem:[%s12520_s10 + $0x58] sm:$0xff]  }
0x3697   :  { %8972 = vmatpush3.bf16.msra.mxu0 %v9820_v44  ;;  %6441 = vmatprep.subr.bf16.mxu1 %v9821_v1  ;;  %v9831_v44 = vld [vmem:[%s12520_s10 + $0x60] sm:$0xff]   ;;  %v9832_v1 = vld [vmem:[%s12520_s10 + $0x68] sm:$0xff]  }
0x3698   :  { %8973 = vmatprep.subr.bf16.mxu0 %v10202_v45 }
0x369a   :  { %6442 = vmatpush1.bf16.msra.mxu1 %v9822_v13  ;;  %v9833_v13 = vld [vmem:[%s12520_s10 + $0x70] sm:$0xff]  }
0x369b   :  { %8974 = vmatpush3.bf16.msra.mxu0 %v9823_v3  ;;  %8979 = vmatprep.subr.mxu1 %v10202_v45  ;;  %v9834_v3 = vld [vmem:[%s12520_s10 + $0x78] sm:$0xff]  }
0x369c   :  { %9019 = vmatprep.subr.bf16.mxu0 %v10202_v45 }
0x3750   :  { %v8446_v7 = vpop.f32.mrb[84].mxu1 }
0x3751   :  { %v8468_v60 = vpop.f32.mrb[88].mxu0  ;;  %v8447_v61 = vpop.f32.mrb[85].mxu1 }
0x3752   :  { %v8448_v4 = vadd.f32 %v8447_v61, %v8446_v7  ;;  %v8469_v5 = vpop.f32.mrb[89].mxu0  ;;  %v8449_v8 = vpop.f32.mrb[86].mxu1 }
0x3753   :  { %v8470_v63 = vadd.f32 %v8469_v5, %v8468_v60  ;;  %v8471_v12 = vpop.f32.mrb[90].mxu0  ;;  %v8450_v18 = vpop.f32.mrb[87].mxu1 }
0x3754   :  { %v6351_v62 = vadd.f32 %v9824_v10, %v8448_v4  ;;  %v8451_v14 = vadd.f32 %v8450_v18, %v8449_v8  ;;  %v8472_v9 = vpop.f32.mrb[91].mxu0 }
0x3755   :  { %v8473_v19 = vadd.f32 %v8472_v9, %v8471_v12 }
0x3756   :  { %v6392_v20 = vadd.f32 %v8470_v63, %v6351_v62  ;;  %v6354_v15 = vadd.f32 %v9824_v10, %v8451_v14 }
0x3758   :  { %v6395_v23 = vadd.f32 %v8473_v19, %v6354_v15  ;;  %v12089_v24 = vadd.f32 %v6392_v20, %v11906_v26 }
0x375a   :  { %6400 = vadd.xlane.f32.xlu0 %v12089_v24  ;;  %v12093_v48 = vadd.f32 %v6395_v23, %v11909_v27 }
0x375c   :  { %6402 = vadd.xlane.f32.xlu1 %v12093_v48 }
0x37e7   :  { %v6401_v21 = vpop.xlane.xlu0 %6400 }
0x37e8   :  { %v6404_v25 = vmul.f32 0.0078125, %v6401_v21 }
0x37e9   :  { %v6403_v28 = vpop.xlane.xlu1 %6402 }
0x37ea   :  { %v6406_v30 = vsub.f32 %v12089_v24, %v6404_v25  ;;  %v6405_v31 = vmul.f32 0.0078125, %v6403_v28 }
0x37ec   :  { %v6407_v0 = vsub.f32 %v12093_v48, %v6405_v31  ;;  %v6408_v32 = vmul.f32 %v6406_v30, %v6406_v30 }
0x37ee   :  { %6410 = vadd.xlane.f32.xlu0 %v6408_v32  ;;  %v6409_v39 = vmul.f32 %v6407_v0, %v6407_v0 }
0x37f0   :  { %6412 = vadd.xlane.f32.xlu1 %v6409_v39 }
0x387b   :  { %v6411_v26 = vpop.xlane.xlu0 %6410 }
0x387c   :  { %v6414_v29 = vmul.f32 0.0078125, %v6411_v26 }
0x387d   :  { %v6413_v54 = vpop.xlane.xlu1 %6412 }
0x387e   :  { %v6416_v38 = vadd.f32 1e-05, %v6414_v29  ;;  %v6415_v27 = vmul.f32 0.0078125, %v6413_v54 }
0x3880   :  { %9629 = vrsqrt.f32 %v6416_v38  ;;  %v6417_v37 = vadd.f32 1e-05, %v6415_v27 }
0x3882   :  { %9631 = vrsqrt.f32 %v6417_v37 }
0x388a   :  { %v9630_v40 = vpop.eup %9629 }
0x388b   :  { %v6420_v51 = vmul.f32 %v9630_v40, %v6406_v30 }
0x388c   :  { %v9632_v42 = vpop.eup %9631 }
0x388d   :  { %v6421_v33 = vmul.f32 %v9632_v42, %v6407_v0  ;;  %v6422_v34 = vmul.f32 %v9825_v22, %v6420_v51 }
0x388f   :  { %v6423_v41 = vmul.f32 %v9825_v22, %v6421_v33  ;;  %v6424_v50 = vadd.f32 %v9826_v46, %v6422_v34  ;;  %v9835_v33 = vld [vmem:[#allocation6 + $0x40] sm:$0xff]   ;;  %v9836_v22 = vld [vmem:[#allocation6 + $0x48] sm:$0xff]   ;;  %v9837_v34 = vld [vmem:[#allocation6 + $0x50] sm:$0xff]  }
0x3891   :  { %v6425_v16 = vadd.f32 %v9826_v46, %v6423_v41  ;;  %v9838_v41 = vld [vmem:[#allocation6 + $0x58] sm:$0xff]   ;;  %v9839_v46 = vld [vmem:[#allocation6 + $0x60] sm:$0xff]  }
0x3893   :  { %v6426_v52 = vpack.c.bf16 %v6425_v16, %v6424_v50  ;;  %v9840_v50 = vld [vmem:[#allocation6 + $0x68] sm:$0xff]   ;;  %v9841_v16 = vld [vmem:[#allocation6 + $0x70] sm:$0xff]  }
0x3895   :  { %6460 = vmatmul.mubr.bf16.vlgmr.msra.gmra.mrb[88].mxu1 %v6426_v52  ;;  %8976 = vmatmul.mubr.bf16.vlgmr.msra.gmra.mrb[92].mxu0 %v6426_v52  ;;  %v9842_v52 = vld [vmem:[#allocation6 + $0x78] sm:$0xff]  }
0x3896   :  { %8981 = vmatprep.mubr.msk.f32.mxu1 %vm10203_vm0, %v10202_v45  ;;  %9020 = vmatpush3.bf16.msra.mxu0 %v9827_v53 }
0x3897   :  { %9021 = vmatprep.subr.bf16.mxu0 %v10202_v45  ;;  %9035 = vmatprep.mubr.msk.bf16.mxu0 %vm10203_vm0, %v10202_v45 }
0x389a   :  { %9022 = vmatpush3.bf16.msra.mxu0 %v9828_v57 }
0x389b   :  { %9023 = vmatprep.subr.bf16.mxu0 %v10202_v45 }
0x389e   :  { %9024 = vmatpush3.bf16.msra.mxu0 %v9829_v11 }
0x389f   :  { %9025 = vmatprep.subr.bf16.mxu0 %v10202_v45 }
0x38a2   :  { %9026 = vmatpush3.bf16.msra.mxu0 %v9830_v17 }
0x38a3   :  { %9027 = vmatprep.subr.bf16.mxu0 %v10202_v45 }
0x38a6   :  { %9028 = vmatpush3.bf16.msra.mxu0 %v9831_v44  ;;  %v9843_v44 = vld [vmem:[#allocation7 + $0x1] ss:$0 sm:$0xff] }
0x38a7   :  { %9029 = vmatprep.subr.bf16.mxu0 %v10202_v45 }
0x38aa   :  { %9030 = vmatpush3.bf16.msra.mxu0 %v9832_v1 }
0x38ab   :  { %9031 = vmatprep.subr.bf16.mxu0 %v10202_v45 }
0x38ae   :  { %9032 = vmatpush3.bf16.msra.mxu0 %v9833_v13 }
0x38af   :  { %9033 = vmatprep.subr.bf16.mxu0 %v10202_v45 }
0x38b2   :  { %9034 = vmatpush3.bf16.msra.mxu0 %v9834_v3 }
0x38b3   :  { %9054 = vmatprep.subr.mxu0 %v10202_v45 }
0x3968   :  { %v6461_v7 = vpop.f32.mrb[88].mxu1  ;;  %v6504_v60 = vpop.f32.mrb[92].mxu0 }
0x3969   :  { %v6463_v61 = vpop.f32.mrb[89].mxu1  ;;  %v8977_v4 = vpop.f32.mrb[93].mxu0 }
0x396a   :  { %v6465_v5 = vpop.f32.mrb[90].mxu1  ;;  %v6507_v8 = vpop.f32.mrb[94].mxu0  ;;  %8980 = vmatpush3.xpose.msra.mxu1 %v6463_v61 }
0x396b   :  { %v6467_v63 = vpop.f32.mrb[91].mxu1  ;;  %v8978_v12 = vpop.f32.mrb[95].mxu0  ;;  %8984 = vmatprep.subr.mxu1 %v10202_v45 }
0x396d   :  { %8982 = vmatmul.mubr.f32.vlgmr.msra.gmra.mrb[92].mxu1 %v6461_v7 }
0x396e   :  { %8985 = vmatpush3.msra.mxu1 %v6504_v60  ;;  %8986 = vmatprep.mubr.msk.f32.mxu1 %vm10203_vm0, %v10202_v45 }
0x396f   :  { %8989 = vmatprep.subr.mxu1 %v10202_v45 }
0x3a40   :  { %v6577_v18 = vpop.f32.mrb[92].mxu1 }
0x3a41   :  { %v6581_v10 = vmul.f32 0.088388346, %v6577_v18  ;;  %v8983_v62 = vpop.f32.mrb[93].mxu1 }
0x3a43   :  { %v6582_v14 = vsel %vm1360_vm1, %v6581_v10, -inf }
0x3a44   :  { %6583 = vmax.xlane.f32.xlu0 %v6582_v14 }
0x3ad1   :  { %v6584_v9 = vpop.xlane.xlu0 %6583 }
0x3ad2   :  { %v6585_v19 = vsub.f32 %v6581_v10, %v6584_v9 }
0x3ad4   :  { %v6586_v20 = vmul.f32 1.442695, %v6585_v19 }
0x3ad6   :  { %9633 = vpow2.f32 %v6586_v20 }
0x3ae0   :  { %v9634_v15 = vpop.eup %9633 }
0x3ae1   :  { %v6588_v23 = vsel %vm1360_vm1, %v9634_v15, 0.0 }
0x3ae2   :  { %6589 = vadd.xlane.f32.xlu1 %v6588_v23 }
0x3b6f   :  { %v6590_v21 = vpop.xlane.xlu1 %6589 }
0x3b70   :  { %9635 = vrcp.f32 %v6590_v21 }
0x3b7a   :  { %v9636_v25 = vpop.eup %9635 }
0x3b7b   :  { %v6592_v28 = vmul.f32 %v9636_v25, %v9634_v15 }
0x3b7d   :  { %8987 = vmatmul.mubr.msk.f32.vlgmr.msra.gmra.mrb[94].mxu1 %vm1360_vm1, %v6592_v28 }
0x3b7e   :  { %8990 = vmatpush3.xpose.msra.mxu1 %v6467_v63  ;;  %8991 = vmatprep.mubr.msk.f32.mxu1 %vm10203_vm0, %v10202_v45 }
0x3b7f   :  { %8994 = vmatprep.subr.mxu1 %v10202_v45 }
0x3b81   :  { %8992 = vmatmul.mubr.f32.vlgmr.msra.gmra.mrb[96].mxu1 %v6465_v5 }
0x3b82   :  { %8995 = vmatpush3.msra.mxu1 %v6507_v8  ;;  %8996 = vmatprep.mubr.msk.f32.mxu1 %vm10203_vm0, %v10202_v45 }
0x3b83   :  { %8999 = vmatprep.subr.bf16.mxu1 %v10202_v45 }
0x3c50   :  { %v6662_v30 = vpop.f32.mrb[94].mxu1 }
0x3c51   :  { %v8988_v31 = vpop.f32.mrb[95].mxu1 }
0x3c54   :  { %v6732_v0 = vpop.f32.mrb[96].mxu1 }
0x3c55   :  { %v6736_v32 = vmul.f32 0.088388346, %v6732_v0  ;;  %v8993_v39 = vpop.f32.mrb[97].mxu1 }
0x3c57   :  { %v6737_v26 = vsel %vm1360_vm1, %v6736_v32, -inf }
0x3c58   :  { %6738 = vmax.xlane.f32.xlu0 %v6737_v26 }
0x3ce5   :  { %v6739_v29 = vpop.xlane.xlu0 %6738 }
0x3ce6   :  { %v6740_v54 = vsub.f32 %v6736_v32, %v6739_v29  ;;  %v9845_v32 = vld [vmem:[%s12516_s6 + $0x4] ss:$0 sm:$0xff] }
0x3ce8   :  { %v6741_v38 = vmul.f32 1.442695, %v6740_v54  ;;  %v9846_v54 = vld [vmem:[%s12524_s14 + $0x104] ss:$16 sps:$4 sm:$0xff]  }
0x3cea   :  { %9637 = vpow2.f32 %v6741_v38 }
0x3cf4   :  { %v9638_v27 = vpop.eup %9637 }
0x3cf5   :  { %v6743_v37 = vsel %vm1360_vm1, %v9638_v27, 0.0 }
0x3cf6   :  { %6744 = vadd.xlane.f32.xlu1 %v6743_v37 }
0x3d83   :  { %v6745_v40 = vpop.xlane.xlu1 %6744 }
0x3d84   :  { %9639 = vrcp.f32 %v6745_v40 }
0x3d8e   :  { %v9640_v51 = vpop.eup %9639 }
0x3d8f   :  { %v6747_v42 = vmul.f32 %v9640_v51, %v9638_v27 }
0x3d91   :  { %8997 = vmatmul.mubr.msk.f32.vlgmr.msra.gmra.mrb[98].mxu1 %vm1360_vm1, %v6747_v42 }
0x3d92   :  { %9000 = vmatpush3.bf16.msra.mxu1 %v9835_v33  ;;  %9015 = vmatprep.mubr.msk.bf16.mxu1 %vm10203_vm0, %v10202_v45 }
0x3d93   :  { %9001 = vmatprep.subr.bf16.mxu1 %v10202_v45 }
0x3d96   :  { %9002 = vmatpush3.bf16.msra.mxu1 %v9836_v22 }
0x3d97   :  { %9003 = vmatprep.subr.bf16.mxu1 %v10202_v45 }
0x3d9a   :  { %9004 = vmatpush3.bf16.msra.mxu1 %v9837_v34 }
0x3d9b   :  { %9005 = vmatprep.subr.bf16.mxu1 %v10202_v45 }
0x3d9e   :  { %9006 = vmatpush3.bf16.msra.mxu1 %v9838_v41 }
0x3d9f   :  { %9007 = vmatprep.subr.bf16.mxu1 %v10202_v45 }
0x3da2   :  { %9008 = vmatpush3.bf16.msra.mxu1 %v9839_v46 }
0x3da3   :  { %9009 = vmatprep.subr.bf16.mxu1 %v10202_v45 }
0x3da6   :  { %9010 = vmatpush3.bf16.msra.mxu1 %v9840_v50 }
0x3da7   :  { %9011 = vmatprep.subr.bf16.mxu1 %v10202_v45 }
0x3daa   :  { %9012 = vmatpush3.bf16.msra.mxu1 %v9841_v16 }
0x3dab   :  { %9013 = vmatprep.subr.bf16.mxu1 %v10202_v45 }
0x3dae   :  { %9014 = vmatpush3.bf16.msra.mxu1 %v9842_v52 }
0x3daf   :  { %9039 = vmatprep.subr.mxu1 %v10202_v45 }
0x3e64   :  { %v6817_v53 = vpop.f32.mrb[98].mxu1 }
0x3e65   :  { %v6821_v57 = vpack.c.bf16 %v6817_v53, %v6662_v30  ;;  %v8998_v11 = vpop.f32.mrb[99].mxu1  ;;  %v9844_v30 = vld [vmem:[%s12551_s28 + $0x4] ss:$0 sm:$0xff] }
0x3e66   :  { %v9847_v53 = vld [vmem:[#allocation9 + $0x40] sm:$0xff]   ;;  %v9849_v11 = vld [vmem:[#allocation9 + $0x50] sm:$0xff]  }
0x3e67   :  { %9016 = vmatmul.mubr.bf16.vlgmr.msra.gmra.mrb[100].mxu1 %v6821_v57  ;;  %v9848_v57 = vld [vmem:[#allocation9 + $0x48] sm:$0xff]  }
0x3e68   :  { %9040 = vmatpush3.xpose.msra.mxu1 %v10767_v47  ;;  %9041 = vmatprep.mubr.msk.f32.mxu1 %vm10203_vm0, %v10202_v45  ;;  %v9850_v47 = vld [vmem:[#allocation9 + $0x58] sm:$0xff]  }
0x3e69   :  { %9044 = vmatprep.subr.mxu1 %v10202_v45 }
0x3f3a   :  { %v6856_v17 = vpop.f32.mrb[100].mxu1 }
0x3f3b   :  { %v6857_v1 = vadd.f32 %v9843_v44, %v6856_v17  ;;  %v9017_v13 = vpop.f32.mrb[101].mxu1  ;;  %v9852_v17 = vld [vmem:[#allocation9 + $0x68] sm:$0xff]  }
0x3f3c   :  { %v6859_v3 = vpop.f32.mrb[102].mxu1  ;;  %v9855_v13 = vld [vmem:[%s12524_s14 + $0x10c] ss:$16 sps:$4 sm:$0xff]  }
0x3f3d   :  { %v12171_v7 = vadd.f32 %v6857_v1, %v12089_v24  ;;  %v6860_v60 = vadd.f32 %v9843_v44, %v6859_v3  ;;  %v9018_v61 = vpop.f32.mrb[103].mxu1  ;;  %v9853_v44 = vld [vmem:[#allocation9 + $0x70] sm:$0xff]   ;;  %v9854_v1 = vld [vmem:[#allocation9 + $0x78] sm:$0xff]  }
0x3f3f   :  { %v12174_v4 = vadd.f32 %v6860_v60, %v12093_v48  ;;  %6865 = vadd.xlane.f32.xlu0 %v12171_v7 }
0x3f41   :  { %6867 = vadd.xlane.f32.xlu1 %v12174_v4 }
0x3fcc   :  { %v6866_v5 = vpop.xlane.xlu0 %6865 }
0x3fcd   :  { %v6869_v8 = vmul.f32 0.0078125, %v6866_v5 }
0x3fce   :  { %v6868_v63 = vpop.xlane.xlu1 %6867 }
0x3fcf   :  { %v6871_v12 = vsub.f32 %v12171_v7, %v6869_v8  ;;  %v6870_v18 = vmul.f32 0.0078125, %v6868_v63 }
0x3fd1   :  { %v6872_v10 = vsub.f32 %v12174_v4, %v6870_v18  ;;  %v6873_v62 = vmul.f32 %v6871_v12, %v6871_v12 }
0x3fd3   :  { %6875 = vadd.xlane.f32.xlu0 %v6873_v62  ;;  %v6874_v24 = vmul.f32 %v6872_v10, %v6872_v10 }
0x3fd5   :  { %6877 = vadd.xlane.f32.xlu1 %v6874_v24 }
0x4060   :  { %v6876_v14 = vpop.xlane.xlu0 %6875 }
0x4061   :  { %v6879_v9 = vmul.f32 0.0078125, %v6876_v14 }
0x4062   :  { %v6878_v48 = vpop.xlane.xlu1 %6877 }
0x4063   :  { %v6881_v19 = vadd.f32 1e-05, %v6879_v9  ;;  %v6880_v20 = vmul.f32 0.0078125, %v6878_v48 }
0x4065   :  { %9641 = vrsqrt.f32 %v6881_v19  ;;  %v6882_v15 = vadd.f32 1e-05, %v6880_v20  ;;  %v9856_v19 = vld [vmem:[%s12524_s14 + $0x100] ss:$16 sps:$4 sm:$0xff]   ;;  %v9857_v20 = vld [vmem:[%s12524_s14 + $0x124] ss:$16 sps:$4 sm:$0xff]  }
0x4067   :  { %9643 = vrsqrt.f32 %v6882_v15  ;;  %v9858_v15 = vld [vmem:[%s12524_s14 + $0x120] ss:$16 sps:$4 sm:$0xff]  }
0x406f   :  { %v9642_v23 = vpop.eup %9641 }
0x4070   :  { %v6885_v21 = vmul.f32 %v9642_v23, %v6871_v12  ;;  %v9859_v23 = vld [vmem:[%s12524_s14 + $0x144] ss:$16 sps:$4 sm:$0xff]  }
0x4071   :  { %v9644_v25 = vpop.eup %9643 }
0x4072   :  { %v6886_v28 = vmul.f32 %v9644_v25, %v6872_v10  ;;  %v6887_v31 = vmul.f32 %v9844_v30, %v6885_v21  ;;  %v9860_v21 = vld [vmem:[%s12524_s14 + $0x140] ss:$16 sps:$4 sm:$0xff]   ;;  %v9861_v25 = vld [vmem:[%s12524_s14 + $0x164] ss:$16 sps:$4 sm:$0xff]  }
0x4074   :  { %v6888_v0 = vmul.f32 %v9844_v30, %v6886_v28  ;;  %v6889_v39 = vadd.f32 %v9845_v32, %v6887_v31  ;;  %v9862_v28 = vld [vmem:[%s12524_s14 + $0x160] ss:$16 sps:$4 sm:$0xff]   ;;  %v9863_v30 = vld [vmem:[%s12524_s14 + $0x184] ss:$16 sps:$4 sm:$0xff]  }
0x4075   :  { %v9864_v31 = vld [vmem:[%s12524_s14 + $0x180] ss:$16 sps:$4 sm:$0xff]  }
0x4076   :  { %v6890_v26 = vadd.f32 %v9845_v32, %v6888_v0  ;;  %v9865_v0 = vld [vmem:[%s12524_s14 + $0x1a4] ss:$16 sps:$4 sm:$0xff]   ;;  %v9866_v32 = vld [vmem:[%s12524_s14 + $0x1a0] ss:$16 sps:$4 sm:$0xff]  }
0x4078   :  { %v6891_v29 = vpack.c.bf16 %v6890_v26, %v6889_v39  ;;  %v9867_v39 = vld [vmem:[%s12524_s14 + $0x1c4] ss:$16 sps:$4 sm:$0xff]   ;;  %v9868_v26 = vld [vmem:[%s12524_s14 + $0x1c0] ss:$16 sps:$4 sm:$0xff]  }
0x407a   :  { %9036 = vmatmul.mubr.bf16.vlgmr.msra.gmra.mrb[96].mxu0 %v6891_v29  ;;  %v9869_v29 = vld [vmem:[%s12524_s14 + $0x1e4] ss:$16 sps:$4 sm:$0xff]  }
0x407b   :  { %9055 = vmatpush3.msk.msra.mxu0 %vm1941_vm2, %v4139_v35  ;;  %9056 = vmatprep.mubr.msk.f32.mxu0 %vm10203_vm0, %v10202_v45 }
0x407c   :  { %7314 = vmatprep.subr.bf16.mxu0 %v9846_v54  ;;  %v9870_v54 = vld [vmem:[%s12524_s14 + $0x1e0] ss:$16 sps:$4 sm:$0xff]  }
0x414d   :  { %v6926_v38 = vpop.f32.mrb[96].mxu0 }
0x414e   :  { %v9037_v27 = vpop.f32.mrb[97].mxu0  ;;  %9042 = vmatmul.mubr.f32.vlgmr.msra.gmra.mrb[104].mxu1 %v6926_v38  ;;  %v9871_v38 = vld [vmem:[%s12526_s16 + $0x140] sm:$0xff]  }
0x414f   :  { %9045 = vmatpush3.msk.msra.mxu1 %vm1941_vm2, %v10771_v49  ;;  %v6929_v37 = vpop.f32.mrb[98].mxu0  ;;  %9046 = vmatprep.mubr.msk.f32.mxu1 %vm10203_vm0, %v10202_v45 }
0x4150   :  { %v9038_v40 = vpop.f32.mrb[99].mxu0  ;;  %9049 = vmatprep.subr.mxu1 %v10202_v45 }
0x4221   :  { %v6999_v35 = vpop.f32.mrb[104].mxu1 }
0x4222   :  { %v7003_v51 = vmul.f32 0.088388346, %v6999_v35  ;;  %v9043_v42 = vpop.f32.mrb[105].mxu1  ;;  %v9872_v35 = vld [vmem:[%s12524_s14 + $0x108] ss:$16 sps:$4 sm:$0xff]  }
0x4223   :  { %v9874_v42 = vld [vmem:[%s12524_s14 + $0x128] ss:$16 sps:$4 sm:$0xff]  }
0x4224   :  { %v7004_v33 = vsel %vm1926_vm3, %v7003_v51, -inf }
0x4225   :  { %7005 = vmax.xlane.f32.xlu0 %v7004_v33  ;;  %v9875_v33 = vld [vmem:[%s12524_s14 + $0x14c] ss:$16 sps:$4 sm:$0xff]  }
0x42b2   :  { %v7006_v22 = vpop.xlane.xlu0 %7005 }
0x42b3   :  { %v7007_v34 = vsub.f32 %v7003_v51, %v7006_v22  ;;  %v9873_v51 = vld [vmem:[%s12524_s14 + $0x12c] ss:$16 sps:$4 sm:$0xff]   ;;  %v9876_v22 = vld [vmem:[%s12524_s14 + $0x148] ss:$16 sps:$4 sm:$0xff]  }
0x42b5   :  { %v7008_v41 = vmul.f32 1.442695, %v7007_v34  ;;  %v9878_v34 = vld [vmem:[%s12524_s14 + $0x168] ss:$16 sps:$4 sm:$0xff]  }
0x42b7   :  { %9645 = vpow2.f32 %v7008_v41  ;;  %v9879_v41 = vld [vmem:[%s12524_s14 + $0x18c] ss:$16 sps:$4 sm:$0xff]  }
0x42c1   :  { %v9646_v46 = vpop.eup %9645 }
0x42c2   :  { %v7010_v49 = vsel %vm1926_vm3, %v9646_v46, 0.0 }
0x42c3   :  { %7011 = vadd.xlane.f32.xlu1 %v7010_v49  ;;  %v9881_v49 = vld [vmem:[%s12524_s14 + $0x1ac] ss:$16 sps:$4 sm:$0xff]  }
0x4350   :  { %v7012_v50 = vpop.xlane.xlu1 %7011 }
0x4351   :  { %9647 = vrcp.f32 %v7012_v50  ;;  %v9882_v50 = vld [vmem:[%s12524_s14 + $0x1a8] ss:$16 sps:$4 sm:$0xff]  }
0x435b   :  { %v9648_v16 = vpop.eup %9647 }
0x435c   :  { %v7014_v52 = vmul.f32 %v9648_v16, %v9646_v46  ;;  %v9880_v46 = vld [vmem:[%s12524_s14 + $0x188] ss:$16 sps:$4 sm:$0xff]   ;;  %v9883_v16 = vld [vmem:[%s12524_s14 + $0x1cc] ss:$16 sps:$4 sm:$0xff]  }
0x435e   :  { %9047 = vmatmul.mubr.msk.f32.vlgmr.msra.gmra.mrb[106].mxu1 %vm1926_vm3, %v7014_v52  ;;  %v9884_v52 = vld [vmem:[%s12524_s14 + $0x1c8] ss:$16 sps:$4 sm:$0xff]  }
0x435f   :  { %9050 = vmatpush3.xpose.msra.mxu1 %v4055_v58  ;;  %9051 = vmatprep.mubr.msk.f32.mxu1 %vm10203_vm0, %v10202_v45  ;;  %v9851_v58 = vld [vmem:[#allocation9 + $0x60] sm:$0xff]  }
0x4360   :  { %9059 = vmatprep.subr.bf16.mxu1 %v10202_v45 }
0x4362   :  { %9052 = vmatmul.mubr.f32.vlgmr.msra.gmra.mrb[108].mxu1 %v6929_v37 }
0x4363   :  { %9060 = vmatpush3.bf16.msra.mxu1 %v9847_v53  ;;  %9075 = vmatprep.mubr.msk.bf16.mxu1 %vm10203_vm0, %v10202_v45  ;;  %v9885_v53 = vld [vmem:[%s12524_s14 + $0x1ec] ss:$16 sps:$4 sm:$0xff]  }
0x4364   :  { %9061 = vmatprep.subr.bf16.mxu1 %v10202_v45 }
0x4367   :  { %9062 = vmatpush3.bf16.msra.mxu1 %v9848_v57  ;;  %v9886_v57 = vld [vmem:[%s12524_s14 + $0x1e8] ss:$16 sps:$4 sm:$0xff]  }
0x4368   :  { %9063 = vmatprep.subr.bf16.mxu1 %v10202_v45 }
0x436b   :  { %9064 = vmatpush3.bf16.msra.mxu1 %v9849_v11  ;;  %v9887_v11 = vld [vmem:[%s12526_s16 + $0x1c0] sm:$0xff]  }
0x436c   :  { %9065 = vmatprep.subr.bf16.mxu1 %v10202_v45 }
0x436f   :  { %9066 = vmatpush3.bf16.msra.mxu1 %v9850_v47 }
0x4370   :  { %9067 = vmatprep.subr.bf16.mxu1 %v10202_v45 }
0x4373   :  { %9068 = vmatpush3.bf16.msra.mxu1 %v9851_v58  ;;  %v9888_v58 = vld [vmem:[#allocation10 + $0x1] ss:$0 sm:$0xff] }
0x4374   :  { %9069 = vmatprep.subr.bf16.mxu1 %v10202_v45 }
0x4377   :  { %9070 = vmatpush3.bf16.msra.mxu1 %v9852_v17 }
0x4378   :  { %9071 = vmatprep.subr.bf16.mxu1 %v10202_v45 }
0x437b   :  { %9072 = vmatpush3.bf16.msra.mxu1 %v9853_v44 }
0x437c   :  { %9073 = vmatprep.subr.bf16.mxu1 %v10202_v45 }
0x437f   :  { %9074 = vmatpush3.bf16.msra.mxu1 %v9854_v1 }
0x4380   :  { %7357 = vmatprep.subr.bf16.mxu1 %v9855_v13 }
0x4431   :  { %v7084_v3 = vpop.f32.mrb[106].mxu1 }
0x4432   :  { %v9048_v60 = vpop.f32.mrb[107].mxu1 }
0x4435   :  { %v7154_v61 = vpop.f32.mrb[108].mxu1 }
0x4436   :  { %v7158_v5 = vmul.f32 0.088388346, %v7154_v61  ;;  %v9053_v8 = vpop.f32.mrb[109].mxu1 }
0x4438   :  { %v7159_v63 = vsel %vm1926_vm3, %v7158_v5, -inf }
0x4439   :  { %7160 = vmax.xlane.f32.xlu0 %v7159_v63 }
0x44c6   :  { %v7161_v12 = vpop.xlane.xlu0 %7160 }
0x44c7   :  { %v7162_v18 = vsub.f32 %v7158_v5, %v7161_v12 }
0x44c9   :  { %v7163_v10 = vmul.f32 1.442695, %v7162_v18 }
0x44cb   :  { %9649 = vpow2.f32 %v7163_v10 }
0x44d5   :  { %v9650_v62 = vpop.eup %9649 }
0x44d6   :  { %v7165_v24 = vsel %vm1926_vm3, %v9650_v62, 0.0 }
0x44d7   :  { %7166 = vadd.xlane.f32.xlu1 %v7165_v24 }
0x4564   :  { %v7167_v14 = vpop.xlane.xlu1 %7166 }
0x4565   :  { %9651 = vrcp.f32 %v7167_v14 }
0x456f   :  { %v9652_v9 = vpop.eup %9651 }
0x4570   :  { %v7169_v48 = vmul.f32 %v9652_v9, %v9650_v62 }
0x4572   :  { %9057 = vmatmul.mubr.msk.f32.vlgmr.msra.gmra.mrb[100].mxu0 %vm1926_vm3, %v7169_v48 }
0x4573   :  { %7315 = vmatpush1.bf16.msra.mxu0 %v9856_v19  ;;  %7346 = vmatprep.mubr.bf16.mxu0 %v10201_v43 }
0x4574   :  { %7316 = vmatprep.subr.bf16.mxu0 %v9857_v20 }
0x4577   :  { %7317 = vmatpush1.bf16.msra.mxu0 %v9858_v15 }
0x4578   :  { %7318 = vmatprep.subr.bf16.mxu0 %v9859_v23 }
0x457b   :  { %7319 = vmatpush1.bf16.msra.mxu0 %v9860_v21 }
0x457c   :  { %7320 = vmatprep.subr.bf16.mxu0 %v9861_v25  ;;  %v9889_v25 = vld [vmem:[%s12551_s28 + $0x5] ss:$0 sm:$0xff] }
0x457f   :  { %7321 = vmatpush1.bf16.msra.mxu0 %v9862_v28 }
0x4580   :  { %7322 = vmatprep.subr.bf16.mxu0 %v9863_v30 }
0x4583   :  { %7323 = vmatpush1.bf16.msra.mxu0 %v9864_v31  ;;  %v9890_v31 = vld [vmem:[%s12516_s6 + $0x5] ss:$0 sm:$0xff] }
0x4584   :  { %7324 = vmatprep.subr.bf16.mxu0 %v9865_v0 }
0x4587   :  { %7325 = vmatpush1.bf16.msra.mxu0 %v9866_v32 }
0x4588   :  { %7326 = vmatprep.subr.bf16.mxu0 %v9867_v39 }
0x458b   :  { %7327 = vmatpush1.bf16.msra.mxu0 %v9868_v26  ;;  %v9891_v26 = vld [vmem:[%s12526_s16 + $0x100] sm:$0xff]  }
0x458c   :  { %7328 = vmatprep.subr.bf16.mxu0 %v9869_v29  ;;  %v9892_v29 = vld [vmem:[%s12526_s16 + $0x180] sm:$0xff]  }
0x458f   :  { %7329 = vmatpush1.bf16.msra.mxu0 %v9870_v54  ;;  %v9893_v54 = vld [vmem:[%s12526_s16 + $0x148] sm:$0xff]  }
0x4590   :  { %8526 = vmatprep.subr.bf16.mxu0 %v9871_v38  ;;  %v9894_v38 = vld [vmem:[%s12526_s16 + $0x1c8] sm:$0xff]  }
0x4645   :  { %v7239_v27 = vpop.f32.mrb[100].mxu0 }
0x4646   :  { %v7243_v37 = vpack.c.bf16 %v7239_v27, %v7084_v3  ;;  %v9058_v40 = vpop.f32.mrb[101].mxu0  ;;  %v9895_v27 = vld [vmem:[%s12526_s16 + $0x108] sm:$0xff]  }
0x4647   :  { %v9897_v40 = vld [vmem:[%s12526_s16 + $0x150] sm:$0xff]  }
0x4648   :  { %9076 = vmatmul.mubr.bf16.vlgmr.msra.gmra.mrb[112].mxu1 %v7243_v37  ;;  %v9896_v37 = vld [vmem:[%s12526_s16 + $0x188] sm:$0xff]  }
0x4649   :  { %7358 = vmatpush1.bf16.msra.mxu1 %v9872_v35  ;;  %7389 = vmatprep.mubr.bf16.mxu1 %v10201_v43  ;;  %v9877_v43 = vld [vmem:[%s12524_s14 + $0x16c] ss:$16 sps:$4 sm:$0xff]   ;;  %v9898_v35 = vld [vmem:[%s12526_s16 + $0x1d0] sm:$0xff]  }
0x464a   :  { %7359 = vmatprep.subr.bf16.mxu1 %v9873_v51  ;;  %v9899_v51 = vld [vmem:[%s12526_s16 + $0x110] sm:$0xff]  }
0x464d   :  { %7360 = vmatpush1.bf16.msra.mxu1 %v9874_v42  ;;  %v9900_v42 = vld [vmem:[%s12526_s16 + $0x190] sm:$0xff]  }
0x464e   :  { %7361 = vmatprep.subr.bf16.mxu1 %v9875_v33  ;;  %v9901_v33 = vld [vmem:[%s12526_s16 + $0x158] sm:$0xff]  }
0x4651   :  { %7362 = vmatpush1.bf16.msra.mxu1 %v9876_v22  ;;  %v9902_v22 = vld [vmem:[%s12526_s16 + $0x1d8] sm:$0xff]  }
0x4652   :  { %7363 = vmatprep.subr.bf16.mxu1 %v9877_v43  ;;  %v9903_v43 = vld [vmem:[%s12526_s16 + $0x118] sm:$0xff]  }
0x4655   :  { %7364 = vmatpush1.bf16.msra.mxu1 %v9878_v34  ;;  %v9904_v34 = vld [vmem:[%s12526_s16 + $0x198] sm:$0xff]  }
0x4656   :  { %7365 = vmatprep.subr.bf16.mxu1 %v9879_v41  ;;  %v9905_v41 = vld [vmem:[%s12526_s16 + $0x160] sm:$0xff]  }
0x4659   :  { %7366 = vmatpush1.bf16.msra.mxu1 %v9880_v46  ;;  %v9906_v46 = vld [vmem:[%s12526_s16 + $0x1e0] sm:$0xff]  }
0x465a   :  { %7367 = vmatprep.subr.bf16.mxu1 %v9881_v49  ;;  %v9907_v49 = vld [vmem:[%s12526_s16 + $0x120] sm:$0xff]  }
0x465d   :  { %7368 = vmatpush1.bf16.msra.mxu1 %v9882_v50  ;;  %v9908_v50 = vld [vmem:[%s12526_s16 + $0x1a0] sm:$0xff]  }
0x465e   :  { %7369 = vmatprep.subr.bf16.mxu1 %v9883_v16  ;;  %v9909_v16 = vld [vmem:[%s12526_s16 + $0x168] sm:$0xff]  }
0x4661   :  { %7370 = vmatpush1.bf16.msra.mxu1 %v9884_v52  ;;  %v9910_v52 = vld [vmem:[%s12526_s16 + $0x1e8] sm:$0xff]  }
0x4662   :  { %7371 = vmatprep.subr.bf16.mxu1 %v9885_v53  ;;  %v9911_v53 = vld [vmem:[%s12526_s16 + $0x128] sm:$0xff]  }
0x4665   :  { %7372 = vmatpush1.bf16.msra.mxu1 %v9886_v57  ;;  %v9912_v57 = vld [vmem:[%s12526_s16 + $0x1a8] sm:$0xff]  }
0x4666   :  { %8548 = vmatprep.subr.bf16.mxu1 %v9887_v11  ;;  %v9913_v11 = vld [vmem:[%s12526_s16 + $0x170] sm:$0xff]  }
0x471b   :  { %v7278_v47 = vpop.f32.mrb[112].mxu1 }
0x471c   :  { %v7279_v17 = vadd.f32 %v9888_v58, %v7278_v47  ;;  %v9077_v44 = vpop.f32.mrb[113].mxu1  ;;  %v9914_v47 = vld [vmem:[%s12526_s16 + $0x1f0] sm:$0xff]  }
0x471d   :  { %v7281_v1 = vpop.f32.mrb[114].mxu1  ;;  %v9917_v44 = vld [vmem:[%s12526_s16 + $0x178] sm:$0xff]  }
0x471e   :  { %v12321_v13 = vadd.f32 %v7279_v17, %v12171_v7  ;;  %v7282_v3 = vadd.f32 %v9888_v58, %v7281_v1  ;;  %v9078_v60 = vpop.f32.mrb[115].mxu1  ;;  %v9915_v58 = vld [vmem:[%s12526_s16 + $0x130] sm:$0xff]   ;;  %v9918_v1 = vld [vmem:[%s12526_s16 + $0x1f8] sm:$0xff]  }
0x471f   :  { %v9916_v17 = vld [vmem:[%s12526_s16 + $0x1b0] sm:$0xff]   ;;  %v9920_v60 = vld [vmem:[%s12526_s16 + $0x1b8] sm:$0xff]  }
0x4720   :  { %v12324_v61 = vadd.f32 %v7282_v3, %v12174_v4  ;;  %7287 = vadd.xlane.f32.xlu0 %v12321_v13  ;;  %v9919_v3 = vld [vmem:[%s12526_s16 + $0x138] sm:$0xff]  }
0x4722   :  { %7289 = vadd.xlane.f32.xlu1 %v12324_v61 }
0x47ad   :  { %v7288_v5 = vpop.xlane.xlu0 %7287 }
0x47ae   :  { %v7291_v8 = vmul.f32 0.0078125, %v7288_v5 }
0x47af   :  { %v7290_v63 = vpop.xlane.xlu1 %7289 }
0x47b0   :  { %v7293_v12 = vsub.f32 %v12321_v13, %v7291_v8  ;;  %v7292_v18 = vmul.f32 0.0078125, %v7290_v63 }
0x47b2   :  { %v7294_v10 = vsub.f32 %v12324_v61, %v7292_v18  ;;  %v7295_v62 = vmul.f32 %v7293_v12, %v7293_v12 }
0x47b4   :  { %7297 = vadd.xlane.f32.xlu0 %v7295_v62  ;;  %v7296_v7 = vmul.f32 %v7294_v10, %v7294_v10 }
0x47b6   :  { %7299 = vadd.xlane.f32.xlu1 %v7296_v7 }
0x4841   :  { %v7298_v24 = vpop.xlane.xlu0 %7297 }
0x4842   :  { %v7301_v14 = vmul.f32 0.0078125, %v7298_v24 }
0x4843   :  { %v7300_v4 = vpop.xlane.xlu1 %7299 }
0x4844   :  { %v7303_v9 = vadd.f32 1e-05, %v7301_v14  ;;  %v7302_v48 = vmul.f32 0.0078125, %v7300_v4 }
0x4846   :  { %9653 = vrsqrt.f32 %v7303_v9  ;;  %v7304_v19 = vadd.f32 1e-05, %v7302_v48 }
0x4848   :  { %9655 = vrsqrt.f32 %v7304_v19 }
0x4850   :  { %v9654_v20 = vpop.eup %9653 }
0x4851   :  { %v7307_v15 = vmul.f32 %v9654_v20, %v7293_v12 }
0x4852   :  { %v9656_v23 = vpop.eup %9655 }
0x4853   :  { %v7308_v21 = vmul.f32 %v9656_v23, %v7294_v10  ;;  %v7309_v28 = vmul.f32 %v9889_v25, %v7307_v15 }
0x4855   :  { %v7310_v30 = vmul.f32 %v9889_v25, %v7308_v21  ;;  %v7311_v0 = vadd.f32 %v9890_v31, %v7309_v28 }
0x4857   :  { %v7312_v32 = vadd.f32 %v9890_v31, %v7310_v30 }
0x4859   :  { %v7313_v39 = vpack.c.bf16 %v7312_v32, %v7311_v0 }
0x485b   :  { %7347 = vmatmul.mubr.bf16.vlgmr.msra.gmra.mrb[104].mxu0 %v7313_v39  ;;  %7390 = vmatmul.mubr.bf16.vlgmr.msra.gmra.mrb[116].mxu1 %v7313_v39 }
0x485c   :  { %8527 = vmatpush3.bf16.msra.mxu0 %v9891_v26  ;;  %8549 = vmatpush3.bf16.msra.mxu1 %v9892_v29 }
0x485d   :  { %8528 = vmatprep.subr.bf16.mxu0 %v9893_v54  ;;  %8550 = vmatprep.subr.bf16.mxu1 %v9894_v38 }
0x4860   :  { %8529 = vmatpush3.bf16.msra.mxu0 %v9895_v27  ;;  %8551 = vmatpush3.bf16.msra.mxu1 %v9896_v37 }
0x4861   :  { %8530 = vmatprep.subr.bf16.mxu0 %v9897_v40  ;;  %8552 = vmatprep.subr.bf16.mxu1 %v9898_v35 }
0x4864   :  { %8531 = vmatpush3.bf16.msra.mxu0 %v9899_v51  ;;  %8553 = vmatpush3.bf16.msra.mxu1 %v9900_v42 }
0x4865   :  { %8532 = vmatprep.subr.bf16.mxu0 %v9901_v33  ;;  %8554 = vmatprep.subr.bf16.mxu1 %v9902_v22 }
0x4868   :  { %8533 = vmatpush3.bf16.msra.mxu0 %v9903_v43  ;;  %8555 = vmatpush3.bf16.msra.mxu1 %v9904_v34 }
0x4869   :  { %8534 = vmatprep.subr.bf16.mxu0 %v9905_v41  ;;  %8556 = vmatprep.subr.bf16.mxu1 %v9906_v46 }
0x486c   :  { %8535 = vmatpush3.bf16.msra.mxu0 %v9907_v49  ;;  %8557 = vmatpush3.bf16.msra.mxu1 %v9908_v50 }
0x486d   :  { %8536 = vmatprep.subr.bf16.mxu0 %v9909_v16  ;;  %8558 = vmatprep.subr.bf16.mxu1 %v9910_v52 }
0x4870   :  { %8537 = vmatpush3.bf16.msra.mxu0 %v9911_v53  ;;  %8559 = vmatpush3.bf16.msra.mxu1 %v9912_v57 }
0x4871   :  { %8538 = vmatprep.subr.bf16.mxu0 %v9913_v11  ;;  %8560 = vmatprep.subr.bf16.mxu1 %v9914_v47 }
0x4874   :  { %8539 = vmatpush3.bf16.msra.mxu0 %v9915_v58  ;;  %8561 = vmatpush3.bf16.msra.mxu1 %v9916_v17 }
0x4875   :  { %8540 = vmatprep.subr.bf16.mxu0 %v9917_v44  ;;  %8562 = vmatprep.subr.bf16.mxu1 %v9918_v1 }
0x4878   :  { %8541 = vmatpush3.bf16.msra.mxu0 %v9919_v3  ;;  %8563 = vmatpush3.bf16.msra.mxu1 %v9920_v60 }
0x4879   :  { %9079 = vmatprep.subr.bf16.mxu0 %v10202_v45 }
0x492e   :  { %v7348_v5 = vpop.f32.mrb[104].mxu0  ;;  %v7391_v8 = vpop.f32.mrb[116].mxu1 }
0x492f   :  { %v12428_v63 = vadd.f32 %v7348_v5, %v11555_v6  ;;  %v12431_v12 = vadd.f32 %v7391_v8, %v11559_v55  ;;  %v7350_v18 = vpop.f32.mrb[105].mxu0  ;;  %v7393_v10 = vpop.f32.mrb[117].mxu1 }
0x4930   :  { %v12434_v62 = vadd.f32 %v7350_v18, %v11563_v56  ;;  %v12437_v7 = vadd.f32 %v7393_v10, %v11567_v36  ;;  %v7352_v24 = vpop.f32.mrb[106].mxu0  ;;  %v7395_v14 = vpop.f32.mrb[118].mxu1 }
0x4931   :  { %v7400_v4 = vmul.f32 %v12428_v63, %v12428_v63  ;;  %v7402_v9 = vmul.f32 %v12431_v12, %v12431_v12  ;;  %v12444_v48 = vadd.f32 %v7352_v24, %v11555_v6  ;;  %v12447_v19 = vadd.f32 %v7395_v14, %v11559_v55  ;;  %v7354_v20 = vpop.f32.mrb[107].mxu0  ;;  %v7397_v15 = vpop.f32.mrb[119].mxu1 }
0x4932   :  { %v7401_v23 = vmul.f32 %v12434_v62, %v12434_v62  ;;  %v7403_v21 = vmul.f32 %v12437_v7, %v12437_v7  ;;  %v12454_v25 = vadd.f32 %v7354_v20, %v11563_v56  ;;  %v12457_v28 = vadd.f32 %v7397_v15, %v11567_v36 }
0x4933   :  { %v7408_v6 = vmul.f32 %v7400_v4, %v12428_v63  ;;  %v7410_v30 = vmul.f32 %v7402_v9, %v12431_v12  ;;  %v7404_v55 = vmul.f32 %v12444_v48, %v12444_v48  ;;  %v7406_v31 = vmul.f32 %v12447_v19, %v12447_v19 }
0x4934   :  { %v7409_v0 = vmul.f32 %v7401_v23, %v12434_v62  ;;  %v7411_v32 = vmul.f32 %v7403_v21, %v12437_v7  ;;  %v7405_v56 = vmul.f32 %v12454_v25, %v12454_v25  ;;  %v7407_v36 = vmul.f32 %v12457_v28, %v12457_v28 }
0x4935   :  { %v7416_v39 = vmul.f32 0.044715, %v7408_v6  ;;  %v7418_v26 = vmul.f32 0.044715, %v7410_v30  ;;  %v7412_v29 = vmul.f32 %v7404_v55, %v12444_v48  ;;  %v7414_v54 = vmul.f32 %v7406_v31, %v12447_v19 }
0x4936   :  { %v7417_v38 = vmul.f32 0.044715, %v7409_v0  ;;  %v7419_v27 = vmul.f32 0.044715, %v7411_v32  ;;  %v7413_v37 = vmul.f32 %v7405_v56, %v12454_v25  ;;  %v7415_v40 = vmul.f32 %v7407_v36, %v12457_v28 }
0x4937   :  { %v7424_v35 = vadd.f32 %v7416_v39, %v12428_v63  ;;  %v7426_v51 = vadd.f32 %v7418_v26, %v12431_v12  ;;  %v7420_v42 = vmul.f32 0.044715, %v7412_v29  ;;  %v7422_v33 = vmul.f32 0.044715, %v7414_v54 }
0x4938   :  { %v7425_v22 = vadd.f32 %v7417_v38, %v12434_v62  ;;  %v7427_v43 = vadd.f32 %v7419_v27, %v12437_v7  ;;  %v7421_v34 = vmul.f32 0.044715, %v7413_v37  ;;  %v7423_v41 = vmul.f32 0.044715, %v7415_v40 }
0x4939   :  { %v7432_v46 = vmul.f32 0.7978846, %v7424_v35  ;;  %v7434_v49 = vmul.f32 0.7978846, %v7426_v51  ;;  %v7428_v50 = vadd.f32 %v7420_v42, %v12444_v48  ;;  %v7430_v16 = vadd.f32 %v7422_v33, %v12447_v19 }
0x493a   :  { %v7433_v52 = vmul.f32 0.7978846, %v7425_v22  ;;  %v7435_v53 = vmul.f32 0.7978846, %v7427_v43  ;;  %v7429_v57 = vadd.f32 %v7421_v34, %v12454_v25  ;;  %v7431_v11 = vadd.f32 %v7423_v41, %v12457_v28  ;;  %v9928_v22 = vld [vmem:[#allocation18 + $0x38] sm:$0xff]  }
0x493b   :  { %9657 = vtanh.f32 %v7432_v46  ;;  %v7436_v47 = vmul.f32 0.7978846, %v7428_v50  ;;  %v7438_v58 = vmul.f32 0.7978846, %v7430_v16 }
0x493c   :  { %9659 = vtanh.f32 %v7434_v49  ;;  %v7437_v17 = vmul.f32 0.7978846, %v7429_v57  ;;  %v7439_v44 = vmul.f32 0.7978846, %v7431_v11  ;;  %v9929_v57 = vld [vmem:[#allocation13 + $0x1] ss:$0 sm:$0xff] }
0x493d   :  { %9661 = vtanh.f32 %v7433_v52 }
0x493e   :  { %9663 = vtanh.f32 %v7435_v53 }
0x493f   :  { %9665 = vtanh.f32 %v7436_v47 }
0x4940   :  { %9667 = vtanh.f32 %v7438_v58 }
0x4941   :  { %9669 = vtanh.f32 %v7437_v17 }
0x4942   :  { %9671 = vtanh.f32 %v7439_v44 }
0x4945   :  { %v9658_v1 = vpop.eup %9657 }
0x4946   :  { %v9660_v3 = vpop.eup %9659  ;;  %v7448_v60 = vadd.f32 1.0, %v9658_v1 }
0x4947   :  { %v9662_v5 = vpop.eup %9661  ;;  %v7450_v8 = vadd.f32 1.0, %v9660_v3 }
0x4948   :  { %v9664_v18 = vpop.eup %9663  ;;  %v7449_v10 = vadd.f32 1.0, %v9662_v5  ;;  %v7456_v9 = vmul.f32 0.5, %v7448_v60 }
0x4949   :  { %v9666_v24 = vpop.eup %9665  ;;  %v7451_v14 = vadd.f32 1.0, %v9664_v18  ;;  %v7458_v23 = vmul.f32 0.5, %v7450_v8 }
0x494a   :  { %v9668_v4 = vpop.eup %9667  ;;  %v7452_v20 = vadd.f32 1.0, %v9666_v24  ;;  %v7457_v31 = vmul.f32 0.5, %v7449_v10  ;;  %v7464_v36 = vmul.f32 %v7456_v9, %v12428_v63 }
0x494b   :  { %v9670_v15 = vpop.eup %9669  ;;  %v7454_v21 = vadd.f32 1.0, %v9668_v4  ;;  %v7459_v56 = vmul.f32 0.5, %v7451_v14  ;;  %v7466_v29 = vmul.f32 %v7458_v23, %v12431_v12  ;;  %v9921_v12 = vld [vmem:[#allocation18] sm:$0xff]  }
0x494c   :  { %v9672_v6 = vpop.eup %9671  ;;  %v7460_v30 = vmul.f32 0.5, %v7452_v20  ;;  %v7453_v55 = vadd.f32 1.0, %v9670_v15  ;;  %v7465_v27 = vmul.f32 %v7457_v31, %v12434_v62  ;;  %v9922_v62 = vld [vmem:[#allocation18 + $0x8] sm:$0xff]  }
0x494d   :  { %v7462_v0 = vmul.f32 0.5, %v7454_v21  ;;  %v7455_v32 = vadd.f32 1.0, %v9672_v6  ;;  %v7467_v35 = vmul.f32 %v7459_v56, %v12437_v7  ;;  %v9923_v7 = vld [vmem:[#allocation18 + $0x10] sm:$0xff]  }
0x494e   :  { %v7468_v39 = vmul.f32 %v7460_v30, %v12444_v48  ;;  %v7461_v26 = vmul.f32 0.5, %v7453_v55  ;;  %v9924_v48 = vld [vmem:[#allocation18 + $0x18] sm:$0xff]  }
0x494f   :  { %v7470_v54 = vmul.f32 %v7462_v0, %v12447_v19  ;;  %v7463_v38 = vmul.f32 0.5, %v7455_v32  ;;  %v9925_v19 = vld [vmem:[#allocation18 + $0x20] sm:$0xff]   ;;  %v9930_v0 = vld [vmem:[#allocation15] ss:$0 sm:$0xff] }
0x4950   :  { %v7469_v37 = vmul.f32 %v7461_v26, %v12454_v25  ;;  %v7472_v40 = vpack.c.bf16 %v7468_v39, %v7464_v36  ;;  %v9926_v25 = vld [vmem:[#allocation18 + $0x28] sm:$0xff]   ;;  %v9931_v36 = vld [vmem:[#allocation16] ss:$0 sm:$0xff] }
0x4951   :  { %v7471_v51 = vmul.f32 %v7463_v38, %v12457_v28  ;;  %v7474_v42 = vpack.c.bf16 %v7470_v54, %v7466_v29  ;;  %v9927_v28 = vld [vmem:[#allocation18 + $0x30] sm:$0xff]  }
0x4952   :  { %v7473_v33 = vpack.c.bf16 %v7469_v37, %v7465_v27 }
0x4953   :  { %v7475_v63 = vpack.c.bf16 %v7471_v51, %v7467_v35 }
0x4954   :  { %7508 = vmatprep.mubr.bf16.mxu0 %v7473_v33 }
0x4955   :  { %7549 = vmatprep.mubr.bf16.mxu1 %v7475_v63  ;;  %7509 = vmatmul.mubr.bf16.vlgmr.msra.gmra.mrb[108].mxu0 %v7472_v40 }
0x4956   :  { %7550 = vmatmul.mubr.bf16.vlgmr.msra.gmra.mrb[120].mxu1 %v7474_v42  ;;  %9080 = vmatpush3.bf16.msra.mxu0 %v9921_v12 }
0x4957   :  { %9081 = vmatprep.subr.bf16.mxu0 %v10202_v45  ;;  %9095 = vmatprep.mubr.msk.bf16.mxu0 %vm10203_vm0, %v10202_v45 }
0x495a   :  { %9082 = vmatpush3.bf16.msra.mxu0 %v9922_v62 }
0x495b   :  { %9083 = vmatprep.subr.bf16.mxu0 %v10202_v45 }
0x495e   :  { %9084 = vmatpush3.bf16.msra.mxu0 %v9923_v7 }
0x495f   :  { %9085 = vmatprep.subr.bf16.mxu0 %v10202_v45 }
0x4962   :  { %9086 = vmatpush3.bf16.msra.mxu0 %v9924_v48 }
0x4963   :  { %9087 = vmatprep.subr.bf16.mxu0 %v10202_v45 }
0x4966   :  { %9088 = vmatpush3.bf16.msra.mxu0 %v9925_v19 }
0x4967   :  { %9089 = vmatprep.subr.bf16.mxu0 %v10202_v45 }
0x496a   :  { %9090 = vmatpush3.bf16.msra.mxu0 %v9926_v25 }
0x496b   :  { %9091 = vmatprep.subr.bf16.mxu0 %v10202_v45 }
0x496e   :  { %9092 = vmatpush3.bf16.msra.mxu0 %v9927_v28 }
0x496f   :  { %9093 = vmatprep.subr.bf16.mxu0 %v10202_v45 }
0x4972   :  { %9094 = vmatpush3.bf16.msra.mxu0 %v9928_v22 }
0x4a28   :  { %v8542_v43 = vpop.f32.mrb[108].mxu0 }
0x4a29   :  { %v8564_v34 = vpop.f32.mrb[120].mxu1  ;;  %v8543_v41 = vpop.f32.mrb[109].mxu0 }
0x4a2a   :  { %v8544_v46 = vadd.f32 %v8543_v41, %v8542_v43  ;;  %v8565_v49 = vpop.f32.mrb[121].mxu1  ;;  %v8545_v50 = vpop.f32.mrb[110].mxu0 }
0x4a2b   :  { %v8566_v16 = vadd.f32 %v8565_v49, %v8564_v34  ;;  %v8567_v52 = vpop.f32.mrb[122].mxu1  ;;  %v8546_v53 = vpop.f32.mrb[111].mxu0 }
0x4a2c   :  { %v7511_v11 = vadd.f32 %v9929_v57, %v8544_v46  ;;  %v8547_v47 = vadd.f32 %v8546_v53, %v8545_v50  ;;  %v8568_v58 = vpop.f32.mrb[123].mxu1 }
0x4a2d   :  { %v8569_v17 = vadd.f32 %v8568_v58, %v8567_v52 }
0x4a2e   :  { %v7552_v44 = vadd.f32 %v8566_v16, %v7511_v11  ;;  %v7514_v1 = vadd.f32 %v9929_v57, %v8547_v47 }
0x4a30   :  { %v7555_v3 = vadd.f32 %v8569_v17, %v7514_v1  ;;  %v7558_v45 = vadd.f32 %v7552_v44, %v12321_v13 }
0x4a32   :  { %7560 = vadd.xlane.f32.xlu0 %v7558_v45  ;;  %v7559_v60 = vadd.f32 %v7555_v3, %v12324_v61 }
0x4a34   :  { %7562 = vadd.xlane.f32.xlu1 %v7559_v60 }
0x4abf   :  { %v7561_v5 = vpop.xlane.xlu0 %7560 }
0x4ac0   :  { %v7564_v8 = vmul.f32 0.0078125, %v7561_v5 }
0x4ac1   :  { %v7563_v18 = vpop.xlane.xlu1 %7562 }
0x4ac2   :  { %v7566_v10 = vsub.f32 %v7558_v45, %v7564_v8  ;;  %v7565_v24 = vmul.f32 0.0078125, %v7563_v18 }
0x4ac4   :  { %v7567_v14 = vsub.f32 %v7559_v60, %v7565_v24  ;;  %v7568_v4 = vmul.f32 %v7566_v10, %v7566_v10 }
0x4ac6   :  { %7570 = vadd.xlane.f32.xlu0 %v7568_v4  ;;  %v7569_v9 = vmul.f32 %v7567_v14, %v7567_v14 }
0x4ac8   :  { %7572 = vadd.xlane.f32.xlu1 %v7569_v9 }
0x4b53   :  { %v7571_v20 = vpop.xlane.xlu0 %7570 }
0x4b54   :  { %v7574_v15 = vmul.f32 0.0078125, %v7571_v20 }
0x4b55   :  { %v7573_v23 = vpop.xlane.xlu1 %7572 }
0x4b56   :  { %v7576_v21 = vadd.f32 1e-05, %v7574_v15  ;;  %v7575_v6 = vmul.f32 0.0078125, %v7573_v23 }
0x4b58   :  { %9673 = vrsqrt.f32 %v7576_v21  ;;  %v7577_v13 = vadd.f32 1e-05, %v7575_v6 }
0x4b5a   :  { %9675 = vrsqrt.f32 %v7577_v13 }
0x4b62   :  { %v9674_v61 = vpop.eup %9673 }
0x4b63   :  { %v7580_v30 = vmul.f32 %v9674_v61, %v7566_v10 }
0x4b64   :  { %v9676_v55 = vpop.eup %9675 }
0x4b65   :  { %v7581_v31 = vmul.f32 %v9676_v55, %v7567_v14  ;;  %v7582_v32 = vmul.f32 %v9930_v0, %v7580_v30 }
0x4b67   :  { %v7583_v56 = vmul.f32 %v9930_v0, %v7581_v31  ;;  %v7584_v39 = vadd.f32 %v9931_v36, %v7582_v32 }
0x4b69   :  { %v7585_v26 = vadd.f32 %v9931_v36, %v7583_v56 }
0x4b6b   :  { %v7586_v29 = vpack.c.bf16 %v7585_v26, %v7584_v39 }
0x4b6d   :  { %9096 = vmatmul.mubr.bf16.vlgmr.msra.gmra.mrb[112].mxu0 %v7586_v29 }
0x4c40   :  { %v7621_v54 = vpop.f32.mrb[112].mxu0 }
0x4c41   :  { %v7628_v38 = vadd.f32 %v7621_v54, %v11660_v2  ;;  %v9097_v27 = vpop.f32.mrb[113].mxu0 }
0x4c42   :  { %v7624_v37 = vpop.f32.mrb[114].mxu0 }
0x4c43   :  { %7630 = vst [vmem:[%s12552_s5] sm:$0xff] %v7628_v38  ;;  %v7629_v40 = vadd.f32 %v7624_v37, %v11671_v59  ;;  %v9098_v35 = vpop.f32.mrb[115].mxu0 }
0x4c45   :  { %7631 = vst [vmem:[%s12552_s5 + $0x8] sm:$0xff] %v7629_v40 }
0x4c46   :  { %7636 = vsyncpa [#allocation3], 1 }
0x4c47   :  { %7637 = vsyncpa [#allocation5], 1 }
0x4c48   :  { %7638 = vsyncpa [#allocation8], 1 }
0x4c49   :  { %7639 = vsyncpa [#allocation11], 1 }
0x4c4a   :  { %7640 = vsyncpa [#allocation14], 1 }
0x4c4b   :  { %7641 = vsyncpa [#allocation17], 1 }

</bundles_post_ra>
